<compile_context>
chip_gen: v7x
topology: tpu7x:2x2x1
jax: 0.10.0
libtpu: 0.0.40
codegen_flags: <defaults>
</compile_context>

<pallas_src>
import functools

import numpy as np
import jax
import jax.numpy as jnp
from jax.experimental import pallas as pl
from jax.experimental.pallas import tpu as pltpu


# --------------------------- fused Pallas kernel -----------------------------

def _bga_fused_kernel(
    x_d_ref, x_s_ref,
    l1_dw_ref, l1_s_ref, l1_b_ref, l1_pw_ref,
    l2_w_ref, l2_s_ref, l2_b_ref,
    r1_w_ref, r1_s_ref, r1_b_ref,
    r2_dw_ref, r2_s_ref, r2_b_ref, r2_pw_ref,
    f_w_ref, f_s_ref, f_b_ref,
    p_ref, u_ref,
    out_ref,
    xdpad_ref, xspad_ref, fpad_ref, colbig_ref, colsml_ref,
    *, H, W, h, w):
  C = out_ref.shape[-1]
  f32 = jnp.float32
  bf16 = jnp.bfloat16

  # ---- in-VMEM zero padding (no padded copies in HBM) ----------------------
  # Padded layout: rows [1, R+1), cols [8, 8+S) hold data; the border stays 0.
  # Column offset 8 keeps every interior *store* (8,128)-tile aligned; the 3x3
  # window *reads* below use unaligned column offsets 7/8/9 (cheap relayout).
  xdpad_ref[...] = jnp.zeros_like(xdpad_ref)
  xspad_ref[...] = jnp.zeros_like(xspad_ref)
  fpad_ref[...] = jnp.zeros_like(fpad_ref)
  xdpad_ref[1:H + 1, 8:8 + W, :] = x_d_ref[0].astype(f32)
  xspad_ref[1:h + 1, 8:8 + w, :] = x_s_ref[0].astype(f32)

  def im2col_and_dw(pad_ref, col_ref, R, S, dw_ref=None):
    """Write the (R*S, 9*C) bf16 im2col matrix into col_ref; optionally also
    accumulate the 3x3 depthwise conv (f32, VPU) from the same window loads."""
    acc = jnp.zeros((R * S, C), f32) if dw_ref is not None else None
    for k in range(9):
      ky, kx = divmod(k, 3)
      patch = pad_ref[ky:ky + R, kx + 7:kx + 7 + S, :].reshape(R * S, C)
      col_ref[:, k * C:(k + 1) * C] = patch.astype(bf16)
      if dw_ref is not None:
        acc = acc + patch * dw_ref[k:k + 1, :]
    return acc

  def sigmoid(x):
    # exp + approx reciprocal both land on the EUP slot (no VPU divide).
    return pl.reciprocal(1.0 + jnp.exp(-x), approx=True)

  # ---- detail branch (x_d) ---------------------------------------------------
  dw_d = im2col_and_dw(xdpad_ref, colbig_ref, H, W, l1_dw_ref)
  # left_1: dwconv3x3 + BN + 1x1 conv
  l1 = dw_d * l1_s_ref[...] + l1_b_ref[...]
  left1 = jnp.dot(l1.astype(bf16), l1_pw_ref[...],
                  preferred_element_type=f32)                     # (H*W, C)
  # left_2: conv3x3(stride2) + BN + AvgPool(3,2,1)  ==  conv3x3(stride1) + BN
  # followed by the exact precomputed linear map P. One K=9C im2col dot.
  l2 = jnp.dot(colbig_ref[...], l2_w_ref[...], preferred_element_type=f32)
  l2 = l2 * l2_s_ref[...] + l2_b_ref[...]
  left2 = jnp.dot(p_ref[...], l2, preferred_element_type=f32)     # (h*w, C)

  # ---- semantic branch (x_s) -------------------------------------------------
  dw_s = im2col_and_dw(xspad_ref, colsml_ref, h, w, r2_dw_ref)
  # right_1: conv3x3 + BN + bilinear x4 (align_corners=True, map U) + sigmoid
  r1 = jnp.dot(colsml_ref[...], r1_w_ref[...], preferred_element_type=f32)
  r1 = r1 * r1_s_ref[...] + r1_b_ref[...]
  right1 = sigmoid(jnp.dot(u_ref[...], r1,
                           preferred_element_type=f32))           # (H*W, C)
  # right_2: dwconv3x3 + BN + 1x1 conv + sigmoid
  r2 = dw_s * r2_s_ref[...] + r2_b_ref[...]
  right2 = sigmoid(jnp.dot(r2.astype(bf16), r2_pw_ref[...],
                           preferred_element_type=f32))           # (h*w, C)

  # ---- bilateral aggregation -------------------------------------------------
  fused = left1 * right1 + jnp.dot(u_ref[...], left2 * right2,
                                   preferred_element_type=f32)    # (H*W, C)

  # ---- final conv3x3 + BN (pad + im2col entirely in VMEM) --------------------
  fpad_ref[1:H + 1, 8:8 + W, :] = fused.reshape(H, W, C)
  im2col_and_dw(fpad_ref, colbig_ref, H, W)     # reuse the big im2col scratch
  y = jnp.dot(colbig_ref[...], f_w_ref[...], preferred_element_type=f32)
  y = y * f_s_ref[...] + f_b_ref[...]
  out_ref[0, :, :, :] = y.reshape(H, W, C).astype(out_ref.dtype)


# ------------------- precomputed exact spatial linear maps -------------------

def make_pool_matrix(H, W):
  """Linear map = (subsample the stride-1 conv output at even rows/cols, i.e.
  the stride-2 conv) followed by AvgPool2d(3, stride=2, padding=1,
  count_include_pad=True). Maps flattened (H*W,) -> (H//4 * W//4,)."""
  def axis_mat(n_out, n_s2, n_full):
    m = np.zeros((n_out, n_full), np.float32)
    for p in range(n_out):
      for d in range(3):
        i = 2 * p + d - 1                # index in stride-2-conv output
        if 0 <= i < n_s2:
          m[p, 2 * i] += 1.0             # stride-2 conv out[i] == full out[2i]
    return m
  Ho, Wo = H // 2, W // 2
  Hp = (Ho + 2 - 3) // 2 + 1
  Wp = (Wo + 2 - 3) // 2 + 1
  Pv = axis_mat(Hp, Ho, H)
  Ph = axis_mat(Wp, Wo, W)
  return jnp.asarray(np.kron(Pv, Ph) / 9.0)


def make_upsample_matrix(h, w, scale):
  """Bilinear x`scale` upsample with align_corners=True as a linear map
  (h*w,) -> (scale*h * scale*w,) (kron of 1-D interpolation matrices)."""
  def axis_mat(n_in, n_out):
    m = np.zeros((n_out, n_in), np.float64)
    for o in range(n_out):
      pos = o * (n_in - 1) / (n_out - 1)
      i0 = int(np.floor(pos))
      i1 = min(i0 + 1, n_in - 1)
      f = pos - i0
      m[o, i0] += 1.0 - f
      m[o, i1] += f
    return m.astype(np.float32)
  Ry = axis_mat(h, scale * h)
  Rx = axis_mat(w, scale * w)
  return jnp.asarray(np.kron(Ry, Rx))


# ------------------------------ pallas_call glue ------------------------------

def bga_forward(x_d, x_s, p):
  """x_d: (N, H, W, 128) detail branch; x_s: (N, H//4, W//4, 128) semantic."""
  N, H, W, C = x_d.shape
  _, h, w, _ = x_s.shape
  assert (H, W) == (4 * h, 4 * w), "detail must be 4x the semantic resolution"
  assert C == 128

  P = make_pool_matrix(H, W)            # (h*w, H*W)  f32
  U = make_upsample_matrix(h, w, 4)     # (H*W, h*w)  f32

  bf16 = jnp.bfloat16
  def w9(wc):                            # (3,3,C,C) -> (9C, C) bf16 im2col weight
    return wc.reshape(9 * C, C).astype(bf16)

  args = (
      x_d, x_s,
      p["l1_dw"].reshape(9, C), p["l1_s"], p["l1_b"], p["l1_pw"].astype(bf16),
      w9(p["l2_w"]), p["l2_s"], p["l2_b"],
      w9(p["r1_w"]), p["r1_s"], p["r1_b"],
      p["r2_dw"].reshape(9, C), p["r2_s"], p["r2_b"], p["r2_pw"].astype(bf16),
      w9(p["f_w"]), p["f_s"], p["f_b"],
      P, U,
  )

  def shared(a):
    nd = a.ndim
    return pl.BlockSpec(a.shape, lambda b, _nd=nd: (0,) * _nd)

  in_specs = [
      pl.BlockSpec((1, H, W, C), lambda b: (b, 0, 0, 0)),
      pl.BlockSpec((1, h, w, C), lambda b: (b, 0, 0, 0)),
  ] + [shared(a) for a in args[2:]]

  kernel = functools.partial(_bga_fused_kernel, H=H, W=W, h=h, w=w)

  return pl.pallas_call(
      kernel,
      out_shape=jax.ShapeDtypeStruct((N, H, W, C), x_d.dtype),
      grid=(N,),
      in_specs=in_specs,
      out_specs=pl.BlockSpec((1, H, W, C), lambda b: (b, 0, 0, 0)),
      scratch_shapes=[
          pltpu.VMEM((H + 2, W + 16, C), jnp.float32),   # padded x_d
          pltpu.VMEM((h + 2, w + 16, C), jnp.float32),   # padded x_s
          pltpu.VMEM((H + 2, W + 16, C), jnp.float32),   # padded fused map
          pltpu.VMEM((H * W, 9 * C), jnp.bfloat16),      # im2col (x_d, reused for fused)
          pltpu.VMEM((h * w, 9 * C), jnp.bfloat16),      # im2col (x_s)
      ],
      compiler_params=pltpu.CompilerParams(
          dimension_semantics=("parallel",)),             # v7x: one TC per batch elem
  )(*args)


# --------------------------- deterministic params -----------------------------

def init_params(key, C):
  ks = jax.random.split(key, 12)

  def conv_w(k):   # (ky, kx, Cin, Cout)
    return jax.random.normal(k, (3, 3, C, C), jnp.float32) / np.sqrt(9 * C)

  def dw_w(k):     # (ky, kx, C)
    return jax.random.normal(k, (3, 3, C), jnp.float32) / 3.0

  def pw_w(k):     # (Cin, Cout)
    return jax.random.normal(k, (C, C), jnp.float32) / np.sqrt(C)

  def bn(k):       # folded BatchNorm -> (scale, bias), each (1, C)
    k1, k2 = jax.random.split(k)
    scale = 1.0 + 0.1 * jax.random.normal(k1, (1, C), jnp.float32)
    bias = 0.1 * jax.random.normal(k2, (1, C), jnp.float32)
    return scale, bias

  p = {}
  p["l1_dw"] = dw_w(ks[0]); p["l1_s"], p["l1_b"] = bn(ks[1]); p["l1_pw"] = pw_w(ks[2])
  p["l2_w"] = conv_w(ks[3]); p["l2_s"], p["l2_b"] = bn(ks[4])
  p["r1_w"] = conv_w(ks[5]); p["r1_s"], p["r1_b"] = bn(ks[6])
  p["r2_dw"] = dw_w(ks[7]); p["r2_s"], p["r2_b"] = bn(ks[8]); p["r2_pw"] = pw_w(ks[9])
  p["f_w"] = conv_w(ks[10]); p["f_s"], p["f_b"] = bn(ks[11])
  return p


# ------------------------------ pure-JAX reference -----------------------------

_HP = jax.lax.Precision.HIGHEST


def _ref_conv(x, w, stride=1):
  return jax.lax.conv_general_dilated(
      x, w, (stride, stride), ((1, 1), (1, 1)),
      dimension_numbers=("NHWC", "HWIO", "NHWC"), precision=_HP)


def _ref_dwconv(x, wdw):
  C = x.shape[-1]
  return jax.lax.conv_general_dilated(
      x, wdw.reshape(3, 3, 1, C), (1, 1), ((1, 1), (1, 1)),
      dimension_numbers=("NHWC", "HWIO", "NHWC"),
      feature_group_count=C, precision=_HP)


def _ref_avgpool3x3s2(x):
  s = jax.lax.reduce_window(x, jnp.float32(0), jax.lax.add,
                            (1, 3, 3, 1), (1, 2, 2, 1),
                            ((0, 0), (1, 1), (1, 1), (0, 0)))
  return s / 9.0  # count_include_pad=True


def _ref_upsample4(x):
  n, h, w, c = x.shape
  H, W = 4 * h, 4 * w
  ys = jnp.arange(H, dtype=jnp.float32) * ((h - 1) / (H - 1))
  xs = jnp.arange(W, dtype=jnp.float32) * ((w - 1) / (W - 1))
  y0 = jnp.floor(ys).astype(jnp.int32); y1 = jnp.minimum(y0 + 1, h - 1); fy = ys - y0
  x0 = jnp.floor(xs).astype(jnp.int32); x1 = jnp.minimum(x0 + 1, w - 1); fx = xs - x0
  g00 = x[:, y0][:, :, x0]; g01 = x[:, y0][:, :, x1]
  g10 = x[:, y1][:, :, x0]; g11 = x[:, y1][:, :, x1]
  fx_ = fx[None, None, :, None]; fy_ = fy[None, :, None, None]
  top = g00 * (1 - fx_) + g01 * fx_
  bot = g10 * (1 - fx_) + g11 * fx_
  return top * (1 - fy_) + bot * fy_


def ref_forward(x_d, x_s, p):
  left1 = _ref_dwconv(x_d, p["l1_dw"]) * p["l1_s"] + p["l1_b"]
  left1 = jnp.einsum("nhwc,cd->nhwd", left1, p["l1_pw"], precision=_HP)
  left2 = _ref_conv(x_d, p["l2_w"], stride=2) * p["l2_s"] + p["l2_b"]
  left2 = _ref_avgpool3x3s2(left2)
  right1 = _ref_conv(x_s, p["r1_w"]) * p["r1_s"] + p["r1_b"]
  right1 = jax.nn.sigmoid(_ref_upsample4(right1))
  right2 = _ref_dwconv(x_s, p["r2_dw"]) * p["r2_s"] + p["r2_b"]
  right2 = jax.nn.sigmoid(jnp.einsum("nhwc,cd->nhwd", right2, p["r2_pw"],
                                     precision=_HP))
  x_left = left1 * right1
  x_right = _ref_upsample4(left2 * right2)
  x = x_left + x_right
  x = _ref_conv(x, p["f_w"]) * p["f_s"] + p["f_b"]
  return x


# ------------------------------------ main -------------------------------------

if __name__ == "__main__":
  N, C, H, W = 2, 128, 16, 16            # channels fixed at 128 by the module
  h, w = H // 4, W // 4                  # semantic branch is 1/4 resolution
  key = jax.random.PRNGKey(0)
  kd, ks_, kp = jax.random.split(key, 3)
  x_d = jax.random.normal(kd, (N, H, W, C), jnp.float32)   # detail branch (NHWC)
  x_s = jax.random.normal(ks_, (N, h, w, C), jnp.float32)  # semantic branch (NHWC)
  params = init_params(kp, C)

  out = bga_forward(x_d, x_s, params)
  out = jax.block_until_ready(out)

  ref = ref_forward(x_d, x_s, params)
  np.testing.assert_allclose(np.asarray(out), np.asarray(ref),
                             rtol=2e-2, atol=2e-2)
  print("KERNEL_OK")
</pallas_src>

<mosaic_0001>
module attributes {stable_mosaic.version = 11 : i64} {
  func.func @_bga_fused_kernel(%arg0: i32, %arg1: memref<1x16x16x128xf32, #tpu.memory_space<vmem>>, %arg2: memref<1x4x4x128xf32, #tpu.memory_space<vmem>>, %arg3: memref<9x128xf32, #tpu.memory_space<vmem>>, %arg4: memref<1x128xf32, #tpu.memory_space<vmem>>, %arg5: memref<1x128xf32, #tpu.memory_space<vmem>>, %arg6: memref<128x128xbf16, #tpu.memory_space<vmem>>, %arg7: memref<1152x128xbf16, #tpu.memory_space<vmem>>, %arg8: memref<1x128xf32, #tpu.memory_space<vmem>>, %arg9: memref<1x128xf32, #tpu.memory_space<vmem>>, %arg10: memref<1152x128xbf16, #tpu.memory_space<vmem>>, %arg11: memref<1x128xf32, #tpu.memory_space<vmem>>, %arg12: memref<1x128xf32, #tpu.memory_space<vmem>>, %arg13: memref<9x128xf32, #tpu.memory_space<vmem>>, %arg14: memref<1x128xf32, #tpu.memory_space<vmem>>, %arg15: memref<1x128xf32, #tpu.memory_space<vmem>>, %arg16: memref<128x128xbf16, #tpu.memory_space<vmem>>, %arg17: memref<1152x128xbf16, #tpu.memory_space<vmem>>, %arg18: memref<1x128xf32, #tpu.memory_space<vmem>>, %arg19: memref<1x128xf32, #tpu.memory_space<vmem>>, %arg20: memref<16x256xf32, #tpu.memory_space<vmem>>, %arg21: memref<256x16xf32, #tpu.memory_space<vmem>>, %arg22: memref<1x16x16x128xf32, #tpu.memory_space<vmem>>, %arg23: memref<18x32x128xf32, #tpu.memory_space<vmem>>, %arg24: memref<6x20x128xf32, #tpu.memory_space<vmem>>, %arg25: memref<18x32x128xf32, #tpu.memory_space<vmem>>, %arg26: memref<256x1152xbf16, #tpu.memory_space<vmem>>, %arg27: memref<16x1152xbf16, #tpu.memory_space<vmem>>) attributes {dimension_semantics = [#tpu.dimension_semantics<parallel>], iteration_bounds = array<i64: 2>, scalar_prefetch = 0 : i64, scratch_operands = 5 : i64, tpu.core_type = #tpu.core_type<tc>, window_params = [{transform_indices = @transform_0, window_bounds = array<i64: 1, 16, 16, 128>}, {transform_indices = @transform_1, window_bounds = array<i64: 1, 4, 4, 128>}, {pipeline_mode = #tpu.pipeline_mode<synchronous>, transform_indices = @transform_2, window_bounds = array<i64: 9, 128>}, {pipeline_mode = #tpu.pipeline_mode<synchronous>, transform_indices = @transform_3, window_bounds = array<i64: 1, 128>}, {pipeline_mode = #tpu.pipeline_mode<synchronous>, transform_indices = @transform_4, window_bounds = array<i64: 1, 128>}, {pipeline_mode = #tpu.pipeline_mode<synchronous>, transform_indices = @transform_5, window_bounds = array<i64: 128, 128>}, {pipeline_mode = #tpu.pipeline_mode<synchronous>, transform_indices = @transform_6, window_bounds = array<i64: 1152, 128>}, {pipeline_mode = #tpu.pipeline_mode<synchronous>, transform_indices = @transform_7, window_bounds = array<i64: 1, 128>}, {pipeline_mode = #tpu.pipeline_mode<synchronous>, transform_indices = @transform_8, window_bounds = array<i64: 1, 128>}, {pipeline_mode = #tpu.pipeline_mode<synchronous>, transform_indices = @transform_9, window_bounds = array<i64: 1152, 128>}, {pipeline_mode = #tpu.pipeline_mode<synchronous>, transform_indices = @transform_10, window_bounds = array<i64: 1, 128>}, {pipeline_mode = #tpu.pipeline_mode<synchronous>, transform_indices = @transform_11, window_bounds = array<i64: 1, 128>}, {pipeline_mode = #tpu.pipeline_mode<synchronous>, transform_indices = @transform_12, window_bounds = array<i64: 9, 128>}, {pipeline_mode = #tpu.pipeline_mode<synchronous>, transform_indices = @transform_13, window_bounds = array<i64: 1, 128>}, {pipeline_mode = #tpu.pipeline_mode<synchronous>, transform_indices = @transform_14, window_bounds = array<i64: 1, 128>}, {pipeline_mode = #tpu.pipeline_mode<synchronous>, transform_indices = @transform_15, window_bounds = array<i64: 128, 128>}, {pipeline_mode = #tpu.pipeline_mode<synchronous>, transform_indices = @transform_16, window_bounds = array<i64: 1152, 128>}, {pipeline_mode = #tpu.pipeline_mode<synchronous>, transform_indices = @transform_17, window_bounds = array<i64: 1, 128>}, {pipeline_mode = #tpu.pipeline_mode<synchronous>, transform_indices = @transform_18, window_bounds = array<i64: 1, 128>}, {pipeline_mode = #tpu.pipeline_mode<synchronous>, transform_indices = @transform_19, window_bounds = array<i64: 16, 256>}, {pipeline_mode = #tpu.pipeline_mode<synchronous>, transform_indices = @transform_20, window_bounds = array<i64: 256, 16>}, {transform_indices = @transform_21, window_bounds = array<i64: 1, 16, 16, 128>}]} {
    %cst = arith.constant 0.000000e+00 : f32
    %0 = vector.broadcast %cst : f32 to vector<18x32x128xf32>
    %c0 = arith.constant 0 : index
    %c0_0 = arith.constant 0 : index
    %c0_1 = arith.constant 0 : index
    %1 = vector.load %arg23[%c0, %c0_0, %c0_1] : memref<18x32x128xf32, #tpu.memory_space<vmem>>, vector<18x32x128xf32>
    tpu.vector_store %arg23[%c0, %c0_0, %c0_1], %0 {strides = array<i32>} : memref<18x32x128xf32, #tpu.memory_space<vmem>>, vector<18x32x128xf32>,
    %cst_2 = arith.constant 0.000000e+00 : f32
    %2 = vector.broadcast %cst_2 : f32 to vector<6x20x128xf32>
    %c0_3 = arith.constant 0 : index
    %c0_4 = arith.constant 0 : index
    %c0_5 = arith.constant 0 : index
    %3 = vector.load %arg24[%c0_3, %c0_4, %c0_5] : memref<6x20x128xf32, #tpu.memory_space<vmem>>, vector<6x20x128xf32>
    tpu.vector_store %arg24[%c0_3, %c0_4, %c0_5], %2 {strides = array<i32>} : memref<6x20x128xf32, #tpu.memory_space<vmem>>, vector<6x20x128xf32>,
    %cst_6 = arith.constant 0.000000e+00 : f32
    %4 = vector.broadcast %cst_6 : f32 to vector<18x32x128xf32>
    %c0_7 = arith.constant 0 : index
    %c0_8 = arith.constant 0 : index
    %c0_9 = arith.constant 0 : index
    %5 = vector.load %arg25[%c0_7, %c0_8, %c0_9] : memref<18x32x128xf32, #tpu.memory_space<vmem>>, vector<18x32x128xf32>
    tpu.vector_store %arg25[%c0_7, %c0_8, %c0_9], %4 {strides = array<i32>} : memref<18x32x128xf32, #tpu.memory_space<vmem>>, vector<18x32x128xf32>,
    %c0_10 = arith.constant 0 : index
    %c0_11 = arith.constant 0 : index
    %c0_12 = arith.constant 0 : index
    %c0_13 = arith.constant 0 : index
    %6 = vector.load %arg1[%c0_10, %c0_11, %c0_12, %c0_13] : memref<1x16x16x128xf32, #tpu.memory_space<vmem>>, vector<1x16x16x128xf32>
    %7 = vector.shape_cast %6 : vector<1x16x16x128xf32> to vector<16x16x128xf32>
    %c1 = arith.constant 1 : index
    %c8 = arith.constant 8 : index
    %c0_14 = arith.constant 0 : index
    %8 = vector.load %arg23[%c1, %c8, %c0_14] : memref<18x32x128xf32, #tpu.memory_space<vmem>>, vector<16x16x128xf32>
    tpu.vector_store %arg23[%c1, %c8, %c0_14], %7 {strides = array<i32>} : memref<18x32x128xf32, #tpu.memory_space<vmem>>, vector<16x16x128xf32>,
    %c0_15 = arith.constant 0 : index
    %c0_16 = arith.constant 0 : index
    %c0_17 = arith.constant 0 : index
    %c0_18 = arith.constant 0 : index
    %9 = vector.load %arg2[%c0_15, %c0_16, %c0_17, %c0_18] : memref<1x4x4x128xf32, #tpu.memory_space<vmem>>, vector<1x4x4x128xf32>
    %10 = vector.shape_cast %9 : vector<1x4x4x128xf32> to vector<4x4x128xf32>
    %c1_19 = arith.constant 1 : index
    %c8_20 = arith.constant 8 : index
    %c0_21 = arith.constant 0 : index
    %11 = vector.load %arg24[%c1_19, %c8_20, %c0_21] : memref<6x20x128xf32, #tpu.memory_space<vmem>>, vector<4x4x128xf32>
    tpu.vector_store %arg24[%c1_19, %c8_20, %c0_21], %10 {strides = array<i32>} : memref<6x20x128xf32, #tpu.memory_space<vmem>>, vector<4x4x128xf32>,
    %cst_22 = arith.constant 0.000000e+00 : f32
    %12 = vector.broadcast %cst_22 : f32 to vector<256x128xf32>
    %c0_23 = arith.constant 0 : index
    %c7 = arith.constant 7 : index
    %c0_24 = arith.constant 0 : index
    %13 = vector.load %arg23[%c0_23, %c7, %c0_24] : memref<18x32x128xf32, #tpu.memory_space<vmem>>, vector<16x16x128xf32>
    %14 = vector.shape_cast %13 : vector<16x16x128xf32> to vector<256x128xf32>
    %15 = arith.truncf %14 : vector<256x128xf32> to vector<256x128xbf16>
    %c0_25 = arith.constant 0 : index
    %c0_26 = arith.constant 0 : index
    %16 = vector.load %arg26[%c0_25, %c0_26] : memref<256x1152xbf16, #tpu.memory_space<vmem>>, vector<256x128xbf16>
    tpu.vector_store %arg26[%c0_25, %c0_26], %15 {strides = array<i32>} : memref<256x1152xbf16, #tpu.memory_space<vmem>>, vector<256x128xbf16>,
    %c0_27 = arith.constant 0 : index
    %c0_28 = arith.constant 0 : index
    %17 = vector.load %arg3[%c0_27, %c0_28] : memref<9x128xf32, #tpu.memory_space<vmem>>, vector<1x128xf32>
    %18 = vector.broadcast %17 : vector<1x128xf32> to vector<256x128xf32>
    %19 = arith.mulf %14, %18 : vector<256x128xf32>
    %20 = arith.addf %12, %19 : vector<256x128xf32>
    %c0_29 = arith.constant 0 : index
    %c8_30 = arith.constant 8 : index
    %c0_31 = arith.constant 0 : index
    %21 = vector.load %arg23[%c0_29, %c8_30, %c0_31] : memref<18x32x128xf32, #tpu.memory_space<vmem>>, vector<16x16x128xf32>
    %22 = vector.shape_cast %21 : vector<16x16x128xf32> to vector<256x128xf32>
    %23 = arith.truncf %22 : vector<256x128xf32> to vector<256x128xbf16>
    %c0_32 = arith.constant 0 : index
    %c128 = arith.constant 128 : index
    %24 = vector.load %arg26[%c0_32, %c128] : memref<256x1152xbf16, #tpu.memory_space<vmem>>, vector<256x128xbf16>
    tpu.vector_store %arg26[%c0_32, %c128], %23 {strides = array<i32>} : memref<256x1152xbf16, #tpu.memory_space<vmem>>, vector<256x128xbf16>,
    %c1_33 = arith.constant 1 : index
    %c0_34 = arith.constant 0 : index
    %25 = vector.load %arg3[%c1_33, %c0_34] : memref<9x128xf32, #tpu.memory_space<vmem>>, vector<1x128xf32>
    %26 = vector.broadcast %25 : vector<1x128xf32> to vector<256x128xf32>
    %27 = arith.mulf %22, %26 : vector<256x128xf32>
    %28 = arith.addf %20, %27 : vector<256x128xf32>
    %c0_35 = arith.constant 0 : index
    %c9 = arith.constant 9 : index
    %c0_36 = arith.constant 0 : index
    %29 = vector.load %arg23[%c0_35, %c9, %c0_36] : memref<18x32x128xf32, #tpu.memory_space<vmem>>, vector<16x16x128xf32>
    %30 = vector.shape_cast %29 : vector<16x16x128xf32> to vector<256x128xf32>
    %31 = arith.truncf %30 : vector<256x128xf32> to vector<256x128xbf16>
    %c0_37 = arith.constant 0 : index
    %c256 = arith.constant 256 : index
    %32 = vector.load %arg26[%c0_37, %c256] : memref<256x1152xbf16, #tpu.memory_space<vmem>>, vector<256x128xbf16>
    tpu.vector_store %arg26[%c0_37, %c256], %31 {strides = array<i32>} : memref<256x1152xbf16, #tpu.memory_space<vmem>>, vector<256x128xbf16>,
    %c2 = arith.constant 2 : index
    %c0_38 = arith.constant 0 : index
    %33 = vector.load %arg3[%c2, %c0_38] : memref<9x128xf32, #tpu.memory_space<vmem>>, vector<1x128xf32>
    %34 = vector.broadcast %33 : vector<1x128xf32> to vector<256x128xf32>
    %35 = arith.mulf %30, %34 : vector<256x128xf32>
    %36 = arith.addf %28, %35 : vector<256x128xf32>
    %c1_39 = arith.constant 1 : index
    %c7_40 = arith.constant 7 : index
    %c0_41 = arith.constant 0 : index
    %37 = vector.load %arg23[%c1_39, %c7_40, %c0_41] : memref<18x32x128xf32, #tpu.memory_space<vmem>>, vector<16x16x128xf32>
    %38 = vector.shape_cast %37 : vector<16x16x128xf32> to vector<256x128xf32>
    %39 = arith.truncf %38 : vector<256x128xf32> to vector<256x128xbf16>
    %c0_42 = arith.constant 0 : index
    %c384 = arith.constant 384 : index
    %40 = vector.load %arg26[%c0_42, %c384] : memref<256x1152xbf16, #tpu.memory_space<vmem>>, vector<256x128xbf16>
    tpu.vector_store %arg26[%c0_42, %c384], %39 {strides = array<i32>} : memref<256x1152xbf16, #tpu.memory_space<vmem>>, vector<256x128xbf16>,
    %c3 = arith.constant 3 : index
    %c0_43 = arith.constant 0 : index
    %41 = vector.load %arg3[%c3, %c0_43] : memref<9x128xf32, #tpu.memory_space<vmem>>, vector<1x128xf32>
    %42 = vector.broadcast %41 : vector<1x128xf32> to vector<256x128xf32>
    %43 = arith.mulf %38, %42 : vector<256x128xf32>
    %44 = arith.addf %36, %43 : vector<256x128xf32>
    %c1_44 = arith.constant 1 : index
    %c8_45 = arith.constant 8 : index
    %c0_46 = arith.constant 0 : index
    %45 = vector.load %arg23[%c1_44, %c8_45, %c0_46] : memref<18x32x128xf32, #tpu.memory_space<vmem>>, vector<16x16x128xf32>
    %46 = vector.shape_cast %45 : vector<16x16x128xf32> to vector<256x128xf32>
    %47 = arith.truncf %46 : vector<256x128xf32> to vector<256x128xbf16>
    %c0_47 = arith.constant 0 : index
    %c512 = arith.constant 512 : index
    %48 = vector.load %arg26[%c0_47, %c512] : memref<256x1152xbf16, #tpu.memory_space<vmem>>, vector<256x128xbf16>
    tpu.vector_store %arg26[%c0_47, %c512], %47 {strides = array<i32>} : memref<256x1152xbf16, #tpu.memory_space<vmem>>, vector<256x128xbf16>,
    %c4 = arith.constant 4 : index
    %c0_48 = arith.constant 0 : index
    %49 = vector.load %arg3[%c4, %c0_48] : memref<9x128xf32, #tpu.memory_space<vmem>>, vector<1x128xf32>
    %50 = vector.broadcast %49 : vector<1x128xf32> to vector<256x128xf32>
    %51 = arith.mulf %46, %50 : vector<256x128xf32>
    %52 = arith.addf %44, %51 : vector<256x128xf32>
    %c1_49 = arith.constant 1 : index
    %c9_50 = arith.constant 9 : index
    %c0_51 = arith.constant 0 : index
    %53 = vector.load %arg23[%c1_49, %c9_50, %c0_51] : memref<18x32x128xf32, #tpu.memory_space<vmem>>, vector<16x16x128xf32>
    %54 = vector.shape_cast %53 : vector<16x16x128xf32> to vector<256x128xf32>
    %55 = arith.truncf %54 : vector<256x128xf32> to vector<256x128xbf16>
    %c0_52 = arith.constant 0 : index
    %c640 = arith.constant 640 : index
    %56 = vector.load %arg26[%c0_52, %c640] : memref<256x1152xbf16, #tpu.memory_space<vmem>>, vector<256x128xbf16>
    tpu.vector_store %arg26[%c0_52, %c640], %55 {strides = array<i32>} : memref<256x1152xbf16, #tpu.memory_space<vmem>>, vector<256x128xbf16>,
    %c5 = arith.constant 5 : index
    %c0_53 = arith.constant 0 : index
    %57 = vector.load %arg3[%c5, %c0_53] : memref<9x128xf32, #tpu.memory_space<vmem>>, vector<1x128xf32>
    %58 = vector.broadcast %57 : vector<1x128xf32> to vector<256x128xf32>
    %59 = arith.mulf %54, %58 : vector<256x128xf32>
    %60 = arith.addf %52, %59 : vector<256x128xf32>
    %c2_54 = arith.constant 2 : index
    %c7_55 = arith.constant 7 : index
    %c0_56 = arith.constant 0 : index
    %61 = vector.load %arg23[%c2_54, %c7_55, %c0_56] : memref<18x32x128xf32, #tpu.memory_space<vmem>>, vector<16x16x128xf32>
    %62 = vector.shape_cast %61 : vector<16x16x128xf32> to vector<256x128xf32>
    %63 = arith.truncf %62 : vector<256x128xf32> to vector<256x128xbf16>
    %c0_57 = arith.constant 0 : index
    %c768 = arith.constant 768 : index
    %64 = vector.load %arg26[%c0_57, %c768] : memref<256x1152xbf16, #tpu.memory_space<vmem>>, vector<256x128xbf16>
    tpu.vector_store %arg26[%c0_57, %c768], %63 {strides = array<i32>} : memref<256x1152xbf16, #tpu.memory_space<vmem>>, vector<256x128xbf16>,
    %c6 = arith.constant 6 : index
    %c0_58 = arith.constant 0 : index
    %65 = vector.load %arg3[%c6, %c0_58] : memref<9x128xf32, #tpu.memory_space<vmem>>, vector<1x128xf32>
    %66 = vector.broadcast %65 : vector<1x128xf32> to vector<256x128xf32>
    %67 = arith.mulf %62, %66 : vector<256x128xf32>
    %68 = arith.addf %60, %67 : vector<256x128xf32>
    %c2_59 = arith.constant 2 : index
    %c8_60 = arith.constant 8 : index
    %c0_61 = arith.constant 0 : index
    %69 = vector.load %arg23[%c2_59, %c8_60, %c0_61] : memref<18x32x128xf32, #tpu.memory_space<vmem>>, vector<16x16x128xf32>
    %70 = vector.shape_cast %69 : vector<16x16x128xf32> to vector<256x128xf32>
    %71 = arith.truncf %70 : vector<256x128xf32> to vector<256x128xbf16>
    %c0_62 = arith.constant 0 : index
    %c896 = arith.constant 896 : index
    %72 = vector.load %arg26[%c0_62, %c896] : memref<256x1152xbf16, #tpu.memory_space<vmem>>, vector<256x128xbf16>
    tpu.vector_store %arg26[%c0_62, %c896], %71 {strides = array<i32>} : memref<256x1152xbf16, #tpu.memory_space<vmem>>, vector<256x128xbf16>,
    %c7_63 = arith.constant 7 : index
    %c0_64 = arith.constant 0 : index
    %73 = vector.load %arg3[%c7_63, %c0_64] : memref<9x128xf32, #tpu.memory_space<vmem>>, vector<1x128xf32>
    %74 = vector.broadcast %73 : vector<1x128xf32> to vector<256x128xf32>
    %75 = arith.mulf %70, %74 : vector<256x128xf32>
    %76 = arith.addf %68, %75 : vector<256x128xf32>
    %c2_65 = arith.constant 2 : index
    %c9_66 = arith.constant 9 : index
    %c0_67 = arith.constant 0 : index
    %77 = vector.load %arg23[%c2_65, %c9_66, %c0_67] : memref<18x32x128xf32, #tpu.memory_space<vmem>>, vector<16x16x128xf32>
    %78 = vector.shape_cast %77 : vector<16x16x128xf32> to vector<256x128xf32>
    %79 = arith.truncf %78 : vector<256x128xf32> to vector<256x128xbf16>
    %c0_68 = arith.constant 0 : index
    %c1024 = arith.constant 1024 : index
    %80 = vector.load %arg26[%c0_68, %c1024] : memref<256x1152xbf16, #tpu.memory_space<vmem>>, vector<256x128xbf16>
    tpu.vector_store %arg26[%c0_68, %c1024], %79 {strides = array<i32>} : memref<256x1152xbf16, #tpu.memory_space<vmem>>, vector<256x128xbf16>,
    %c8_69 = arith.constant 8 : index
    %c0_70 = arith.constant 0 : index
    %81 = vector.load %arg3[%c8_69, %c0_70] : memref<9x128xf32, #tpu.memory_space<vmem>>, vector<1x128xf32>
    %82 = vector.broadcast %81 : vector<1x128xf32> to vector<256x128xf32>
    %83 = arith.mulf %78, %82 : vector<256x128xf32>
    %84 = arith.addf %76, %83 : vector<256x128xf32>
    %c0_71 = arith.constant 0 : index
    %c0_72 = arith.constant 0 : index
    %85 = vector.load %arg4[%c0_71, %c0_72] : memref<1x128xf32, #tpu.memory_space<vmem>>, vector<1x128xf32>
    %86 = vector.broadcast %85 : vector<1x128xf32> to vector<256x128xf32>
    %87 = arith.mulf %84, %86 : vector<256x128xf32>
    %c0_73 = arith.constant 0 : index
    %c0_74 = arith.constant 0 : index
    %88 = vector.load %arg5[%c0_73, %c0_74] : memref<1x128xf32, #tpu.memory_space<vmem>>, vector<1x128xf32>
    %89 = vector.broadcast %88 : vector<1x128xf32> to vector<256x128xf32>
    %90 = arith.addf %87, %89 : vector<256x128xf32>
    %91 = arith.truncf %90 : vector<256x128xf32> to vector<256x128xbf16>
    %c0_75 = arith.constant 0 : index
    %c0_76 = arith.constant 0 : index
    %92 = vector.load %arg6[%c0_75, %c0_76] : memref<128x128xbf16, #tpu.memory_space<vmem>>, vector<128x128xbf16>
    %cst_77 = arith.constant dense<0.000000e+00> : vector<256x128xf32>
    %93 = tpu.matmul %91, %92, %cst_77 {dimension_numbers = #tpu.dot_dimension_numbers<[1], [0], [0], [1], [0, 0, 1, 1], [], []>} : vector<256x128xbf16>, vector<128x128xbf16>, vector<256x128xf32> -> vector<256x128xf32>
    %c0_78 = arith.constant 0 : index
    %c0_79 = arith.constant 0 : index
    %94 = vector.load %arg26[%c0_78, %c0_79] : memref<256x1152xbf16, #tpu.memory_space<vmem>>, vector<256x1152xbf16>
    %c0_80 = arith.constant 0 : index
    %c0_81 = arith.constant 0 : index
    %95 = vector.load %arg7[%c0_80, %c0_81] : memref<1152x128xbf16, #tpu.memory_space<vmem>>, vector<1152x128xbf16>
    %cst_82 = arith.constant dense<0.000000e+00> : vector<256x128xf32>
    %96 = tpu.matmul %94, %95, %cst_82 {dimension_numbers = #tpu.dot_dimension_numbers<[1], [0], [0], [1], [0, 0, 1, 1], [], []>} : vector<256x1152xbf16>, vector<1152x128xbf16>, vector<256x128xf32> -> vector<256x128xf32>
    %c0_83 = arith.constant 0 : index
    %c0_84 = arith.constant 0 : index
    %97 = vector.load %arg8[%c0_83, %c0_84] : memref<1x128xf32, #tpu.memory_space<vmem>>, vector<1x128xf32>
    %98 = vector.broadcast %97 : vector<1x128xf32> to vector<256x128xf32>
    %99 = arith.mulf %96, %98 : vector<256x128xf32>
    %c0_85 = arith.constant 0 : index
    %c0_86 = arith.constant 0 : index
    %100 = vector.load %arg9[%c0_85, %c0_86] : memref<1x128xf32, #tpu.memory_space<vmem>>, vector<1x128xf32>
    %101 = vector.broadcast %100 : vector<1x128xf32> to vector<256x128xf32>
    %102 = arith.addf %99, %101 : vector<256x128xf32>
    %c0_87 = arith.constant 0 : index
    %c0_88 = arith.constant 0 : index
    %103 = vector.load %arg20[%c0_87, %c0_88] : memref<16x256xf32, #tpu.memory_space<vmem>>, vector<16x256xf32>
    %cst_89 = arith.constant dense<0.000000e+00> : vector<16x128xf32>
    %104 = tpu.matmul %103, %102, %cst_89 {dimension_numbers = #tpu.dot_dimension_numbers<[1], [0], [0], [1], [0, 0, 1, 1], [], []>} : vector<16x256xf32>, vector<256x128xf32>, vector<16x128xf32> -> vector<16x128xf32>
    %cst_90 = arith.constant 0.000000e+00 : f32
    %105 = vector.broadcast %cst_90 : f32 to vector<16x128xf32>
    %c0_91 = arith.constant 0 : index
    %c7_92 = arith.constant 7 : index
    %c0_93 = arith.constant 0 : index
    %106 = vector.load %arg24[%c0_91, %c7_92, %c0_93] : memref<6x20x128xf32, #tpu.memory_space<vmem>>, vector<4x4x128xf32>
    %107 = vector.shape_cast %106 : vector<4x4x128xf32> to vector<16x128xf32>
    %108 = arith.truncf %107 : vector<16x128xf32> to vector<16x128xbf16>
    %c0_94 = arith.constant 0 : index
    %c0_95 = arith.constant 0 : index
    %109 = vector.load %arg27[%c0_94, %c0_95] : memref<16x1152xbf16, #tpu.memory_space<vmem>>, vector<16x128xbf16>
    tpu.vector_store %arg27[%c0_94, %c0_95], %108 {strides = array<i32>} : memref<16x1152xbf16, #tpu.memory_space<vmem>>, vector<16x128xbf16>,
    %c0_96 = arith.constant 0 : index
    %c0_97 = arith.constant 0 : index
    %110 = vector.load %arg13[%c0_96, %c0_97] : memref<9x128xf32, #tpu.memory_space<vmem>>, vector<1x128xf32>
    %111 = vector.broadcast %110 : vector<1x128xf32> to vector<16x128xf32>
    %112 = arith.mulf %107, %111 : vector<16x128xf32>
    %113 = arith.addf %105, %112 : vector<16x128xf32>
    %c0_98 = arith.constant 0 : index
    %c8_99 = arith.constant 8 : index
    %c0_100 = arith.constant 0 : index
    %114 = vector.load %arg24[%c0_98, %c8_99, %c0_100] : memref<6x20x128xf32, #tpu.memory_space<vmem>>, vector<4x4x128xf32>
    %115 = vector.shape_cast %114 : vector<4x4x128xf32> to vector<16x128xf32>
    %116 = arith.truncf %115 : vector<16x128xf32> to vector<16x128xbf16>
    %c0_101 = arith.constant 0 : index
    %c128_102 = arith.constant 128 : index
    %117 = vector.load %arg27[%c0_101, %c128_102] : memref<16x1152xbf16, #tpu.memory_space<vmem>>, vector<16x128xbf16>
    tpu.vector_store %arg27[%c0_101, %c128_102], %116 {strides = array<i32>} : memref<16x1152xbf16, #tpu.memory_space<vmem>>, vector<16x128xbf16>,
    %c1_103 = arith.constant 1 : index
    %c0_104 = arith.constant 0 : index
    %118 = vector.load %arg13[%c1_103, %c0_104] : memref<9x128xf32, #tpu.memory_space<vmem>>, vector<1x128xf32>
    %119 = vector.broadcast %118 : vector<1x128xf32> to vector<16x128xf32>
    %120 = arith.mulf %115, %119 : vector<16x128xf32>
    %121 = arith.addf %113, %120 : vector<16x128xf32>
    %c0_105 = arith.constant 0 : index
    %c9_106 = arith.constant 9 : index
    %c0_107 = arith.constant 0 : index
    %122 = vector.load %arg24[%c0_105, %c9_106, %c0_107] : memref<6x20x128xf32, #tpu.memory_space<vmem>>, vector<4x4x128xf32>
    %123 = vector.shape_cast %122 : vector<4x4x128xf32> to vector<16x128xf32>
    %124 = arith.truncf %123 : vector<16x128xf32> to vector<16x128xbf16>
    %c0_108 = arith.constant 0 : index
    %c256_109 = arith.constant 256 : index
    %125 = vector.load %arg27[%c0_108, %c256_109] : memref<16x1152xbf16, #tpu.memory_space<vmem>>, vector<16x128xbf16>
    tpu.vector_store %arg27[%c0_108, %c256_109], %124 {strides = array<i32>} : memref<16x1152xbf16, #tpu.memory_space<vmem>>, vector<16x128xbf16>,
    %c2_110 = arith.constant 2 : index
    %c0_111 = arith.constant 0 : index
    %126 = vector.load %arg13[%c2_110, %c0_111] : memref<9x128xf32, #tpu.memory_space<vmem>>, vector<1x128xf32>
    %127 = vector.broadcast %126 : vector<1x128xf32> to vector<16x128xf32>
    %128 = arith.mulf %123, %127 : vector<16x128xf32>
    %129 = arith.addf %121, %128 : vector<16x128xf32>
    %c1_112 = arith.constant 1 : index
    %c7_113 = arith.constant 7 : index
    %c0_114 = arith.constant 0 : index
    %130 = vector.load %arg24[%c1_112, %c7_113, %c0_114] : memref<6x20x128xf32, #tpu.memory_space<vmem>>, vector<4x4x128xf32>
    %131 = vector.shape_cast %130 : vector<4x4x128xf32> to vector<16x128xf32>
    %132 = arith.truncf %131 : vector<16x128xf32> to vector<16x128xbf16>
    %c0_115 = arith.constant 0 : index
    %c384_116 = arith.constant 384 : index
    %133 = vector.load %arg27[%c0_115, %c384_116] : memref<16x1152xbf16, #tpu.memory_space<vmem>>, vector<16x128xbf16>
    tpu.vector_store %arg27[%c0_115, %c384_116], %132 {strides = array<i32>} : memref<16x1152xbf16, #tpu.memory_space<vmem>>, vector<16x128xbf16>,
    %c3_117 = arith.constant 3 : index
    %c0_118 = arith.constant 0 : index
    %134 = vector.load %arg13[%c3_117, %c0_118] : memref<9x128xf32, #tpu.memory_space<vmem>>, vector<1x128xf32>
    %135 = vector.broadcast %134 : vector<1x128xf32> to vector<16x128xf32>
    %136 = arith.mulf %131, %135 : vector<16x128xf32>
    %137 = arith.addf %129, %136 : vector<16x128xf32>
    %c1_119 = arith.constant 1 : index
    %c8_120 = arith.constant 8 : index
    %c0_121 = arith.constant 0 : index
    %138 = vector.load %arg24[%c1_119, %c8_120, %c0_121] : memref<6x20x128xf32, #tpu.memory_space<vmem>>, vector<4x4x128xf32>
    %139 = vector.shape_cast %138 : vector<4x4x128xf32> to vector<16x128xf32>
    %140 = arith.truncf %139 : vector<16x128xf32> to vector<16x128xbf16>
    %c0_122 = arith.constant 0 : index
    %c512_123 = arith.constant 512 : index
    %141 = vector.load %arg27[%c0_122, %c512_123] : memref<16x1152xbf16, #tpu.memory_space<vmem>>, vector<16x128xbf16>
    tpu.vector_store %arg27[%c0_122, %c512_123], %140 {strides = array<i32>} : memref<16x1152xbf16, #tpu.memory_space<vmem>>, vector<16x128xbf16>,
    %c4_124 = arith.constant 4 : index
    %c0_125 = arith.constant 0 : index
    %142 = vector.load %arg13[%c4_124, %c0_125] : memref<9x128xf32, #tpu.memory_space<vmem>>, vector<1x128xf32>
    %143 = vector.broadcast %142 : vector<1x128xf32> to vector<16x128xf32>
    %144 = arith.mulf %139, %143 : vector<16x128xf32>
    %145 = arith.addf %137, %144 : vector<16x128xf32>
    %c1_126 = arith.constant 1 : index
    %c9_127 = arith.constant 9 : index
    %c0_128 = arith.constant 0 : index
    %146 = vector.load %arg24[%c1_126, %c9_127, %c0_128] : memref<6x20x128xf32, #tpu.memory_space<vmem>>, vector<4x4x128xf32>
    %147 = vector.shape_cast %146 : vector<4x4x128xf32> to vector<16x128xf32>
    %148 = arith.truncf %147 : vector<16x128xf32> to vector<16x128xbf16>
    %c0_129 = arith.constant 0 : index
    %c640_130 = arith.constant 640 : index
    %149 = vector.load %arg27[%c0_129, %c640_130] : memref<16x1152xbf16, #tpu.memory_space<vmem>>, vector<16x128xbf16>
    tpu.vector_store %arg27[%c0_129, %c640_130], %148 {strides = array<i32>} : memref<16x1152xbf16, #tpu.memory_space<vmem>>, vector<16x128xbf16>,
    %c5_131 = arith.constant 5 : index
    %c0_132 = arith.constant 0 : index
    %150 = vector.load %arg13[%c5_131, %c0_132] : memref<9x128xf32, #tpu.memory_space<vmem>>, vector<1x128xf32>
    %151 = vector.broadcast %150 : vector<1x128xf32> to vector<16x128xf32>
    %152 = arith.mulf %147, %151 : vector<16x128xf32>
    %153 = arith.addf %145, %152 : vector<16x128xf32>
    %c2_133 = arith.constant 2 : index
    %c7_134 = arith.constant 7 : index
    %c0_135 = arith.constant 0 : index
    %154 = vector.load %arg24[%c2_133, %c7_134, %c0_135] : memref<6x20x128xf32, #tpu.memory_space<vmem>>, vector<4x4x128xf32>
    %155 = vector.shape_cast %154 : vector<4x4x128xf32> to vector<16x128xf32>
    %156 = arith.truncf %155 : vector<16x128xf32> to vector<16x128xbf16>
    %c0_136 = arith.constant 0 : index
    %c768_137 = arith.constant 768 : index
    %157 = vector.load %arg27[%c0_136, %c768_137] : memref<16x1152xbf16, #tpu.memory_space<vmem>>, vector<16x128xbf16>
    tpu.vector_store %arg27[%c0_136, %c768_137], %156 {strides = array<i32>} : memref<16x1152xbf16, #tpu.memory_space<vmem>>, vector<16x128xbf16>,
    %c6_138 = arith.constant 6 : index
    %c0_139 = arith.constant 0 : index
    %158 = vector.load %arg13[%c6_138, %c0_139] : memref<9x128xf32, #tpu.memory_space<vmem>>, vector<1x128xf32>
    %159 = vector.broadcast %158 : vector<1x128xf32> to vector<16x128xf32>
    %160 = arith.mulf %155, %159 : vector<16x128xf32>
    %161 = arith.addf %153, %160 : vector<16x128xf32>
    %c2_140 = arith.constant 2 : index
    %c8_141 = arith.constant 8 : index
    %c0_142 = arith.constant 0 : index
    %162 = vector.load %arg24[%c2_140, %c8_141, %c0_142] : memref<6x20x128xf32, #tpu.memory_space<vmem>>, vector<4x4x128xf32>
    %163 = vector.shape_cast %162 : vector<4x4x128xf32> to vector<16x128xf32>
    %164 = arith.truncf %163 : vector<16x128xf32> to vector<16x128xbf16>
    %c0_143 = arith.constant 0 : index
    %c896_144 = arith.constant 896 : index
    %165 = vector.load %arg27[%c0_143, %c896_144] : memref<16x1152xbf16, #tpu.memory_space<vmem>>, vector<16x128xbf16>
    tpu.vector_store %arg27[%c0_143, %c896_144], %164 {strides = array<i32>} : memref<16x1152xbf16, #tpu.memory_space<vmem>>, vector<16x128xbf16>,
    %c7_145 = arith.constant 7 : index
    %c0_146 = arith.constant 0 : index
    %166 = vector.load %arg13[%c7_145, %c0_146] : memref<9x128xf32, #tpu.memory_space<vmem>>, vector<1x128xf32>
    %167 = vector.broadcast %166 : vector<1x128xf32> to vector<16x128xf32>
    %168 = arith.mulf %163, %167 : vector<16x128xf32>
    %169 = arith.addf %161, %168 : vector<16x128xf32>
    %c2_147 = arith.constant 2 : index
    %c9_148 = arith.constant 9 : index
    %c0_149 = arith.constant 0 : index
    %170 = vector.load %arg24[%c2_147, %c9_148, %c0_149] : memref<6x20x128xf32, #tpu.memory_space<vmem>>, vector<4x4x128xf32>
    %171 = vector.shape_cast %170 : vector<4x4x128xf32> to vector<16x128xf32>
    %172 = arith.truncf %171 : vector<16x128xf32> to vector<16x128xbf16>
    %c0_150 = arith.constant 0 : index
    %c1024_151 = arith.constant 1024 : index
    %173 = vector.load %arg27[%c0_150, %c1024_151] : memref<16x1152xbf16, #tpu.memory_space<vmem>>, vector<16x128xbf16>
    tpu.vector_store %arg27[%c0_150, %c1024_151], %172 {strides = array<i32>} : memref<16x1152xbf16, #tpu.memory_space<vmem>>, vector<16x128xbf16>,
    %c8_152 = arith.constant 8 : index
    %c0_153 = arith.constant 0 : index
    %174 = vector.load %arg13[%c8_152, %c0_153] : memref<9x128xf32, #tpu.memory_space<vmem>>, vector<1x128xf32>
    %175 = vector.broadcast %174 : vector<1x128xf32> to vector<16x128xf32>
    %176 = arith.mulf %171, %175 : vector<16x128xf32>
    %177 = arith.addf %169, %176 : vector<16x128xf32>
    %c0_154 = arith.constant 0 : index
    %c0_155 = arith.constant 0 : index
    %178 = vector.load %arg27[%c0_154, %c0_155] : memref<16x1152xbf16, #tpu.memory_space<vmem>>, vector<16x1152xbf16>
    %c0_156 = arith.constant 0 : index
    %c0_157 = arith.constant 0 : index
    %179 = vector.load %arg10[%c0_156, %c0_157] : memref<1152x128xbf16, #tpu.memory_space<vmem>>, vector<1152x128xbf16>
    %cst_158 = arith.constant dense<0.000000e+00> : vector<16x128xf32>
    %180 = tpu.matmul %178, %179, %cst_158 {dimension_numbers = #tpu.dot_dimension_numbers<[1], [0], [0], [1], [0, 0, 1, 1], [], []>} : vector<16x1152xbf16>, vector<1152x128xbf16>, vector<16x128xf32> -> vector<16x128xf32>
    %c0_159 = arith.constant 0 : index
    %c0_160 = arith.constant 0 : index
    %181 = vector.load %arg11[%c0_159, %c0_160] : memref<1x128xf32, #tpu.memory_space<vmem>>, vector<1x128xf32>
    %182 = vector.broadcast %181 : vector<1x128xf32> to vector<16x128xf32>
    %183 = arith.mulf %180, %182 : vector<16x128xf32>
    %c0_161 = arith.constant 0 : index
    %c0_162 = arith.constant 0 : index
    %184 = vector.load %arg12[%c0_161, %c0_162] : memref<1x128xf32, #tpu.memory_space<vmem>>, vector<1x128xf32>
    %185 = vector.broadcast %184 : vector<1x128xf32> to vector<16x128xf32>
    %186 = arith.addf %183, %185 : vector<16x128xf32>
    %c0_163 = arith.constant 0 : index
    %c0_164 = arith.constant 0 : index
    %187 = vector.load %arg21[%c0_163, %c0_164] : memref<256x16xf32, #tpu.memory_space<vmem>>, vector<256x16xf32>
    %cst_165 = arith.constant dense<0.000000e+00> : vector<256x128xf32>
    %188 = tpu.matmul %187, %186, %cst_165 {dimension_numbers = #tpu.dot_dimension_numbers<[1], [0], [0], [1], [0, 0, 1, 1], [], []>} : vector<256x16xf32>, vector<16x128xf32>, vector<256x128xf32> -> vector<256x128xf32>
    %cst_166 = arith.constant 0.000000e+00 : f32
    %189 = vector.broadcast %cst_166 : f32 to vector<256x128xf32>
    %190 = arith.subf %189, %188 : vector<256x128xf32>
    %191 = math.exp %190 : vector<256x128xf32>
    %cst_167 = arith.constant 1.000000e+00 : f32
    %192 = vector.broadcast %cst_167 : f32 to vector<256x128xf32>
    %193 = arith.addf %192, %191 : vector<256x128xf32>
    %194 = tpu.reciprocal %193 {approx = true} : vector<256x128xf32> -> vector<256x128xf32>
    %c0_168 = arith.constant 0 : index
    %c0_169 = arith.constant 0 : index
    %195 = vector.load %arg14[%c0_168, %c0_169] : memref<1x128xf32, #tpu.memory_space<vmem>>, vector<1x128xf32>
    %196 = vector.broadcast %195 : vector<1x128xf32> to vector<16x128xf32>
    %197 = arith.mulf %177, %196 : vector<16x128xf32>
    %c0_170 = arith.constant 0 : index
    %c0_171 = arith.constant 0 : index
    %198 = vector.load %arg15[%c0_170, %c0_171] : memref<1x128xf32, #tpu.memory_space<vmem>>, vector<1x128xf32>
    %199 = vector.broadcast %198 : vector<1x128xf32> to vector<16x128xf32>
    %200 = arith.addf %197, %199 : vector<16x128xf32>
    %201 = arith.truncf %200 : vector<16x128xf32> to vector<16x128xbf16>
    %c0_172 = arith.constant 0 : index
    %c0_173 = arith.constant 0 : index
    %202 = vector.load %arg16[%c0_172, %c0_173] : memref<128x128xbf16, #tpu.memory_space<vmem>>, vector<128x128xbf16>
    %cst_174 = arith.constant dense<0.000000e+00> : vector<16x128xf32>
    %203 = tpu.matmul %201, %202, %cst_174 {dimension_numbers = #tpu.dot_dimension_numbers<[1], [0], [0], [1], [0, 0, 1, 1], [], []>} : vector<16x128xbf16>, vector<128x128xbf16>, vector<16x128xf32> -> vector<16x128xf32>
    %cst_175 = arith.constant 0.000000e+00 : f32
    %204 = vector.broadcast %cst_175 : f32 to vector<16x128xf32>
    %205 = arith.subf %204, %203 : vector<16x128xf32>
    %206 = math.exp %205 : vector<16x128xf32>
    %cst_176 = arith.constant 1.000000e+00 : f32
    %207 = vector.broadcast %cst_176 : f32 to vector<16x128xf32>
    %208 = arith.addf %207, %206 : vector<16x128xf32>
    %209 = tpu.reciprocal %208 {approx = true} : vector<16x128xf32> -> vector<16x128xf32>
    %210 = arith.mulf %93, %194 : vector<256x128xf32>
    %c0_177 = arith.constant 0 : index
    %c0_178 = arith.constant 0 : index
    %211 = vector.load %arg21[%c0_177, %c0_178] : memref<256x16xf32, #tpu.memory_space<vmem>>, vector<256x16xf32>
    %212 = arith.mulf %104, %209 : vector<16x128xf32>
    %cst_179 = arith.constant dense<0.000000e+00> : vector<256x128xf32>
    %213 = tpu.matmul %211, %212, %cst_179 {dimension_numbers = #tpu.dot_dimension_numbers<[1], [0], [0], [1], [0, 0, 1, 1], [], []>} : vector<256x16xf32>, vector<16x128xf32>, vector<256x128xf32> -> vector<256x128xf32>
    %214 = arith.addf %210, %213 : vector<256x128xf32>
    %215 = vector.shape_cast %214 : vector<256x128xf32> to vector<16x16x128xf32>
    %c1_180 = arith.constant 1 : index
    %c8_181 = arith.constant 8 : index
    %c0_182 = arith.constant 0 : index
    %216 = vector.load %arg25[%c1_180, %c8_181, %c0_182] : memref<18x32x128xf32, #tpu.memory_space<vmem>>, vector<16x16x128xf32>
    tpu.vector_store %arg25[%c1_180, %c8_181, %c0_182], %215 {strides = array<i32>} : memref<18x32x128xf32, #tpu.memory_space<vmem>>, vector<16x16x128xf32>,
    %c0_183 = arith.constant 0 : index
    %c7_184 = arith.constant 7 : index
    %c0_185 = arith.constant 0 : index
    %217 = vector.load %arg25[%c0_183, %c7_184, %c0_185] : memref<18x32x128xf32, #tpu.memory_space<vmem>>, vector<16x16x128xf32>
    %218 = vector.shape_cast %217 : vector<16x16x128xf32> to vector<256x128xf32>
    %219 = arith.truncf %218 : vector<256x128xf32> to vector<256x128xbf16>
    %c0_186 = arith.constant 0 : index
    %c0_187 = arith.constant 0 : index
    %220 = vector.load %arg26[%c0_186, %c0_187] : memref<256x1152xbf16, #tpu.memory_space<vmem>>, vector<256x128xbf16>
    tpu.vector_store %arg26[%c0_186, %c0_187], %219 {strides = array<i32>} : memref<256x1152xbf16, #tpu.memory_space<vmem>>, vector<256x128xbf16>,
    %c0_188 = arith.constant 0 : index
    %c8_189 = arith.constant 8 : index
    %c0_190 = arith.constant 0 : index
    %221 = vector.load %arg25[%c0_188, %c8_189, %c0_190] : memref<18x32x128xf32, #tpu.memory_space<vmem>>, vector<16x16x128xf32>
    %222 = vector.shape_cast %221 : vector<16x16x128xf32> to vector<256x128xf32>
    %223 = arith.truncf %222 : vector<256x128xf32> to vector<256x128xbf16>
    %c0_191 = arith.constant 0 : index
    %c128_192 = arith.constant 128 : index
    %224 = vector.load %arg26[%c0_191, %c128_192] : memref<256x1152xbf16, #tpu.memory_space<vmem>>, vector<256x128xbf16>
    tpu.vector_store %arg26[%c0_191, %c128_192], %223 {strides = array<i32>} : memref<256x1152xbf16, #tpu.memory_space<vmem>>, vector<256x128xbf16>,
    %c0_193 = arith.constant 0 : index
    %c9_194 = arith.constant 9 : index
    %c0_195 = arith.constant 0 : index
    %225 = vector.load %arg25[%c0_193, %c9_194, %c0_195] : memref<18x32x128xf32, #tpu.memory_space<vmem>>, vector<16x16x128xf32>
    %226 = vector.shape_cast %225 : vector<16x16x128xf32> to vector<256x128xf32>
    %227 = arith.truncf %226 : vector<256x128xf32> to vector<256x128xbf16>
    %c0_196 = arith.constant 0 : index
    %c256_197 = arith.constant 256 : index
    %228 = vector.load %arg26[%c0_196, %c256_197] : memref<256x1152xbf16, #tpu.memory_space<vmem>>, vector<256x128xbf16>
    tpu.vector_store %arg26[%c0_196, %c256_197], %227 {strides = array<i32>} : memref<256x1152xbf16, #tpu.memory_space<vmem>>, vector<256x128xbf16>,
    %c1_198 = arith.constant 1 : index
    %c7_199 = arith.constant 7 : index
    %c0_200 = arith.constant 0 : index
    %229 = vector.load %arg25[%c1_198, %c7_199, %c0_200] : memref<18x32x128xf32, #tpu.memory_space<vmem>>, vector<16x16x128xf32>
    %230 = vector.shape_cast %229 : vector<16x16x128xf32> to vector<256x128xf32>
    %231 = arith.truncf %230 : vector<256x128xf32> to vector<256x128xbf16>
    %c0_201 = arith.constant 0 : index
    %c384_202 = arith.constant 384 : index
    %232 = vector.load %arg26[%c0_201, %c384_202] : memref<256x1152xbf16, #tpu.memory_space<vmem>>, vector<256x128xbf16>
    tpu.vector_store %arg26[%c0_201, %c384_202], %231 {strides = array<i32>} : memref<256x1152xbf16, #tpu.memory_space<vmem>>, vector<256x128xbf16>,
    %c1_203 = arith.constant 1 : index
    %c8_204 = arith.constant 8 : index
    %c0_205 = arith.constant 0 : index
    %233 = vector.load %arg25[%c1_203, %c8_204, %c0_205] : memref<18x32x128xf32, #tpu.memory_space<vmem>>, vector<16x16x128xf32>
    %234 = vector.shape_cast %233 : vector<16x16x128xf32> to vector<256x128xf32>
    %235 = arith.truncf %234 : vector<256x128xf32> to vector<256x128xbf16>
    %c0_206 = arith.constant 0 : index
    %c512_207 = arith.constant 512 : index
    %236 = vector.load %arg26[%c0_206, %c512_207] : memref<256x1152xbf16, #tpu.memory_space<vmem>>, vector<256x128xbf16>
    tpu.vector_store %arg26[%c0_206, %c512_207], %235 {strides = array<i32>} : memref<256x1152xbf16, #tpu.memory_space<vmem>>, vector<256x128xbf16>,
    %c1_208 = arith.constant 1 : index
    %c9_209 = arith.constant 9 : index
    %c0_210 = arith.constant 0 : index
    %237 = vector.load %arg25[%c1_208, %c9_209, %c0_210] : memref<18x32x128xf32, #tpu.memory_space<vmem>>, vector<16x16x128xf32>
    %238 = vector.shape_cast %237 : vector<16x16x128xf32> to vector<256x128xf32>
    %239 = arith.truncf %238 : vector<256x128xf32> to vector<256x128xbf16>
    %c0_211 = arith.constant 0 : index
    %c640_212 = arith.constant 640 : index
    %240 = vector.load %arg26[%c0_211, %c640_212] : memref<256x1152xbf16, #tpu.memory_space<vmem>>, vector<256x128xbf16>
    tpu.vector_store %arg26[%c0_211, %c640_212], %239 {strides = array<i32>} : memref<256x1152xbf16, #tpu.memory_space<vmem>>, vector<256x128xbf16>,
    %c2_213 = arith.constant 2 : index
    %c7_214 = arith.constant 7 : index
    %c0_215 = arith.constant 0 : index
    %241 = vector.load %arg25[%c2_213, %c7_214, %c0_215] : memref<18x32x128xf32, #tpu.memory_space<vmem>>, vector<16x16x128xf32>
    %242 = vector.shape_cast %241 : vector<16x16x128xf32> to vector<256x128xf32>
    %243 = arith.truncf %242 : vector<256x128xf32> to vector<256x128xbf16>
    %c0_216 = arith.constant 0 : index
    %c768_217 = arith.constant 768 : index
    %244 = vector.load %arg26[%c0_216, %c768_217] : memref<256x1152xbf16, #tpu.memory_space<vmem>>, vector<256x128xbf16>
    tpu.vector_store %arg26[%c0_216, %c768_217], %243 {strides = array<i32>} : memref<256x1152xbf16, #tpu.memory_space<vmem>>, vector<256x128xbf16>,
    %c2_218 = arith.constant 2 : index
    %c8_219 = arith.constant 8 : index
    %c0_220 = arith.constant 0 : index
    %245 = vector.load %arg25[%c2_218, %c8_219, %c0_220] : memref<18x32x128xf32, #tpu.memory_space<vmem>>, vector<16x16x128xf32>
    %246 = vector.shape_cast %245 : vector<16x16x128xf32> to vector<256x128xf32>
    %247 = arith.truncf %246 : vector<256x128xf32> to vector<256x128xbf16>
    %c0_221 = arith.constant 0 : index
    %c896_222 = arith.constant 896 : index
    %248 = vector.load %arg26[%c0_221, %c896_222] : memref<256x1152xbf16, #tpu.memory_space<vmem>>, vector<256x128xbf16>
    tpu.vector_store %arg26[%c0_221, %c896_222], %247 {strides = array<i32>} : memref<256x1152xbf16, #tpu.memory_space<vmem>>, vector<256x128xbf16>,
    %c2_223 = arith.constant 2 : index
    %c9_224 = arith.constant 9 : index
    %c0_225 = arith.constant 0 : index
    %249 = vector.load %arg25[%c2_223, %c9_224, %c0_225] : memref<18x32x128xf32, #tpu.memory_space<vmem>>, vector<16x16x128xf32>
    %250 = vector.shape_cast %249 : vector<16x16x128xf32> to vector<256x128xf32>
    %251 = arith.truncf %250 : vector<256x128xf32> to vector<256x128xbf16>
    %c0_226 = arith.constant 0 : index
    %c1024_227 = arith.constant 1024 : index
    %252 = vector.load %arg26[%c0_226, %c1024_227] : memref<256x1152xbf16, #tpu.memory_space<vmem>>, vector<256x128xbf16>
    tpu.vector_store %arg26[%c0_226, %c1024_227], %251 {strides = array<i32>} : memref<256x1152xbf16, #tpu.memory_space<vmem>>, vector<256x128xbf16>,
    %c0_228 = arith.constant 0 : index
    %c0_229 = arith.constant 0 : index
    %253 = vector.load %arg26[%c0_228, %c0_229] : memref<256x1152xbf16, #tpu.memory_space<vmem>>, vector<256x1152xbf16>
    %c0_230 = arith.constant 0 : index
    %c0_231 = arith.constant 0 : index
    %254 = vector.load %arg17[%c0_230, %c0_231] : memref<1152x128xbf16, #tpu.memory_space<vmem>>, vector<1152x128xbf16>
    %cst_232 = arith.constant dense<0.000000e+00> : vector<256x128xf32>
    %255 = tpu.matmul %253, %254, %cst_232 {dimension_numbers = #tpu.dot_dimension_numbers<[1], [0], [0], [1], [0, 0, 1, 1], [], []>} : vector<256x1152xbf16>, vector<1152x128xbf16>, vector<256x128xf32> -> vector<256x128xf32>
    %c0_233 = arith.constant 0 : index
    %c0_234 = arith.constant 0 : index
    %256 = vector.load %arg18[%c0_233, %c0_234] : memref<1x128xf32, #tpu.memory_space<vmem>>, vector<1x128xf32>
    %257 = vector.broadcast %256 : vector<1x128xf32> to vector<256x128xf32>
    %258 = arith.mulf %255, %257 : vector<256x128xf32>
    %c0_235 = arith.constant 0 : index
    %c0_236 = arith.constant 0 : index
    %259 = vector.load %arg19[%c0_235, %c0_236] : memref<1x128xf32, #tpu.memory_space<vmem>>, vector<1x128xf32>
    %260 = vector.broadcast %259 : vector<1x128xf32> to vector<256x128xf32>
    %261 = arith.addf %258, %260 : vector<256x128xf32>
    %262 = vector.shape_cast %261 : vector<256x128xf32> to vector<16x16x128xf32>
    %c0_237 = arith.constant 0 : index
    %c0_238 = arith.constant 0 : index
    %c0_239 = arith.constant 0 : index
    %c0_240 = arith.constant 0 : index
    %263 = vector.load %arg22[%c0_237, %c0_238, %c0_239, %c0_240] : memref<1x16x16x128xf32, #tpu.memory_space<vmem>>, vector<1x16x16x128xf32>
    %264 = vector.shape_cast %263 : vector<1x16x16x128xf32> to vector<16x16x128xf32>
    %265 = vector.shape_cast %262 : vector<16x16x128xf32> to vector<1x16x16x128xf32>
    tpu.vector_store %arg22[%c0_237, %c0_238, %c0_239, %c0_240], %265 {strides = array<i32>} : memref<1x16x16x128xf32, #tpu.memory_space<vmem>>, vector<1x16x16x128xf32>,
    return
  }
  func.func @transform_0(%arg0: i32) -> (i32, i32, i32, i32) {
    %c0_i32 = arith.constant 0 : i32
    %c0_i32_0 = arith.constant 0 : i32
    %c0_i32_1 = arith.constant 0 : i32
    %c0_i32_2 = arith.constant 0 : i32
    return %arg0, %c0_i32, %c0_i32_0, %c0_i32_1 : i32, i32, i32, i32
  }
  func.func @transform_1(%arg0: i32) -> (i32, i32, i32, i32) {
    %c0_i32 = arith.constant 0 : i32
    %c0_i32_0 = arith.constant 0 : i32
    %c0_i32_1 = arith.constant 0 : i32
    %c0_i32_2 = arith.constant 0 : i32
    return %arg0, %c0_i32, %c0_i32_0, %c0_i32_1 : i32, i32, i32, i32
  }
  func.func @transform_2(%arg0: i32) -> (i32, i32) {
    %c0_i32 = arith.constant 0 : i32
    %c0_i32_0 = arith.constant 0 : i32
    %c0_i32_1 = arith.constant 0 : i32
    return %c0_i32, %c0_i32_0 : i32, i32
  }
  func.func @transform_3(%arg0: i32) -> (i32, i32) {
    %c0_i32 = arith.constant 0 : i32
    %c0_i32_0 = arith.constant 0 : i32
    %c0_i32_1 = arith.constant 0 : i32
    return %c0_i32, %c0_i32_0 : i32, i32
  }
  func.func @transform_4(%arg0: i32) -> (i32, i32) {
    %c0_i32 = arith.constant 0 : i32
    %c0_i32_0 = arith.constant 0 : i32
    %c0_i32_1 = arith.constant 0 : i32
    return %c0_i32, %c0_i32_0 : i32, i32
  }
  func.func @transform_5(%arg0: i32) -> (i32, i32) {
    %c0_i32 = arith.constant 0 : i32
    %c0_i32_0 = arith.constant 0 : i32
    %c0_i32_1 = arith.constant 0 : i32
    return %c0_i32, %c0_i32_0 : i32, i32
  }
  func.func @transform_6(%arg0: i32) -> (i32, i32) {
    %c0_i32 = arith.constant 0 : i32
    %c0_i32_0 = arith.constant 0 : i32
    %c0_i32_1 = arith.constant 0 : i32
    return %c0_i32, %c0_i32_0 : i32, i32
  }
  func.func @transform_7(%arg0: i32) -> (i32, i32) {
    %c0_i32 = arith.constant 0 : i32
    %c0_i32_0 = arith.constant 0 : i32
    %c0_i32_1 = arith.constant 0 : i32
    return %c0_i32, %c0_i32_0 : i32, i32
  }
  func.func @transform_8(%arg0: i32) -> (i32, i32) {
    %c0_i32 = arith.constant 0 : i32
    %c0_i32_0 = arith.constant 0 : i32
    %c0_i32_1 = arith.constant 0 : i32
    return %c0_i32, %c0_i32_0 : i32, i32
  }
  func.func @transform_9(%arg0: i32) -> (i32, i32) {
    %c0_i32 = arith.constant 0 : i32
    %c0_i32_0 = arith.constant 0 : i32
    %c0_i32_1 = arith.constant 0 : i32
    return %c0_i32, %c0_i32_0 : i32, i32
  }
  func.func @transform_10(%arg0: i32) -> (i32, i32) {
    %c0_i32 = arith.constant 0 : i32
    %c0_i32_0 = arith.constant 0 : i32
    %c0_i32_1 = arith.constant 0 : i32
    return %c0_i32, %c0_i32_0 : i32, i32
  }
  func.func @transform_11(%arg0: i32) -> (i32, i32) {
    %c0_i32 = arith.constant 0 : i32
    %c0_i32_0 = arith.constant 0 : i32
    %c0_i32_1 = arith.constant 0 : i32
    return %c0_i32, %c0_i32_0 : i32, i32
  }
  func.func @transform_12(%arg0: i32) -> (i32, i32) {
    %c0_i32 = arith.constant 0 : i32
    %c0_i32_0 = arith.constant 0 : i32
    %c0_i32_1 = arith.constant 0 : i32
    return %c0_i32, %c0_i32_0 : i32, i32
  }
  func.func @transform_13(%arg0: i32) -> (i32, i32) {
    %c0_i32 = arith.constant 0 : i32
    %c0_i32_0 = arith.constant 0 : i32
    %c0_i32_1 = arith.constant 0 : i32
    return %c0_i32, %c0_i32_0 : i32, i32
  }
  func.func @transform_14(%arg0: i32) -> (i32, i32) {
    %c0_i32 = arith.constant 0 : i32
    %c0_i32_0 = arith.constant 0 : i32
    %c0_i32_1 = arith.constant 0 : i32
    return %c0_i32, %c0_i32_0 : i32, i32
  }
  func.func @transform_15(%arg0: i32) -> (i32, i32) {
    %c0_i32 = arith.constant 0 : i32
    %c0_i32_0 = arith.constant 0 : i32
    %c0_i32_1 = arith.constant 0 : i32
    return %c0_i32, %c0_i32_0 : i32, i32
  }
  func.func @transform_16(%arg0: i32) -> (i32, i32) {
    %c0_i32 = arith.constant 0 : i32
    %c0_i32_0 = arith.constant 0 : i32
    %c0_i32_1 = arith.constant 0 : i32
    return %c0_i32, %c0_i32_0 : i32, i32
  }
  func.func @transform_17(%arg0: i32) -> (i32, i32) {
    %c0_i32 = arith.constant 0 : i32
    %c0_i32_0 = arith.constant 0 : i32
    %c0_i32_1 = arith.constant 0 : i32
    return %c0_i32, %c0_i32_0 : i32, i32
  }
  func.func @transform_18(%arg0: i32) -> (i32, i32) {
    %c0_i32 = arith.constant 0 : i32
    %c0_i32_0 = arith.constant 0 : i32
    %c0_i32_1 = arith.constant 0 : i32
    return %c0_i32, %c0_i32_0 : i32, i32
  }
  func.func @transform_19(%arg0: i32) -> (i32, i32) {
    %c0_i32 = arith.constant 0 : i32
    %c0_i32_0 = arith.constant 0 : i32
    %c0_i32_1 = arith.constant 0 : i32
    return %c0_i32, %c0_i32_0 : i32, i32
  }
  func.func @transform_20(%arg0: i32) -> (i32, i32) {
    %c0_i32 = arith.constant 0 : i32
    %c0_i32_0 = arith.constant 0 : i32
    %c0_i32_1 = arith.constant 0 : i32
    return %c0_i32, %c0_i32_0 : i32, i32
  }
  func.func @transform_21(%arg0: i32) -> (i32, i32, i32, i32) {
    %c0_i32 = arith.constant 0 : i32
    %c0_i32_0 = arith.constant 0 : i32
    %c0_i32_1 = arith.constant 0 : i32
    %c0_i32_2 = arith.constant 0 : i32
    return %arg0, %c0_i32, %c0_i32_0, %c0_i32_1 : i32, i32, i32, i32
  }
}

</mosaic_0001>

<bundles_post_ra>
// kernel: tpu_custom_call.1
= control target key start
LH: loop header
LB: loop body
LE: loop exit
PB: predicated region body
PF: predicated region fallthrough
CT: control target
= control target key end

     0   :  { %s14870_s0 = inlined_call_operand.hbm [shape: f32[2,16,16,128], index: 0, kind: input, shape index: {}]   ;;  %s14871_s1 = inlined_call_operand.vmem [shape: f32[2,4,4,128], index: 1, kind: input, shape index: {}]   ;;  %s14872_s2 = inlined_call_operand.vmem [shape: f32[9,128], index: 2, kind: input, shape index: {}]   ;;  %s14873_s3 = inlined_call_operand.vmem [shape: f32[1,128], index: 3, kind: input, shape index: {}]   ;;  %s14874_s4 = inlined_call_operand.vmem [shape: f32[1,128], index: 4, kind: input, shape index: {}]   ;;  %s14875_s5 = inlined_call_operand.vmem [shape: bf16[128,128], index: 5, kind: input, shape index: {}]   ;;  %s14876_s6 = inlined_call_operand.hbm [shape: bf16[1152,128], index: 6, kind: input, shape index: {}]   ;;  %s14877_s7 = inlined_call_operand.vmem [shape: f32[1,128], index: 7, kind: input, shape index: {}]   ;;  %s14878_s8 = inlined_call_operand.vmem [shape: f32[1,128], index: 8, kind: input, shape index: {}]   ;;  %s14879_s9 = inlined_call_operand.hbm [shape: bf16[1152,128], index: 9, kind: input, shape index: {}]   ;;  %s14880_s10 = inlined_call_operand.vmem [shape: f32[1,128], index: 10, kind: input, shape index: {}]   ;;  %s14881_s11 = inlined_call_operand.vmem [shape: f32[1,128], index: 11, kind: input, shape index: {}]   ;;  %s14882_s12 = inlined_call_operand.vmem [shape: f32[9,128], index: 12, kind: input, shape index: {}]   ;;  %s14883_s13 = inlined_call_operand.vmem [shape: f32[1,128], index: 13, kind: input, shape index: {}]   ;;  %s14884_s14 = inlined_call_operand.vmem [shape: f32[1,128], index: 14, kind: input, shape index: {}]   ;;  %s14885_s15 = inlined_call_operand.vmem [shape: bf16[128,128], index: 15, kind: input, shape index: {}]   ;;  %s14886_s16 = inlined_call_operand.hbm [shape: bf16[1152,128], index: 16, kind: input, shape index: {}]   ;;  %s14887_s17 = inlined_call_operand.vmem [shape: f32[1,128], index: 17, kind: input, shape index: {}]   ;;  %s14888_s18 = inlined_call_operand.vmem [shape: f32[1,128], index: 18, kind: input, shape index: {}]   ;;  %s14889_s19 = inlined_call_operand.vmem [shape: f32[16,256], index: 19, kind: input, shape index: {}]   ;;  %s14890_s20 = inlined_call_operand.vmem [shape: f32[256,16], index: 20, kind: input, shape index: {}]   ;;  %s14891_s21 = inlined_call_operand.hbm [shape: f32[2,16,16,128], index: 21, kind: output, shape index: {}]  }
   0x1   :  { %14943 = sst [smem:[#allocation74_spill]] %s14870_s0 }
   0x2   :  { %14944 = sst [smem:[#allocation75_spill]] %s14871_s1 }
   0x3   :  { %14945 = sst [smem:[#allocation76_spill]] %s14872_s2 }
   0x4   :  { %14946 = sst [smem:[#allocation77_spill]] %s14873_s3 }
   0x5   :  { %14947 = sst [smem:[#allocation78_spill]] %s14874_s4 }
   0x6   :  { %14948 = sst [smem:[#allocation79_spill]] %s14875_s5 }
   0x7   :  { %14949 = sst [smem:[#allocation80_spill]] %s14876_s6 }
   0x8   :  { %14950 = sst [smem:[#allocation81_spill]] %s14880_s10 }
   0x9   :  { %14951 = sst [smem:[#allocation82_spill]] %s14881_s11 }
   0xa   :  { %14952 = sst [smem:[#allocation83_spill]] %s14884_s14 }
   0xb   :  { %14953 = sst [smem:[#allocation84_spill]] %s14885_s15 }
   0xc   :  { %14954 = sst [smem:[#allocation85_spill]] %s14887_s17 }
   0xd   :  { %14955 = sst [smem:[#allocation86_spill]] %s14888_s18 }
   0xe   :  { %14956 = sst [smem:[#allocation87_spill]] %s14891_s21 }
   0xf   :  { %26 = vsyncpa [#allocation8], 0 }
  0x10   :  { %28 = vsyncpa [#allocation8 + $0x1], 0 }
  0x11   :  { %29 = vsyncpa [#allocation11], 0 }
  0x12   :  { %30 = vsyncpa [#allocation14], 0 }
  0x13   :  { %31 = vsyncpa [#allocation9], 0 }
  0x14   :  { %33 = vsyncpa [#allocation9 + $0x1], 0  ;;  %s11351_s2 = smov 0   ;;  %s11353_s25 = smov 0  }
  0x15   :  { %s11355_s26 = smov 0   ;;  %s11357_s27 = smov 0  }
  0x16 LB: > { %14957 = sst [smem:[#allocation20_spill]] %s11213_s2  ;;  %s11372_s3 = sadd.s32 4294967295, %s11225_s27   ;;  %s11225_s27 = sphi %s11357_s27, %s15151_s27   ;;  %s11221_s26 = sphi %s11355_s26, %s15150_s26   ;;  %s11217_s25 = sphi %s11353_s25, %s15149_s25   ;;  %s11213_s2 = sphi %s11351_s2, %s15148_s2  }
  0x17   : > { %s8582_s28 = sadd.s32 4294967294, %s11225_s27   ;;  %p59_p0 = scmp.ne.s32.totalorder %s11217_s25, %s11213_s2 }
  0x18   : > { %p14900_p1 = scmp.eq.s32.totalorder %s11372_s3, 0  ;;  %p514_p3 = scmp.eq.s32.totalorder %s8582_s28, 1 }
  0x19   : > { %p8583_p5 = scmp.ge.s32.totalorder %s11225_s27, 1  ;;  %p521_p7 = scmp.lt.s32.totalorder %s11225_s27, 3 }
  0x1a   : > { %p11381_p4 = por %p14900_p1, %p59_p0  ;;  %p11386_p6 = por %p514_p3, %p59_p0 }
  0x1b   : > { %p11391_p8 = pnand %p8583_p5, %p521_p7  ;;  %s11227_s30 = smov [#allocation10]  }
  0x1c   : > { %s14958_s29 = scalar_select %p11381_p4, 1, 0 }
  0x1d   : > { %s14959_s0 = scalar_select %p11386_p6, 1, 0 }
  0x1e   : > { %s14961_s4 = scalar_select %p11391_p8, 1, 0 }
  0x1f   : > { %14960 = sst [smem:[#allocation21_spill]] %s14959_s0  ;;  %s545_s5 = sshll.u32 %s11227_s30, 4  ;;  %s11395_s5 = int_to_ptr.vmem [resolvable:$true] %s545_s5 }
  0x20   : > { %p10457_p9 = pneg %p11391_p8  ;;  %s11228_s23 = smov [#allocation12]  }
  0x21   : > { %s564_s1 = sshll.u32 %s11228_s23, 4  ;;  %s11229_s24 = smov [#allocation13]   ;;  %s11406_s1 = int_to_ptr.vmem [resolvable:$true] %s564_s1 }
  0x22   : > { %p11402_p11 = pnand %p10457_p9, %p14900_p1  ;;  %s11408_s28 = sshll.u32 %s11229_s24, 4  ;;  %s596_s28 = int_to_ptr.vmem [resolvable:$true] %s11408_s28 }
  0x23   : > { %s14963_s6 = sld [smem:[#allocation80_spill]] }
  0x24   : > { %p11418_p13 = pneg %p11402_p11 }
  0x29   : > { %s11037_s2 = scalar_lea.hbm %s14963_s6, 9216 }
  0x2a   : > { %p11038_p12 = scmp.ne.s32.totalorder %s14963_s6, %s11037_s2  ;;  %p11044_p5 = scmp.lt.u32.totalorder %s11037_s2, %s14963_s6 }
  0x2c   : > { %p11040_p0 = pnand %p11418_p13, %p11038_p12 }
  0x2e   : > { %p11041_p3 = pneg %p11040_p0 }
  0x30   : > { %p11046_p7 = pnand %p11044_p5, %p11041_p3 }
  0x32   : > { %11049 = shalt.err (!%p11046_p7)
}
  0x33   : > { %s11050_s18 = scalar_lea.vmem %s11395_s5, 9216  ;;  %p11058_p2 = scmp.lt.s32.totalorder %s11395_s5, %s11395_s5 }
  0x34   : > { %p11051_p9 = scmp.ne.s32.totalorder %s11395_s5, %s11050_s18  ;;  %p11059_p6 = scmp.lt.s32.totalorder %s11050_s18, %s11050_s18 }
  0x36   : > { %p11053_p10 = pnand %p11051_p9, %p11418_p13  ;;  %p11060_p12 = por %p11059_p6, %p11058_p2 }
  0x38   : > { %p11054_p1 = pneg %p11053_p10 }
  0x3a   : > { %p11061_p0 = pnand %p11060_p12, %p11054_p1 }
  0x3c   : > { %11064 = shalt.err (!%p11061_p0)
}
  0x3d   : > { %s11230_s21 = smov 64   ;;  %s11231_s2 = smov 4  }
  0x3e   : > { %10460 = dma.hbm_to_vmem [thread:$0]  (!%p11402_p11), %s14963_s6, 9216, %s11395_s5, [#allocation11], %s11230_s21, %s11230_s21, %s11231_s2  }
  0x3f   : > { %s11065_s18 = scalar_lea.hbm %s14879_s9, 9216 }
  0x40   : > { %p11066_p1 = scmp.ne.s32.totalorder %s14879_s9, %s11065_s18  ;;  %p11072_p10 = scmp.lt.u32.totalorder %s11065_s18, %s14879_s9 }
  0x42   : > { %p11068_p2 = pnand %p11066_p1, %p11418_p13 }
  0x44   : > { %p11069_p6 = pneg %p11068_p2 }
  0x46   : > { %p11074_p3 = pnand %p11072_p10, %p11069_p6 }
  0x48   : > { %11077 = shalt.err (!%p11074_p3)
}
  0x49   : > { %s11078_s5 = scalar_lea.vmem %s11406_s1, 9216  ;;  %p11086_p12 = scmp.lt.s32.totalorder %s11406_s1, %s11406_s1 }
  0x4a   : > { %p11079_p5 = scmp.ne.s32.totalorder %s11406_s1, %s11078_s5  ;;  %p11087_p0 = scmp.lt.s32.totalorder %s11078_s5, %s11078_s5 }
  0x4c   : > { %p11081_p7 = pnand %p11079_p5, %p11418_p13  ;;  %p11088_p1 = por %p11087_p0, %p11086_p12 }
  0x4e   : > { %p11082_p9 = pneg %p11081_p7 }
  0x50   : > { %p11089_p2 = pnand %p11088_p1, %p11082_p9 }
  0x52   : > { %11092 = shalt.err (!%p11089_p2)
}
  0x53   : > { %10463 = dma.hbm_to_vmem [thread:$0]  (!%p11402_p11), %s14879_s9, 9216, %s11406_s1, [#allocation11], %s11230_s21, %s11230_s21, %s11231_s2  }
  0x54   : > { %s11093_s0 = scalar_lea.hbm %s14886_s16, 9216 }
  0x55   : > { %p11094_p6 = scmp.ne.s32.totalorder %s14886_s16, %s11093_s0  ;;  %p11100_p5 = scmp.lt.u32.totalorder %s11093_s0, %s14886_s16 }
  0x57   : > { %p11096_p10 = pnand %p11094_p6, %p11418_p13 }
  0x59   : > { %p11097_p3 = pneg %p11096_p10 }
  0x5b   : > { %p11102_p7 = pnand %p11100_p5, %p11097_p3 }
  0x5d   : > { %11105 = shalt.err (!%p11102_p7)
}
  0x5e   : > { %s11106_s5 = scalar_lea.vmem %s596_s28, 9216  ;;  %p11114_p1 = scmp.lt.s32.totalorder %s596_s28, %s596_s28 }
  0x5f   : > { %p11107_p9 = scmp.ne.s32.totalorder %s596_s28, %s11106_s5  ;;  %p11115_p2 = scmp.lt.s32.totalorder %s11106_s5, %s11106_s5 }
  0x61   : > { %p11109_p12 = pnand %p11107_p9, %p11418_p13  ;;  %p11116_p4 = por %p11115_p2, %p11114_p1 }
  0x63   : > { %p11110_p0 = pneg %p11109_p12 }
  0x65   : > { %p11117_p8 = pnand %p11116_p4, %p11110_p0 }
  0x67   : > { %11120 = shalt.err (!%p11117_p8)
}
  0x68   : > { %10466 = dma.hbm_to_vmem [thread:$0]  (!%p11402_p11), %s14886_s16, 9216, %s596_s28, [#allocation14], %s11230_s21, %s11230_s21, %s11231_s2  }
  0x69   : > { %s11491_s17 = sadd.s32 1, %s11225_s27   ;;  %s46_s11 = sadd.s32 1, %s11221_s26 }
  0x6a   : > { %s43_s22 = ssub.s32 %s11225_s27, %s11491_s17  ;;  %p53_p8 = scmp.ne.s32.totalorder %s11221_s26, %s11217_s25 }
  0x6b   : > { %p44_p4 = scmp.eq.s32.totalorder %s43_s22, 0  ;;  %p54_p13 = scmp.eq.s32.totalorder %s11225_s27, 0 }
  0x6c   : > { %p10478_p6 = scmp.lt.s32.totalorder %s11225_s27, 2  ;;  %p14965_p3 = scmp.eq.s32.totalorder %s11372_s3, 1 }
  0x6d   : > { %s11501_s14 = scalar_select %p44_p4, %s11221_s26, %s46_s11  }
  0x6e   : > { %p55_p10 = por %p54_p13, %p53_p8  ;;  %p11505_p5 = por %p14965_p3, %p53_p8 }
  0x6f   : > { %s621_s0 = sand.u32 1, %s11221_s26   ;;  %s8928_s30 = sshll.u32 %s11225_s27, 12 }
  0x70   : > { %s8588_s28 = sshll.u32 %s621_s0, 8  ;;  %s14967_s23 = sld [smem:[#allocation74_spill]] }
  0x71   : > { %s625_s18 = scalar_lea.vmem [#allocation7], %s8588_s28  ;;  %p11516_p11 = pnand %p10478_p6, %p55_p10 }
  0x72   : > { %s632_s5 = sshll.u32 %s625_s18, 4  ;;  %s11522_s10 = scalar_lea.sflag [#allocation8], %s621_s0  ;;  %s11520_s5 = int_to_ptr.vmem [resolvable:$true] %s632_s5 }
  0x73   : > { %p11123_p9 = pneg %p11516_p11 }
  0x76   : > { %s11514_s24 = scalar_lea.hbm %s14967_s23, %s8928_s30  ;;  %s11126_s28 = scalar_lea.hbm %s14967_s23, 8192 }
  0x77   : > { %s11121_s22 = scalar_lea.hbm %s11514_s24, 4096  ;;  %p11127_p1 = scmp.lt.u32.totalorder %s11514_s24, %s14967_s23 }
  0x78   : > { %p11122_p7 = scmp.ne.s32.totalorder %s11514_s24, %s11121_s22  ;;  %p11128_p2 = scmp.lt.u32.totalorder %s11126_s28, %s11121_s22 }
  0x79   : > { %p11130_p8 = scmp.lt.u32.totalorder %s11121_s22, %s11514_s24 }
  0x7a   : > { %p11124_p12 = pnand %p11123_p9, %p11122_p7  ;;  %p11129_p4 = por %p11128_p2, %p11127_p1 }
  0x7c   : > { %p11125_p0 = pneg %p11124_p12  ;;  %p11131_p13 = por %p11130_p8, %p11129_p4 }
  0x7e   : > { %p11132_p6 = pnand %p11131_p13, %p11125_p0 }
  0x80   : > { %11135 = shalt.err (!%p11132_p6)
}
  0x81   : > { %s11136_s0 = scalar_lea.vmem %s11520_s5, 4096  ;;  %s11232_s18 = smov [#allocation7]  }
  0x82   : > { %p11137_p10 = scmp.ne.s32.totalorder %s11520_s5, %s11136_s0  ;;  %s11141_s11 = sshll.u32 %s11232_s18, 4  ;;  %s11142_s11 = int_to_ptr.vmem [resolvable:$false] %s11141_s11 }
  0x83   : > { %s11143_s30 = scalar_lea.vmem %s11142_s11, 8192  ;;  %p11144_p12 = scmp.lt.s32.totalorder %s11520_s5, %s11142_s11 }
  0x84   : > { %p11139_p3 = pnand %p11137_p10, %p11123_p9  ;;  %p11145_p1 = scmp.lt.s32.totalorder %s11143_s30, %s11136_s0 }
  0x86   : > { %p11140_p7 = pneg %p11139_p3  ;;  %p11146_p2 = por %p11145_p1, %p11144_p12 }
  0x88   : > { %p11147_p4 = pnand %p11146_p2, %p11140_p7 }
  0x8a   : > { %11150 = shalt.err (!%p11147_p4)
}
  0x8b   : > { %s11233_s22 = smov 128   ;;  %s11234_s28 = smov 8  }
  0x8c   : > { %10470 = dma.hbm_to_vmem [thread:$0]  (!%p11516_p11), %s11514_s24, 4096, %s11520_s5, %s11522_s10, %s11233_s22, %s11233_s22, %s11234_s28  }
  0x8d   : > { %p14969_p9 = scmp.ne.s32.totalorder %s14961_s4, 0 }
  0x8f   : > { %652 = sbr.rel (%p14969_p9) target bundleno = 2236 (0x8bc), region = 104 }
  0x96   : > { %s11553_s21 = sand.u32 1, %s11217_s25   ;;  %p14970_p0 = scmp.ne.s32.totalorder %s14958_s29, 0 }
  0x97   : > { %s14935_s2 = sshll.u32 %s11553_s21, 8  ;;  %s655_s0 = scalar_lea.sflag [#allocation8], %s11553_s21 }
  0x98   : > { %s11559_s18 = scalar_lea.vmem [#allocation7], %s14935_s2 }
  0x99   : > { %11196 = dma.done.wait (%p14970_p0), %s655_s0, 4096  }
  0x9a   : > { %11198 = vsyncadd (%p14970_p0), %s655_s0, 4294963200  ;;  %p14971_p11 = scmp.eq.s32.totalorder %s11372_s3, 0 }
  0x9c   : > { %11200 = dma.done.wait (%p14971_p11), [#allocation11], 18432   ;;  %p14972_p8 = pmov %p14971_p11 }
  0x9e   : > { %11202 = vsyncadd (%p14972_p8), [#allocation11], 4294948864  ;;  %p14973_p13 = pmov %p14972_p8 }
  0x9f   : > { %p14974_p6 = pmov %p14972_p8 }
  0xa0   : > { %11204 = dma.done.wait (%p14973_p13), [#allocation14], 9216  }
  0xa1   : > { %11206 = vsyncadd (%p14974_p6), [#allocation14], 4294958080  ;;  %v11235_v0 = vmov 0.0   ;;  %v11236_v1 = vmov 0.0|0.0   ;;  %s14975_s24 = sld [smem:[#allocation79_spill]]  ;;  %v10527_v3 = vld [vmem:[#allocation10 + $0x40] sm:$0xff]  }
  0xa2   : > { %740 = vst [vmem:[#allocation2] sm:$0xff] %v11235_v0  ;;  %741 = vst [vmem:[#allocation2 + $0x8] sm:$0xff] %v11235_v0  ;;  %3245 = vmatprep.mubr.bf16.mxu1 %v11236_v1  ;;  %v10528_v4 = vld [vmem:[#allocation10] sm:$0xff]   ;;  %8955 = vmatprep.subr.bf16.mxu1 %v10527_v3  ;;  %v10530_v6 = vld [vmem:[#allocation10 + $0x48] sm:$0xff]   ;;  %s14976_s28 = sld [smem:[#allocation76_spill]]  ;;  %s14984_s0 = sld [smem:[#allocation77_spill]] }
  0xa3   : > { %742 = vst [vmem:[#allocation2 + $0x10] sm:$0xff] %v11235_v0  ;;  %743 = vst [vmem:[#allocation2 + $0x18] sm:$0xff] %v11235_v0  ;;  %8956 = vmatpush3.bf16.msra.mxu1 %v10528_v4  ;;  %v10531_v7 = vld [vmem:[#allocation10 + $0x8] sm:$0xff]   ;;  %v10533_v9 = vld [vmem:[#allocation10 + $0x50] sm:$0xff]   ;;  %s14985_s5 = sld [smem:[#allocation78_spill]]  ;;  %p734_p10 = scmp.lt.s32.totalorder %s11372_s3, 1 }
  0xa4   : > { %744 = vst [vmem:[#allocation2 + $0x20] sm:$0xff] %v11235_v0  ;;  %747 = vst [vmem:[#allocation2 + $0x38] sm:$0xff] %v11235_v0  ;;  %8957 = vmatprep.subr.bf16.mxu1 %v10530_v6  ;;  %v10534_v10 = vld [vmem:[#allocation10 + $0x10] sm:$0xff]   ;;  %v10536_v12 = vld [vmem:[#allocation10 + $0x58] sm:$0xff]   ;;  %vm11237_vm0 = vmmov 0   ;;  %vm5286_vm1 = vcmask 130048  }
  0xa5   : > { %748 = vst [vmem:[#allocation2 + $0x40] sm:$0xff] %v11235_v0  ;;  %751 = vst [vmem:[#allocation2 + $0x58] sm:$0xff] %v11235_v0  ;;  %v10537_v13 = vld [vmem:[#allocation10 + $0x18] sm:$0xff]   ;;  %v10539_v15 = vld [vmem:[#allocation10 + $0x60] sm:$0xff]   ;;  %s735_s30 = scalar_select %p734_p10, %s11372_s3, 1 }
  0xa6   : > { %752 = vst [vmem:[#allocation2 + $0x60] sm:$0xff] %v11235_v0  ;;  %755 = vst [vmem:[#allocation2 + $0x78] sm:$0xff] %v11235_v0  ;;  %v10540_v16 = vld [vmem:[#allocation10 + $0x20] sm:$0xff]   ;;  %v10542_v18 = vld [vmem:[#allocation10 + $0x68] sm:$0xff]   ;;  %s15075_s11 = sld [smem:[#allocation81_spill]]  ;;  %s15076_s29 = sld [smem:[#allocation82_spill]] }
  0xa7   : > { %756 = vst [vmem:[#allocation2 + $0x80] sm:$0xff] %v11235_v0  ;;  %759 = vst [vmem:[#allocation2 + $0x98] sm:$0xff] %v11235_v0  ;;  %v10526_v2 = vld [vmem:[%s14975_s24] sm:$0xff]   ;;  %v10529_v5 = vld [vmem:[%s14975_s24 + $0x8] sm:$0xff]   ;;  %8958 = vmatpush3.bf16.msra.mxu1 %v10531_v7  ;;  %s8929_s22 = sshll.u32 %s735_s30, 4  ;;  %s15141_s2 = sshll.u32 %s11553_s21, 8 }
  0xa8   : > { %760 = vst [vmem:[#allocation2 + $0xa0] sm:$0xff] %v11235_v0  ;;  %763 = vst [vmem:[#allocation2 + $0xb8] sm:$0xff] %v11235_v0  ;;  %10111 = vmatprep.subr.bf16.mxu0 %v10526_v2  ;;  %v10532_v8 = vld [vmem:[%s14975_s24 + $0x10] sm:$0xff]   ;;  %8959 = vmatprep.subr.bf16.mxu1 %v10533_v9  ;;  %v10535_v11 = vld [vmem:[%s14975_s24 + $0x18] sm:$0xff]   ;;  %s14697_s10 = scalar_lea.vmem [#allocation15], %s15141_s2  ;;  %s15142_s4 = sld [smem:[#allocation87_spill]] }
  0xa9   : > { %764 = vst [vmem:[#allocation2 + $0xc0] sm:$0xff] %v11235_v0  ;;  %767 = vst [vmem:[#allocation2 + $0xd8] sm:$0xff] %v11235_v0  ;;  %10112 = vmatpush3.bf16.msra.mxu0 %v10526_v2  ;;  %v10538_v14 = vld [vmem:[%s14975_s24 + $0x20] sm:$0xff]   ;;  %v10541_v17 = vld [vmem:[%s14975_s24 + $0x28] sm:$0xff]   ;;  %s11238_s2 = smov [#allocation15]  }
  0xaa   : > { %768 = vst [vmem:[#allocation2 + $0xe0] sm:$0xff] %v11235_v0  ;;  %771 = vst [vmem:[#allocation2 + $0xf8] sm:$0xff] %v11235_v0  ;;  %10113 = vmatprep.subr.bf16.mxu0 %v10529_v5  ;;  %v10543_v19 = vld [vmem:[#allocation10 + $0x28] sm:$0xff]   ;;  %v10544_v20 = vld [vmem:[%s14975_s24 + $0x30] sm:$0xff]   ;;  %s11155_s30 = sshll.u32 %s11238_s2, 4  ;;  %s11156_s30 = int_to_ptr.vmem [resolvable:$false] %s11155_s30 }
  0xab   : > { %772 = vst [vmem:[#allocation2 + $0x100] sm:$0xff] %v11235_v0  ;;  %775 = vst [vmem:[#allocation2 + $0x118] sm:$0xff] %v11235_v0  ;;  %8960 = vmatpush3.bf16.msra.mxu1 %v10534_v10  ;;  %v10545_v21 = vld [vmem:[#allocation10 + $0x70] sm:$0xff]   ;;  %v10547_v23 = vld [vmem:[%s14975_s24 + $0x38] sm:$0xff]  }
  0xac   : > { %776 = vst [vmem:[#allocation2 + $0x120] sm:$0xff] %v11235_v0  ;;  %779 = vst [vmem:[#allocation2 + $0x138] sm:$0xff] %v11235_v0  ;;  %8961 = vmatprep.subr.bf16.mxu1 %v10536_v12  ;;  %v10546_v22 = vld [vmem:[#allocation10 + $0x30] sm:$0xff]   ;;  %v10548_v24 = vld [vmem:[#allocation10 + $0x78] sm:$0xff]  }
  0xad   : > { %780 = vst [vmem:[#allocation2 + $0x140] sm:$0xff] %v11235_v0  ;;  %783 = vst [vmem:[#allocation2 + $0x158] sm:$0xff] %v11235_v0  ;;  %10114 = vmatpush3.bf16.msra.mxu0 %v10529_v5  ;;  %v11690_v25 = vld [vmem:[%s11559_s18] sm:$0xff]  ;;  %v11693_v26 = vld [vmem:[%s11559_s18 + $0x8] sm:$0xff] }
  0xae   : > { %784 = vst [vmem:[#allocation2 + $0x160] sm:$0xff] %v11235_v0  ;;  %787 = vst [vmem:[#allocation2 + $0x178] sm:$0xff] %v11235_v0  ;;  %10115 = vmatprep.subr.bf16.mxu0 %v10532_v8  ;;  %v11696_v27 = vld [vmem:[%s11559_s18 + $0x10] sm:$0xff]  ;;  %v11699_v28 = vld [vmem:[%s11559_s18 + $0x18] sm:$0xff]  ;;  %v1142_v35 = vpack.c.bf16 %v11693_v26, %v11690_v25 }
  0xaf   : > { %788 = vst [vmem:[#allocation2 + $0x180] sm:$0xff] %v11235_v0  ;;  %791 = vst [vmem:[#allocation2 + $0x198] sm:$0xff] %v11235_v0  ;;  %8962 = vmatpush3.bf16.msra.mxu1 %v10537_v13  ;;  %v11704_v29 = vld [vmem:[#allocation2 + $0x7] sm:$0xff]  ;;  %v11706_v30 = vld [vmem:[#allocation2 + $0xf] sm:$0xff] }
  0xb0   : > { %792 = vst [vmem:[#allocation2 + $0x1a0] sm:$0xff] %v11235_v0  ;;  %795 = vst [vmem:[#allocation2 + $0x1b8] sm:$0xff] %v11235_v0  ;;  %8963 = vmatprep.subr.bf16.mxu1 %v10539_v15  ;;  %v11712_v31 = vld [vmem:[%s14976_s28] ss:$0 sm:$0xff]  ;;  %v11717_v32 = vld [vmem:[%s14976_s28 + $0x1] ss:$0 sm:$0xff]  ;;  %v1008_v34 = vpack.c.bf16 %v11706_v30, %v11704_v29 }
  0xb1   : > { %796 = vst [vmem:[#allocation2 + $0x1c0] sm:$0xff] %v11235_v0  ;;  %799 = vst [vmem:[#allocation2 + $0x1d8] sm:$0xff] %v11235_v0  ;;  %10116 = vmatpush3.bf16.msra.mxu0 %v10532_v8  ;;  %v1242_v33 = vld [vmem:[#allocation2 + $0x9] sm:$0xff]  ;;  %v1045_v37 = vmul.f32 %v11712_v31, %v11704_v29  ;;  %v1046_v38 = vmul.f32 %v11712_v31, %v11706_v30  ;;  %v1178_v39 = vmul.f32 0.0, %v11717_v32  ;;  %v1243_v40 = vld [vmem:[#allocation2 + $0x11] sm:$0xff] }
  0xb2   : > { %800 = vst [vmem:[#allocation2 + $0x1e0] sm:$0xff] %v11235_v0  ;;  %803 = vst [vmem:[#allocation2 + $0x1f8] sm:$0xff] %v11235_v0  ;;  %10117 = vmatprep.subr.bf16.mxu0 %v10535_v11  ;;  %v11733_v41 = vld [vmem:[%s14976_s28 + $0x2] ss:$0 sm:$0xff]  ;;  %v11737_v42 = vmul.f32 %v11717_v32, %v11690_v25  ;;  %v10549_v43 = vld [vmem:[#allocation10 + $0x38] sm:$0xff]   ;;  %v1181_v48 = vmul.f32 %v11717_v32, %v11693_v26  ;;  %v11830_v9 = vmul.f32 %v11717_v32, %v11696_v27 }
  0xb3   : > { %804 = vst [vmem:[#allocation2 + $0x200] sm:$0xff] %v11235_v0  ;;  %807 = vst [vmem:[#allocation2 + $0x218] sm:$0xff] %v11235_v0  ;;  %8964 = vmatpush3.bf16.msra.mxu1 %v10540_v16  ;;  %v1311_v44 = vmul.f32 %v11733_v41, %v1242_v33  ;;  %v1312_v45 = vmul.f32 %v11733_v41, %v1243_v40  ;;  %v11744_v46 = vld [vmem:[%s14976_s28 + $0x3] ss:$0 sm:$0xff]  ;;  %v11749_v47 = vld [vmem:[%s14976_s28 + $0x4] ss:$0 sm:$0xff]  ;;  %v1210_v49 = vadd.f32 %v1178_v39, %v1045_v37 }
  0xb4   : > { %808 = vst [vmem:[#allocation2 + $0x220] sm:$0xff] %v11235_v0  ;;  %809 = vst [vmem:[#allocation2 + $0x228] sm:$0xff] %v11235_v0  ;;  %8965 = vmatprep.subr.bf16.mxu1 %v10542_v18  ;;  %v1211_v50 = vadd.f32 %v1178_v39, %v1046_v38  ;;  %v11755_v51 = vmul.f32 %v11749_v47, %v11690_v25  ;;  %v11759_v52 = vmul.f32 %v11749_v47, %v11693_v26  ;;  %v11764_v53 = vld [vmem:[%s14976_s28 + $0x5] ss:$0 sm:$0xff]  ;;  %v11769_v54 = vld [vmem:[%s14976_s28 + $0x6] ss:$0 sm:$0xff] }
  0xb5   : > { %810 = vst [vmem:[#allocation2 + $0x230] sm:$0xff] %v11235_v0  ;;  %811 = vst [vmem:[#allocation2 + $0x238] sm:$0xff] %v11235_v0  ;;  %10118 = vmatpush3.bf16.msra.mxu0 %v10535_v11  ;;  %v11774_v55 = vld [vmem:[%s14976_s28 + $0x7] ss:$0 sm:$0xff]  ;;  %v11787_v58 = vld [vmem:[%s14976_s28 + $0x8] ss:$0 sm:$0xff]  ;;  %v11797_v61 = vmul.f32 %v11749_v47, %v11696_v27  ;;  %v11801_v62 = vmul.f32 %v11749_v47, %v11699_v28  ;;  %v1343_v63 = vadd.f32 %v1311_v44, %v1210_v49 }
  0xb6   : > { %812 = vst [vmem:[#allocation3] sm:$0xff] %v11235_v0  ;;  %813 = vst [vmem:[#allocation3 + $0x8] sm:$0xff] %v11235_v0  ;;  %10119 = vmatprep.subr.bf16.mxu0 %v10538_v14  ;;  %v11778_v56 = vmul.f32 %v11774_v55, %v11696_v27  ;;  %v11782_v57 = vmul.f32 %v11774_v55, %v11699_v28  ;;  %v11790_v59 = vld [vmem:[%s11559_s18 + $0x20] sm:$0xff]  ;;  %v11793_v60 = vld [vmem:[%s11559_s18 + $0x28] sm:$0xff]  ;;  %v11834_v10 = vmul.f32 %v11717_v32, %v11699_v28 }
  0xb7   : > { %815 = vst [vmem:[#allocation3 + $0x18] sm:$0xff] %v11235_v0  ;;  %816 = vst [vmem:[#allocation3 + $0x20] sm:$0xff] %v11235_v0  ;;  %8966 = vmatpush3.bf16.msra.mxu1 %v10543_v19  ;;  %v11807_v1 = vmul.f32 %v11774_v55, %v11790_v59  ;;  %v11811_v2 = vmul.f32 %v11774_v55, %v11793_v60  ;;  %v11814_v3 = vld [vmem:[%s11559_s18 + $0x30] sm:$0xff]  ;;  %v11817_v4 = vld [vmem:[%s11559_s18 + $0x38] sm:$0xff]  ;;  %v11838_v11 = vmul.f32 %v11749_v47, %v11790_v59 }
  0xb8   : > { %818 = vst [vmem:[#allocation3 + $0x30] sm:$0xff] %v11235_v0  ;;  %819 = vst [vmem:[#allocation3 + $0x38] sm:$0xff] %v11235_v0  ;;  %8967 = vmatprep.subr.bf16.mxu1 %v10545_v21  ;;  %v11820_v5 = vld [vmem:[%s11559_s18 + $0x40] sm:$0xff]  ;;  %v11842_v12 = vmul.f32 %v11749_v47, %v11793_v60  ;;  %v11864_v37 = vld [vmem:[%s11559_s18 + $0x48] sm:$0xff] }
  0xb9   : > { %821 = vst [vmem:[#allocation3 + $0x48] sm:$0xff] %v11235_v0  ;;  %822 = vst [vmem:[#allocation3 + $0x50] sm:$0xff] %v11235_v0  ;;  %10120 = vmatpush3.bf16.msra.mxu0 %v10538_v14  ;;  %v11877_v44 = vld [vmem:[%s11559_s18 + $0x50] sm:$0xff]  ;;  %v11883_v49 = vld [vmem:[%s11559_s18 + $0x60] sm:$0xff] }
  0xba   : > { %824 = vst [vmem:[#allocation3 + $0x60] sm:$0xff] %v11235_v0  ;;  %825 = vst [vmem:[#allocation3 + $0x68] sm:$0xff] %v11235_v0  ;;  %10121 = vmatprep.subr.bf16.mxu0 %v10541_v17  ;;  %v11894_v29 = vld [vmem:[%s11559_s18 + $0x68] sm:$0xff]  ;;  %v11898_v30 = vld [vmem:[%s11559_s18 + $0x70] sm:$0xff] }
  0xbb   : > { %827 = vst [vmem:[#allocation3 + $0x78] sm:$0xff] %v11235_v0  ;;  %828 = vst [vmem:[#allocation3 + $0x80] sm:$0xff] %v11235_v0  ;;  %8968 = vmatpush3.bf16.msra.mxu1 %v10546_v22 }
  0xbc   : > { %830 = vst [vmem:[#allocation4] sm:$0xff] %v11235_v0  ;;  %831 = vst [vmem:[#allocation4 + $0x8] sm:$0xff] %v11235_v0  ;;  %8969 = vmatprep.subr.bf16.mxu1 %v10548_v24 }
  0xbd   : > { %832 = vst [vmem:[#allocation4 + $0x10] sm:$0xff] %v11235_v0  ;;  %833 = vst [vmem:[#allocation4 + $0x18] sm:$0xff] %v11235_v0  ;;  %10122 = vmatpush3.bf16.msra.mxu0 %v10541_v17 }
  0xbe   : > { %834 = vst [vmem:[#allocation4 + $0x20] sm:$0xff] %v11235_v0  ;;  %837 = vst [vmem:[#allocation4 + $0x38] sm:$0xff] %v11235_v0  ;;  %10123 = vmatprep.subr.bf16.mxu0 %v10544_v20 }
  0xbf   : > { %838 = vst [vmem:[#allocation4 + $0x40] sm:$0xff] %v11235_v0  ;;  %841 = vst [vmem:[#allocation4 + $0x58] sm:$0xff] %v11235_v0  ;;  %8970 = vmatpush3.bf16.msra.mxu1 %v10549_v43 }
  0xc0   : > { %842 = vst [vmem:[#allocation4 + $0x60] sm:$0xff] %v11235_v0  ;;  %845 = vst [vmem:[#allocation4 + $0x78] sm:$0xff] %v11235_v0 }
  0xc1   : > { %846 = vst [vmem:[#allocation4 + $0x80] sm:$0xff] %v11235_v0  ;;  %849 = vst [vmem:[#allocation4 + $0x98] sm:$0xff] %v11235_v0  ;;  %10124 = vmatpush3.bf16.msra.mxu0 %v10544_v20 }
  0xc2   : > { %850 = vst [vmem:[#allocation4 + $0xa0] sm:$0xff] %v11235_v0  ;;  %853 = vst [vmem:[#allocation4 + $0xb8] sm:$0xff] %v11235_v0  ;;  %10125 = vmatprep.subr.bf16.mxu0 %v10547_v23  ;;  %3246 = vmatmul.mubr.bf16.vlgmr.msra.gmra.mrb[0].mxu1 %v1008_v34  ;;  %v11901_v34 = vld [vmem:[%s11559_s18 + $0x78] sm:$0xff] }
  0xc3   : > { %854 = vst [vmem:[#allocation4 + $0xc0] sm:$0xff] %v11235_v0  ;;  %857 = vst [vmem:[#allocation4 + $0xd8] sm:$0xff] %v11235_v0  ;;  %3253 = vmatprep.mubr.bf16.mxu1 %v1142_v35  ;;  %v11913_v35 = vld [vmem:[%s11559_s18 + $0x80] sm:$0xff] }
  0xc4   : > { %858 = vst [vmem:[#allocation4 + $0xe0] sm:$0xff] %v11235_v0  ;;  %861 = vst [vmem:[#allocation4 + $0xf8] sm:$0xff] %v11235_v0 }
  0xc5   : > { %862 = vst [vmem:[#allocation4 + $0x100] sm:$0xff] %v11235_v0  ;;  %865 = vst [vmem:[#allocation4 + $0x118] sm:$0xff] %v11235_v0  ;;  %10126 = vmatpush3.bf16.msra.mxu0 %v10547_v23 }
  0xc6   : > { %866 = vst [vmem:[#allocation4 + $0x120] sm:$0xff] %v11235_v0  ;;  %869 = vst [vmem:[#allocation4 + $0x138] sm:$0xff] %v11235_v0 }
  0xc7   : > { %870 = vst [vmem:[#allocation4 + $0x140] sm:$0xff] %v11235_v0  ;;  %873 = vst [vmem:[#allocation4 + $0x158] sm:$0xff] %v11235_v0 }
  0xc8   : > { %874 = vst [vmem:[#allocation4 + $0x160] sm:$0xff] %v11235_v0  ;;  %877 = vst [vmem:[#allocation4 + $0x178] sm:$0xff] %v11235_v0 }
  0xc9   : > { %878 = vst [vmem:[#allocation4 + $0x180] sm:$0xff] %v11235_v0  ;;  %881 = vst [vmem:[#allocation4 + $0x198] sm:$0xff] %v11235_v0 }
  0xca   : > { %882 = vst [vmem:[#allocation4 + $0x1a0] sm:$0xff] %v11235_v0  ;;  %885 = vst [vmem:[#allocation4 + $0x1b8] sm:$0xff] %v11235_v0 }
  0xcb   : > { %886 = vst [vmem:[#allocation4 + $0x1c0] sm:$0xff] %v11235_v0  ;;  %889 = vst [vmem:[#allocation4 + $0x1d8] sm:$0xff] %v11235_v0 }
  0xcc   : > { %890 = vst [vmem:[#allocation4 + $0x1e0] sm:$0xff] %v11235_v0  ;;  %893 = vst [vmem:[#allocation4 + $0x1f8] sm:$0xff] %v11235_v0 }
  0xcd   : > { %894 = vst [vmem:[#allocation4 + $0x200] sm:$0xff] %v11235_v0  ;;  %897 = vst [vmem:[#allocation4 + $0x218] sm:$0xff] %v11235_v0 }
  0xce   : > { %898 = vst [vmem:[#allocation4 + $0x220] sm:$0xff] %v11235_v0  ;;  %899 = vst [vmem:[#allocation4 + $0x228] sm:$0xff] %v11235_v0 }
  0xcf   : > { %900 = vst [vmem:[#allocation4 + $0x230] sm:$0xff] %v11235_v0  ;;  %901 = vst [vmem:[#allocation4 + $0x238] sm:$0xff] %v11235_v0  ;;  %v1344_v0 = vadd.f32 %v1312_v45, %v1211_v50  ;;  %v11880_v45 = vld [vmem:[%s11559_s18 + $0x58] sm:$0xff] }
  0xd0   : > { %935 = vst [vmem:[#allocation2 + $0x28] sm:$0xff] %v11690_v25  ;;  %936 = vst [vmem:[#allocation2 + $0x30] sm:$0xff] %v11693_v26 }
  0xd1   : > { %937 = vst [vmem:[#allocation2 + $0x48] sm:$0xff] %v11696_v27  ;;  %938 = vst [vmem:[#allocation2 + $0x50] sm:$0xff] %v11699_v28 }
  0xd2   : > { %939 = vst [vmem:[#allocation2 + $0x68] sm:$0xff] %v11790_v59  ;;  %940 = vst [vmem:[#allocation2 + $0x70] sm:$0xff] %v11793_v60 }
  0xd3   : > { %941 = vst [vmem:[#allocation2 + $0x88] sm:$0xff] %v11814_v3  ;;  %942 = vst [vmem:[#allocation2 + $0x90] sm:$0xff] %v11817_v4 }
  0xd4   : > { %943 = vst [vmem:[#allocation2 + $0xa8] sm:$0xff] %v11820_v5  ;;  %944 = vst [vmem:[#allocation2 + $0xb0] sm:$0xff] %v11864_v37 }
  0xd5   : > { %14977 = vst [vmem:[#allocation22_spill] sm:$0xff] %v11883_v49  ;;  %945 = vst [vmem:[#allocation2 + $0xc8] sm:$0xff] %v11877_v44 }
  0xd6   : > { %946 = vst [vmem:[#allocation2 + $0xd0] sm:$0xff] %v11880_v45  ;;  %14978 = vst [vmem:[#allocation23_spill] sm:$0xff] %v11894_v29 }
  0xd7   : > { %v11822_v6 = vld [vmem:[#allocation2 + $0x27] sm:$0xff]  ;;  %v11824_v7 = vld [vmem:[#allocation2 + $0x2f] sm:$0xff]  ;;  %947 = vst [vmem:[#allocation2 + $0xe8] sm:$0xff] %v11883_v49  ;;  %14979 = vst [vmem:[#allocation24_spill] sm:$0xff] %v11898_v30 }
  0xd8   : > { %v1641_v8 = vld [vmem:[#allocation2 + $0x29] sm:$0xff]  ;;  %v1444_v13 = vmul.f32 %v11744_v46, %v11822_v6  ;;  %v1445_v14 = vmul.f32 %v11744_v46, %v11824_v7  ;;  %v1642_v15 = vld [vmem:[#allocation2 + $0x31] sm:$0xff]  ;;  %v1047_v19 = vmul.f32 %v11712_v31, %v11822_v6  ;;  %v1048_v33 = vmul.f32 %v11712_v31, %v11824_v7  ;;  %14980 = vst [vmem:[#allocation25_spill] sm:$0xff] %v11901_v34 }
  0xd9   : > { %v1710_v16 = vmul.f32 %v11764_v53, %v1641_v8  ;;  %v11850_v17 = vld [vmem:[#allocation2 + $0x47] sm:$0xff]  ;;  %v11852_v18 = vld [vmem:[#allocation2 + $0x4f] sm:$0xff]  ;;  %v1711_v20 = vmul.f32 %v11764_v53, %v1642_v15  ;;  %948 = vst [vmem:[#allocation2 + $0xf0] sm:$0xff] %v11894_v29  ;;  %949 = vst [vmem:[#allocation2 + $0x108] sm:$0xff] %v11898_v30 }
  0xda   : > { %v1844_v21 = vmul.f32 %v11769_v54, %v11850_v17  ;;  %v1845_v22 = vmul.f32 %v11769_v54, %v11852_v18  ;;  %v2041_v23 = vld [vmem:[#allocation2 + $0x49] sm:$0xff]  ;;  %v2042_v24 = vld [vmem:[#allocation2 + $0x51] sm:$0xff]  ;;  %v1476_v38 = vadd.f32 %v1444_v13, %v1343_v63  ;;  %v1477_v39 = vadd.f32 %v1445_v14, %v1344_v0  ;;  %950 = vst [vmem:[#allocation2 + $0x110] sm:$0xff] %v11901_v34  ;;  %v11919_v14 = vld [vmem:[%s11559_s18 + $0x90] sm:$0xff] }
  0xdb   : > { %v11867_v40 = vmul.f32 %v11787_v58, %v2041_v23  ;;  %v11870_v43 = vmul.f32 %v11787_v58, %v2042_v24  ;;  %v1212_v50 = vadd.f32 %v11737_v42, %v1047_v19  ;;  %v1213_v63 = vadd.f32 %v1181_v48, %v1048_v33  ;;  %14981 = vst [vmem:[#allocation26_spill] sm:$0xff] %v11913_v35  ;;  %v11923_v33 = vld [vmem:[#allocation2 + $0x67] sm:$0xff]  ;;  %v11936_v36 = vld [vmem:[#allocation2 + $0x71] sm:$0xff] }
  0xdc   : > { %v1313_v0 = vmul.f32 %v11733_v41, %v1641_v8  ;;  %v1314_v13 = vmul.f32 %v11733_v41, %v1642_v15  ;;  %v1609_v42 = vadd.f32 %v11755_v51, %v1476_v38  ;;  %v1610_v48 = vadd.f32 %v11759_v52, %v1477_v39  ;;  %v11916_v8 = vld [vmem:[%s11559_s18 + $0x88] sm:$0xff]  ;;  %14983 = vst [vmem:[#allocation28_spill] sm:$0xff] %v11919_v14  ;;  %v11925_v38 = vld [vmem:[#allocation2 + $0x6f] sm:$0xff] }
  0xdd   : > { %v1446_v25 = vmul.f32 %v11744_v46, %v11850_v17  ;;  %v1447_v26 = vmul.f32 %v11744_v46, %v11852_v18  ;;  %14982 = vst [vmem:[#allocation27_spill] sm:$0xff] %v11916_v8  ;;  %v1712_v15 = vmul.f32 %v11764_v53, %v2041_v23  ;;  %v1713_v19 = vmul.f32 %v11764_v53, %v2042_v24  ;;  %v11947_v30 = vld [vmem:[%s11559_s18 + $0x98] sm:$0xff]  ;;  %v922_v29 = vld [vmem:[%s11559_s18 + $0xa0] sm:$0xff]  ;;  %v923_v49 = vld [vmem:[%s11559_s18 + $0xa8] sm:$0xff] }
  0xde   : > { %v1345_v51 = vadd.f32 %v1313_v0, %v1212_v50  ;;  %v1346_v52 = vadd.f32 %v1314_v13, %v1213_v63  ;;  %951 = vst [vmem:[#allocation2 + $0x128] sm:$0xff] %v11913_v35  ;;  %952 = vst [vmem:[#allocation2 + $0x130] sm:$0xff] %v11916_v8  ;;  %v1742_v39 = vadd.f32 %v1710_v16, %v1609_v42  ;;  %v11934_v13 = vld [vmem:[#allocation2 + $0x69] sm:$0xff] }
  0xdf   : > { %953 = vst [vmem:[#allocation2 + $0x148] sm:$0xff] %v11919_v14  ;;  %v1743_v50 = vadd.f32 %v1711_v20, %v1610_v48  ;;  %v1846_v63 = vmul.f32 %v11769_v54, %v11923_v33  ;;  %v1847_v0 = vmul.f32 %v11769_v54, %v11925_v38  ;;  %v2112_v8 = vmul.f32 %v11787_v58, %v11934_v13 }
  0xe0   : > { %v1478_v35 = vadd.f32 %v1446_v25, %v1345_v51  ;;  %v1479_v34 = vadd.f32 %v1447_v26, %v1346_v52  ;;  %v2113_v16 = vmul.f32 %v11787_v58, %v11936_v36  ;;  %v1876_v42 = vadd.f32 %v1844_v21, %v1742_v39  ;;  %954 = vst [vmem:[#allocation2 + $0x150] sm:$0xff] %v11947_v30 }
  0xe1   : > { %v1877_v20 = vadd.f32 %v1845_v22, %v1743_v50  ;;  %v1049_v48 = vmul.f32 %v11712_v31, %v11850_v17  ;;  %v1050_v14 = vmul.f32 %v11712_v31, %v11852_v18  ;;  %v1315_v51 = vmul.f32 %v11733_v41, %v2041_v23  ;;  %955 = vst [vmem:[#allocation2 + $0x168] sm:$0xff] %v922_v29 }
  0xe2   : > { %v1611_v25 = vadd.f32 %v11797_v61, %v1478_v35  ;;  %v1612_v26 = vadd.f32 %v11801_v62, %v1479_v34  ;;  %v1316_v52 = vmul.f32 %v11733_v41, %v2042_v24  ;;  %956 = vst [vmem:[#allocation2 + $0x170] sm:$0xff] %v923_v49  ;;  %v2009_v21 = vadd.f32 %v11778_v56, %v1876_v42  ;;  %v11963_v61 = vld [vmem:[%s14984_s0] ss:$0 sm:$0xff] }
  0xe3   : > { %v2010_v22 = vadd.f32 %v11782_v57, %v1877_v20  ;;  %v1214_v39 = vadd.f32 %v11830_v9, %v1049_v48  ;;  %v1215_v50 = vadd.f32 %v11834_v10, %v1050_v14  ;;  %v1448_v24 = vmul.f32 %v11744_v46, %v11923_v33  ;;  %v11974_v10 = vld [vmem:[%s14985_s5] ss:$0 sm:$0xff]  ;;  %v11982_v20 = vld [vmem:[#allocation2 + $0x87] sm:$0xff]  ;;  %v11984_v48 = vld [vmem:[#allocation2 + $0x8f] sm:$0xff] }
  0xe4   : > { %v1744_v62 = vadd.f32 %v1712_v15, %v1611_v25  ;;  %v1745_v23 = vadd.f32 %v1713_v19, %v1612_v26  ;;  %v1449_v49 = vmul.f32 %v11744_v46, %v11925_v38  ;;  %v2142_v56 = vadd.f32 %v11867_v40, %v2009_v21 }
  0xe5   : > { %v2143_v57 = vadd.f32 %v11870_v43, %v2010_v22  ;;  %v1347_v9 = vadd.f32 %v1315_v51, %v1214_v39  ;;  %v1348_v29 = vadd.f32 %v1316_v52, %v1215_v50  ;;  %v1714_v14 = vmul.f32 %v11764_v53, %v11934_v13 }
  0xe6   : > { %v1878_v34 = vadd.f32 %v1846_v63, %v1744_v62  ;;  %v1879_v35 = vadd.f32 %v1847_v0, %v1745_v23  ;;  %v1715_v15 = vmul.f32 %v11764_v53, %v11936_v36  ;;  %v2181_v19 = vmul.f32 %v11963_v61, %v2142_v56  ;;  %v12000_v62 = vld [vmem:[#allocation2 + $0x89] sm:$0xff]  ;;  %v12002_v56 = vld [vmem:[#allocation2 + $0x91] sm:$0xff] }
  0xe7   : > { %v2182_v40 = vmul.f32 %v11963_v61, %v2143_v57  ;;  %v1480_v43 = vadd.f32 %v1448_v24, %v1347_v9  ;;  %v1481_v42 = vadd.f32 %v1449_v49, %v1348_v29  ;;  %v1848_v0 = vmul.f32 %v11769_v54, %v11982_v20  ;;  %v10550_v57 = vld [vmem:[#allocation10 + $0xc0] sm:$0xff]  }
  0xe8   : > { %v2011_v25 = vadd.f32 %v11807_v1, %v1878_v34  ;;  %v2012_v63 = vadd.f32 %v11811_v2, %v1879_v35  ;;  %v1849_v26 = vmul.f32 %v11769_v54, %v11984_v48  ;;  %v2220_v51 = vadd.f32 %v11974_v10, %v2181_v19  ;;  %9067 = vmatprep.subr.bf16.mxu0 %v10550_v57 }
  0xe9   : > { %v2221_v52 = vadd.f32 %v11974_v10, %v2182_v40  ;;  %v1613_v21 = vadd.f32 %v11838_v11, %v1480_v43  ;;  %v1614_v22 = vadd.f32 %v11842_v12, %v1481_v42  ;;  %v1981_v1 = vmul.f32 %v11774_v55, %v11814_v3 }
  0xea   : > { %v2144_v39 = vadd.f32 %v2112_v8, %v2011_v25  ;;  %v2145_v50 = vadd.f32 %v2113_v16, %v2012_v63  ;;  %v1982_v2 = vmul.f32 %v11774_v55, %v11817_v4  ;;  %v2114_v11 = vmul.f32 %v11787_v58, %v12000_v62  ;;  %v10552_v25 = vld [vmem:[#allocation10 + $0xc8] sm:$0xff]  }
  0xeb   : > { %v2252_v23 = vpack.c.bf16 %v2221_v52, %v2220_v51  ;;  %v1746_v24 = vadd.f32 %v1714_v14, %v1613_v21  ;;  %v1747_v49 = vadd.f32 %v1715_v15, %v1614_v22  ;;  %v2115_v16 = vmul.f32 %v11787_v58, %v12002_v56  ;;  %v10551_v15 = vld [vmem:[#allocation10 + $0x80] sm:$0xff]   ;;  %v924_v52 = vld [vmem:[%s11559_s18 + $0xb0] sm:$0xff]  ;;  %v925_v21 = vld [vmem:[%s11559_s18 + $0xb8] sm:$0xff] }
  0xec   : > { %v2183_v12 = vmul.f32 %v11963_v61, %v2144_v39  ;;  %v2184_v8 = vmul.f32 %v11963_v61, %v2145_v50  ;;  %v1051_v9 = vmul.f32 %v11712_v31, %v11923_v33  ;;  %v1052_v35 = vmul.f32 %v11712_v31, %v11925_v38  ;;  %v926_v22 = vld [vmem:[%s11559_s18 + $0xc0] sm:$0xff]  ;;  %957 = vst [vmem:[#allocation2 + $0x188] sm:$0xff] %v924_v52  ;;  %v929_v52 = vld [vmem:[%s11559_s18 + $0xd8] sm:$0xff] }
  0xed   : > { %10127 = vmatprep.mubr.bf16.mxu0 %v2252_v23  ;;  %v1880_v29 = vadd.f32 %v1848_v0, %v1746_v24  ;;  %v1881_v34 = vadd.f32 %v1849_v26, %v1747_v49  ;;  %v1184_v14 = vmul.f32 %v11717_v32, %v11790_v59  ;;  %v1185_v43 = vmul.f32 %v11717_v32, %v11793_v60  ;;  %v12031_v24 = vld [vmem:[#allocation2 + $0xa7] sm:$0xff] }
  0xee   : > { %v2222_v19 = vadd.f32 %v11974_v10, %v2183_v12  ;;  %v2223_v40 = vadd.f32 %v11974_v10, %v2184_v8  ;;  %v1317_v42 = vmul.f32 %v11733_v41, %v11934_v13  ;;  %v1318_v51 = vmul.f32 %v11733_v41, %v11936_v36  ;;  %958 = vst [vmem:[#allocation2 + $0x190] sm:$0xff] %v925_v21  ;;  %v12036_v12 = vld [vmem:[#allocation2 + $0xaf] sm:$0xff] }
  0xef   : > { %v2013_v63 = vadd.f32 %v1981_v1, %v1880_v29  ;;  %v2014_v0 = vadd.f32 %v1982_v2, %v1881_v34  ;;  %v1216_v26 = vadd.f32 %v1184_v14, %v1051_v9  ;;  %v1217_v50 = vadd.f32 %v1185_v43, %v1052_v35  ;;  %v927_v1 = vld [vmem:[%s11559_s18 + $0xc8] sm:$0xff]  ;;  %959 = vst [vmem:[#allocation2 + $0x1a8] sm:$0xff] %v926_v22 }
  0xf0   : > { %v2253_v39 = vpack.c.bf16 %v2223_v40, %v2222_v19  ;;  %v1450_v23 = vmul.f32 %v11744_v46, %v11982_v20  ;;  %v1451_v13 = vmul.f32 %v11744_v46, %v11984_v48  ;;  %v1583_v57 = vmul.f32 %v11749_v47, %v11814_v3  ;;  %960 = vst [vmem:[#allocation2 + $0x1b0] sm:$0xff] %v927_v1  ;;  %v10553_v40 = vld [vmem:[#allocation10 + $0x88] sm:$0xff]  }
  0xf1   : > { %v2146_v2 = vadd.f32 %v2114_v11, %v2013_v63  ;;  %v2147_v49 = vadd.f32 %v2115_v16, %v2014_v0  ;;  %v1349_v36 = vadd.f32 %v1317_v42, %v1216_v26  ;;  %v1350_v8 = vadd.f32 %v1318_v51, %v1217_v50  ;;  %v12044_v16 = vld [vmem:[#allocation2 + $0xa9] sm:$0xff]  ;;  %v12056_v26 = vld [vmem:[#allocation2 + $0xb1] sm:$0xff]  ;;  %v928_v51 = vld [vmem:[%s11559_s18 + $0xd0] sm:$0xff]  ;;  %962 = vst [vmem:[#allocation2 + $0x1d0] sm:$0xff] %v929_v52 }
  0xf2   : > { %10128 = vmatmul.mubr.bf16.vlgmr.msra.gmra.mrb[0].mxu0 %v2253_v39  ;;  %v1584_v9 = vmul.f32 %v11749_v47, %v11817_v4  ;;  %v1716_v29 = vmul.f32 %v11764_v53, %v12000_v62  ;;  %v1717_v11 = vmul.f32 %v11764_v53, %v12002_v56  ;;  %v1850_v19 = vmul.f32 %v11769_v54, %v12031_v24  ;;  %v930_v50 = vld [vmem:[%s11559_s18 + $0xe0] sm:$0xff] }
  0xf3   : > { %v2185_v34 = vmul.f32 %v11963_v61, %v2146_v2  ;;  %v2186_v35 = vmul.f32 %v11963_v61, %v2147_v49  ;;  %v1482_v14 = vadd.f32 %v1450_v23, %v1349_v36  ;;  %9068 = vmatpush3.bf16.msra.mxu0 %v10551_v15  ;;  %v1483_v43 = vadd.f32 %v1451_v13, %v1350_v8  ;;  %v931_v23 = vld [vmem:[%s11559_s18 + $0xe8] sm:$0xff] }
  0xf4   : > { %v1851_v42 = vmul.f32 %v11769_v54, %v12036_v12  ;;  %v1983_v63 = vmul.f32 %v11774_v55, %v11820_v5  ;;  %v1984_v0 = vmul.f32 %v11774_v55, %v11864_v37  ;;  %9069 = vmatprep.subr.bf16.mxu0 %v10552_v25  ;;  %v2116_v39 = vmul.f32 %v11787_v58, %v12044_v16 }
  0xf5   : > { %v2224_v15 = vadd.f32 %v11974_v10, %v2185_v34  ;;  %v2225_v21 = vadd.f32 %v11974_v10, %v2186_v35  ;;  %v1615_v22 = vadd.f32 %v1583_v57, %v1482_v14  ;;  %961 = vst [vmem:[#allocation2 + $0x1c8] sm:$0xff] %v928_v51  ;;  %v1616_v13 = vadd.f32 %v1584_v9, %v1483_v43  ;;  %v10554_v9 = vld [vmem:[#allocation10 + $0xd0] sm:$0xff]   ;;  %v10556_v14 = vld [vmem:[#allocation10 + $0xd8] sm:$0xff]  }
  0xf6   : > { %v2117_v1 = vmul.f32 %v11787_v58, %v12056_v26  ;;  %v1009_v25 = vpack.c.bf16 %v11824_v7, %v11822_v6  ;;  %v1053_v2 = vmul.f32 %v11712_v31, %v11982_v20  ;;  %963 = vst [vmem:[#allocation2 + $0x1e8] sm:$0xff] %v930_v50  ;;  %964 = vst [vmem:[#allocation2 + $0x1f0] sm:$0xff] %v931_v23 }
  0xf7   : > { %v2254_v49 = vpack.c.bf16 %v2225_v21, %v2224_v15  ;;  %v1748_v36 = vadd.f32 %v1716_v29, %v1615_v22  ;;  %v1054_v57 = vmul.f32 %v11712_v31, %v11984_v48  ;;  %v1186_v8 = vmul.f32 %v11717_v32, %v11814_v3  ;;  %9070 = vmatpush3.bf16.msra.mxu0 %v10553_v40  ;;  %v10555_v29 = vld [vmem:[#allocation10 + $0x90] sm:$0xff]   ;;  %v12099_v21 = vld [vmem:[#allocation2 + $0xcf] sm:$0xff] }
  0xf8   : > { %v1749_v34 = vadd.f32 %v1717_v11, %v1616_v13  ;;  %3254 = vmatmul.mubr.bf16.gmra.mrb[4].mxu1 %v1009_v25  ;;  %v1187_v6 = vmul.f32 %v11717_v32, %v11817_v4  ;;  %v1319_v7 = vmul.f32 %v11733_v41, %v12000_v62  ;;  %v1320_v20 = vmul.f32 %v11733_v41, %v12002_v56  ;;  %v12090_v56 = vld [vmem:[#allocation2 + $0xc7] sm:$0xff] }
  0xf9   : > { %10131 = vmatprep.mubr.bf16.mxu0 %v2254_v49  ;;  %v1882_v35 = vadd.f32 %v1850_v19, %v1748_v36  ;;  %v1218_v48 = vadd.f32 %v1186_v8, %v1053_v2  ;;  %v1452_v3 = vmul.f32 %v11744_v46, %v12031_v24  ;;  %v1453_v11 = vmul.f32 %v11744_v46, %v12036_v12  ;;  %v12111_v49 = vld [vmem:[#allocation2 + $0xd1] sm:$0xff] }
  0xfa   : > { %v1883_v40 = vadd.f32 %v1851_v42, %v1749_v34  ;;  %v1219_v43 = vadd.f32 %v1187_v6, %v1054_v57  ;;  %v1585_v4 = vmul.f32 %v11749_v47, %v11820_v5  ;;  %v1586_v62 = vmul.f32 %v11749_v47, %v11864_v37  ;;  %9071 = vmatprep.subr.bf16.mxu0 %v10554_v9  ;;  %v10558_v36 = vld [vmem:[#allocation10 + $0xe0] sm:$0xff]  }
  0xfb   : > { %v14986_v19 = vpack.c.bf16 %v11699_v28, %v11696_v27  ;;  %v2015_v51 = vadd.f32 %v1983_v63, %v1882_v35  ;;  %v1351_v52 = vadd.f32 %v1319_v7, %v1218_v48  ;;  %v1718_v15 = vmul.f32 %v11764_v53, %v12044_v16  ;;  %9072 = vmatpush3.bf16.msra.mxu0 %v10555_v29  ;;  %v10557_v28 = vld [vmem:[#allocation10 + $0x98] sm:$0xff]   ;;  %v932_v29 = vld [vmem:[%s11559_s18 + $0xf0] sm:$0xff] }
  0xfc   : > { %v1719_v42 = vmul.f32 %v11764_v53, %v12056_v26  ;;  %v2016_v22 = vadd.f32 %v1984_v0, %v1883_v40  ;;  %v1352_v50 = vadd.f32 %v1320_v20, %v1219_v43  ;;  %v1852_v23 = vmul.f32 %v11769_v54, %v12090_v56  ;;  %v12109_v0 = vld [vmem:[#allocation2 + $0xc9] sm:$0xff]  ;;  %9073 = vmatprep.subr.bf16.mxu0 %v10556_v14 }
  0xfd   : > { %3261 = vmatprep.mubr.bf16.mxu1 %v14986_v19  ;;  %v1853_v27 = vmul.f32 %v11769_v54, %v12099_v21  ;;  %v2148_v63 = vadd.f32 %v2116_v39, %v2015_v51  ;;  %v1484_v13 = vadd.f32 %v1452_v3, %v1351_v52  ;;  %v1985_v25 = vmul.f32 %v11774_v55, %v11877_v44  ;;  %v933_v35 = vld [vmem:[%s11559_s18 + $0xf8] sm:$0xff]  ;;  %v10559_v14 = vld [vmem:[#allocation10 + $0xa0] sm:$0xff]   ;;  %s15026_s18 = sld [smem:[#allocation75_spill]] }
  0xfe   : > { %v1986_v2 = vmul.f32 %v11774_v55, %v11880_v45  ;;  %v2149_v57 = vadd.f32 %v2117_v1, %v2016_v22  ;;  %v1485_v8 = vadd.f32 %v1453_v11, %v1352_v50  ;;  %v2118_v39 = vmul.f32 %v11787_v58, %v12109_v0  ;;  %965 = vst [vmem:[#allocation2 + $0x208] sm:$0xff] %v932_v29  ;;  %v12141_v22 = vld [vmem:[#allocation2 + $0xe7] sm:$0xff] }
  0xff   : > { %v2119_v9 = vmul.f32 %v11787_v58, %v12111_v49  ;;  %v2187_v34 = vmul.f32 %v11963_v61, %v2148_v63  ;;  %v1617_v6 = vadd.f32 %v1585_v4, %v1484_v13  ;;  %v1055_v7 = vmul.f32 %v11712_v31, %v12031_v24  ;;  %9074 = vmatpush3.bf16.msra.mxu0 %v10557_v28  ;;  %v10560_v4 = vld [vmem:[#allocation10 + $0xe8] sm:$0xff]  }
 0x100   : > { %v1056_v20 = vmul.f32 %v11712_v31, %v12036_v12  ;;  %v2188_v1 = vmul.f32 %v11963_v61, %v2149_v57  ;;  %v1618_v48 = vadd.f32 %v1586_v62, %v1485_v8  ;;  %v1188_v3 = vmul.f32 %v11717_v32, %v11820_v5  ;;  %966 = vst [vmem:[#allocation2 + $0x210] sm:$0xff] %v933_v35  ;;  %v14987_v35 = vld [vmem:[#allocation22_spill] sm:$0xff] }
 0x101   : > { %v1189_v11 = vmul.f32 %v11717_v32, %v11864_v37  ;;  %v2226_v24 = vadd.f32 %v11974_v10, %v2187_v34  ;;  %v1750_v40 = vadd.f32 %v1718_v15, %v1617_v6  ;;  %v1321_v12 = vmul.f32 %v11733_v41, %v12044_v16  ;;  %9075 = vmatprep.subr.bf16.mxu0 %v10558_v36 }
 0x102   : > { %v1322_v43 = vmul.f32 %v11733_v41, %v12056_v26  ;;  %v2227_v5 = vadd.f32 %v11974_v10, %v2188_v1  ;;  %v1751_v62 = vadd.f32 %v1719_v42, %v1618_v48  ;;  %v1220_v19 = vadd.f32 %v1188_v3, %v1055_v7  ;;  %v10561_v26 = vld [vmem:[#allocation10 + $0xa8] sm:$0xff]   ;;  %v12143_v42 = vld [vmem:[#allocation2 + $0xef] sm:$0xff] }
 0x103   : > { %v1221_v37 = vadd.f32 %v1189_v11, %v1056_v20  ;;  %v1884_v51 = vadd.f32 %v1852_v23, %v1750_v40  ;;  %v1454_v52 = vmul.f32 %v11744_v46, %v12090_v56  ;;  %v1455_v15 = vmul.f32 %v11744_v46, %v12099_v21  ;;  %9076 = vmatpush3.bf16.msra.mxu0 %v10559_v14  ;;  %v10562_v23 = vld [vmem:[#allocation10 + $0xf0] sm:$0xff]   ;;  %v14988_v48 = vld [vmem:[#allocation23_spill] sm:$0xff]  ;;  %v12159_v11 = vld [vmem:[#allocation2 + $0xe9] sm:$0xff]  ;;  %s13285_s1 = scalar_lea.vmem %s15026_s18, %s8929_s22  ;;  %s15074_s18 = sld [smem:[#allocation83_spill]] }
 0x104   : > { %v1587_v16 = vmul.f32 %v11749_v47, %v11877_v44  ;;  %v2255_v50 = vpack.c.bf16 %v2227_v5, %v2226_v24  ;;  %v1885_v28 = vadd.f32 %v1853_v27, %v1751_v62  ;;  %v1353_v63 = vadd.f32 %v1321_v12, %v1220_v19  ;;  %9077 = vmatprep.subr.bf16.mxu0 %v10560_v4  ;;  %v12161_v14 = vld [vmem:[#allocation2 + $0xf1] sm:$0xff]  ;;  %s15077_s22 = sld [smem:[#allocation84_spill]] }
 0x105   : > { %v1354_v13 = vadd.f32 %v1322_v43, %v1221_v37  ;;  %v2017_v36 = vadd.f32 %v1985_v25, %v1884_v51  ;;  %v1588_v57 = vmul.f32 %v11749_v47, %v11880_v45  ;;  %v1720_v8 = vmul.f32 %v11764_v53, %v12109_v0  ;;  %v10564_v43 = vld [vmem:[#allocation10 + $0xf8] sm:$0xff]  }
 0x106   : > { %v1721_v34 = vmul.f32 %v11764_v53, %v12111_v49  ;;  %10132 = vmatmul.mubr.bf16.gmra.mrb[4].mxu0 %v2255_v50  ;;  %v2018_v6 = vadd.f32 %v1986_v2, %v1885_v28  ;;  %v1486_v27 = vadd.f32 %v1454_v52, %v1353_v63  ;;  %v1854_v20 = vmul.f32 %v11769_v54, %v12141_v22  ;;  %v10563_v2 = vld [vmem:[#allocation10 + $0xb0] sm:$0xff]  }
 0x107   : > { %v1487_v7 = vadd.f32 %v1455_v15, %v1354_v13  ;;  %v2150_v29 = vadd.f32 %v2118_v39, %v2017_v36  ;;  %v1855_v25 = vmul.f32 %v11769_v54, %v12143_v42  ;;  %v1987_v1 = vmul.f32 %v11774_v55, %v14987_v35  ;;  %9078 = vmatpush3.bf16.msra.mxu0 %v10561_v26 }
 0x108   : > { %v1988_v3 = vmul.f32 %v11774_v55, %v14988_v48  ;;  %v2151_v24 = vadd.f32 %v2119_v9, %v2018_v6  ;;  %v1619_v40 = vadd.f32 %v1587_v16, %v1486_v27  ;;  %v2120_v39 = vmul.f32 %v11787_v58, %v12159_v11  ;;  %9079 = vmatprep.subr.bf16.mxu0 %v10562_v23  ;;  %v12189_v23 = vld [vmem:[#allocation2 + $0x107] sm:$0xff] }
 0x109   : > { %v1620_v12 = vadd.f32 %v1588_v57, %v1487_v7  ;;  %v2189_v4 = vmul.f32 %v11963_v61, %v2150_v29  ;;  %v2121_v5 = vmul.f32 %v11787_v58, %v12161_v14  ;;  %v1010_v62 = vpack.c.bf16 %v11852_v18, %v11850_v17 }
 0x10a   : > { %v1057_v19 = vmul.f32 %v11712_v31, %v12090_v56  ;;  %v2190_v9 = vmul.f32 %v11963_v61, %v2151_v24  ;;  %v1752_v37 = vadd.f32 %v1720_v8, %v1619_v40  ;;  %v1058_v52 = vmul.f32 %v11712_v31, %v12099_v21  ;;  %v10565_v56 = vld [vmem:[#allocation10 + $0xb8] sm:$0xff]  }
 0x10b   : > { %v1753_v51 = vadd.f32 %v1721_v34, %v1620_v12  ;;  %v2228_v15 = vadd.f32 %v11974_v10, %v2189_v4  ;;  %3262 = vmatmul.mubr.bf16.gmra.mrb[8].mxu1 %v1010_v62  ;;  %v1190_v16 = vmul.f32 %v11717_v32, %v11877_v44  ;;  %v1191_v17 = vmul.f32 %v11717_v32, %v11880_v45  ;;  %v12193_v34 = vld [vmem:[#allocation2 + $0x10f] sm:$0xff] }
 0x10c   : > { %v1323_v18 = vmul.f32 %v11733_v41, %v12109_v0  ;;  %v2229_v26 = vadd.f32 %v11974_v10, %v2190_v9  ;;  %v1886_v50 = vadd.f32 %v1854_v20, %v1752_v37  ;;  %v1324_v21 = vmul.f32 %v11733_v41, %v12111_v49  ;;  %9080 = vmatpush3.bf16.msra.mxu0 %v10563_v2  ;;  %v12199_v20 = vld [vmem:[#allocation2 + $0x109] sm:$0xff]  ;;  %v12205_v2 = vld [vmem:[#allocation2 + $0x111] sm:$0xff] }
 0x10d   : > { %v1887_v28 = vadd.f32 %v1855_v25, %v1753_v51  ;;  %v1222_v63 = vadd.f32 %v1190_v16, %v1057_v19  ;;  %v1223_v13 = vadd.f32 %v1191_v17, %v1058_v52  ;;  %v1456_v44 = vmul.f32 %v11744_v46, %v12141_v22  ;;  %9081 = vmatprep.subr.bf16.mxu0 %v10564_v43  ;;  %v14989_v43 = vld [vmem:[#allocation24_spill] sm:$0xff]  ;;  %v14990_v62 = vld [vmem:[#allocation25_spill] sm:$0xff] }
 0x10e   : > { %v1457_v45 = vmul.f32 %v11744_v46, %v12143_v42  ;;  %v2256_v0 = vpack.c.bf16 %v2229_v26, %v2228_v15  ;;  %v2019_v36 = vadd.f32 %v1987_v1, %v1886_v50  ;;  %v1589_v8 = vmul.f32 %v11749_v47, %v14987_v35 }
 0x10f   : > { %v2020_v57 = vadd.f32 %v1988_v3, %v1887_v28  ;;  %v1355_v49 = vadd.f32 %v1323_v18, %v1222_v63  ;;  %v1356_v6 = vadd.f32 %v1324_v21, %v1223_v13  ;;  %v1590_v27 = vmul.f32 %v11749_v47, %v14988_v48 }
 0x110   : > { %v1722_v7 = vmul.f32 %v11764_v53, %v12159_v11  ;;  %10135 = vmatprep.mubr.bf16.mxu0 %v2256_v0  ;;  %v2152_v29 = vadd.f32 %v2120_v39, %v2019_v36  ;;  %v1723_v1 = vmul.f32 %v11764_v53, %v12161_v14  ;;  %v1856_v3 = vmul.f32 %v11769_v54, %v12189_v23 }
 0x111   : > { %v2153_v25 = vadd.f32 %v2121_v5, %v2020_v57  ;;  %v1488_v24 = vadd.f32 %v1456_v44, %v1355_v49  ;;  %v1489_v40 = vadd.f32 %v1457_v45, %v1356_v6  ;;  %v1857_v12 = vmul.f32 %v11769_v54, %v12193_v34  ;;  %9082 = vmatpush3.bf16.msra.mxu0 %v10565_v56  ;;  %v12237_v44 = vld [vmem:[#allocation2 + $0x127] sm:$0xff]  ;;  %v14991_v6 = vld [vmem:[#allocation26_spill] sm:$0xff] }
 0x112   : > { %v1989_v4 = vmul.f32 %v11774_v55, %v14989_v43  ;;  %v2191_v39 = vmul.f32 %v11963_v61, %v2152_v29  ;;  %v1990_v19 = vmul.f32 %v11774_v55, %v14990_v62  ;;  %v2122_v9 = vmul.f32 %v11787_v58, %v12199_v20  ;;  %v12249_v57 = vld [vmem:[#allocation2 + $0x129] sm:$0xff] }
 0x113   : > { %v2192_v5 = vmul.f32 %v11963_v61, %v2153_v25  ;;  %v1621_v37 = vadd.f32 %v1589_v8, %v1488_v24  ;;  %v1622_v51 = vadd.f32 %v1590_v27, %v1489_v40  ;;  %v2123_v52 = vmul.f32 %v11787_v58, %v12205_v2  ;;  %v12251_v8 = vld [vmem:[#allocation2 + $0x131] sm:$0xff]  ;;  %v12271_v40 = vld [vmem:[%s14976_s28 + $0x8] ss:$0 sm:$0xff] }
 0x114   : > { %v1144_v15 = vpack.c.bf16 %v11793_v60, %v11790_v59  ;;  %v2230_v16 = vadd.f32 %v11974_v10, %v2191_v39  ;;  %v1059_v18 = vmul.f32 %v11712_v31, %v12141_v22  ;;  %v1060_v56 = vmul.f32 %v11712_v31, %v12143_v42  ;;  %v14992_v24 = vld [vmem:[#allocation27_spill] sm:$0xff] }
 0x115   : > { %v2231_v17 = vadd.f32 %v11974_v10, %v2192_v5  ;;  %v1754_v26 = vadd.f32 %v1722_v7, %v1621_v37  ;;  %v1755_v50 = vadd.f32 %v1723_v1, %v1622_v51  ;;  %v1192_v28 = vmul.f32 %v11717_v32, %v14987_v35  ;;  %v12239_v35 = vld [vmem:[#allocation2 + $0x12f] sm:$0xff] }
 0x116   : > { %3269 = vmatprep.mubr.bf16.mxu1 %v1144_v15  ;;  %v1193_v58 = vmul.f32 %v11717_v32, %v14988_v48  ;;  %v1325_v60 = vmul.f32 %v11733_v41, %v12159_v11  ;;  %v1326_v21 = vmul.f32 %v11733_v41, %v12161_v14  ;;  %v1458_v22 = vmul.f32 %v11744_v46, %v12189_v23  ;;  %v10566_v15 = vld [vmem:[#allocation10 + $0x140] sm:$0xff]  }
 0x117   : > { %v2257_v59 = vpack.c.bf16 %v2231_v17, %v2230_v16  ;;  %v1888_v31 = vadd.f32 %v1856_v3, %v1754_v26  ;;  %v1889_v42 = vadd.f32 %v1857_v12, %v1755_v50  ;;  %v1224_v63 = vadd.f32 %v1192_v28, %v1059_v18  ;;  %v12264_v3 = vld [vmem:[%s14976_s28 + $0x7] ss:$0 sm:$0xff]  ;;  %v12304_v26 = vld [vmem:[%s14976_s28 + $0x2] ss:$0 sm:$0xff]  ;;  %9179 = vmatprep.subr.bf16.mxu1 %v10566_v15 }
 0x118   : > { %v1225_v13 = vadd.f32 %v1193_v58, %v1060_v56  ;;  %v1459_v32 = vmul.f32 %v11744_v46, %v12193_v34  ;;  %v1591_v48 = vmul.f32 %v11749_v47, %v14989_v43  ;;  %v1592_v41 = vmul.f32 %v11749_v47, %v14990_v62 }
 0x119   : > { %10136 = vmatmul.mubr.bf16.gmra.mrb[8].mxu0 %v2257_v59  ;;  %v1724_v11 = vmul.f32 %v11764_v53, %v12199_v20  ;;  %v2021_v14 = vadd.f32 %v1989_v4, %v1888_v31  ;;  %v2022_v45 = vadd.f32 %v1990_v19, %v1889_v42  ;;  %v1357_v0 = vadd.f32 %v1325_v60, %v1224_v63  ;;  %v12313_v59 = vld [vmem:[%s14976_s28 + $0x3] ss:$0 sm:$0xff]  ;;  %v12328_v63 = vld [vmem:[#allocation2 + $0x14f] sm:$0xff] }
 0x11a   : > { %v1358_v36 = vadd.f32 %v1326_v21, %v1225_v13  ;;  %v1725_v46 = vmul.f32 %v11764_v53, %v12205_v2  ;;  %v1858_v49 = vmul.f32 %v11769_v54, %v12237_v44  ;;  %v1859_v47 = vmul.f32 %v11769_v54, %v12239_v35  ;;  %v12317_v21 = vld [vmem:[#allocation2 + $0x147] sm:$0xff] }
 0x11b   : > { %v1991_v27 = vmul.f32 %v11774_v55, %v14991_v6  ;;  %v2154_v7 = vadd.f32 %v2122_v9, %v2021_v14  ;;  %v2155_v29 = vadd.f32 %v2123_v52, %v2022_v45  ;;  %v1490_v25 = vadd.f32 %v1458_v22, %v1357_v0  ;;  %v12284_v9 = vld [vmem:[%s14976_s28] ss:$0 sm:$0xff]  ;;  %v12339_v14 = vld [vmem:[#allocation2 + $0x149] sm:$0xff] }
 0x11c   : > { %v1491_v1 = vadd.f32 %v1459_v32, %v1358_v36  ;;  %v1992_v53 = vmul.f32 %v12264_v3, %v14992_v24  ;;  %v2124_v54 = vmul.f32 %v12271_v40, %v12249_v57  ;;  %v2125_v55 = vmul.f32 %v12271_v40, %v12251_v8 }
 0x11d   : > { %v1011_v12 = vpack.c.bf16 %v11925_v38, %v11923_v33  ;;  %v2193_v4 = vmul.f32 %v11963_v61, %v2154_v7  ;;  %v2194_v39 = vmul.f32 %v11963_v61, %v2155_v29  ;;  %v1623_v5 = vadd.f32 %v1591_v48, %v1490_v25  ;;  %v12293_v33 = vld [vmem:[%s14976_s28 + $0x1] ss:$0 sm:$0xff] }
 0x11e   : > { %v1624_v19 = vadd.f32 %v1592_v41, %v1491_v1  ;;  %v1061_v37 = vmul.f32 %v12284_v9, %v12189_v23  ;;  %v1062_v51 = vmul.f32 %v12284_v9, %v12193_v34  ;;  %v1194_v38 = vmul.f32 %v12293_v33, %v14989_v43  ;;  %v12335_v41 = vld [vmem:[%s14976_s28 + $0x5] ss:$0 sm:$0xff] }
 0x11f   : > { %3270 = vmatmul.mubr.bf16.gmra.mrb[12].mxu1 %v1011_v12  ;;  %v1195_v52 = vmul.f32 %v12293_v33, %v14990_v62  ;;  %v2232_v16 = vadd.f32 %v11974_v10, %v2193_v4  ;;  %v2233_v17 = vadd.f32 %v11974_v10, %v2194_v39  ;;  %v1756_v23 = vadd.f32 %v1724_v11, %v1623_v5  ;;  %v14993_v25 = vld [vmem:[#allocation28_spill] sm:$0xff] }
 0x120   : > { %v1757_v18 = vadd.f32 %v1725_v46, %v1624_v19  ;;  %v1226_v56 = vadd.f32 %v1194_v38, %v1061_v37  ;;  %v1327_v43 = vmul.f32 %v12304_v26, %v12199_v20  ;;  %v1328_v62 = vmul.f32 %v12304_v26, %v12205_v2  ;;  %v12324_v2 = vld [vmem:[%s14976_s28 + $0x4] ss:$0 sm:$0xff]  ;;  %v12346_v46 = vld [vmem:[%s14976_s28 + $0x6] ss:$0 sm:$0xff]  ;;  %v10921_v37 = vld [vmem:[#allocation2 + $0x88] sm:$0xff] }
 0x121   : > { %v1227_v34 = vadd.f32 %v1195_v52, %v1062_v51  ;;  %v2258_v50 = vpack.c.bf16 %v2233_v17, %v2232_v16  ;;  %v1890_v28 = vadd.f32 %v1858_v49, %v1756_v23  ;;  %v1460_v60 = vmul.f32 %v12313_v59, %v12237_v44  ;;  %v10922_v51 = vld [vmem:[#allocation2 + $0x90] sm:$0xff] }
 0x122   : > { %v1891_v58 = vadd.f32 %v1859_v47, %v1757_v18  ;;  %v1359_v22 = vadd.f32 %v1327_v43, %v1226_v56  ;;  %v1461_v20 = vmul.f32 %v12313_v59, %v12239_v35  ;;  %v1593_v42 = vmul.f32 %v12324_v2, %v14991_v6  ;;  %v12350_v47 = vld [vmem:[#allocation2 + $0x151] sm:$0xff] }
 0x123   : > { %v1360_v31 = vadd.f32 %v1328_v62, %v1227_v34  ;;  %10139 = vmatprep.mubr.bf16.mxu0 %v2258_v50  ;;  %v2023_v13 = vadd.f32 %v1991_v27, %v1890_v28  ;;  %v1594_v48 = vmul.f32 %v12324_v2, %v14992_v24  ;;  %v1726_v11 = vmul.f32 %v12335_v41, %v12249_v57  ;;  %v10567_v6 = vld [vmem:[#allocation10 + $0x100] sm:$0xff]   ;;  %v10568_v24 = vld [vmem:[#allocation10 + $0x148] sm:$0xff]  }
 0x124   : > { %v2024_v32 = vadd.f32 %v1992_v53, %v1891_v58  ;;  %v1492_v45 = vadd.f32 %v1460_v60, %v1359_v22  ;;  %v1727_v36 = vmul.f32 %v12335_v41, %v12251_v8  ;;  %v1860_v49 = vmul.f32 %v12346_v46, %v12317_v21  ;;  %v10569_v53 = vld [vmem:[#allocation10 + $0x108] sm:$0xff]   ;;  %9180 = vmatpush3.bf16.msra.mxu1 %v10567_v6  ;;  %v10924_v56 = vld [vmem:[#allocation2 + $0x130] sm:$0xff]  ;;  %v12378_v60 = vld [vmem:[#allocation2 + $0x167] sm:$0xff] }
 0x125   : > { %v1493_v0 = vadd.f32 %v1461_v20, %v1360_v31  ;;  %v2156_v27 = vadd.f32 %v2124_v54, %v2023_v13  ;;  %v1861_v29 = vmul.f32 %v12346_v46, %v12328_v63  ;;  %v1993_v1 = vmul.f32 %v12264_v3, %v14993_v25  ;;  %9181 = vmatprep.subr.bf16.mxu1 %v10568_v24  ;;  %v10570_v22 = vld [vmem:[#allocation10 + $0x150] sm:$0xff]   ;;  %v10925_v13 = vld [vmem:[#allocation2 + $0x148] sm:$0xff] }
 0x126   : > { %v2157_v7 = vadd.f32 %v2125_v55, %v2024_v32  ;;  %v1625_v12 = vadd.f32 %v1593_v42, %v1492_v45  ;;  %v1994_v39 = vmul.f32 %v12264_v3, %v11947_v30  ;;  %v2126_v5 = vmul.f32 %v12271_v40, %v12339_v14  ;;  %v12383_v32 = vld [vmem:[#allocation2 + $0x16f] sm:$0xff] }
 0x127   : > { %v1626_v4 = vadd.f32 %v1594_v48, %v1493_v0  ;;  %v2195_v54 = vmul.f32 %v11963_v61, %v2156_v27  ;;  %v2127_v19 = vmul.f32 %v12271_v40, %v12350_v47  ;;  %v1145_v38 = vpack.c.bf16 %v10922_v51, %v10921_v37  ;;  %v10926_v45 = vld [vmem:[#allocation2 + $0x150] sm:$0xff]  ;;  %v10572_v6 = vld [vmem:[#allocation10 + $0x158] sm:$0xff]  }
 0x128   : > { %v2196_v55 = vmul.f32 %v11963_v61, %v2157_v7  ;;  %v1758_v52 = vadd.f32 %v1726_v11, %v1625_v12  ;;  %v1063_v30 = vmul.f32 %v12284_v9, %v12237_v44  ;;  %v1064_v16 = vmul.f32 %v12284_v9, %v12239_v35  ;;  %v10923_v61 = vld [vmem:[#allocation2 + $0x128] sm:$0xff]  ;;  %9182 = vmatpush3.bf16.msra.mxu1 %v10569_v53  ;;  %v12409_v37 = vld [vmem:[#allocation2 + $0x170] sm:$0xff] }
 0x129   : > { %v1759_v15 = vadd.f32 %v1727_v36, %v1626_v4  ;;  %v2234_v17 = vadd.f32 %v11974_v10, %v2195_v54  ;;  %3277 = vmatprep.mubr.bf16.mxu1 %v1145_v38  ;;  %v1196_v18 = vmul.f32 %v10923_v61, %v12293_v33  ;;  %v1197_v34 = vmul.f32 %v10924_v56, %v12293_v33  ;;  %v10573_v24 = vld [vmem:[#allocation10 + $0x118] sm:$0xff]   ;;  %v12405_v54 = vld [vmem:[%s14984_s0] ss:$0 sm:$0xff] }
 0x12a   : > { %v2235_v23 = vadd.f32 %v11974_v10, %v2196_v55  ;;  %v1892_v43 = vadd.f32 %v1860_v49, %v1758_v52  ;;  %v1329_v50 = vmul.f32 %v12304_v26, %v12249_v57  ;;  %v1330_v44 = vmul.f32 %v12304_v26, %v12251_v8  ;;  %v10571_v8 = vld [vmem:[#allocation10 + $0x110] sm:$0xff]   ;;  %v12388_v49 = vld [vmem:[#allocation2 + $0x169] sm:$0xff]  ;;  %9183 = vmatprep.subr.bf16.mxu1 %v10570_v22 }
 0x12b   : > { %v1893_v62 = vadd.f32 %v1861_v29, %v1759_v15  ;;  %v1228_v28 = vadd.f32 %v1196_v18, %v1063_v30  ;;  %v1229_v58 = vadd.f32 %v1197_v34, %v1064_v16  ;;  %v1462_v10 = vmul.f32 %v12313_v59, %v12317_v21  ;;  %v10930_v16 = vld [vmem:[#allocation2 + $0x87] sm:$0xff]  ;;  %v12422_v61 = vld [vmem:[%s14985_s5] ss:$0 sm:$0xff] }
 0x12c   : > { %v2259_v35 = vpack.c.bf16 %v2235_v23, %v2234_v17  ;;  %v2025_v31 = vadd.f32 %v1993_v1, %v1892_v43  ;;  %v1463_v42 = vmul.f32 %v12313_v59, %v12328_v63  ;;  %v1595_v57 = vmul.f32 %v10925_v13, %v12324_v2  ;;  %v12394_v1 = vld [vmem:[#allocation2 + $0x171] sm:$0xff]  ;;  %9184 = vmatpush3.bf16.msra.mxu1 %v10571_v8 }
 0x12d   : > { %v2026_v20 = vadd.f32 %v1994_v39, %v1893_v62  ;;  %v1361_v48 = vadd.f32 %v1329_v50, %v1228_v28  ;;  %v1362_v11 = vadd.f32 %v1330_v44, %v1229_v58  ;;  %v1596_v0 = vmul.f32 %v10926_v45, %v12324_v2  ;;  %v12398_v39 = vld [vmem:[#allocation2 + $0x168] sm:$0xff]  ;;  %9185 = vmatprep.subr.bf16.mxu1 %v10572_v6  ;;  %v10574_v28 = vld [vmem:[#allocation10 + $0x160] sm:$0xff]  }
 0x12e   : > { %10140 = vmatmul.mubr.bf16.gmra.mrb[12].mxu0 %v2259_v35  ;;  %v1728_v36 = vmul.f32 %v12335_v41, %v12339_v14  ;;  %v2158_v27 = vadd.f32 %v2126_v5, %v2025_v31  ;;  %v1729_v29 = vmul.f32 %v12335_v41, %v12350_v47  ;;  %v1862_v25 = vmul.f32 %v12346_v46, %v12378_v60  ;;  %v10931_v17 = vld [vmem:[#allocation2 + $0x8f] sm:$0xff] }
 0x12f   : > { %v2159_v7 = vadd.f32 %v2127_v19, %v2026_v20  ;;  %v1494_v53 = vadd.f32 %v1462_v10, %v1361_v48  ;;  %v1495_v12 = vadd.f32 %v1463_v42, %v1362_v11  ;;  %v1863_v4 = vmul.f32 %v12346_v46, %v12383_v32  ;;  %v12441_v8 = vld [vmem:[#allocation2 + $0x18f] sm:$0xff]  ;;  %v10576_v48 = vld [vmem:[#allocation10 + $0x168] sm:$0xff]  }
 0x130   : > { %v1995_v5 = vmul.f32 %v12398_v39, %v12264_v3  ;;  %v2197_v55 = vmul.f32 %v12405_v54, %v2158_v27  ;;  %v1996_v51 = vmul.f32 %v12409_v37, %v12264_v3  ;;  %v2128_v38 = vmul.f32 %v12271_v40, %v12388_v49  ;;  %9186 = vmatpush3.bf16.msra.mxu1 %v10573_v24 }
 0x131   : > { %v2198_v19 = vmul.f32 %v12405_v54, %v2159_v7  ;;  %v1627_v52 = vadd.f32 %v1595_v57, %v1494_v53  ;;  %v1628_v15 = vadd.f32 %v1596_v0, %v1495_v12  ;;  %v2129_v30 = vmul.f32 %v12271_v40, %v12394_v1  ;;  %9187 = vmatprep.subr.bf16.mxu1 %v10574_v28  ;;  %v12451_v7 = vld [vmem:[#allocation2 + $0x189] sm:$0xff] }
 0x132   : > { %v12417_v23 = vpack.c.bf16 %v10931_v17, %v10930_v16  ;;  %v2236_v18 = vadd.f32 %v12422_v61, %v2197_v55  ;;  %v1065_v34 = vmul.f32 %v12284_v9, %v12317_v21  ;;  %v1066_v43 = vmul.f32 %v12284_v9, %v12328_v63  ;;  %v10575_v63 = vld [vmem:[#allocation10 + $0x120] sm:$0xff]  }
 0x133   : > { %v2237_v56 = vadd.f32 %v12422_v61, %v2198_v19  ;;  %v1760_v62 = vadd.f32 %v1728_v36, %v1627_v52  ;;  %v1761_v50 = vadd.f32 %v1729_v29, %v1628_v15  ;;  %v1198_v44 = vmul.f32 %v10925_v13, %v12293_v33  ;;  %v12439_v13 = vld [vmem:[#allocation2 + $0x187] sm:$0xff]  ;;  %v12453_v29 = vld [vmem:[#allocation2 + $0x191] sm:$0xff] }
 0x134   : > { %3278 = vmatmul.mubr.bf16.gmra.mrb[16].mxu1 %v12417_v23  ;;  %v1199_v35 = vmul.f32 %v10926_v45, %v12293_v33  ;;  %v1331_v10 = vmul.f32 %v12304_v26, %v12339_v14  ;;  %v1332_v22 = vmul.f32 %v12304_v26, %v12350_v47  ;;  %v1464_v21 = vmul.f32 %v12313_v59, %v12378_v60  ;;  %v12465_v15 = vld [vmem:[#allocation2 + $0x190] sm:$0xff] }
 0x135   : > { %v2260_v58 = vpack.c.bf16 %v2237_v56, %v2236_v18  ;;  %v1894_v31 = vadd.f32 %v1862_v25, %v1760_v62  ;;  %v1895_v20 = vadd.f32 %v1863_v4, %v1761_v50  ;;  %v1230_v42 = vadd.f32 %v1198_v44, %v1065_v34  ;;  %v10577_v25 = vld [vmem:[#allocation10 + $0x128] sm:$0xff]   ;;  %v12461_v4 = vld [vmem:[#allocation2 + $0x188] sm:$0xff]  ;;  %9188 = vmatpush3.bf16.msra.mxu1 %v10575_v63  ;;  %v10936_v34 = vld [vmem:[#allocation2 + $0xb0] sm:$0xff] }
 0x136   : > { %v1231_v57 = vadd.f32 %v1199_v35, %v1066_v43  ;;  %v1465_v14 = vmul.f32 %v12313_v59, %v12383_v32  ;;  %v1597_v47 = vmul.f32 %v12398_v39, %v12324_v2  ;;  %v1598_v11 = vmul.f32 %v12409_v37, %v12324_v2  ;;  %9189 = vmatprep.subr.bf16.mxu1 %v10576_v48  ;;  %v10935_v56 = vld [vmem:[#allocation2 + $0xa8] sm:$0xff]  ;;  %v10578_v44 = vld [vmem:[#allocation10 + $0x170] sm:$0xff]  }
 0x137   : > { %10143 = vmatprep.mubr.bf16.mxu0 %v2260_v58  ;;  %v1730_v45 = vmul.f32 %v12335_v41, %v12388_v49  ;;  %v2027_v0 = vadd.f32 %v1995_v5, %v1894_v31  ;;  %v2028_v36 = vadd.f32 %v1996_v51, %v1895_v20  ;;  %v1363_v6 = vadd.f32 %v1331_v10, %v1230_v42  ;;  %v10579_v20 = vld [vmem:[#allocation10 + $0x130] sm:$0xff]   ;;  %v10580_v42 = vld [vmem:[#allocation10 + $0x178] sm:$0xff]  }
 0x138   : > { %v1364_v27 = vadd.f32 %v1332_v22, %v1231_v57  ;;  %v1731_v24 = vmul.f32 %v12335_v41, %v12394_v1  ;;  %v1864_v53 = vmul.f32 %v12346_v46, %v12439_v13  ;;  %v1865_v12 = vmul.f32 %v12346_v46, %v12441_v8 }
 0x139   : > { %v1997_v5 = vmul.f32 %v12461_v4, %v12264_v3  ;;  %v2160_v55 = vadd.f32 %v2128_v38, %v2027_v0  ;;  %v2161_v19 = vadd.f32 %v2129_v30, %v2028_v36  ;;  %v1496_v51 = vadd.f32 %v1464_v21, %v1363_v6  ;;  %9190 = vmatpush3.bf16.msra.mxu1 %v10577_v25  ;;  %v12497_v6 = vld [vmem:[#allocation2 + $0x1af] sm:$0xff] }
 0x13a   : > { %v1497_v52 = vadd.f32 %v1465_v14, %v1364_v27  ;;  %v1998_v16 = vmul.f32 %v12465_v15, %v12264_v3  ;;  %v2130_v17 = vmul.f32 %v12271_v40, %v12451_v7  ;;  %v2131_v18 = vmul.f32 %v12271_v40, %v12453_v29  ;;  %9191 = vmatprep.subr.bf16.mxu1 %v10578_v44 }
 0x13b   : > { %v1146_v43 = vpack.c.bf16 %v10936_v34, %v10935_v56  ;;  %v2199_v38 = vmul.f32 %v12405_v54, %v2160_v55  ;;  %v2200_v30 = vmul.f32 %v12405_v54, %v2161_v19  ;;  %v1629_v62 = vadd.f32 %v1597_v47, %v1496_v51  ;;  %v12509_v56 = vld [vmem:[#allocation2 + $0x1b1] sm:$0xff] }
 0x13c   : > { %v1630_v50 = vadd.f32 %v1598_v11, %v1497_v52  ;;  %v1067_v35 = vmul.f32 %v12284_v9, %v12378_v60  ;;  %v1068_v28 = vmul.f32 %v12284_v9, %v12383_v32  ;;  %v1200_v58 = vmul.f32 %v12398_v39, %v12293_v33  ;;  %v12491_v11 = vld [vmem:[#allocation2 + $0x1a7] sm:$0xff] }
 0x13d   : > { %3285 = vmatprep.mubr.bf16.mxu1 %v1146_v43  ;;  %v1201_v10 = vmul.f32 %v12409_v37, %v12293_v33  ;;  %v2238_v22 = vadd.f32 %v12422_v61, %v2199_v38  ;;  %v2239_v21 = vadd.f32 %v12422_v61, %v2200_v30  ;;  %v1762_v63 = vadd.f32 %v1730_v45, %v1629_v62  ;;  %v12513_v43 = vld [vmem:[#allocation2 + $0x1a8] sm:$0xff] }
 0x13e   : > { %v1763_v31 = vadd.f32 %v1731_v24, %v1630_v50  ;;  %v1232_v57 = vadd.f32 %v1200_v58, %v1067_v35  ;;  %v1333_v32 = vmul.f32 %v12304_v26, %v12388_v49  ;;  %v1334_v39 = vmul.f32 %v12304_v26, %v12394_v1  ;;  %v10581_v1 = vld [vmem:[#allocation10 + $0x138] sm:$0xff]   ;;  %9192 = vmatpush3.bf16.msra.mxu1 %v10579_v20  ;;  %v12517_v50 = vld [vmem:[#allocation2 + $0x1b0] sm:$0xff] }
 0x13f   : > { %v1233_v60 = vadd.f32 %v1201_v10, %v1068_v28  ;;  %v2261_v48 = vpack.c.bf16 %v2239_v21, %v2238_v22  ;;  %v1896_v37 = vadd.f32 %v1864_v53, %v1762_v63  ;;  %v1466_v47 = vmul.f32 %v12313_v59, %v12439_v13  ;;  %9193 = vmatprep.subr.bf16.mxu1 %v10580_v42  ;;  %v10939_v58 = vld [vmem:[#allocation2 + $0xa7] sm:$0xff]  ;;  %v10940_v10 = vld [vmem:[#allocation2 + $0xaf] sm:$0xff] }
 0x140   : > { %v1897_v14 = vadd.f32 %v1865_v12, %v1763_v31  ;;  %v1365_v45 = vadd.f32 %v1333_v32, %v1232_v57  ;;  %v1467_v36 = vmul.f32 %v12313_v59, %v12441_v8  ;;  %v1599_v49 = vmul.f32 %v12461_v4, %v12324_v2  ;;  %v12503_v12 = vld [vmem:[#allocation2 + $0x1a9] sm:$0xff] }
 0x141   : > { %v1366_v0 = vadd.f32 %v1334_v39, %v1233_v60  ;;  %10144 = vmatmul.mubr.bf16.gmra.mrb[16].mxu0 %v2261_v48  ;;  %v2029_v27 = vadd.f32 %v1997_v5, %v1896_v37  ;;  %v1600_v24 = vmul.f32 %v12465_v15, %v12324_v2  ;;  %v1732_v53 = vmul.f32 %v12335_v41, %v12451_v7 }
 0x142   : > { %v2030_v25 = vadd.f32 %v1998_v16, %v1897_v14  ;;  %v1498_v55 = vadd.f32 %v1466_v47, %v1365_v45  ;;  %v1733_v51 = vmul.f32 %v12335_v41, %v12453_v29  ;;  %v1866_v52 = vmul.f32 %v12346_v46, %v12491_v11  ;;  %9194 = vmatpush3.bf16.msra.mxu1 %v10581_v1 }
 0x143   : > { %v1499_v19 = vadd.f32 %v1467_v36, %v1366_v0  ;;  %v2162_v5 = vadd.f32 %v2130_v17, %v2029_v27  ;;  %v1867_v34 = vmul.f32 %v12346_v46, %v12497_v6  ;;  %v1999_v38 = vmul.f32 %v12513_v43, %v12264_v3 }
 0x144   : > { %v2163_v16 = vadd.f32 %v2131_v18, %v2030_v25  ;;  %v1631_v30 = vadd.f32 %v1599_v49, %v1498_v55  ;;  %v2000_v44 = vmul.f32 %v12517_v50, %v12264_v3  ;;  %v2132_v17 = vmul.f32 %v12271_v40, %v12503_v12  ;;  %v12546_v49 = vld [vmem:[#allocation2 + $0x1c7] sm:$0xff]  ;;  %v12552_v25 = vld [vmem:[#allocation2 + $0x1cf] sm:$0xff] }
 0x145   : > { %v1632_v62 = vadd.f32 %v1600_v24, %v1499_v19  ;;  %v2201_v18 = vmul.f32 %v12405_v54, %v2162_v5  ;;  %v2133_v28 = vmul.f32 %v12271_v40, %v12509_v56  ;;  %v12527_v22 = vpack.c.bf16 %v10940_v10, %v10939_v58  ;;  %v12574_v58 = vld [vmem:[#allocation2 + $0x1d0] sm:$0xff] }
 0x146   : > { %v2202_v35 = vmul.f32 %v12405_v54, %v2163_v16  ;;  %v1764_v21 = vadd.f32 %v1732_v53, %v1631_v30  ;;  %v1069_v31 = vmul.f32 %v12284_v9, %v12439_v13  ;;  %v1070_v20 = vmul.f32 %v12284_v9, %v12441_v8 }
 0x147   : > { %v1765_v63 = vadd.f32 %v1733_v51, %v1632_v62  ;;  %v2240_v42 = vadd.f32 %v12422_v61, %v2201_v18  ;;  %3286 = vmatmul.mubr.bf16.gmra.mrb[20].mxu1 %v12527_v22  ;;  %v1202_v60 = vmul.f32 %v12461_v4, %v12293_v33  ;;  %v1203_v32 = vmul.f32 %v12465_v15, %v12293_v33  ;;  %v12558_v51 = vld [vmem:[#allocation2 + $0x1c9] sm:$0xff] }
 0x148   : > { %v2241_v57 = vadd.f32 %v12422_v61, %v2202_v35  ;;  %v1898_v39 = vadd.f32 %v1866_v52, %v1764_v21  ;;  %v1335_v37 = vmul.f32 %v12304_v26, %v12451_v7  ;;  %v1336_v14 = vmul.f32 %v12304_v26, %v12453_v29  ;;  %v12568_v18 = vld [vmem:[#allocation2 + $0x1c8] sm:$0xff] }
 0x149   : > { %v1899_v48 = vadd.f32 %v1867_v34, %v1765_v63  ;;  %v1234_v45 = vadd.f32 %v1202_v60, %v1069_v31  ;;  %v1235_v0 = vadd.f32 %v1203_v32, %v1070_v20  ;;  %v1468_v36 = vmul.f32 %v12313_v59, %v12491_v11 }
 0x14a   : > { %v2262_v47 = vpack.c.bf16 %v2241_v57, %v2240_v42  ;;  %v2031_v4 = vadd.f32 %v1999_v38, %v1898_v39  ;;  %v1469_v15 = vmul.f32 %v12313_v59, %v12497_v6  ;;  %v1601_v27 = vmul.f32 %v12513_v43, %v12324_v2  ;;  %v12564_v38 = vld [vmem:[#allocation2 + $0x1d1] sm:$0xff]  ;;  %v10943_v42 = vld [vmem:[#allocation2 + $0xc8] sm:$0xff] }
 0x14b   : > { %v2032_v1 = vadd.f32 %v2000_v44, %v1899_v48  ;;  %v1367_v24 = vadd.f32 %v1335_v37, %v1234_v45  ;;  %v1368_v53 = vadd.f32 %v1336_v14, %v1235_v0  ;;  %v1602_v55 = vmul.f32 %v12517_v50, %v12324_v2  ;;  %v10944_v57 = vld [vmem:[#allocation2 + $0xd0] sm:$0xff] }
 0x14c   : > { %10147 = vmatprep.mubr.bf16.mxu0 %v2262_v47  ;;  %v1734_v19 = vmul.f32 %v12335_v41, %v12503_v12  ;;  %v2164_v52 = vadd.f32 %v2132_v17, %v2031_v4  ;;  %v1735_v16 = vmul.f32 %v12335_v41, %v12509_v56  ;;  %v1868_v34 = vmul.f32 %v12346_v46, %v12546_v49 }
 0x14d   : > { %v2165_v5 = vadd.f32 %v2133_v28, %v2032_v1  ;;  %v1500_v30 = vadd.f32 %v1468_v36, %v1367_v24  ;;  %v1501_v62 = vadd.f32 %v1469_v15, %v1368_v53  ;;  %v1869_v44 = vmul.f32 %v12346_v46, %v12552_v25 }
 0x14e   : > { %v2001_v35 = vmul.f32 %v12568_v18, %v12264_v3  ;;  %v2203_v17 = vmul.f32 %v12405_v54, %v2164_v52  ;;  %v2002_v10 = vmul.f32 %v12574_v58, %v12264_v3  ;;  %v2134_v21 = vmul.f32 %v12271_v40, %v12558_v51  ;;  %v12603_v52 = vld [vmem:[#allocation2 + $0x1ef] sm:$0xff] }
 0x14f   : > { %v2204_v28 = vmul.f32 %v12405_v54, %v2165_v5  ;;  %v1633_v63 = vadd.f32 %v1601_v27, %v1500_v30  ;;  %v1634_v31 = vadd.f32 %v1602_v55, %v1501_v62  ;;  %v2135_v20 = vmul.f32 %v12271_v40, %v12564_v38 }
 0x150   : > { %v12582_v60 = vpack.c.bf16 %v10944_v57, %v10943_v42  ;;  %v2242_v32 = vadd.f32 %v12422_v61, %v2203_v17  ;;  %v1071_v48 = vmul.f32 %v12284_v9, %v12491_v11  ;;  %v1072_v37 = vmul.f32 %v12284_v9, %v12497_v6 }
 0x151   : > { %v2243_v39 = vadd.f32 %v12422_v61, %v2204_v28  ;;  %v1766_v14 = vadd.f32 %v1734_v19, %v1633_v63  ;;  %v1767_v47 = vadd.f32 %v1735_v16, %v1634_v31  ;;  %v1204_v45 = vmul.f32 %v12513_v43, %v12293_v33  ;;  %v12601_v19 = vld [vmem:[#allocation2 + $0x1e7] sm:$0xff]  ;;  %v12615_v31 = vld [vmem:[#allocation2 + $0x1f1] sm:$0xff] }
 0x152   : > { %3293 = vmatprep.mubr.bf16.mxu1 %v12582_v60  ;;  %v1205_v0 = vmul.f32 %v12517_v50, %v12293_v33  ;;  %v1337_v4 = vmul.f32 %v12304_v26, %v12503_v12  ;;  %v1338_v1 = vmul.f32 %v12304_v26, %v12509_v56  ;;  %v1470_v15 = vmul.f32 %v12313_v59, %v12546_v49  ;;  %v12613_v63 = vld [vmem:[#allocation2 + $0x1e9] sm:$0xff] }
 0x153   : > { %v2263_v36 = vpack.c.bf16 %v2243_v39, %v2242_v32  ;;  %v1900_v27 = vadd.f32 %v1868_v34, %v1766_v14  ;;  %v1901_v24 = vadd.f32 %v1869_v44, %v1767_v47  ;;  %v1236_v53 = vadd.f32 %v1204_v45, %v1071_v48  ;;  %v12623_v39 = vld [vmem:[#allocation2 + $0x1e8] sm:$0xff]  ;;  %v12627_v47 = vld [vmem:[#allocation2 + $0x1f0] sm:$0xff] }
 0x154   : > { %v1237_v55 = vadd.f32 %v1205_v0, %v1072_v37  ;;  %v1471_v5 = vmul.f32 %v12313_v59, %v12552_v25  ;;  %v1603_v16 = vmul.f32 %v12568_v18, %v12324_v2  ;;  %v1604_v30 = vmul.f32 %v12574_v58, %v12324_v2 }
 0x155   : > { %10148 = vmatmul.mubr.bf16.gmra.mrb[20].mxu0 %v2263_v36  ;;  %v1736_v34 = vmul.f32 %v12335_v41, %v12558_v51  ;;  %v2033_v62 = vadd.f32 %v2001_v35, %v1900_v27  ;;  %v2034_v44 = vadd.f32 %v2002_v10, %v1901_v24  ;;  %v1369_v17 = vadd.f32 %v1337_v4, %v1236_v53  ;;  %v10947_v4 = vld [vmem:[#allocation2 + $0xc7] sm:$0xff] }
 0x156   : > { %v1370_v28 = vadd.f32 %v1338_v1, %v1237_v55  ;;  %v1737_v42 = vmul.f32 %v12335_v41, %v12564_v38  ;;  %v1870_v57 = vmul.f32 %v12346_v46, %v12601_v19  ;;  %v1871_v32 = vmul.f32 %v12346_v46, %v12603_v52  ;;  %v10948_v1 = vld [vmem:[#allocation2 + $0xcf] sm:$0xff] }
 0x157   : > { %v2003_v35 = vmul.f32 %v12623_v39, %v12264_v3  ;;  %v2166_v10 = vadd.f32 %v2134_v21, %v2033_v62  ;;  %v2167_v48 = vadd.f32 %v2135_v20, %v2034_v44  ;;  %v1502_v37 = vadd.f32 %v1470_v15, %v1369_v17 }
 0x158   : > { %v1503_v14 = vadd.f32 %v1471_v5, %v1370_v28  ;;  %v2004_v45 = vmul.f32 %v12627_v47, %v12264_v3  ;;  %v2136_v0 = vmul.f32 %v12271_v40, %v12613_v63  ;;  %v2137_v36 = vmul.f32 %v12271_v40, %v12615_v31 }
 0x159   : > { %v12635_v27 = vpack.c.bf16 %v10948_v1, %v10947_v4  ;;  %v2205_v21 = vmul.f32 %v12405_v54, %v2166_v10  ;;  %v2206_v20 = vmul.f32 %v12405_v54, %v2167_v48  ;;  %v1635_v15 = vadd.f32 %v1603_v16, %v1502_v37 }
 0x15a   : > { %v1636_v24 = vadd.f32 %v1604_v30, %v1503_v14  ;;  %v1073_v3 = vmul.f32 %v12284_v9, %v12546_v49  ;;  %v1074_v53 = vmul.f32 %v12284_v9, %v12552_v25  ;;  %v1206_v40 = vmul.f32 %v12568_v18, %v12293_v33  ;;  %v12656_v14 = vld [vmem:[#allocation2 + $0x207] sm:$0xff] }
 0x15b   : > { %3294 = vmatmul.mubr.bf16.gmra.mrb[24].mxu1 %v12635_v27  ;;  %v1207_v55 = vmul.f32 %v12574_v58, %v12293_v33  ;;  %v2244_v5 = vadd.f32 %v12422_v61, %v2205_v21  ;;  %v2245_v62 = vadd.f32 %v12422_v61, %v2206_v20  ;;  %v1768_v16 = vadd.f32 %v1736_v34, %v1635_v15  ;;  %v12662_v21 = vld [vmem:[#allocation2 + $0x20f] sm:$0xff] }
 0x15c   : > { %v1769_v30 = vadd.f32 %v1737_v42, %v1636_v24  ;;  %v1238_v44 = vadd.f32 %v1206_v40, %v1073_v3  ;;  %v1339_v28 = vmul.f32 %v12304_v26, %v12558_v51  ;;  %v1340_v9 = vmul.f32 %v12304_v26, %v12564_v38  ;;  %v10582_v20 = vld [vmem:[#allocation10 + $0x1c0] sm:$0xff]  }
 0x15d   : > { %v1239_v17 = vadd.f32 %v1207_v55, %v1074_v53  ;;  %v2264_v10 = vpack.c.bf16 %v2245_v62, %v2244_v5  ;;  %v1902_v48 = vadd.f32 %v1870_v57, %v1768_v16  ;;  %v1472_v33 = vmul.f32 %v12313_v59, %v12601_v19  ;;  %v12668_v24 = vld [vmem:[#allocation2 + $0x209] sm:$0xff]  ;;  %v12674_v55 = vld [vmem:[#allocation2 + $0x211] sm:$0xff]  ;;  %9291 = vmatprep.subr.bf16.mxu0 %v10582_v20  ;;  %v12681_v5 = vld [vmem:[%s14976_s28 + $0x7] ss:$0 sm:$0xff] }
 0x15e   : > { %v1903_v37 = vadd.f32 %v1871_v32, %v1769_v30  ;;  %v1371_v4 = vadd.f32 %v1339_v28, %v1238_v44  ;;  %v1473_v34 = vmul.f32 %v12313_v59, %v12603_v52  ;;  %v1605_v42 = vmul.f32 %v12623_v39, %v12324_v2  ;;  %v12683_v62 = vld [vmem:[#allocation2 + $0x208] sm:$0xff]  ;;  %v12687_v44 = vld [vmem:[#allocation2 + $0x210] sm:$0xff] }
 0x15f   : > { %v1372_v1 = vadd.f32 %v1340_v9, %v1239_v17  ;;  %10151 = vmatprep.mubr.bf16.mxu0 %v2264_v10  ;;  %v2035_v26 = vadd.f32 %v2003_v35, %v1902_v48  ;;  %v1606_v32 = vmul.f32 %v12627_v47, %v12324_v2  ;;  %v1738_v15 = vmul.f32 %v12335_v41, %v12613_v63  ;;  %v10953_v10 = vld [vmem:[#allocation2 + $0xe8] sm:$0xff]  ;;  %v10954_v48 = vld [vmem:[#allocation2 + $0xf0] sm:$0xff] }
 0x160   : > { %v2036_v57 = vadd.f32 %v2004_v45, %v1903_v37  ;;  %v1504_v3 = vadd.f32 %v1472_v33, %v1371_v4  ;;  %v1739_v59 = vmul.f32 %v12335_v41, %v12615_v31  ;;  %v1872_v40 = vmul.f32 %v12346_v46, %v12656_v14 }
 0x161   : > { %v1505_v53 = vadd.f32 %v1473_v34, %v1372_v1  ;;  %v2168_v35 = vadd.f32 %v2136_v0, %v2035_v26  ;;  %v1873_v2 = vmul.f32 %v12346_v46, %v12662_v21  ;;  %v2005_v41 = vmul.f32 %v12683_v62, %v12681_v5  ;;  %v12694_v46 = vld [vmem:[%s14976_s28 + $0x8] ss:$0 sm:$0xff]  ;;  %v10955_v1 = vld [vmem:[%s14976_s28] ss:$0 sm:$0xff] }
 0x162   : > { %v2169_v45 = vadd.f32 %v2137_v36, %v2036_v57  ;;  %v1637_v16 = vadd.f32 %v1605_v42, %v1504_v3  ;;  %v2006_v0 = vmul.f32 %v12687_v44, %v12681_v5  ;;  %v2138_v36 = vmul.f32 %v12694_v46, %v12668_v24  ;;  %v10956_v57 = vld [vmem:[%s14976_s28 + $0x1] ss:$0 sm:$0xff] }
 0x163   : > { %v1638_v30 = vadd.f32 %v1606_v32, %v1505_v53  ;;  %v2207_v17 = vmul.f32 %v12405_v54, %v2168_v35  ;;  %v2139_v9 = vmul.f32 %v12694_v46, %v12674_v55  ;;  %v12702_v37 = vpack.c.bf16 %v10954_v48, %v10953_v10  ;;  %v1805_v48 = vld [vmem:[#allocation2 + $0x227] sm:$0xff] }
 0x164   : > { %v2208_v28 = vmul.f32 %v12405_v54, %v2169_v45  ;;  %v1770_v33 = vadd.f32 %v1738_v15, %v1637_v16  ;;  %v1075_v34 = vmul.f32 %v10955_v1, %v12601_v19  ;;  %v1076_v42 = vmul.f32 %v10955_v1, %v12603_v52 }
 0x165   : > { %v1771_v4 = vadd.f32 %v1739_v59, %v1638_v30  ;;  %v2246_v20 = vadd.f32 %v12422_v61, %v2207_v17  ;;  %3301 = vmatprep.mubr.bf16.mxu1 %v12702_v37  ;;  %v1208_v32 = vmul.f32 %v10956_v57, %v12623_v39  ;;  %v1209_v15 = vmul.f32 %v10956_v57, %v12627_v47  ;;  %v10957_v59 = vld [vmem:[%s14976_s28 + $0x2] ss:$0 sm:$0xff] }
 0x166   : > { %v2247_v26 = vadd.f32 %v12422_v61, %v2208_v28  ;;  %v1904_v3 = vadd.f32 %v1872_v40, %v1770_v33  ;;  %v1341_v35 = vmul.f32 %v10957_v59, %v12613_v63  ;;  %v1342_v45 = vmul.f32 %v10957_v59, %v12615_v31  ;;  %v10958_v28 = vld [vmem:[%s14976_s28 + $0x3] ss:$0 sm:$0xff]  ;;  %v1806_v40 = vld [vmem:[#allocation2 + $0x22f] sm:$0xff] }
 0x167   : > { %v1905_v53 = vadd.f32 %v1873_v2, %v1771_v4  ;;  %v1240_v30 = vadd.f32 %v1208_v32, %v1075_v34  ;;  %v1241_v17 = vadd.f32 %v1209_v15, %v1076_v42  ;;  %v1474_v10 = vmul.f32 %v10958_v28, %v12656_v14  ;;  %v10959_v34 = vld [vmem:[%s14976_s28 + $0x4] ss:$0 sm:$0xff] }
 0x168   : > { %v2265_v16 = vpack.c.bf16 %v2247_v26, %v2246_v20  ;;  %v2037_v2 = vadd.f32 %v2005_v41, %v1904_v3  ;;  %v1475_v4 = vmul.f32 %v10958_v28, %v12662_v21  ;;  %v1607_v42 = vmul.f32 %v10959_v34, %v12683_v62  ;;  %v10960_v41 = vld [vmem:[%s14976_s28 + $0x5] ss:$0 sm:$0xff]  ;;  %v12744_v28 = vld [vmem:[#allocation2 + $0x231] sm:$0xff] }
 0x169   : > { %v2038_v33 = vadd.f32 %v2006_v0, %v1905_v53  ;;  %v1373_v1 = vadd.f32 %v1341_v35, %v1240_v30  ;;  %v1374_v57 = vadd.f32 %v1342_v45, %v1241_v17  ;;  %v1608_v20 = vmul.f32 %v10959_v34, %v12687_v44  ;;  %v10961_v45 = vld [vmem:[%s14976_s28 + $0x6] ss:$0 sm:$0xff]  ;;  %v12742_v17 = vld [vmem:[#allocation2 + $0x229] sm:$0xff] }
 0x16a   : > { %10152 = vmatmul.mubr.bf16.gmra.mrb[24].mxu0 %v2265_v16  ;;  %v2170_v26 = vadd.f32 %v2138_v36, %v2037_v2  ;;  %v1740_v0 = vmul.f32 %v10960_v41, %v12668_v24  ;;  %v1741_v3 = vmul.f32 %v10960_v41, %v12674_v55  ;;  %v1874_v36 = vmul.f32 %v10961_v45, %v1805_v48  ;;  %v10963_v2 = vld [vmem:[#allocation2 + $0xef] sm:$0xff] }
 0x16b   : > { %v2171_v32 = vadd.f32 %v2139_v9, %v2038_v33  ;;  %v1506_v15 = vadd.f32 %v1474_v10, %v1373_v1  ;;  %v1507_v59 = vadd.f32 %v1475_v4, %v1374_v57  ;;  %v1875_v9 = vmul.f32 %v10961_v45, %v1806_v40  ;;  %v10962_v10 = vld [vmem:[#allocation2 + $0xe7] sm:$0xff]  ;;  %v10965_v1 = vld [vmem:[#allocation2 + $0x110] sm:$0xff] }
 0x16c   : > { %v2209_v53 = vmul.f32 %v12405_v54, %v2170_v26  ;;  %v12746_v33 = vpack.c.bf16 %v10963_v2, %v10962_v10  ;;  %v10964_v4 = vld [vmem:[#allocation2 + $0x108] sm:$0xff]  ;;  %v10970_v45 = vld [vmem:[#allocation2 + $0x130] sm:$0xff]  ;;  %v12776_v10 = vpack.c.bf16 %v12552_v25, %v12546_v49  ;;  %v12780_v2 = vpack.c.bf16 %v12603_v52, %v12601_v19 }
 0x16d   : > { %v2210_v35 = vmul.f32 %v12405_v54, %v2171_v32  ;;  %v1639_v16 = vadd.f32 %v1607_v42, %v1506_v15  ;;  %v1640_v30 = vadd.f32 %v1608_v20, %v1507_v59  ;;  %v12748_v57 = vpack.c.bf16 %v10965_v1, %v10964_v4  ;;  %v12752_v42 = vld [vmem:[#allocation2] sm:$0xff]  ;;  %v10974_v1 = vld [vmem:[#allocation2 + $0x2f] sm:$0xff] }
 0x16e   : > { %v2248_v54 = vadd.f32 %v12422_v61, %v2209_v53  ;;  %v2007_v20 = vmul.f32 %v12752_v42, %v12681_v5  ;;  %3302 = vmatmul.mubr.bf16.gmra.mrb[28].mxu1 %v12746_v33  ;;  %v2140_v59 = vmul.f32 %v12694_v46, %v12742_v17  ;;  %v10968_v53 = vld [vmem:[#allocation2 + $0x10f] sm:$0xff]  ;;  %v10971_v4 = vld [vmem:[%s14984_s0] ss:$0 sm:$0xff]  ;;  %v10973_v25 = vld [vmem:[#allocation2 + $0x27] sm:$0xff]  ;;  %s8930_s0 = sshll.u32 %s11372_s3, 12 }
 0x16f   : > { %v2249_v34 = vadd.f32 %v12422_v61, %v2210_v35  ;;  %v1772_v48 = vadd.f32 %v1740_v0, %v1639_v16  ;;  %v1773_v40 = vadd.f32 %v1741_v3, %v1640_v30  ;;  %3309 = vmatprep.mubr.bf16.mxu1 %v12748_v57  ;;  %v2141_v61 = vmul.f32 %v12694_v46, %v12744_v28  ;;  %v10967_v3 = vld [vmem:[#allocation2 + $0x107] sm:$0xff] }
 0x170   : > { %v12762_v35 = vpack.c.bf16 %v10968_v53, %v10967_v3  ;;  %v10969_v5 = vld [vmem:[#allocation2 + $0x128] sm:$0xff]  ;;  %v1407_v19 = vpack.c.bf16 %v10974_v1, %v10973_v25  ;;  %v10986_v53 = vld [vmem:[#allocation2 + $0x170] sm:$0xff] }
 0x171   : > { %v2266_v26 = vpack.c.bf16 %v2249_v34, %v2248_v54  ;;  %v1906_v32 = vadd.f32 %v1874_v36, %v1772_v48  ;;  %v1907_v15 = vadd.f32 %v1875_v9, %v1773_v40  ;;  %v12764_v16 = vpack.c.bf16 %v10970_v45, %v10969_v5  ;;  %v10975_v52 = vld [vmem:[#allocation2 + $0x127] sm:$0xff]  ;;  %v10976_v54 = vld [vmem:[#allocation2 + $0x12f] sm:$0xff]  ;;  %v10585_v45 = vld [vmem:[#allocation10 + $0x188] sm:$0xff]  }
 0x172   : > { %v12768_v36 = vpack.c.bf16 %v12441_v8, %v12439_v13  ;;  %v12772_v9 = vpack.c.bf16 %v12497_v6, %v12491_v11  ;;  %v10972_v11 = vld [vmem:[%s14985_s5] ss:$0 sm:$0xff]  ;;  %v12790_v34 = vpack.c.bf16 %v10976_v54, %v10975_v52  ;;  %v12794_v48 = vpack.c.bf16 %v12453_v29, %v12451_v7  ;;  %v10978_v7 = vld [vmem:[#allocation2 + $0x150] sm:$0xff]  ;;  %v10985_v3 = vld [vmem:[#allocation2 + $0x168] sm:$0xff] }
 0x173   : > { %10155 = vmatprep.mubr.bf16.mxu0 %v2266_v26  ;;  %v2039_v41 = vadd.f32 %v2007_v20, %v1906_v32  ;;  %v2040_v0 = vadd.f32 %v2007_v20, %v1907_v15  ;;  %v12798_v40 = vpack.c.bf16 %v12509_v56, %v12503_v12  ;;  %v12802_v26 = vpack.c.bf16 %v12564_v38, %v12558_v51  ;;  %v10583_v12 = vld [vmem:[#allocation10 + $0x180] sm:$0xff]   ;;  %v10991_v1 = vld [vmem:[#allocation2 + $0x167] sm:$0xff] }
 0x174   : > { %v12806_v32 = vpack.c.bf16 %v12662_v21, %v12656_v14  ;;  %v12810_v15 = vpack.c.bf16 %v12615_v31, %v12613_v63  ;;  %v10979_v56 = vld [vmem:[#allocation2 + $0x9] sm:$0xff]  ;;  %v10980_v51 = vld [vmem:[#allocation2 + $0x11] sm:$0xff]  ;;  %v12820_v5 = vpack.c.bf16 %v10986_v53, %v10985_v3 }
 0x175   : > { %v2172_v46 = vadd.f32 %v2140_v59, %v2039_v41  ;;  %v2173_v30 = vadd.f32 %v2141_v61, %v2040_v0  ;;  %v10977_v59 = vld [vmem:[#allocation2 + $0x148] sm:$0xff]  ;;  %v1274_v38 = vpack.c.bf16 %v10980_v51, %v10979_v56  ;;  %v10584_v14 = vld [vmem:[#allocation10 + $0x1c8] sm:$0xff]  }
 0x176   : > { %3310 = vmatmul.mubr.bf16.gmra.mrb[32].mxu1 %v12762_v35  ;;  %v12812_v29 = vpack.c.bf16 %v10978_v7, %v10977_v59  ;;  %v10981_v21 = vld [vmem:[#allocation2 + $0x47] sm:$0xff]  ;;  %v10982_v61 = vld [vmem:[#allocation2 + $0x4f] sm:$0xff] }
 0x177   : > { %v2211_v13 = vmul.f32 %v10971_v4, %v2172_v46  ;;  %v2212_v8 = vmul.f32 %v10971_v4, %v2173_v30  ;;  %3317 = vmatprep.mubr.bf16.mxu1 %v12764_v16  ;;  %v12816_v41 = vpack.c.bf16 %v10982_v61, %v10981_v21  ;;  %v10983_v63 = vld [vmem:[#allocation2 + $0x147] sm:$0xff]  ;;  %v10984_v31 = vld [vmem:[#allocation2 + $0x14f] sm:$0xff]  ;;  %v10592_v21 = vld [vmem:[#allocation10 + $0x1e8] sm:$0xff]   ;;  %v12841_v61 = vpack.c.bf16 %v12517_v50, %v12513_v43 }
 0x178   : > { %v12818_v0 = vpack.c.bf16 %v10984_v31, %v10983_v63  ;;  %v10586_v46 = vld [vmem:[#allocation10 + $0x1d0] sm:$0xff]   ;;  %v10987_v4 = vld [vmem:[#allocation2 + $0x29] sm:$0xff]  ;;  %v10996_v51 = vld [vmem:[#allocation2 + $0x51] sm:$0xff]  ;;  %v12851_v50 = vpack.c.bf16 %v12574_v58, %v12568_v18  ;;  %v12861_v18 = vpack.c.bf16 %v12627_v47, %v12623_v39 }
 0x179   : > { %v2250_v6 = vadd.f32 %v10972_v11, %v2211_v13  ;;  %v2251_v49 = vadd.f32 %v10972_v11, %v2212_v8  ;;  %v10587_v30 = vld [vmem:[#allocation10 + $0x190] sm:$0xff]   ;;  %v10988_v13 = vld [vmem:[#allocation2 + $0x31] sm:$0xff]  ;;  %v10588_v11 = vld [vmem:[#allocation10 + $0x1d8] sm:$0xff]  }
 0x17a   : > { %v12825_v8 = vpack.c.bf16 %v10988_v13, %v10987_v4  ;;  %v10993_v54 = vld [vmem:[#allocation2 + $0x188] sm:$0xff]  ;;  %v10593_v63 = vld [vmem:[#allocation10 + $0x1a8] sm:$0xff]   ;;  %v10594_v31 = vld [vmem:[#allocation10 + $0x1f0] sm:$0xff]  }
 0x17b   : > { %v2267_v20 = vpack.c.bf16 %v2251_v49, %v2250_v6  ;;  %v10989_v6 = vld [vmem:[#allocation2 + $0x67] sm:$0xff]  ;;  %v10990_v49 = vld [vmem:[#allocation2 + $0x6f] sm:$0xff] }
 0x17c   : > { %v12827_v25 = vpack.c.bf16 %v10990_v49, %v10989_v6  ;;  %v10589_v7 = vld [vmem:[#allocation10 + $0x198] sm:$0xff]   ;;  %v10998_v53 = vld [vmem:[#allocation2 + $0x71] sm:$0xff] }
 0x17d   : > { %10156 = vmatmul.mubr.bf16.gmra.mrb[28].mxu0 %v2267_v20  ;;  %v10994_v20 = vld [vmem:[#allocation2 + $0x190] sm:$0xff]  ;;  %v10596_v43 = vld [vmem:[#allocation10 + $0x1f8] sm:$0xff]  }
 0x17e   : > { %3406 = vmatprep.mubr.bf16.mxu0 %v1407_v19  ;;  %3318 = vmatmul.mubr.bf16.gmra.mrb[36].mxu1 %v12790_v34  ;;  %v10992_v19 = vld [vmem:[#allocation2 + $0x16f] sm:$0xff]  ;;  %v12831_v59 = vpack.c.bf16 %v10994_v20, %v10993_v54 }
 0x17f   : > { %3325 = vmatprep.mubr.bf16.mxu1 %v12812_v29  ;;  %v12829_v52 = vpack.c.bf16 %v10992_v19, %v10991_v1  ;;  %v10995_v56 = vld [vmem:[#allocation2 + $0x49] sm:$0xff]  ;;  %v11000_v13 = vld [vmem:[#allocation2 + $0x91] sm:$0xff] }
 0x180   : > { %v10997_v3 = vld [vmem:[#allocation2 + $0x69] sm:$0xff]  ;;  %v11002_v58 = vld [vmem:[#allocation2 + $0xb1] sm:$0xff] }
 0x181   : > { %v10999_v4 = vld [vmem:[#allocation2 + $0x89] sm:$0xff]  ;;  %v11004_v54 = vld [vmem:[#allocation2 + $0xd1] sm:$0xff] }
 0x182   : > { %v11003_v19 = vld [vmem:[#allocation2 + $0xc9] sm:$0xff] }
 0x183   : > { %v12875_v20 = vpack.c.bf16 %v11004_v54, %v11003_v19  ;;  %v10603_v19 = vld [vmem:[#allocation10 + $0x228] sm:$0xff]  }
 0x185   : > { %3407 = vmatmul.mubr.bf16.vlgmr.msra.gmra.mrb[32].mxu0 %v1274_v38  ;;  %v12837_v38 = vpack.c.bf16 %v10996_v51, %v10995_v56  ;;  %v11005_v56 = vld [vmem:[#allocation2 + $0x28] sm:$0xff]  ;;  %v11006_v51 = vld [vmem:[#allocation2 + $0x30] sm:$0xff] }
 0x186   : > { %3414 = vmatprep.mubr.bf16.mxu0 %v12816_v41  ;;  %9292 = vmatpush3.bf16.msra.mxu0 %v10583_v12  ;;  %v10590_v12 = vld [vmem:[#allocation10 + $0x1e0] sm:$0xff]  }
 0x187   : > { %3326 = vmatmul.mubr.bf16.gmra.mrb[40].mxu1 %v12818_v0  ;;  %9293 = vmatprep.subr.bf16.mxu0 %v10584_v14  ;;  %v10591_v14 = vld [vmem:[#allocation10 + $0x1a0] sm:$0xff]  }
 0x188   : > { %3333 = vmatprep.mubr.bf16.mxu1 %v12820_v5 }
 0x18a   : > { %9294 = vmatpush3.bf16.msra.mxu0 %v10585_v45  ;;  %v12847_v45 = vpack.c.bf16 %v10998_v53, %v10997_v3  ;;  %v10600_v3 = vld [vmem:[#allocation10 + $0x210] sm:$0xff]   ;;  %v11009_v53 = vld [vmem:[#allocation2 + $0x48] sm:$0xff] }
 0x18b   : > { %9295 = vmatprep.subr.bf16.mxu0 %v10586_v46  ;;  %v10595_v46 = vld [vmem:[#allocation10 + $0x1b0] sm:$0xff]  }
 0x18d   : > { %3415 = vmatmul.mubr.bf16.gmra.mrb[36].mxu0 %v12825_v8 }
 0x18e   : > { %3422 = vmatprep.mubr.bf16.mxu0 %v12827_v25  ;;  %9296 = vmatpush3.bf16.msra.mxu0 %v10587_v30  ;;  %v10598_v30 = vld [vmem:[#allocation10 + $0x200] sm:$0xff]  }
 0x18f   : > { %3334 = vmatmul.mubr.bf16.gmra.mrb[44].mxu1 %v12829_v52  ;;  %9297 = vmatprep.subr.bf16.mxu0 %v10588_v11  ;;  %v12857_v11 = vpack.c.bf16 %v11000_v13, %v10999_v4  ;;  %v11012_v4 = vld [vmem:[#allocation2 + $0x111] sm:$0xff] }
 0x190   : > { %3341 = vmatprep.mubr.bf16.mxu1 %v12831_v59  ;;  %10159 = vmatprep.subr.bf16.mxu1 %v10598_v30 }
 0x192   : > { %9298 = vmatpush3.bf16.msra.mxu0 %v10589_v7 }
 0x193   : > { %9299 = vmatprep.subr.bf16.mxu0 %v10590_v12 }
 0x195   : > { %3423 = vmatmul.mubr.bf16.gmra.mrb[40].mxu0 %v12837_v38  ;;  %v8971_v49 = vpop.f32.mrb[0].mxu1 }
 0x196   : > { %3430 = vmatprep.mubr.bf16.mxu0 %v12417_v23  ;;  %9300 = vmatpush3.bf16.msra.mxu0 %v10591_v14  ;;  %v10597_v23 = vld [vmem:[#allocation10 + $0x1b8] sm:$0xff]   ;;  %v8972_v39 = vpop.f32.mrb[1].mxu1  ;;  %v1540_v14 = vpack.c.bf16 %v11006_v51, %v11005_v56 }
 0x197   : > { %3342 = vmatmul.mubr.bf16.gmra.mrb[48].mxu1 %v12768_v36  ;;  %9301 = vmatprep.subr.bf16.mxu0 %v10592_v21  ;;  %v12873_v47 = vadd.f32 %v8972_v39, %v8971_v49  ;;  %v8974_v1 = vpop.f32.mrb[2].mxu1  ;;  %v10599_v21 = vld [vmem:[#allocation10 + $0x208] sm:$0xff]   ;;  %v11014_v49 = vld [vmem:[#allocation2 + $0x70] sm:$0xff] }
 0x198   : > { %3349 = vmatprep.mubr.bf16.mxu1 %v12841_v61  ;;  %v8975_v7 = vpop.f32.mrb[3].mxu1  ;;  %v11015_v51 = vld [vmem:[#allocation2 + $0x129] sm:$0xff] }
 0x199   : > { %v12877_v12 = vadd.f32 %v8975_v7, %v8974_v1 }
 0x19a   : > { %9302 = vmatpush3.bf16.msra.mxu0 %v10593_v63  ;;  %v11008_v63 = vld [vmem:[#allocation2 + $0xf1] sm:$0xff] }
 0x19b   : > { %9303 = vmatprep.subr.bf16.mxu0 %v10594_v31 }
 0x19d   : > { %3431 = vmatmul.mubr.bf16.gmra.mrb[44].mxu0 %v12847_v45 }
 0x19e   : > { %3438 = vmatprep.mubr.bf16.mxu0 %v12527_v22  ;;  %9304 = vmatpush3.bf16.msra.mxu0 %v10595_v46  ;;  %v11001_v22 = vld [vmem:[#allocation2 + $0xa9] sm:$0xff] }
 0x19f   : > { %3350 = vmatmul.mubr.bf16.gmra.mrb[52].mxu1 %v12772_v9  ;;  %9305 = vmatprep.subr.bf16.mxu0 %v10596_v43  ;;  %v12867_v6 = vpack.c.bf16 %v11002_v58, %v11001_v22  ;;  %v11010_v46 = vld [vmem:[#allocation2 + $0x50] sm:$0xff]  ;;  %v11013_v58 = vld [vmem:[#allocation2 + $0x68] sm:$0xff] }
 0x1a0   : > { %3357 = vmatprep.mubr.bf16.mxu1 %v12851_v50  ;;  %v12884_v43 = vpack.c.bf16 %v11010_v46, %v11009_v53  ;;  %v10602_v22 = vld [vmem:[#allocation10 + $0x220] sm:$0xff]   ;;  %v12892_v39 = vpack.c.bf16 %v11014_v49, %v11013_v58 }
 0x1a2   : > { %9306 = vmatpush3.bf16.msra.mxu0 %v10597_v23  ;;  %v10601_v23 = vld [vmem:[#allocation10 + $0x218] sm:$0xff]  }
 0x1a5   : > { %3439 = vmatmul.mubr.bf16.gmra.mrb[48].mxu0 %v12857_v11 }
 0x1a6   : > { %3446 = vmatprep.mubr.bf16.mxu0 %v12635_v27 }
 0x1a7   : > { %3358 = vmatmul.mubr.bf16.gmra.mrb[56].mxu1 %v12776_v10 }
 0x1a8   : > { %3365 = vmatprep.mubr.bf16.mxu1 %v12861_v18 }
 0x1ad   : > { %3447 = vmatmul.mubr.bf16.gmra.mrb[52].mxu0 %v12867_v6 }
 0x1ae   : > { %3454 = vmatprep.mubr.bf16.mxu0 %v12746_v33 }
 0x1af   : > { %3366 = vmatmul.mubr.bf16.gmra.mrb[60].mxu1 %v12780_v2 }
 0x1b0   : > { %3567 = vmatprep.mubr.bf16.mxu1 %v12825_v8  ;;  %v11007_v8 = vld [vmem:[#allocation2 + $0xe9] sm:$0xff] }
 0x1b1   : > { %v12882_v31 = vpack.c.bf16 %v11008_v63, %v11007_v8  ;;  %v10604_v8 = vld [vmem:[#allocation10 + $0x230] sm:$0xff]   ;;  %v11017_v63 = vld [vmem:[#allocation2 + $0x88] sm:$0xff] }
 0x1b5   : > { %3455 = vmatmul.mubr.bf16.gmra.mrb[56].mxu0 %v12875_v20 }
 0x1b6   : > { %3462 = vmatprep.mubr.bf16.mxu0 %v12762_v35 }
 0x1b7   : > { %3568 = vmatmul.mubr.bf16.vlgmr.msra.gmra.mrb[64].mxu1 %v1540_v14  ;;  %v11016_v14 = vld [vmem:[#allocation2 + $0x131] sm:$0xff] }
 0x1b8   : > { %3575 = vmatprep.mubr.bf16.mxu1 %v12837_v38  ;;  %10160 = vmatpush3.bf16.msra.mxu1 %v10598_v30  ;;  %v11011_v30 = vld [vmem:[#allocation2 + $0x109] sm:$0xff] }
 0x1b9   : > { %10161 = vmatprep.subr.bf16.mxu1 %v10599_v21  ;;  %v12890_v13 = vpack.c.bf16 %v11012_v4, %v11011_v30 }
 0x1bc   : > { %10162 = vmatpush3.bf16.msra.mxu1 %v10599_v21  ;;  %v12906_v21 = vpack.c.bf16 %v11016_v14, %v11015_v51  ;;  %v11019_v51 = vld [vmem:[#allocation2 + $0x149] sm:$0xff]  ;;  %v11020_v14 = vld [vmem:[#allocation2 + $0x151] sm:$0xff] }
 0x1bd   : > { %3463 = vmatmul.mubr.bf16.gmra.mrb[60].mxu0 %v12882_v31  ;;  %10163 = vmatprep.subr.bf16.mxu1 %v10600_v3 }
 0x1be   : > { %3470 = vmatprep.mubr.bf16.mxu0 %v12790_v34 }
 0x1bf   : > { %3576 = vmatmul.mubr.bf16.gmra.mrb[68].mxu1 %v12884_v43 }
 0x1c0   : > { %3583 = vmatprep.mubr.bf16.mxu1 %v12847_v45  ;;  %10164 = vmatpush3.bf16.msra.mxu1 %v10600_v3  ;;  %v11018_v3 = vld [vmem:[#allocation2 + $0x90] sm:$0xff] }
 0x1c1   : > { %10165 = vmatprep.subr.bf16.mxu1 %v10601_v23  ;;  %v12908_v53 = vpack.c.bf16 %v11018_v3, %v11017_v63  ;;  %v11021_v63 = vld [vmem:[#allocation2 + $0xa8] sm:$0xff]  ;;  %v11022_v3 = vld [vmem:[#allocation2 + $0xb0] sm:$0xff] }
 0x1c4   : > { %10166 = vmatpush3.bf16.msra.mxu1 %v10601_v23 }
 0x1c5   : > { %3471 = vmatmul.mubr.bf16.gmra.mrb[64].mxu0 %v12890_v13  ;;  %v12895_v1 = vpop.f32.mrb[0].mxu0  ;;  %10167 = vmatprep.subr.bf16.mxu1 %v10602_v22 }
 0x1c6   : > { %14994 = vst [vmem:[#allocation22_spill] sm:$0xff] %v12895_v1  ;;  %3478 = vmatprep.mubr.bf16.mxu0 %v12818_v0  ;;  %v12898_v54 = vpop.f32.mrb[1].mxu0 }
 0x1c7   : > { %14995 = vst [vmem:[#allocation23_spill] sm:$0xff] %v12898_v54  ;;  %3584 = vmatmul.mubr.bf16.gmra.mrb[72].mxu1 %v12892_v39  ;;  %v12901_v7 = vpop.f32.mrb[2].mxu0 }
 0x1c8   : > { %14996 = vst [vmem:[#allocation24_spill] sm:$0xff] %v12901_v7  ;;  %3591 = vmatprep.mubr.bf16.mxu1 %v12857_v11  ;;  %v12904_v56 = vpop.f32.mrb[3].mxu0  ;;  %10168 = vmatpush3.bf16.msra.mxu1 %v10602_v22  ;;  %v10605_v22 = vld [vmem:[#allocation10 + $0x238] sm:$0xff]  }
 0x1c9   : > { %14997 = vst [vmem:[#allocation25_spill] sm:$0xff] %v12904_v56  ;;  %10169 = vmatprep.subr.bf16.mxu1 %v10603_v19 }
 0x1cb   : > { %v8977_v46 = vpop.f32.mrb[4].mxu1 }
 0x1cc   : > { %v8978_v23 = vpop.f32.mrb[5].mxu1  ;;  %10170 = vmatpush3.bf16.msra.mxu1 %v10603_v19  ;;  %v12918_v19 = vpack.c.bf16 %v11020_v14, %v11019_v51 }
 0x1cd   : > { %3479 = vmatmul.mubr.bf16.gmra.mrb[68].mxu0 %v12906_v21  ;;  %v12911_v30 = vadd.f32 %v8978_v23, %v8977_v46  ;;  %v8980_v4 = vpop.f32.mrb[6].mxu1  ;;  %10171 = vmatprep.subr.bf16.mxu1 %v10604_v8  ;;  %v12920_v46 = vpack.c.bf16 %v11022_v3, %v11021_v63  ;;  %v11023_v23 = vld [vmem:[#allocation2 + $0x169] sm:$0xff] }
 0x1ce   : > { %3486 = vmatprep.mubr.bf16.mxu0 %v12829_v52  ;;  %v8981_v58 = vpop.f32.mrb[7].mxu1 }
 0x1cf   : > { %3592 = vmatmul.mubr.bf16.gmra.mrb[76].mxu1 %v12908_v53  ;;  %v12915_v49 = vadd.f32 %v8981_v58, %v8980_v4 }
 0x1d0   : > { %3599 = vmatprep.mubr.bf16.mxu1 %v12867_v6  ;;  %10172 = vmatpush3.bf16.msra.mxu1 %v10604_v8  ;;  %v11024_v8 = vld [vmem:[#allocation2 + $0x171] sm:$0xff] }
 0x1d1   : > { %10173 = vmatprep.subr.bf16.mxu1 %v10605_v22  ;;  %v12926_v4 = vpack.c.bf16 %v11024_v8, %v11023_v23 }
 0x1d4   : > { %10174 = vmatpush3.bf16.msra.mxu1 %v10605_v22 }
 0x1d5   : > { %3487 = vmatmul.mubr.bf16.gmra.mrb[72].mxu0 %v12918_v19 }
 0x1d6   : > { %3494 = vmatprep.mubr.bf16.mxu0 %v12768_v36 }
 0x1d7   : > { %3600 = vmatmul.mubr.bf16.gmra.mrb[80].mxu1 %v12920_v46 }
 0x1d8   : > { %3607 = vmatprep.mubr.bf16.mxu1 %v12875_v20 }
 0x1d9   : > { %v12928_v58 = vpop.f32.mrb[4].mxu0 }
 0x1da   : > { %14998 = vst [vmem:[#allocation26_spill] sm:$0xff] %v12928_v58  ;;  %v12930_v51 = vpop.f32.mrb[5].mxu0 }
 0x1db   : > { %14999 = vst [vmem:[#allocation27_spill] sm:$0xff] %v12930_v51  ;;  %v12932_v14 = vpop.f32.mrb[6].mxu0 }
 0x1dc   : > { %15000 = vst [vmem:[#allocation28_spill] sm:$0xff] %v12932_v14  ;;  %v12934_v63 = vpop.f32.mrb[7].mxu0 }
 0x1dd   : > { %15001 = vst [vmem:[#allocation29_spill] sm:$0xff] %v12934_v63  ;;  %3495 = vmatmul.mubr.bf16.gmra.mrb[76].mxu0 %v12926_v4 }
 0x1de   : > { %3502 = vmatprep.mubr.bf16.mxu0 %v12772_v9  ;;  %v8983_v22 = vpop.f32.mrb[8].mxu1 }
 0x1df   : > { %3608 = vmatmul.mubr.bf16.gmra.mrb[84].mxu1 %v12582_v60  ;;  %v8984_v3 = vpop.f32.mrb[9].mxu1 }
 0x1e0   : > { %3615 = vmatprep.mubr.bf16.mxu1 %v12882_v31  ;;  %v12940_v23 = vadd.f32 %v8984_v3, %v8983_v22  ;;  %v8986_v8 = vpop.f32.mrb[10].mxu1 }
 0x1e1   : > { %v8987_v58 = vpop.f32.mrb[11].mxu1 }
 0x1e2   : > { %v12942_v1 = vadd.f32 %v8987_v58, %v8986_v8 }
 0x1e5   : > { %3503 = vmatmul.mubr.bf16.gmra.mrb[80].mxu0 %v12794_v48 }
 0x1e6   : > { %3510 = vmatprep.mubr.bf16.mxu0 %v12776_v10 }
 0x1e7   : > { %3616 = vmatmul.mubr.bf16.gmra.mrb[88].mxu1 %v12702_v37 }
 0x1e8   : > { %3623 = vmatprep.mubr.bf16.mxu1 %v12890_v13 }
 0x1ec   : > { %v12948_v14 = vpop.f32.mrb[8].mxu0 }
 0x1ed   : > { %15002 = vst [vmem:[#allocation30_spill] sm:$0xff] %v12948_v14  ;;  %v12950_v60 = vpop.f32.mrb[9].mxu0  ;;  %3511 = vmatmul.mubr.bf16.gmra.mrb[84].mxu0 %v12798_v40 }
 0x1ee   : > { %15003 = vst [vmem:[#allocation31_spill] sm:$0xff] %v12950_v60  ;;  %v12953_v22 = vpop.f32.mrb[10].mxu0  ;;  %3518 = vmatprep.mubr.bf16.mxu0 %v12780_v2 }
 0x1ef   : > { %15004 = vst [vmem:[#allocation32_spill] sm:$0xff] %v12953_v22  ;;  %v12956_v58 = vpop.f32.mrb[11].mxu0  ;;  %3624 = vmatmul.mubr.bf16.gmra.mrb[92].mxu1 %v12748_v57 }
 0x1f0   : > { %15005 = vst [vmem:[#allocation33_spill] sm:$0xff] %v12956_v58  ;;  %3631 = vmatprep.mubr.bf16.mxu1 %v12906_v21 }
 0x1f2   : > { %v8989_v3 = vpop.f32.mrb[12].mxu1 }
 0x1f3   : > { %v8990_v8 = vpop.f32.mrb[13].mxu1 }
 0x1f4   : > { %v12960_v51 = vadd.f32 %v8990_v8, %v8989_v3  ;;  %v8992_v63 = vpop.f32.mrb[14].mxu1 }
 0x1f5   : > { %v8993_v14 = vpop.f32.mrb[15].mxu1  ;;  %3519 = vmatmul.mubr.bf16.gmra.mrb[88].mxu0 %v12802_v26 }
 0x1f6   : > { %v12963_v60 = vadd.f32 %v8993_v14, %v8992_v63  ;;  %3526 = vmatprep.mubr.bf16.mxu0 %v12806_v32 }
 0x1f7   : > { %3632 = vmatmul.mubr.bf16.gmra.mrb[96].mxu1 %v12764_v16 }
 0x1f8   : > { %3639 = vmatprep.mubr.bf16.mxu1 %v12918_v19 }
 0x1fd   : > { %3527 = vmatmul.mubr.bf16.gmra.mrb[92].mxu0 %v12810_v15 }
 0x1fe   : > { %3728 = vmatprep.mubr.bf16.mxu0 %v12884_v43 }
 0x1ff   : > { %3640 = vmatmul.mubr.bf16.gmra.mrb[100].mxu1 %v12812_v29 }
 0x200   : > { %3647 = vmatprep.mubr.bf16.mxu1 %v12926_v4 }
 0x201   : > { %v12972_v3 = vpop.f32.mrb[12].mxu0 }
 0x202   : > { %15006 = vst [vmem:[#allocation34_spill] sm:$0xff] %v12972_v3  ;;  %v12974_v8 = vpop.f32.mrb[13].mxu0 }
 0x203   : > { %15007 = vst [vmem:[#allocation35_spill] sm:$0xff] %v12974_v8  ;;  %v12976_v14 = vpop.f32.mrb[14].mxu0 }
 0x204   : > { %15008 = vst [vmem:[#allocation36_spill] sm:$0xff] %v12976_v14  ;;  %v12978_v63 = vpop.f32.mrb[15].mxu0 }
 0x205   : > { %15009 = vst [vmem:[#allocation37_spill] sm:$0xff] %v12978_v63  ;;  %3729 = vmatmul.mubr.bf16.vlgmr.msra.gmra.mrb[96].mxu0 %v12816_v41  ;;  %v11025_v41 = vld [vmem:[#allocation2 + $0x87] sm:$0xff] }
 0x206   : > { %3736 = vmatprep.mubr.bf16.mxu0 %v12892_v39  ;;  %v11026_v39 = vld [vmem:[#allocation2 + $0x8f] sm:$0xff] }
 0x207   : > { %v8995_v22 = vpop.f32.mrb[16].mxu1  ;;  %3648 = vmatmul.mubr.bf16.gmra.mrb[104].mxu1 %v12820_v5  ;;  %v1809_v14 = vpack.c.bf16 %v11026_v39, %v11025_v41  ;;  %v11029_v63 = vld [vmem:[#allocation2 + $0xc8] sm:$0xff]  ;;  %v11030_v41 = vld [vmem:[#allocation2 + $0xd0] sm:$0xff] }
 0x208   : > { %v8996_v43 = vpop.f32.mrb[17].mxu1  ;;  %3655 = vmatprep.mubr.bf16.mxu1 %v12794_v48  ;;  %v1944_v39 = vpack.c.bf16 %v11030_v41, %v11029_v63 }
 0x209   : > { %v12984_v58 = vadd.f32 %v8996_v43, %v8995_v22  ;;  %v8998_v7 = vpop.f32.mrb[18].mxu1 }
 0x20a   : > { %v8999_v3 = vpop.f32.mrb[19].mxu1 }
 0x20b   : > { %v12986_v54 = vadd.f32 %v8999_v3, %v8998_v7  ;;  %v11028_v3 = vld [vmem:[#allocation2 + $0xaf] sm:$0xff] }
 0x20d   : > { %3737 = vmatmul.mubr.bf16.gmra.mrb[100].mxu0 %v12827_v25 }
 0x20e   : > { %3744 = vmatprep.mubr.bf16.mxu0 %v12908_v53  ;;  %v11027_v53 = vld [vmem:[#allocation2 + $0xa7] sm:$0xff] }
 0x20f   : > { %3656 = vmatmul.mubr.bf16.gmra.mrb[108].mxu1 %v12831_v59  ;;  %v1810_v43 = vpack.c.bf16 %v11028_v3, %v11027_v53  ;;  %v13011_v53 = vpack.c.bf16 %v12674_v55, %v12668_v24  ;;  %v13027_v24 = vpack.c.bf16 %v12687_v44, %v12683_v62 }
 0x210   : > { %3663 = vmatprep.mubr.bf16.mxu1 %v12798_v40 }
 0x214   : > { %v12992_v8 = vpop.f32.mrb[16].mxu0 }
 0x215   : > { %15010 = vst [vmem:[#allocation38_spill] sm:$0xff] %v12992_v8  ;;  %3745 = vmatmul.mubr.bf16.gmra.mrb[104].mxu0 %v1809_v14  ;;  %v12994_v22 = vpop.f32.mrb[17].mxu0 }
 0x216   : > { %15011 = vst [vmem:[#allocation39_spill] sm:$0xff] %v12994_v22  ;;  %3752 = vmatprep.mubr.bf16.mxu0 %v12920_v46  ;;  %v12997_v7 = vpop.f32.mrb[18].mxu0 }
 0x217   : > { %15012 = vst [vmem:[#allocation40_spill] sm:$0xff] %v12997_v7  ;;  %3664 = vmatmul.mubr.bf16.gmra.mrb[112].mxu1 %v12841_v61  ;;  %v13000_v25 = vpop.f32.mrb[19].mxu0 }
 0x218   : > { %15013 = vst [vmem:[#allocation41_spill] sm:$0xff] %v13000_v25  ;;  %3671 = vmatprep.mubr.bf16.mxu1 %v12802_v26 }
 0x21a   : > { %v9001_v8 = vpop.f32.mrb[20].mxu1 }
 0x21b   : > { %v9002_v14 = vpop.f32.mrb[21].mxu1 }
 0x21c   : > { %v13003_v56 = vadd.f32 %v9002_v14, %v9001_v8  ;;  %v9004_v22 = vpop.f32.mrb[22].mxu1 }
 0x21d   : > { %3753 = vmatmul.mubr.bf16.gmra.mrb[108].mxu0 %v1810_v43  ;;  %v9005_v46 = vpop.f32.mrb[23].mxu1 }
 0x21e   : > { %3760 = vmatprep.mubr.bf16.mxu0 %v1944_v39  ;;  %v13005_v7 = vadd.f32 %v9005_v46, %v9004_v22 }
 0x21f   : > { %3672 = vmatmul.mubr.bf16.gmra.mrb[116].mxu1 %v12851_v50 }
 0x220   : > { %3679 = vmatprep.mubr.bf16.mxu1 %v12810_v15 }
 0x225   : > { %3761 = vmatmul.mubr.bf16.gmra.mrb[112].mxu0 %v12635_v27 }
 0x226   : > { %3768 = vmatprep.mubr.bf16.mxu0 %v12702_v37 }
 0x227   : > { %3680 = vmatmul.mubr.bf16.gmra.mrb[120].mxu1 %v12861_v18 }
 0x228   : > { %v13016_v8 = vpop.f32.mrb[20].mxu0  ;;  %3687 = vmatprep.mubr.bf16.mxu1 %v13011_v53 }
 0x229   : > { %15014 = vst [vmem:[#allocation42_spill] sm:$0xff] %v13016_v8  ;;  %v13019_v63 = vpop.f32.mrb[21].mxu0 }
 0x22a   : > { %15015 = vst [vmem:[#allocation43_spill] sm:$0xff] %v13019_v63  ;;  %v13021_v22 = vpop.f32.mrb[22].mxu0 }
 0x22b   : > { %15016 = vst [vmem:[#allocation44_spill] sm:$0xff] %v13021_v22  ;;  %v13023_v3 = vpop.f32.mrb[23].mxu0  ;;  %v10631_v22 = vld [vmem:[#allocation12 + $0x100] sm:$0xff]  }
 0x22c   : > { %15017 = vst [vmem:[#allocation45_spill] sm:$0xff] %v13023_v3 }
 0x22d   : > { %3769 = vmatmul.mubr.bf16.gmra.mrb[116].mxu0 %v12746_v33 }
 0x22e   : > { %v9007_v27 = vpop.f32.mrb[24].mxu1  ;;  %3776 = vmatprep.mubr.bf16.mxu0 %v12748_v57 }
 0x22f   : > { %v9008_v55 = vpop.f32.mrb[25].mxu1  ;;  %3688 = vmatmul.mubr.bf16.gmra.mrb[124].mxu1 %v13027_v24 }
 0x230   : > { %v13032_v37 = vadd.f32 %v9008_v55, %v9007_v27  ;;  %v9010_v43 = vpop.f32.mrb[26].mxu1  ;;  %10175 = vmatprep.mubr.bf16.mxu1 %v12837_v38 }
 0x231   : > { %v9011_v41 = vpop.f32.mrb[27].mxu1 }
 0x232   : > { %v13035_v39 = vadd.f32 %v9011_v41, %v9010_v43 }
 0x235   : > { %3777 = vmatmul.mubr.bf16.gmra.mrb[120].mxu0 %v12762_v35 }
 0x236   : > { %3784 = vmatprep.mubr.bf16.mxu0 %v12764_v16 }
 0x237   : > { %10176 = vmatmul.mubr.bf16.vlgmr.msra.gmra.mrb[128].mxu1 %v12847_v45 }
 0x238   : > { %10179 = vmatprep.mubr.bf16.mxu1 %v12857_v11 }
 0x23d   : > { %v13041_v62 = vpop.f32.mrb[24].mxu0  ;;  %3785 = vmatmul.mubr.bf16.gmra.mrb[124].mxu0 %v12790_v34 }
 0x23e   : > { %15018 = vst [vmem:[#allocation46_spill] sm:$0xff] %v13041_v62  ;;  %v13044_v44 = vpop.f32.mrb[25].mxu0  ;;  %3792 = vmatprep.mubr.bf16.mxu0 %v12812_v29 }
 0x23f   : > { %15019 = vst [vmem:[#allocation47_spill] sm:$0xff] %v13044_v44  ;;  %v13047_v33 = vpop.f32.mrb[26].mxu0  ;;  %10180 = vmatmul.mubr.bf16.gmra.mrb[132].mxu1 %v12867_v6 }
 0x240   : > { %15020 = vst [vmem:[#allocation48_spill] sm:$0xff] %v13047_v33  ;;  %v13050_v57 = vpop.f32.mrb[27].mxu0  ;;  %10183 = vmatprep.mubr.bf16.mxu1 %v12875_v20 }
 0x241   : > { %15021 = vst [vmem:[#allocation49_spill] sm:$0xff] %v13050_v57  ;;  %v9013_v35 = vpop.f32.mrb[28].mxu1 }
 0x242   : > { %v9014_v16 = vpop.f32.mrb[29].mxu1 }
 0x243   : > { %v13053_v38 = vadd.f32 %v9014_v16, %v9013_v35  ;;  %v9016_v45 = vpop.f32.mrb[30].mxu1 }
 0x244   : > { %v9017_v34 = vpop.f32.mrb[31].mxu1 }
 0x245   : > { %3793 = vmatmul.mubr.bf16.gmra.mrb[128].mxu0 %v12818_v0  ;;  %v13057_v11 = vadd.f32 %v9017_v34, %v9016_v45 }
 0x246   : > { %3800 = vmatprep.mubr.bf16.mxu0 %v12820_v5 }
 0x247   : > { %10184 = vmatmul.mubr.bf16.gmra.mrb[136].mxu1 %v12882_v31 }
 0x248   : > { %10187 = vmatprep.mubr.bf16.mxu1 %v12890_v13 }
 0x249   : > { %v9019_v29 = vpop.f32.mrb[32].mxu1 }
 0x24a   : > { %v9020_v6 = vpop.f32.mrb[33].mxu1 }
 0x24b   : > { %v13061_v14 = vadd.f32 %v9020_v6, %v9019_v29  ;;  %v9022_v20 = vpop.f32.mrb[34].mxu1 }
 0x24c   : > { %v9023_v46 = vpop.f32.mrb[35].mxu1 }
 0x24d   : > { %3801 = vmatmul.mubr.bf16.gmra.mrb[132].mxu0 %v12829_v52  ;;  %v13065_v0 = vadd.f32 %v9023_v46, %v9022_v20 }
 0x24e   : > { %3808 = vmatprep.mubr.bf16.mxu0 %v12831_v59 }
 0x24f   : > { %10188 = vmatmul.mubr.bf16.gmra.mrb[140].mxu1 %v12906_v21 }
 0x250   : > { %v13068_v5 = vpop.f32.mrb[28].mxu0  ;;  %10191 = vmatprep.mubr.bf16.mxu1 %v12918_v19 }
 0x251   : > { %15022 = vst [vmem:[#allocation50_spill] sm:$0xff] %v13068_v5  ;;  %v13071_v31 = vpop.f32.mrb[29].mxu0  ;;  %v9025_v27 = vpop.f32.mrb[36].mxu1 }
 0x252   : > { %15023 = vst [vmem:[#allocation51_spill] sm:$0xff] %v13071_v31  ;;  %v13073_v13 = vpop.f32.mrb[30].mxu0  ;;  %v9026_v43 = vpop.f32.mrb[37].mxu1 }
 0x253   : > { %15024 = vst [vmem:[#allocation52_spill] sm:$0xff] %v13073_v13  ;;  %v13075_v55 = vpop.f32.mrb[31].mxu0  ;;  %v13077_v52 = vadd.f32 %v9026_v43, %v9025_v27  ;;  %v9028_v41 = vpop.f32.mrb[38].mxu1 }
 0x254   : > { %15025 = vst [vmem:[#allocation53_spill] sm:$0xff] %v13075_v55  ;;  %v9029_v59 = vpop.f32.mrb[39].mxu1 }
 0x255   : > { %3809 = vmatmul.mubr.bf16.gmra.mrb[136].mxu0 %v12768_v36  ;;  %v13081_v21 = vadd.f32 %v9029_v59, %v9028_v41 }
 0x256   : > { %3816 = vmatprep.mubr.bf16.mxu0 %v12841_v61 }
 0x257   : > { %10192 = vmatmul.mubr.bf16.gmra.mrb[144].mxu1 %v12926_v4 }
 0x258   : > { %v9083_v19 = vpop.f32.mrb[32].mxu0  ;;  %10195 = vmatprep.mubr.bf16.mxu1 %v12794_v48 }
 0x259   : > { %v9084_v35 = vpop.f32.mrb[33].mxu0 }
 0x25a   : > { %v9085_v16 = vadd.f32 %v9084_v35, %v9083_v19  ;;  %v9086_v45 = vpop.f32.mrb[34].mxu0  ;;  %v9031_v34 = vpop.f32.mrb[40].mxu1 }
 0x25b   : > { %v9087_v29 = vpop.f32.mrb[35].mxu0  ;;  %v9032_v6 = vpop.f32.mrb[41].mxu1 }
 0x25c   : > { %v13086_v20 = vadd.f32 %v9085_v16, %v12873_v47  ;;  %v9088_v36 = vadd.f32 %v9087_v29, %v9086_v45  ;;  %v13088_v46 = vadd.f32 %v9032_v6, %v9031_v34  ;;  %v9034_v61 = vpop.f32.mrb[42].mxu1 }
 0x25d   : > { %3817 = vmatmul.mubr.bf16.gmra.mrb[140].mxu0 %v12772_v9  ;;  %v9035_v27 = vpop.f32.mrb[43].mxu1 }
 0x25e   : > { %v13092_v4 = vadd.f32 %v9088_v36, %v12877_v12  ;;  %3824 = vmatprep.mubr.bf16.mxu0 %v12851_v50  ;;  %v13095_v48 = vadd.f32 %v9035_v27, %v9034_v61 }
 0x25f   : > { %10196 = vmatmul.mubr.bf16.gmra.mrb[148].mxu1 %v12798_v40 }
 0x260   : > { %v9089_v43 = vpop.f32.mrb[36].mxu0  ;;  %10199 = vmatprep.mubr.bf16.mxu1 %v12802_v26 }
 0x261   : > { %v9090_v47 = vpop.f32.mrb[37].mxu0 }
 0x262   : > { %v9091_v41 = vadd.f32 %v9090_v47, %v9089_v43  ;;  %v9092_v59 = vpop.f32.mrb[38].mxu0  ;;  %v9037_v19 = vpop.f32.mrb[44].mxu1 }
 0x263   : > { %v9093_v35 = vpop.f32.mrb[39].mxu0  ;;  %v9038_v16 = vpop.f32.mrb[45].mxu1 }
 0x264   : > { %v13100_v9 = vadd.f32 %v9091_v41, %v12911_v30  ;;  %v9094_v12 = vadd.f32 %v9093_v35, %v9092_v59  ;;  %v13102_v45 = vadd.f32 %v9038_v16, %v9037_v19  ;;  %v9040_v50 = vpop.f32.mrb[46].mxu1  ;;  %v1955_v35 = vpack.c.bf16 %v12752_v42, %v12752_v42 }
 0x265   : > { %3825 = vmatmul.mubr.bf16.gmra.mrb[144].mxu0 %v12776_v10  ;;  %v9041_v34 = vpop.f32.mrb[47].mxu1  ;;  %v2088_v10 = vpack.c.bf16 %v12744_v28, %v12742_v17 }
 0x266   : > { %v13106_v40 = vadd.f32 %v9094_v12, %v12915_v49  ;;  %3832 = vmatprep.mubr.bf16.mxu0 %v12861_v18  ;;  %v13109_v26 = vadd.f32 %v9041_v34, %v9040_v50 }
 0x267   : > { %10200 = vmatmul.mubr.bf16.gmra.mrb[152].mxu1 %v12810_v15 }
 0x268   : > { %v9095_v29 = vpop.f32.mrb[40].mxu0  ;;  %10203 = vmatprep.mubr.bf16.mxu1 %v13011_v53 }
 0x269   : > { %v9096_v30 = vpop.f32.mrb[41].mxu0 }
 0x26a   : > { %v9097_v6 = vadd.f32 %v9096_v30, %v9095_v29  ;;  %v9098_v36 = vpop.f32.mrb[42].mxu0  ;;  %v9043_v61 = vpop.f32.mrb[48].mxu1 }
 0x26b   : > { %v9099_v27 = vpop.f32.mrb[43].mxu0  ;;  %v9044_v43 = vpop.f32.mrb[49].mxu1 }
 0x26c   : > { %v13116_v49 = vadd.f32 %v9097_v6, %v12940_v23  ;;  %v9100_v18 = vadd.f32 %v9099_v27, %v9098_v36  ;;  %v13118_v47 = vadd.f32 %v9044_v43, %v9043_v61  ;;  %v9046_v41 = vpop.f32.mrb[50].mxu1  ;;  %v11031_v61 = vld [vmem:[#allocation2 + $0x227] sm:$0xff]  ;;  %v11032_v27 = vld [vmem:[#allocation2 + $0x22f] sm:$0xff] }
 0x26d   : > { %3833 = vmatmul.mubr.bf16.gmra.mrb[148].mxu0 %v12780_v2  ;;  %v9047_v15 = vpop.f32.mrb[51].mxu1  ;;  %v1822_v43 = vpack.c.bf16 %v11032_v27, %v11031_v61 }
 0x26e   : > { %v13122_v53 = vadd.f32 %v9100_v18, %v12942_v1  ;;  %3840 = vmatprep.mubr.bf16.mxu0 %v13027_v24  ;;  %v13125_v59 = vadd.f32 %v9047_v15, %v9046_v41 }
 0x26f   : > { %10204 = vmatmul.mubr.bf16.gmra.mrb[156].mxu1 %v2088_v10 }
 0x270   : > { %v9101_v19 = vpop.f32.mrb[44].mxu0 }
 0x271   : > { %v9102_v17 = vpop.f32.mrb[45].mxu0 }
 0x272   : > { %v9103_v28 = vadd.f32 %v9102_v17, %v9101_v19  ;;  %v9104_v23 = vpop.f32.mrb[46].mxu0  ;;  %v9049_v16 = vpop.f32.mrb[52].mxu1 }
 0x273   : > { %v9105_v12 = vpop.f32.mrb[47].mxu0  ;;  %v9050_v50 = vpop.f32.mrb[53].mxu1 }
 0x274   : > { %v13130_v2 = vadd.f32 %v9103_v28, %v12960_v51  ;;  %v9106_v1 = vadd.f32 %v9105_v12, %v9104_v23  ;;  %v13132_v34 = vadd.f32 %v9050_v50, %v9049_v16  ;;  %v9052_v24 = vpop.f32.mrb[54].mxu1 }
 0x275   : > { %3841 = vmatmul.mubr.bf16.gmra.mrb[152].mxu0 %v12806_v32  ;;  %v9053_v29 = vpop.f32.mrb[55].mxu1 }
 0x276   : > { %v13136_v30 = vadd.f32 %v9106_v1, %v12963_v60  ;;  %3848 = vmatprep.mubr.bf16.mxu0 %v1955_v35  ;;  %v13138_v6 = vadd.f32 %v9053_v29, %v9052_v24 }
 0x278   : > { %v9107_v42 = vpop.f32.mrb[48].mxu0 }
 0x279   : > { %v9108_v36 = vpop.f32.mrb[49].mxu0 }
 0x27a   : > { %v9109_v51 = vadd.f32 %v9108_v36, %v9107_v42  ;;  %v9110_v10 = vpop.f32.mrb[50].mxu0  ;;  %v9055_v18 = vpop.f32.mrb[56].mxu1 }
 0x27b   : > { %v9111_v41 = vpop.f32.mrb[51].mxu0  ;;  %v9056_v15 = vpop.f32.mrb[57].mxu1 }
 0x27c   : > { %v13141_v19 = vadd.f32 %v9109_v51, %v12984_v58  ;;  %v9112_v32 = vadd.f32 %v9111_v41, %v9110_v10  ;;  %v13143_v17 = vadd.f32 %v9056_v15, %v9055_v18  ;;  %v9058_v60 = vpop.f32.mrb[58].mxu1 }
 0x27d   : > { %3849 = vmatmul.mubr.bf16.gmra.mrb[156].mxu0 %v1822_v43  ;;  %v9059_v28 = vpop.f32.mrb[59].mxu1 }
 0x27e   : > { %v13146_v23 = vadd.f32 %v9112_v32, %v12986_v54  ;;  %v13148_v35 = vadd.f32 %v9059_v28, %v9058_v60 }
 0x280   : > { %v9113_v16 = vpop.f32.mrb[52].mxu0 }
 0x281   : > { %v9114_v12 = vpop.f32.mrb[53].mxu0 }
 0x282   : > { %v9115_v50 = vadd.f32 %v9114_v12, %v9113_v16  ;;  %v9116_v1 = vpop.f32.mrb[54].mxu0  ;;  %v9061_v24 = vpop.f32.mrb[60].mxu1 }
 0x283   : > { %v9117_v29 = vpop.f32.mrb[55].mxu0  ;;  %v9062_v42 = vpop.f32.mrb[61].mxu1 }
 0x284   : > { %v13151_v58 = vadd.f32 %v9115_v50, %v13003_v56  ;;  %v9118_v36 = vadd.f32 %v9117_v29, %v9116_v1  ;;  %v13153_v61 = vadd.f32 %v9062_v42, %v9061_v24  ;;  %v9064_v27 = vpop.f32.mrb[62].mxu1 }
 0x285   : > { %v9065_v43 = vpop.f32.mrb[63].mxu1 }
 0x286   : > { %v13156_v54 = vadd.f32 %v9118_v36, %v13005_v7  ;;  %v13158_v51 = vadd.f32 %v9065_v43, %v9064_v27 }
 0x288   : > { %v9119_v10 = vpop.f32.mrb[56].mxu0 }
 0x289   : > { %v9120_v18 = vpop.f32.mrb[57].mxu0 }
 0x28a   : > { %v9121_v41 = vadd.f32 %v9120_v18, %v9119_v10  ;;  %v9122_v15 = vpop.f32.mrb[58].mxu0  ;;  %v9195_v32 = vpop.f32.mrb[64].mxu1 }
 0x28b   : > { %v9123_v60 = vpop.f32.mrb[59].mxu0  ;;  %v9196_v28 = vpop.f32.mrb[65].mxu1 }
 0x28c   : > { %v13161_v56 = vadd.f32 %v9121_v41, %v13032_v37  ;;  %v9124_v16 = vadd.f32 %v9123_v60, %v9122_v15  ;;  %v9197_v12 = vadd.f32 %v9196_v28, %v9195_v32  ;;  %v9198_v50 = vpop.f32.mrb[66].mxu1 }
 0x28d   : > { %v9199_v1 = vpop.f32.mrb[67].mxu1 }
 0x28e   : > { %v13164_v24 = vadd.f32 %v9124_v16, %v13035_v39  ;;  %v9200_v7 = vadd.f32 %v9199_v1, %v9198_v50  ;;  %v13167_v29 = vadd.f32 %v9197_v12, %v13086_v20 }
 0x290   : > { %v9125_v42 = vpop.f32.mrb[60].mxu0  ;;  %v13170_v36 = vadd.f32 %v9200_v7, %v13092_v4 }
 0x291   : > { %v9126_v27 = vpop.f32.mrb[61].mxu0 }
 0x292   : > { %v9127_v43 = vadd.f32 %v9126_v27, %v9125_v42  ;;  %v9128_v10 = vpop.f32.mrb[62].mxu0  ;;  %v9201_v37 = vpop.f32.mrb[68].mxu1 }
 0x293   : > { %v9129_v18 = vpop.f32.mrb[63].mxu0  ;;  %v9202_v41 = vpop.f32.mrb[69].mxu1 }
 0x294   : > { %v13173_v15 = vadd.f32 %v9127_v43, %v13053_v38  ;;  %v9130_v32 = vadd.f32 %v9129_v18, %v9128_v10  ;;  %v9203_v39 = vadd.f32 %v9202_v41, %v9201_v37  ;;  %v9204_v60 = vpop.f32.mrb[70].mxu1 }
 0x295   : > { %v9205_v28 = vpop.f32.mrb[71].mxu1 }
 0x296   : > { %v13176_v20 = vadd.f32 %v9130_v32, %v13057_v11  ;;  %v9206_v16 = vadd.f32 %v9205_v28, %v9204_v60  ;;  %v13179_v4 = vadd.f32 %v9203_v39, %v13100_v9 }
 0x298   : > { %v9131_v12 = vpop.f32.mrb[64].mxu0  ;;  %v13182_v50 = vadd.f32 %v9206_v16, %v13106_v40 }
 0x299   : > { %v9132_v1 = vpop.f32.mrb[65].mxu0 }
 0x29a   : > { %v9133_v7 = vadd.f32 %v9132_v1, %v9131_v12  ;;  %v9134_v42 = vpop.f32.mrb[66].mxu0  ;;  %v9207_v38 = vpop.f32.mrb[72].mxu1 }
 0x29b   : > { %v9135_v27 = vpop.f32.mrb[67].mxu0  ;;  %v9208_v43 = vpop.f32.mrb[73].mxu1 }
 0x29c   : > { %v9136_v10 = vadd.f32 %v9135_v27, %v9134_v42  ;;  %v9209_v37 = vadd.f32 %v9208_v43, %v9207_v38  ;;  %v9210_v18 = vpop.f32.mrb[74].mxu1  ;;  %v13185_v11 = vadd.f32 %v9133_v7, %v13061_v14 }
 0x29d   : > { %v9211_v41 = vpop.f32.mrb[75].mxu1 }
 0x29e   : > { %v9212_v32 = vadd.f32 %v9211_v41, %v9210_v18  ;;  %v13188_v9 = vadd.f32 %v9136_v10, %v13065_v0  ;;  %v13191_v40 = vadd.f32 %v9209_v37, %v13116_v49 }
 0x2a0   : > { %v9137_v39 = vpop.f32.mrb[68].mxu0  ;;  %v13194_v60 = vadd.f32 %v9212_v32, %v13122_v53 }
 0x2a1   : > { %v9138_v28 = vpop.f32.mrb[69].mxu0 }
 0x2a2   : > { %v9139_v16 = vadd.f32 %v9138_v28, %v9137_v39  ;;  %v9140_v12 = vpop.f32.mrb[70].mxu0  ;;  %v9213_v1 = vpop.f32.mrb[76].mxu1 }
 0x2a3   : > { %v9141_v42 = vpop.f32.mrb[71].mxu0  ;;  %v9214_v38 = vpop.f32.mrb[77].mxu1 }
 0x2a4   : > { %v9142_v14 = vadd.f32 %v9141_v42, %v9140_v12  ;;  %v9215_v7 = vadd.f32 %v9214_v38, %v9213_v1  ;;  %v9216_v27 = vpop.f32.mrb[78].mxu1  ;;  %v13197_v43 = vadd.f32 %v9139_v16, %v13077_v52 }
 0x2a5   : > { %v9217_v0 = vpop.f32.mrb[79].mxu1 }
 0x2a6   : > { %v9218_v10 = vadd.f32 %v9217_v0, %v9216_v27  ;;  %v13200_v49 = vadd.f32 %v9142_v14, %v13081_v21  ;;  %v13203_v53 = vadd.f32 %v9215_v7, %v13130_v2 }
 0x2a8   : > { %v9143_v37 = vpop.f32.mrb[72].mxu0  ;;  %v13206_v18 = vadd.f32 %v9218_v10, %v13136_v30 }
 0x2a9   : > { %v9144_v41 = vpop.f32.mrb[73].mxu0 }
 0x2aa   : > { %v9145_v32 = vadd.f32 %v9144_v41, %v9143_v37  ;;  %v9146_v39 = vpop.f32.mrb[74].mxu0  ;;  %v9219_v28 = vpop.f32.mrb[80].mxu1 }
 0x2ab   : > { %v9147_v12 = vpop.f32.mrb[75].mxu0  ;;  %v9220_v1 = vpop.f32.mrb[81].mxu1 }
 0x2ac   : > { %v9148_v52 = vadd.f32 %v9147_v12, %v9146_v39  ;;  %v9221_v16 = vadd.f32 %v9220_v1, %v9219_v28  ;;  %v9222_v42 = vpop.f32.mrb[82].mxu1  ;;  %v13209_v38 = vadd.f32 %v9145_v32, %v13088_v46 }
 0x2ad   : > { %v9223_v21 = vpop.f32.mrb[83].mxu1 }
 0x2ae   : > { %v9224_v14 = vadd.f32 %v9223_v21, %v9222_v42  ;;  %v13212_v2 = vadd.f32 %v9148_v52, %v13095_v48  ;;  %v13215_v30 = vadd.f32 %v9221_v16, %v13141_v19 }
 0x2b0   : > { %v9149_v7 = vpop.f32.mrb[76].mxu0  ;;  %v13218_v27 = vadd.f32 %v9224_v14, %v13146_v23 }
 0x2b1   : > { %v9150_v0 = vpop.f32.mrb[77].mxu0 }
 0x2b2   : > { %v9151_v10 = vadd.f32 %v9150_v0, %v9149_v7  ;;  %v9152_v37 = vpop.f32.mrb[78].mxu0  ;;  %v9225_v41 = vpop.f32.mrb[84].mxu1 }
 0x2b3   : > { %v9153_v39 = vpop.f32.mrb[79].mxu0  ;;  %v9226_v28 = vpop.f32.mrb[85].mxu1 }
 0x2b4   : > { %v9154_v46 = vadd.f32 %v9153_v39, %v9152_v37  ;;  %v9227_v32 = vadd.f32 %v9226_v28, %v9225_v41  ;;  %v9228_v12 = vpop.f32.mrb[86].mxu1  ;;  %v13221_v1 = vadd.f32 %v9151_v10, %v13102_v45 }
 0x2b5   : > { %v9229_v48 = vpop.f32.mrb[87].mxu1 }
 0x2b6   : > { %v9230_v52 = vadd.f32 %v9229_v48, %v9228_v12  ;;  %v13224_v19 = vadd.f32 %v9154_v46, %v13109_v26  ;;  %v13227_v23 = vadd.f32 %v9227_v32, %v13151_v58 }
 0x2b8   : > { %v9155_v16 = vpop.f32.mrb[80].mxu0  ;;  %v13230_v42 = vadd.f32 %v9230_v52, %v13156_v54 }
 0x2b9   : > { %v9156_v21 = vpop.f32.mrb[81].mxu0 }
 0x2ba   : > { %v9157_v14 = vadd.f32 %v9156_v21, %v9155_v16  ;;  %v9158_v7 = vpop.f32.mrb[82].mxu0  ;;  %v9231_v0 = vpop.f32.mrb[88].mxu1 }
 0x2bb   : > { %v9159_v37 = vpop.f32.mrb[83].mxu0  ;;  %v9232_v41 = vpop.f32.mrb[89].mxu1 }
 0x2bc   : > { %v9160_v45 = vadd.f32 %v9159_v37, %v9158_v7  ;;  %v9233_v10 = vadd.f32 %v9232_v41, %v9231_v0  ;;  %v9234_v39 = vpop.f32.mrb[90].mxu1  ;;  %v13233_v28 = vadd.f32 %v9157_v14, %v13118_v47 }
 0x2bd   : > { %v9235_v26 = vpop.f32.mrb[91].mxu1 }
 0x2be   : > { %v9236_v46 = vadd.f32 %v9235_v26, %v9234_v39  ;;  %v13236_v58 = vadd.f32 %v9160_v45, %v13125_v59  ;;  %v13239_v54 = vadd.f32 %v9233_v10, %v13161_v56  ;;  %v10606_v59 = vld [vmem:[#allocation12 + $0x40] sm:$0xff]  }
 0x2bf   : > { %v10607_v56 = vld [vmem:[#allocation12] sm:$0xff]   ;;  %9465 = vmatprep.subr.bf16.mxu1 %v10606_v59 }
 0x2c0   : > { %v9161_v32 = vpop.f32.mrb[84].mxu0  ;;  %v13242_v12 = vadd.f32 %v9236_v46, %v13164_v24  ;;  %9466 = vmatpush3.bf16.msra.mxu1 %v10607_v56 }
 0x2c1   : > { %v9162_v48 = vpop.f32.mrb[85].mxu0 }
 0x2c2   : > { %v9163_v52 = vadd.f32 %v9162_v48, %v9161_v32  ;;  %v9164_v16 = vpop.f32.mrb[86].mxu0  ;;  %v9237_v21 = vpop.f32.mrb[92].mxu1  ;;  %v10608_v32 = vld [vmem:[#allocation12 + $0x48] sm:$0xff]  }
 0x2c3   : > { %v9165_v7 = vpop.f32.mrb[87].mxu0  ;;  %v9238_v0 = vpop.f32.mrb[93].mxu1  ;;  %9467 = vmatprep.subr.bf16.mxu1 %v10608_v32 }
 0x2c4   : > { %v9166_v47 = vadd.f32 %v9165_v7, %v9164_v16  ;;  %v9239_v14 = vadd.f32 %v9238_v0, %v9237_v21  ;;  %v9240_v37 = vpop.f32.mrb[94].mxu1  ;;  %v13245_v41 = vadd.f32 %v9163_v52, %v13132_v34  ;;  %v10609_v34 = vld [vmem:[#allocation12 + $0x8] sm:$0xff]  }
 0x2c5   : > { %v9241_v45 = vpop.f32.mrb[95].mxu1  ;;  %9468 = vmatpush3.bf16.msra.mxu1 %v10609_v34  ;;  %v10613_v34 = vld [vmem:[#allocation12 + $0x18] sm:$0xff]  }
 0x2c6   : > { %v9242_v10 = vadd.f32 %v9241_v45, %v9240_v37  ;;  %v13248_v39 = vadd.f32 %v9166_v47, %v13138_v6  ;;  %v13251_v24 = vadd.f32 %v9239_v14, %v13173_v15  ;;  %v10610_v37 = vld [vmem:[#allocation12 + $0x50] sm:$0xff]  }
 0x2c7   : > { %9469 = vmatprep.subr.bf16.mxu1 %v10610_v37  ;;  %v10615_v37 = vld [vmem:[#allocation12 + $0x20] sm:$0xff]  }
 0x2c8   : > { %v9167_v26 = vpop.f32.mrb[88].mxu0  ;;  %v13254_v46 = vadd.f32 %v9242_v10, %v13176_v20  ;;  %v10611_v20 = vld [vmem:[#allocation12 + $0x10] sm:$0xff]  }
 0x2c9   : > { %v9168_v48 = vpop.f32.mrb[89].mxu0  ;;  %9470 = vmatpush3.bf16.msra.mxu1 %v10611_v20 }
 0x2ca   : > { %v9169_v52 = vadd.f32 %v9168_v48, %v9167_v26  ;;  %v9170_v16 = vpop.f32.mrb[90].mxu0  ;;  %v9243_v21 = vpop.f32.mrb[96].mxu1  ;;  %v10612_v48 = vld [vmem:[#allocation12 + $0x58] sm:$0xff]  }
 0x2cb   : > { %v9171_v7 = vpop.f32.mrb[91].mxu0  ;;  %v9244_v0 = vpop.f32.mrb[97].mxu1  ;;  %9471 = vmatprep.subr.bf16.mxu1 %v10612_v48  ;;  %v10616_v48 = vld [vmem:[#allocation12 + $0x68] sm:$0xff]  }
 0x2cc   : > { %v9172_v6 = vadd.f32 %v9171_v7, %v9170_v16  ;;  %v9245_v47 = vadd.f32 %v9244_v0, %v9243_v21  ;;  %v9246_v15 = vpop.f32.mrb[98].mxu1  ;;  %v13257_v14 = vadd.f32 %v9169_v52, %v13143_v17 }
 0x2cd   : > { %v9247_v59 = vpop.f32.mrb[99].mxu1  ;;  %9472 = vmatpush3.bf16.msra.mxu1 %v10613_v34  ;;  %v968_v34 = vld [vmem:[%s13285_s1 + $0x4] sm:$0xf] }
 0x2ce   : > { %v13260_v45 = vadd.f32 %v9245_v47, %v13185_v11  ;;  %v9248_v56 = vadd.f32 %v9247_v59, %v9246_v15  ;;  %v13263_v10 = vadd.f32 %v9172_v6, %v13148_v35  ;;  %973 = vst [vmem:[#allocation3 + $0x38] sm:$0xf] %v968_v34  ;;  %v10621_v34 = vld [vmem:[#allocation12 + $0x78] sm:$0xff]  }
 0x2d0   : > { %v9173_v26 = vpop.f32.mrb[92].mxu0  ;;  %v13266_v32 = vadd.f32 %v9248_v56, %v13188_v9  ;;  %v10614_v9 = vld [vmem:[#allocation12 + $0x60] sm:$0xff]  }
 0x2d1   : > { %v9174_v17 = vpop.f32.mrb[93].mxu0  ;;  %9473 = vmatprep.subr.bf16.mxu1 %v10614_v9 }
 0x2d2   : > { %v9175_v52 = vadd.f32 %v9174_v17, %v9173_v26  ;;  %v9176_v16 = vpop.f32.mrb[94].mxu0  ;;  %v9249_v21 = vpop.f32.mrb[100].mxu1  ;;  %9474 = vmatpush3.bf16.msra.mxu1 %v10615_v37  ;;  %v967_v17 = vld [vmem:[%s13285_s1] sm:$0xf] }
 0x2d3   : > { %v9177_v11 = vpop.f32.mrb[95].mxu0  ;;  %v9250_v7 = vpop.f32.mrb[101].mxu1  ;;  %9475 = vmatprep.subr.bf16.mxu1 %v10616_v48  ;;  %972 = vst [vmem:[#allocation3 + $0x20] sm:$0xf] %v967_v17 }
 0x2d4   : > { %v13270_v35 = vadd.f32 %v9175_v52, %v13153_v61  ;;  %v9178_v0 = vadd.f32 %v9177_v11, %v9176_v16  ;;  %v9251_v6 = vadd.f32 %v9250_v7, %v9249_v21  ;;  %v9252_v47 = vpop.f32.mrb[102].mxu1  ;;  %v969_v11 = vld [vmem:[%s13285_s1 + $0x8] sm:$0xf] }
 0x2d5   : > { %v9253_v15 = vpop.f32.mrb[103].mxu1  ;;  %974 = vst [vmem:[#allocation3 + $0x50] sm:$0xf] %v969_v11 }
 0x2d6   : > { %v13274_v59 = vadd.f32 %v9178_v0, %v13158_v51  ;;  %v13277_v20 = vadd.f32 %v9251_v6, %v13197_v43  ;;  %v9254_v56 = vadd.f32 %v9253_v15, %v9252_v47  ;;  %v10617_v43 = vld [vmem:[#allocation12 + $0x28] sm:$0xff]   ;;  %v10618_v15 = vld [vmem:[#allocation12 + $0x70] sm:$0xff]  }
 0x2d7   : > { %9476 = vmatpush3.bf16.msra.mxu1 %v10617_v43 }
 0x2d8   : > { %v9307_v26 = vpop.f32.mrb[96].mxu0  ;;  %v13280_v61 = vadd.f32 %v9254_v56, %v13200_v49  ;;  %v10619_v56 = vld [vmem:[#allocation12 + $0x30] sm:$0xff]   ;;  %9477 = vmatprep.subr.bf16.mxu1 %v10618_v15 }
 0x2d9   : > { %v9308_v51 = vpop.f32.mrb[97].mxu0 }
 0x2da   : > { %v9309_v52 = vadd.f32 %v9308_v51, %v9307_v26  ;;  %v9310_v16 = vpop.f32.mrb[98].mxu0  ;;  %v9255_v21 = vpop.f32.mrb[104].mxu1 }
 0x2db   : > { %v9311_v49 = vpop.f32.mrb[99].mxu0  ;;  %v9256_v7 = vpop.f32.mrb[105].mxu1  ;;  %9478 = vmatpush3.bf16.msra.mxu1 %v10619_v56 }
 0x2dc   : > { %v9312_v0 = vadd.f32 %v9311_v49, %v9310_v16  ;;  %v9257_v6 = vadd.f32 %v9256_v7, %v9255_v21  ;;  %v9258_v47 = vpop.f32.mrb[106].mxu1  ;;  %v13291_v9 = vadd.f32 %v9309_v52, %v13167_v29  ;;  %v4097_v29 = vld [vmem:[%s14889_s19 + $0x8] sm:$0xff]  ;;  %9479 = vmatprep.subr.bf16.mxu1 %v10621_v34 }
 0x2dd   : > { %v9259_v37 = vpop.f32.mrb[107].mxu1  ;;  %v10623_v52 = vld [vmem:[#allocation12 + $0x38] sm:$0xff]   ;;  %4164 = vmatprep.mubr.f32.mxu0 %v4097_v29 }
 0x2de   : > { %v13294_v26 = vadd.f32 %v9257_v6, %v13209_v38  ;;  %v9260_v48 = vadd.f32 %v9259_v37, %v9258_v47  ;;  %v13297_v51 = vadd.f32 %v9312_v0, %v13170_v36  ;;  %v4175_v36 = vld [vmem:[#allocation3 + $0x7] sm:$0xf]  ;;  %v4176_v0 = vld [vmem:[#allocation3 + $0x1f] sm:$0xf]  ;;  %v4177_v37 = vld [vmem:[#allocation3 + $0x37] sm:$0xf] }
 0x2df   : > { %9480 = vmatpush3.bf16.msra.mxu1 %v10623_v52  ;;  %v4178_v56 = vld [vmem:[#allocation3 + $0x4f] sm:$0xf]  ;;  %v4183_v13 = vcombine.low %v4175_v36, %v4176_v0 }
 0x2e0   : > { %v9313_v43 = vpop.f32.mrb[100].mxu0  ;;  %v13300_v17 = vadd.f32 %v9260_v48, %v13212_v2  ;;  %v10628_v48 = vld [vmem:[#allocation12 + $0x140] sm:$0xff]   ;;  %v4184_v29 = vcombine.low %v4177_v37, %v4178_v56 }
 0x2e1   : > { %v9314_v16 = vpop.f32.mrb[101].mxu0  ;;  %9509 = vmatprep.subr.bf16.mxu1 %v10628_v48 }
 0x2e2   : > { %15027 = vst [vmem:[#allocation54_spill] sm:$0xff] %v13300_v17  ;;  %v9315_v21 = vadd.f32 %v9314_v16, %v9313_v43  ;;  %v9316_v38 = vpop.f32.mrb[102].mxu0  ;;  %v9261_v11 = vpop.f32.mrb[108].mxu1  ;;  %v4205_v43 = vld [vmem:[#allocation3 + $0x8] sm:$0xf]  ;;  %v4187_v48 = vpack.c.bf16 %v4184_v29, %v4183_v13 }
 0x2e3   : > { %v9317_v49 = vpop.f32.mrb[103].mxu0  ;;  %v9262_v7 = vpop.f32.mrb[109].mxu1  ;;  %v4206_v16 = vld [vmem:[#allocation3 + $0x20] sm:$0xf] }
 0x2e4   : > { %v9318_v6 = vadd.f32 %v9317_v49, %v9316_v38  ;;  %v9263_v2 = vadd.f32 %v9262_v7, %v9261_v11  ;;  %v9264_v47 = vpop.f32.mrb[110].mxu1  ;;  %v13306_v15 = vadd.f32 %v9315_v21, %v13179_v4  ;;  %v8692_v4 = vld [vmem:[%s14882_s12] ss:$0 sm:$0xff]  ;;  %v4207_v21 = vld [vmem:[#allocation3 + $0x38] sm:$0xf]  ;;  %v4213_v11 = vcombine.low %v4205_v43, %v4206_v16 }
 0x2e5   : > { %v9265_v5 = vpop.f32.mrb[111].mxu1  ;;  %v4208_v38 = vld [vmem:[#allocation3 + $0x50] sm:$0xf]  ;;  %v4195_v49 = vcombine.high %v8692_v4, %v8692_v4  ;;  %v4197_v7 = vmul.f32 %v8692_v4, %v4175_v36  ;;  %v4199_v55 = vmul.f32 %v8692_v4, %v4177_v37 }
 0x2e6   : > { %v13309_v34 = vadd.f32 %v9263_v2, %v13221_v1  ;;  %v9266_v31 = vadd.f32 %v9265_v5, %v9264_v47  ;;  %v13312_v52 = vadd.f32 %v9318_v6, %v13182_v50  ;;  %v4214_v62 = vcombine.low %v4207_v21, %v4208_v38  ;;  %v8693_v1 = vld [vmem:[%s14882_s12 + $0x1] ss:$0 sm:$0xff] }
 0x2e7   : > { %v4225_v6 = vcombine.high %v8693_v1, %v8693_v1  ;;  %v4227_v2 = vmul.f32 %v8693_v1, %v4205_v43  ;;  %v4229_v47 = vmul.f32 %v8693_v1, %v4207_v21  ;;  %v4198_v44 = vmul.f32 %v4195_v49, %v4176_v0 }
 0x2e8   : > { %15028 = vst [vmem:[#allocation55_spill] sm:$0xff] %v13309_v34  ;;  %v9319_v5 = vpop.f32.mrb[104].mxu0  ;;  %v13321_v50 = vadd.f32 %v9266_v31, %v13224_v19  ;;  %v4200_v57 = vmul.f32 %v4195_v49, %v4178_v56  ;;  %v4217_v8 = vpack.c.bf16 %v4214_v62, %v4213_v11  ;;  %v10634_v34 = vld [vmem:[#allocation12 + $0x148] sm:$0xff]  }
 0x2e9   : > { %v9320_v33 = vpop.f32.mrb[105].mxu0  ;;  %v4228_v63 = vmul.f32 %v4225_v6, %v4206_v16  ;;  %v4230_v3 = vmul.f32 %v4225_v6, %v4208_v38  ;;  %v13323_v25 = vadd.f32 %v4227_v2, %v4197_v7  ;;  %v13325_v19 = vadd.f32 %v4229_v47, %v4199_v55  ;;  %v10635_v16 = vld [vmem:[#allocation12 + $0x108] sm:$0xff]  }
 0x2ea   : > { %v9321_v36 = vadd.f32 %v9320_v33, %v9319_v5  ;;  %v9322_v37 = vpop.f32.mrb[106].mxu0  ;;  %v9267_v4 = vpop.f32.mrb[112].mxu1  ;;  %5063 = vmatprep.mubr.bf16.mxu1 %v4217_v8 }
 0x2eb   : > { %v9323_v17 = vpop.f32.mrb[107].mxu0  ;;  %v9268_v31 = vpop.f32.mrb[113].mxu1  ;;  %v13330_v13 = vadd.f32 %v4228_v63, %v4198_v44  ;;  %5064 = vmatmul.mubr.bf16.vlgmr.msra.gmra.mrb[160].mxu1 %v4187_v48  ;;  %v13332_v56 = vadd.f32 %v4230_v3, %v4200_v57  ;;  %v10639_v44 = vld [vmem:[#allocation12 + $0x110] sm:$0xff]   ;;  %v10646_v48 = vld [vmem:[#allocation12 + $0x160] sm:$0xff]  }
 0x2ec   : > { %v9324_v43 = vadd.f32 %v9323_v17, %v9322_v37  ;;  %v9269_v21 = vadd.f32 %v9268_v31, %v9267_v4  ;;  %v9270_v0 = vpop.f32.mrb[114].mxu1  ;;  %v13328_v62 = vadd.f32 %v9321_v36, %v13191_v40  ;;  %9510 = vmatpush3.bf16.msra.mxu1 %v10631_v22  ;;  %v10638_v17 = vld [vmem:[#allocation12 + $0x150] sm:$0xff]   ;;  %v970_v36 = vld [vmem:[%s13285_s1 + $0xc] sm:$0xf]  ;;  %v10647_v31 = vld [vmem:[#allocation12 + $0x120] sm:$0xff]   ;;  %s15140_s1 = sld [smem:[#allocation86_spill]] }
 0x2ed   : > { %v9271_v33 = vpop.f32.mrb[115].mxu1  ;;  %9511 = vmatprep.subr.bf16.mxu1 %v10634_v34  ;;  %975 = vst [vmem:[#allocation3 + $0x68] sm:$0xf] %v970_v36 }
 0x2ee   : > { %v13335_v29 = vadd.f32 %v9269_v21, %v13233_v28  ;;  %v9272_v55 = vadd.f32 %v9271_v33, %v9270_v0  ;;  %v13338_v8 = vadd.f32 %v9324_v43, %v13194_v60  ;;  %v10642_v28 = vld [vmem:[#allocation12 + $0x158] sm:$0xff]  }
 0x2f0   : > { %v9325_v38 = vpop.f32.mrb[108].mxu0  ;;  %v13341_v40 = vadd.f32 %v9272_v55, %v13236_v58  ;;  %9512 = vmatpush3.bf16.msra.mxu1 %v10635_v16  ;;  %v10643_v58 = vld [vmem:[#allocation12 + $0x118] sm:$0xff]  }
 0x2f1   : > { %v9326_v63 = vpop.f32.mrb[109].mxu0  ;;  %9513 = vmatprep.subr.bf16.mxu1 %v10638_v17 }
 0x2f2   : > { %v9327_v3 = vadd.f32 %v9326_v63, %v9325_v38  ;;  %v9328_v57 = vpop.f32.mrb[110].mxu0  ;;  %v9273_v22 = vpop.f32.mrb[116].mxu1 }
 0x2f3   : > { %v9329_v11 = vpop.f32.mrb[111].mxu0  ;;  %v9274_v49 = vpop.f32.mrb[117].mxu1 }
 0x2f4   : > { %v9330_v7 = vadd.f32 %v9329_v11, %v9328_v57  ;;  %v9275_v60 = vadd.f32 %v9274_v49, %v9273_v22  ;;  %v9276_v1 = vpop.f32.mrb[118].mxu1  ;;  %v13344_v34 = vadd.f32 %v9327_v3, %v13203_v53  ;;  %9514 = vmatpush3.bf16.msra.mxu1 %v10639_v44  ;;  %v10654_v22 = vld [vmem:[#allocation12 + $0x170] sm:$0xff]  }
 0x2f5   : > { %v9277_v5 = vpop.f32.mrb[119].mxu1  ;;  %9515 = vmatprep.subr.bf16.mxu1 %v10642_v28  ;;  %v10655_v49 = vld [vmem:[#allocation12 + $0x130] sm:$0xff]  }
 0x2f6   : > { %v13347_v6 = vadd.f32 %v9275_v60, %v13245_v41  ;;  %v9278_v2 = vadd.f32 %v9277_v5, %v9276_v1  ;;  %v13350_v47 = vadd.f32 %v9330_v7, %v13206_v18  ;;  %v10650_v41 = vld [vmem:[#allocation12 + $0x168] sm:$0xff]   ;;  %v13368_v7 = vld [vmem:[#allocation3 + $0x9] sm:$0xf] }
 0x2f7   : > { %15029 = vst [vmem:[#allocation56_spill] sm:$0xff] %v13368_v7  ;;  %v13372_v1 = vld [vmem:[#allocation3 + $0x39] sm:$0xf] }
 0x2f8   : > { %v9331_v37 = vpop.f32.mrb[112].mxu0  ;;  %v13354_v4 = vadd.f32 %v9278_v2, %v13248_v39  ;;  %9516 = vmatpush3.bf16.msra.mxu1 %v10643_v58  ;;  %v10651_v39 = vld [vmem:[#allocation12 + $0x128] sm:$0xff]   ;;  %15031 = vst [vmem:[#allocation58_spill] sm:$0xff] %v13372_v1 }
 0x2f9   : > { %v9332_v53 = vpop.f32.mrb[113].mxu0  ;;  %9517 = vmatprep.subr.bf16.mxu1 %v10646_v48 }
 0x2fa   : > { %v9333_v43 = vadd.f32 %v9332_v53, %v9331_v37  ;;  %v9334_v21 = vpop.f32.mrb[114].mxu0  ;;  %v9279_v0 = vpop.f32.mrb[120].mxu1  ;;  %v13379_v37 = vld [vmem:[#allocation3 + $0x4f] sm:$0xf]  ;;  %v8695_v53 = vld [vmem:[%s14882_s12 + $0x3] ss:$0 sm:$0xff] }
 0x2fb   : > { %v9335_v33 = vpop.f32.mrb[115].mxu0  ;;  %v9280_v16 = vpop.f32.mrb[121].mxu1  ;;  %15032 = vst [vmem:[#allocation59_spill] sm:$0xff] %v13379_v37 }
 0x2fc   : > { %v9336_v18 = vadd.f32 %v9335_v33, %v9334_v21  ;;  %v9281_v55 = vadd.f32 %v9280_v16, %v9279_v0  ;;  %v9282_v17 = vpop.f32.mrb[122].mxu1  ;;  %v13357_v38 = vadd.f32 %v9333_v43, %v13215_v30  ;;  %9518 = vmatpush3.bf16.msra.mxu1 %v10647_v31  ;;  %v13370_v30 = vld [vmem:[#allocation3 + $0x1f] sm:$0xf]  ;;  %v4285_v0 = vcombine.high %v8695_v53, %v8695_v53 }
 0x2fd   : > { %v9283_v63 = vpop.f32.mrb[123].mxu1  ;;  %9519 = vmatprep.subr.bf16.mxu1 %v10650_v41  ;;  %15030 = vst [vmem:[#allocation57_spill] sm:$0xff] %v13370_v30  ;;  %v13384_v21 = vld [vmem:[#allocation3 + $0x21] sm:$0xf]  ;;  %v4287_v41 = vmul.f32 %v8695_v53, %v13370_v30  ;;  %v4289_v33 = vmul.f32 %v8695_v53, %v13379_v37 }
 0x2fe   : > { %v13360_v44 = vadd.f32 %v9281_v55, %v13257_v14  ;;  %v9284_v3 = vadd.f32 %v9283_v63, %v9282_v17  ;;  %v13363_v57 = vadd.f32 %v9336_v18, %v13218_v27  ;;  %v8694_v27 = vld [vmem:[%s14882_s12 + $0x2] ss:$0 sm:$0xff]  ;;  %v10661_v14 = vld [vmem:[#allocation12 + $0x178] sm:$0xff]   ;;  %15033 = vst [vmem:[#allocation60_spill] sm:$0xff] %v13384_v21  ;;  %v13391_v63 = vld [vmem:[#allocation3 + $0x51] sm:$0xf] }
 0x2ff   : > { %v4257_v48 = vmul.f32 %v8694_v27, %v13368_v7  ;;  %v4259_v36 = vmul.f32 %v8694_v27, %v13372_v1  ;;  %15034 = vst [vmem:[#allocation61_spill] sm:$0xff] %v13391_v63 }
 0x300   : > { %v9337_v28 = vpop.f32.mrb[116].mxu0  ;;  %v13366_v11 = vadd.f32 %v9284_v3, %v13263_v10  ;;  %9520 = vmatpush3.bf16.msra.mxu1 %v10651_v39  ;;  %v4255_v10 = vcombine.high %v8694_v27, %v8694_v27  ;;  %v13397_v27 = vld [vmem:[#allocation3 + $0x37] sm:$0xf] }
 0x301   : > { %v9338_v60 = vpop.f32.mrb[117].mxu0  ;;  %9521 = vmatprep.subr.bf16.mxu1 %v10654_v22  ;;  %15035 = vst [vmem:[#allocation62_spill] sm:$0xff] %v13397_v27 }
 0x302   : > { %v9339_v5 = vadd.f32 %v9338_v60, %v9337_v28  ;;  %v9340_v58 = vpop.f32.mrb[118].mxu0  ;;  %v9285_v2 = vpop.f32.mrb[124].mxu1  ;;  %v4258_v39 = vmul.f32 %v4255_v10, %v13384_v21  ;;  %v4260_v22 = vmul.f32 %v4255_v10, %v13391_v63  ;;  %v4261_v28 = vadd.f32 %v4257_v48, %v13323_v25  ;;  %v8696_v25 = vld [vmem:[%s14882_s12 + $0x4] ss:$0 sm:$0xff]  ;;  %v8697_v21 = vld [vmem:[%s14882_s12 + $0x5] ss:$0 sm:$0xff] }
 0x303   : > { %v9341_v31 = vpop.f32.mrb[119].mxu0  ;;  %v9286_v43 = vpop.f32.mrb[125].mxu1  ;;  %v4263_v60 = vadd.f32 %v4259_v36, %v13325_v19  ;;  %v4325_v36 = vld [vmem:[#allocation3 + $0x21] sm:$0xf] }
 0x304   : > { %v9342_v16 = vadd.f32 %v9341_v31, %v9340_v58  ;;  %v9287_v18 = vadd.f32 %v9286_v43, %v9285_v2  ;;  %v9288_v55 = vpop.f32.mrb[126].mxu1  ;;  %v13389_v17 = vadd.f32 %v9339_v5, %v13227_v23  ;;  %9522 = vmatpush3.bf16.msra.mxu1 %v10655_v49  ;;  %v10663_v58 = vld [vmem:[#allocation12 + $0x138] sm:$0xff]   ;;  %v4262_v53 = vadd.f32 %v4258_v39, %v13330_v13  ;;  %v13408_v49 = vld [vmem:[#allocation3 + $0x20] sm:$0xf]  ;;  %v4326_v13 = vld [vmem:[#allocation3 + $0x39] sm:$0xf] }
 0x305   : > { %v9289_v3 = vpop.f32.mrb[127].mxu1  ;;  %v13406_v31 = vld [vmem:[#allocation3 + $0x67] sm:$0xf]  ;;  %9523 = vmatprep.subr.bf16.mxu1 %v10661_v14  ;;  %v4264_v19 = vadd.f32 %v4260_v22, %v13332_v56  ;;  %v4291_v48 = vadd.f32 %v4287_v41, %v4261_v28  ;;  %v13421_v22 = vld [vmem:[#allocation3 + $0x38] sm:$0xf]  ;;  %v4317_v41 = vmul.f32 %v8696_v25, %v13408_v49 }
 0x306   : > { %v13400_v2 = vadd.f32 %v9287_v18, %v13270_v35  ;;  %v9290_v23 = vadd.f32 %v9289_v3, %v9288_v55  ;;  %v13403_v5 = vadd.f32 %v9342_v16, %v13230_v42  ;;  %15036 = vst [vmem:[#allocation63_spill] sm:$0xff] %v13406_v31  ;;  %v4288_v35 = vmul.f32 %v4285_v0, %v13397_v27  ;;  %v13416_v42 = vld [vmem:[#allocation3 + $0x50] sm:$0xf]  ;;  %v4328_v39 = vld [vmem:[#allocation3 + $0x69] sm:$0xf] }
 0x307   : > { %v4290_v10 = vmul.f32 %v4285_v0, %v13406_v31  ;;  %v4293_v16 = vadd.f32 %v4289_v33, %v4263_v60  ;;  %v4315_v18 = vcombine.high %v8696_v25, %v8696_v25  ;;  %v4327_v55 = vld [vmem:[#allocation3 + $0x51] sm:$0xf]  ;;  %v13423_v0 = vld [vmem:[#allocation3 + $0x68] sm:$0xf]  ;;  %v4319_v28 = vmul.f32 %v8696_v25, %v13416_v42  ;;  %v13430_v33 = vld [vmem:[%s14877_s7] ss:$0 sm:$0xff] }
 0x308   : > { %v9343_v43 = vpop.f32.mrb[120].mxu0  ;;  %v13419_v14 = vadd.f32 %v9290_v23, %v13274_v59  ;;  %v4292_v1 = vadd.f32 %v4288_v35, %v4262_v53  ;;  %9524 = vmatpush3.bf16.msra.mxu1 %v10663_v58  ;;  %v4333_v23 = vcombine.low %v4325_v36, %v4326_v13  ;;  %v13434_v53 = vld [vmem:[#allocation2] sm:$0xff] }
 0x309   : > { %v9344_v3 = vpop.f32.mrb[121].mxu0  ;;  %v4294_v56 = vadd.f32 %v4290_v10, %v4264_v19  ;;  %v4318_v60 = vmul.f32 %v4315_v18, %v13421_v22  ;;  %v4320_v58 = vmul.f32 %v4315_v18, %v13423_v0  ;;  %15038 = vst [vmem:[#allocation65_spill] sm:$0xff] %v13434_v53  ;;  %10207 = vmatprep.subr.bf16.mxu1 %v13434_v53  ;;  %v13444_v18 = vld [vmem:[%s14878_s8] ss:$0 sm:$0xff] }
 0x30a   : > { %15037 = vst [vmem:[#allocation64_spill] sm:$0xff] %v13419_v14  ;;  %v9345_v63 = vadd.f32 %v9344_v3, %v9343_v43  ;;  %v9346_v7 = vpop.f32.mrb[122].mxu0  ;;  %v10177_v59 = vpop.f32.mrb[128].mxu1  ;;  %v4321_v10 = vadd.f32 %v4317_v41, %v4291_v48  ;;  %v4323_v43 = vadd.f32 %v4319_v28, %v4293_v16  ;;  %v4334_v3 = vcombine.low %v4327_v55, %v4328_v39 }
 0x30b   : > { %v9347_v19 = vpop.f32.mrb[123].mxu0  ;;  %v3900_v25 = vadd.f32 %v10177_v59, %v13306_v15  ;;  %v3891_v35 = vpop.f32.mrb[129].mxu1  ;;  %v4322_v15 = vadd.f32 %v4318_v60, %v4292_v1  ;;  %v4324_v28 = vadd.f32 %v4320_v58, %v4294_v56  ;;  %v4347_v1 = vmul.f32 %v8697_v21, %v4325_v36 }
 0x30c   : > { %v9348_v37 = vadd.f32 %v9347_v19, %v9346_v7  ;;  %v3892_v31 = vadd.f32 %v3891_v35, %v13291_v9  ;;  %v10178_v30 = vpop.f32.mrb[130].mxu1  ;;  %v13448_v27 = vadd.f32 %v9345_v63, %v13239_v54  ;;  %v4337_v59 = vpack.c.bf16 %v4334_v3, %v4333_v23 }
 0x30d   : > { %v4027_v48 = vmul.f32 %v13430_v33, %v3900_v25  ;;  %v3903_v16 = vadd.f32 %v10178_v30, %v13312_v52  ;;  %v3894_v41 = vpop.f32.mrb[131].mxu1  ;;  %v4345_v9 = vcombine.high %v8697_v21, %v8697_v21  ;;  %v4349_v63 = vmul.f32 %v8697_v21, %v4327_v55 }
 0x30e   : > { %v4025_v7 = vmul.f32 %v13430_v33, %v3892_v31  ;;  %v3895_v19 = vadd.f32 %v3894_v41, %v13297_v51  ;;  %v13455_v14 = vadd.f32 %v9348_v37, %v13242_v12  ;;  %5145 = vmatprep.mubr.bf16.mxu1 %v4337_v59  ;;  %v13468_v37 = vadd.f32 %v4347_v1, %v4321_v10  ;;  %v10670_v59 = vld [vmem:[#allocation12 + $0x200] sm:$0xff]   ;;  %v4418_v10 = vld [vmem:[#allocation3 + $0x69] sm:$0xf] }
 0x30f   : > { %v13458_v35 = vadd.f32 %v13444_v18, %v4027_v48  ;;  %v4028_v54 = vmul.f32 %v13430_v33, %v3903_v16  ;;  %v4348_v56 = vmul.f32 %v4345_v9, %v4326_v13  ;;  %v4350_v51 = vmul.f32 %v4345_v9, %v4328_v39 }
 0x310   : > { %v9349_v52 = vpop.f32.mrb[124].mxu0  ;;  %v13462_v30 = vadd.f32 %v13444_v18, %v4025_v7  ;;  %v4026_v31 = vmul.f32 %v13430_v33, %v3895_v19  ;;  %v13470_v58 = vadd.f32 %v4349_v63, %v4323_v43  ;;  %v4303_v21 = vcombine.low %v13408_v49, %v13421_v22  ;;  %v10673_v63 = vld [vmem:[#allocation12 + $0x208] sm:$0xff]  }
 0x311   : > { %v9350_v60 = vpop.f32.mrb[125].mxu0  ;;  %v13466_v12 = vadd.f32 %v13444_v18, %v4028_v54  ;;  %v13477_v3 = vadd.f32 %v4348_v56, %v4322_v15  ;;  %v13479_v13 = vadd.f32 %v4350_v51, %v4324_v28  ;;  %v4304_v49 = vcombine.low %v13416_v42, %v13423_v0 }
 0x312   : > { %v9351_v36 = vadd.f32 %v9350_v60, %v9349_v52  ;;  %v9352_v55 = vpop.f32.mrb[126].mxu0  ;;  %v13475_v23 = vadd.f32 %v13444_v18, %v4026_v31  ;;  %v10181_v25 = vpop.f32.mrb[132].mxu1 }
 0x313   : > { %v9353_v39 = vpop.f32.mrb[127].mxu0  ;;  %v3916_v43 = vadd.f32 %v10181_v25, %v13344_v34  ;;  %v3907_v48 = vpop.f32.mrb[133].mxu1  ;;  %v4307_v9 = vpack.c.bf16 %v4304_v49, %v4303_v21 }
 0x314   : > { %v9354_v22 = vadd.f32 %v9353_v39, %v9352_v55  ;;  %v3908_v41 = vadd.f32 %v3907_v48, %v13328_v62  ;;  %v10182_v15 = vpop.f32.mrb[134].mxu1  ;;  %v13490_v28 = vadd.f32 %v9351_v36, %v13251_v24 }
 0x315   : > { %v4031_v7 = vmul.f32 %v13430_v33, %v3916_v43  ;;  %v3919_v19 = vadd.f32 %v10182_v15, %v13350_v47  ;;  %v3910_v34 = vpop.f32.mrb[135].mxu1  ;;  %5146 = vmatmul.mubr.bf16.vlgmr.msra.gmra.mrb[164].mxu1 %v4307_v9 }
 0x316   : > { %v4029_v54 = vmul.f32 %v13430_v33, %v3908_v41  ;;  %v3911_v42 = vadd.f32 %v3910_v34, %v13338_v8  ;;  %v13497_v0 = vadd.f32 %v9354_v22, %v13254_v46  ;;  %10208 = vmatpush3.bf16.msra.mxu1 %v10670_v59  ;;  %v10676_v41 = vld [vmem:[#allocation12 + $0x210] sm:$0xff]   ;;  %10223 = vmatprep.mubr.msk.bf16.mxu1 %vm11237_vm0, %v13434_v53 }
 0x317   : > { %v4032_v62 = vmul.f32 %v13430_v33, %v3919_v19  ;;  %v13502_v47 = vadd.f32 %v13444_v18, %v4031_v7  ;;  %10209 = vmatprep.subr.bf16.mxu1 %v13434_v53 }
 0x318   : > { %v9355_v1 = vpop.f32.mrb[128].mxu0  ;;  %v4030_v24 = vmul.f32 %v13430_v33, %v3911_v42  ;;  %v13509_v56 = vadd.f32 %v13444_v18, %v4029_v54  ;;  %v10679_v54 = vld [vmem:[#allocation12 + $0x218] sm:$0xff]  }
 0x319   : > { %v9356_v52 = vpop.f32.mrb[129].mxu0  ;;  %v13505_v31 = vadd.f32 %v13444_v18, %v4032_v62 }
 0x31a   : > { %v9357_v8 = vadd.f32 %v9356_v52, %v9355_v1  ;;  %v9358_v46 = vpop.f32.mrb[130].mxu0  ;;  %v13512_v51 = vadd.f32 %v13444_v18, %v4030_v24  ;;  %v10185_v60 = vpop.f32.mrb[136].mxu1  ;;  %10210 = vmatpush3.bf16.msra.mxu1 %v10673_v63 }
 0x31b   : > { %v9359_v21 = vpop.f32.mrb[131].mxu0  ;;  %v3932_v55 = vadd.f32 %v10185_v60, %v13389_v17  ;;  %v3923_v25 = vpop.f32.mrb[137].mxu1  ;;  %10211 = vmatprep.subr.bf16.mxu1 %v13434_v53 }
 0x31c   : > { %v9360_v39 = vadd.f32 %v9359_v21, %v9358_v46  ;;  %v3924_v48 = vadd.f32 %v3923_v25, %v13357_v38  ;;  %v10186_v49 = vpop.f32.mrb[138].mxu1  ;;  %v13521_v22 = vadd.f32 %v9357_v8, %v13260_v45  ;;  %v13551_v46 = vld [vmem:[#allocation3 + $0x67] sm:$0xf] }
 0x31d   : > { %v4035_v15 = vmul.f32 %v13430_v33, %v3932_v55  ;;  %v3935_v59 = vadd.f32 %v10186_v49, %v13403_v5  ;;  %v3926_v7 = vpop.f32.mrb[139].mxu1  ;;  %15040 = vst [vmem:[#allocation67_spill] sm:$0xff] %v13551_v46 }
 0x31e   : > { %v4033_v17 = vmul.f32 %v13430_v33, %v3924_v48  ;;  %v3927_v19 = vadd.f32 %v3926_v7, %v13363_v57  ;;  %v13529_v34 = vadd.f32 %v9360_v39, %v13266_v32  ;;  %10212 = vmatpush3.bf16.msra.mxu1 %v10676_v41  ;;  %v13543_v32 = vld [vmem:[#allocation3 + $0x37] sm:$0xf]  ;;  %v8698_v57 = vld [vmem:[%s14882_s12 + $0x6] ss:$0 sm:$0xff] }
 0x31f   : > { %v4036_v38 = vmul.f32 %v13430_v33, %v3935_v59  ;;  %v13534_v5 = vadd.f32 %v13444_v18, %v4035_v15  ;;  %10213 = vmatprep.subr.bf16.mxu1 %v13434_v53  ;;  %15039 = vst [vmem:[#allocation66_spill] sm:$0xff] %v13543_v32  ;;  %v4376_v60 = vcombine.high %v8698_v57, %v8698_v57 }
 0x320   : > { %v9361_v45 = vpop.f32.mrb[132].mxu0  ;;  %v4034_v9 = vmul.f32 %v13430_v33, %v3927_v19  ;;  %v13537_v62 = vadd.f32 %v13444_v18, %v4033_v17  ;;  %v4378_v21 = vmul.f32 %v8698_v57, %v13543_v32  ;;  %v4380_v49 = vmul.f32 %v8698_v57, %v13551_v46  ;;  %v10682_v19 = vld [vmem:[#allocation12 + $0x220] sm:$0xff]  }
 0x321   : > { %v9362_v42 = vpop.f32.mrb[133].mxu0  ;;  %v13540_v1 = vadd.f32 %v13444_v18, %v4036_v38  ;;  %v13562_v38 = vld [vmem:[#allocation3 + $0x4f] sm:$0xf] }
 0x322   : > { %v9363_v24 = vadd.f32 %v9362_v42, %v9361_v45  ;;  %v9364_v63 = vpop.f32.mrb[134].mxu0  ;;  %v13549_v52 = vadd.f32 %v13444_v18, %v4034_v9  ;;  %v10189_v8 = vpop.f32.mrb[140].mxu1  ;;  %10214 = vmatpush3.bf16.msra.mxu1 %v10679_v54  ;;  %15041 = vst [vmem:[#allocation68_spill] sm:$0xff] %v13562_v38  ;;  %v13564_v45 = vld [vmem:[#allocation3 + $0x7f] sm:$0xf]  ;;  %v4379_v57 = vmul.f32 %v4376_v60, %v13562_v38 }
 0x323   : > { %v9365_v55 = vpop.f32.mrb[135].mxu0  ;;  %v3948_v39 = vadd.f32 %v10189_v8, %v13490_v28  ;;  %v3939_v48 = vpop.f32.mrb[141].mxu1  ;;  %15042 = vst [vmem:[#allocation69_spill] sm:$0xff] %v13564_v45  ;;  %10215 = vmatprep.subr.bf16.mxu1 %v13434_v53  ;;  %v8699_v8 = vld [vmem:[%s14882_s12 + $0x7] ss:$0 sm:$0xff] }
 0x324   : > { %v9366_v41 = vadd.f32 %v9365_v55, %v9364_v63  ;;  %v3940_v59 = vadd.f32 %v3939_v48, %v13448_v27  ;;  %v10190_v7 = vpop.f32.mrb[142].mxu1  ;;  %v3803_v17 = vadd.f32 %v9363_v24, %v13277_v20  ;;  %v4381_v27 = vmul.f32 %v4376_v60, %v13564_v45 }
 0x325   : > { %v4039_v28 = vmul.f32 %v13430_v33, %v3948_v39  ;;  %v3951_v9 = vadd.f32 %v10190_v7, %v13497_v0  ;;  %v3942_v42 = vpop.f32.mrb[143].mxu1  ;;  %v4382_v24 = vadd.f32 %v4378_v21, %v13468_v37  ;;  %v4383_v55 = vadd.f32 %v4379_v57, %v13477_v3  ;;  %v13586_v21 = vld [vmem:[#allocation3 + $0x38] sm:$0xf]  ;;  %v13603_v57 = vld [vmem:[#allocation3 + $0x80] sm:$0xf] }
 0x326   : > { %v4037_v63 = vmul.f32 %v13430_v33, %v3940_v59  ;;  %v3943_v20 = vadd.f32 %v3942_v42, %v13455_v14  ;;  %v3806_v54 = vadd.f32 %v9366_v41, %v13280_v61  ;;  %v4384_v39 = vadd.f32 %v4380_v49, %v13470_v58  ;;  %10216 = vmatpush3.bf16.msra.mxu1 %v10682_v19  ;;  %v10685_v61 = vld [vmem:[#allocation12 + $0x228] sm:$0xff]   ;;  %v13595_v58 = vld [vmem:[#allocation3 + $0x50] sm:$0xf]  ;;  %v13597_v49 = vld [vmem:[#allocation3 + $0x68] sm:$0xf] }
 0x327   : > { %v4040_v0 = vmul.f32 %v13430_v33, %v3951_v9  ;;  %v13582_v60 = vadd.f32 %v13444_v18, %v4039_v28  ;;  %v4385_v37 = vadd.f32 %v4381_v27, %v13479_v13  ;;  %15043 = vst [vmem:[#allocation70_spill] sm:$0xff] %v13586_v21  ;;  %10217 = vmatprep.subr.bf16.mxu1 %v13434_v53  ;;  %15044 = vst [vmem:[#allocation71_spill] sm:$0xff] %v13595_v58 }
 0x328   : > { %v9367_v48 = vpop.f32.mrb[136].mxu0  ;;  %v4038_v14 = vmul.f32 %v13430_v33, %v3943_v20  ;;  %v13589_v59 = vadd.f32 %v13444_v18, %v4037_v63  ;;  %15045 = vst [vmem:[#allocation72_spill] sm:$0xff] %v13597_v49  ;;  %v4406_v7 = vcombine.high %v8699_v8, %v8699_v8  ;;  %v4408_v19 = vmul.f32 %v8699_v8, %v13586_v21 }
 0x329   : > { %v9368_v41 = vpop.f32.mrb[137].mxu0  ;;  %v13592_v3 = vadd.f32 %v13444_v18, %v4040_v0  ;;  %15046 = vst [vmem:[#allocation73_spill] sm:$0xff] %v13603_v57  ;;  %v4410_v27 = vmul.f32 %v8699_v8, %v13597_v49 }
 0x32a   : > { %v9369_v28 = vadd.f32 %v9368_v41, %v9367_v48  ;;  %v9370_v13 = vpop.f32.mrb[138].mxu0  ;;  %v13601_v9 = vadd.f32 %v13444_v18, %v4038_v14  ;;  %v10193_v42 = vpop.f32.mrb[144].mxu1  ;;  %v4409_v15 = vmul.f32 %v4406_v7, %v13595_v58  ;;  %v4411_v36 = vmul.f32 %v4406_v7, %v13603_v57  ;;  %v4416_v48 = vld [vmem:[#allocation3 + $0x39] sm:$0xf]  ;;  %10218 = vmatpush3.bf16.msra.mxu1 %v10685_v61  ;;  %v15047_v61 = vld [vmem:[#allocation54_spill] sm:$0xff] }
 0x32b   : > { %v9371_v63 = vpop.f32.mrb[139].mxu0  ;;  %v3964_v0 = vadd.f32 %v10193_v42, %v3803_v17  ;;  %v3955_v25 = vpop.f32.mrb[145].mxu1  ;;  %v10688_v17 = vld [vmem:[#allocation12 + $0x230] sm:$0xff]   ;;  %v4417_v42 = vld [vmem:[#allocation3 + $0x51] sm:$0xf]  ;;  %10219 = vmatprep.subr.bf16.mxu1 %v13434_v53  ;;  %v4412_v45 = vadd.f32 %v4408_v19, %v4382_v24  ;;  %v4414_v41 = vadd.f32 %v4410_v27, %v4384_v39  ;;  %v15048_v58 = vld [vmem:[#allocation55_spill] sm:$0xff] }
 0x32c   : > { %v9372_v14 = vadd.f32 %v9371_v63, %v9370_v13  ;;  %v3956_v8 = vadd.f32 %v3955_v25, %v13521_v22  ;;  %v10194_v43 = vpop.f32.mrb[146].mxu1  ;;  %v3811_v20 = vadd.f32 %v9369_v28, %v13294_v26  ;;  %v4413_v13 = vadd.f32 %v4409_v15, %v4383_v55  ;;  %v4419_v63 = vld [vmem:[#allocation3 + $0x81] sm:$0xf]  ;;  %v8700_v22 = vld [vmem:[%s14882_s12 + $0x8] ss:$0 sm:$0xff] }
 0x32d   : > { %v4043_v7 = vmul.f32 %v13430_v33, %v3964_v0  ;;  %v3967_v16 = vadd.f32 %v10194_v43, %v3806_v54  ;;  %v3958_v46 = vpop.f32.mrb[147].mxu1  ;;  %v4415_v43 = vadd.f32 %v4411_v36, %v4385_v37  ;;  %v4424_v54 = vcombine.low %v4416_v48, %v4417_v42  ;;  %v10693_v55 = vld [vmem:[#allocation12 + $0x238] sm:$0xff]  }
 0x32e   : > { %v4041_v25 = vmul.f32 %v13430_v33, %v3956_v8  ;;  %v3959_v26 = vadd.f32 %v3958_v46, %v13529_v34  ;;  %v3814_v28 = vadd.f32 %v9372_v14, %v15047_v61  ;;  %10220 = vmatpush3.bf16.msra.mxu1 %v10688_v17  ;;  %v4425_v19 = vcombine.low %v4418_v10, %v4419_v63 }
 0x32f   : > { %v4044_v0 = vmul.f32 %v13430_v33, %v3967_v16  ;;  %v4082_v24 = vadd.f32 %v13444_v18, %v4043_v7  ;;  %v4436_v38 = vcombine.high %v8700_v22, %v8700_v22  ;;  %10221 = vmatprep.subr.bf16.mxu1 %v13434_v53  ;;  %v4438_v46 = vmul.f32 %v8700_v22, %v4416_v48 }
 0x330   : > { %v9373_v32 = vpop.f32.mrb[140].mxu0  ;;  %v4042_v15 = vmul.f32 %v13430_v33, %v3959_v26  ;;  %v4080_v8 = vadd.f32 %v13444_v18, %v4041_v25  ;;  %v4440_v16 = vmul.f32 %v8700_v22, %v4418_v10  ;;  %v4428_v14 = vpack.c.bf16 %v4425_v19, %v4424_v54 }
 0x331   : > { %v9374_v49 = vpop.f32.mrb[141].mxu0  ;;  %v4083_v34 = vadd.f32 %v13444_v18, %v4044_v0  ;;  %v4439_v7 = vmul.f32 %v4436_v38, %v4417_v42  ;;  %v4441_v57 = vmul.f32 %v4436_v38, %v4419_v63  ;;  %v13631_v21 = vadd.f32 %v4438_v46, %v4412_v45 }
 0x332   : > { %v9375_v36 = vadd.f32 %v9374_v49, %v9373_v32  ;;  %v9376_v39 = vpop.f32.mrb[142].mxu0  ;;  %v4081_v37 = vadd.f32 %v13444_v18, %v4042_v15  ;;  %v10197_v27 = vpop.f32.mrb[148].mxu1  ;;  %v13633_v25 = vadd.f32 %v4440_v16, %v4414_v41  ;;  %10222 = vmatpush3.bf16.msra.mxu1 %v10693_v55  ;;  %v15049_v41 = vpack.c.bf16 %v13475_v23, %v13462_v30 }
 0x333   : > { %v9377_v17 = vpop.f32.mrb[143].mxu0  ;;  %v3971_v26 = vpop.f32.mrb[149].mxu1  ;;  %v10403_v61 = vpack.c.bf16 %v4083_v34, %v4082_v24  ;;  %v13636_v22 = vadd.f32 %v4439_v7, %v4413_v13  ;;  %v13638_v54 = vadd.f32 %v4441_v57, %v4415_v43 }
 0x334   : > { %v9378_v0 = vadd.f32 %v9377_v17, %v9376_v39  ;;  %v3819_v53 = vadd.f32 %v9375_v36, %v15048_v58  ;;  %v3972_v48 = vadd.f32 %v3971_v26, %v3811_v20  ;;  %v10198_v10 = vpop.f32.mrb[150].mxu1  ;;  %v10399_v32 = vpack.c.bf16 %v4081_v37, %v4080_v8 }
 0x335   : > { %v3974_v49 = vpop.f32.mrb[151].mxu1  ;;  %10224 = vmatmul.mubr.bf16.vlgmr.msra.gmra.mrb[168].mxu1 %v4428_v14  ;;  %v15050_v8 = vpack.c.bf16 %v13466_v12, %v13458_v35  ;;  %v15051_v17 = vpack.c.bf16 %v13512_v51, %v13509_v56 }
 0x336   : > { %v3980_v42 = vadd.f32 %v10197_v27, %v3819_v53  ;;  %v4045_v24 = vmul.f32 %v13430_v33, %v3972_v48  ;;  %v3822_v38 = vadd.f32 %v9378_v0, %v13321_v50  ;;  %v3975_v45 = vadd.f32 %v3974_v49, %v3814_v28  ;;  %10400 = vmatprep.subr.bf16.mxu0 %v10399_v32 }
 0x337   : > { %10402 = vmatpush3.bf16.msra.mxu0 %v15049_v41 }
 0x338   : > { %v9379_v58 = vpop.f32.mrb[144].mxu0  ;;  %v4047_v20 = vmul.f32 %v13430_v33, %v3980_v42  ;;  %v3983_v63 = vadd.f32 %v10198_v10, %v3822_v38  ;;  %v4046_v13 = vmul.f32 %v13430_v33, %v3975_v45  ;;  %10404 = vmatprep.subr.bf16.mxu0 %v10403_v61  ;;  %v4084_v15 = vadd.f32 %v13444_v18, %v4045_v24 }
 0x339   : > { %v9380_v57 = vpop.f32.mrb[145].mxu0 }
 0x33a   : > { %v9381_v53 = vadd.f32 %v9380_v57, %v9379_v58  ;;  %v9382_v43 = vpop.f32.mrb[146].mxu0  ;;  %v4048_v50 = vmul.f32 %v13430_v33, %v3983_v63  ;;  %v4085_v28 = vadd.f32 %v13444_v18, %v4046_v13  ;;  %v10201_v55 = vpop.f32.mrb[152].mxu1  ;;  %v4086_v23 = vadd.f32 %v13444_v18, %v4047_v20 }
 0x33b   : > { %v9383_v30 = vpop.f32.mrb[147].mxu0  ;;  %v3987_v19 = vpop.f32.mrb[153].mxu1  ;;  %10406 = vmatpush3.bf16.msra.mxu0 %v15050_v8 }
 0x33c   : > { %v9384_v34 = vadd.f32 %v9383_v30, %v9382_v43  ;;  %v4087_v46 = vadd.f32 %v13444_v18, %v4048_v50  ;;  %v3827_v16 = vadd.f32 %v9381_v53, %v13335_v29  ;;  %v10202_v36 = vpop.f32.mrb[154].mxu1  ;;  %v10407_v39 = vpack.c.bf16 %v4085_v28, %v4084_v15 }
 0x33d   : > { %v3990_v37 = vpop.f32.mrb[155].mxu1 }
 0x33e   : > { %v3988_v27 = vadd.f32 %v3987_v19, %v3827_v16  ;;  %v3830_v14 = vadd.f32 %v9384_v34, %v13341_v40  ;;  %10408 = vmatprep.subr.bf16.mxu0 %v10407_v39  ;;  %v10411_v7 = vpack.c.bf16 %v4087_v46, %v4086_v23  ;;  %v15052_v40 = vpack.c.bf16 %v13505_v31, %v13502_v47 }
 0x33f   : > { %10410 = vmatpush3.bf16.msra.mxu0 %v15051_v17  ;;  %v15053_v31 = vpack.c.bf16 %v13549_v52, %v13537_v62  ;;  %v15054_v46 = vpack.c.bf16 %v13540_v1, %v13534_v5  ;;  %v15055_v17 = vld [vmem:[#allocation64_spill] sm:$0xff]  ;;  %v15056_v1 = vpack.c.bf16 %v13601_v9, %v13589_v59  ;;  %v15058_v59 = vld [vmem:[#allocation62_spill] sm:$0xff]  ;;  %v15059_v9 = vld [vmem:[#allocation57_spill] sm:$0xff] }
 0x340   : > { %v9385_v26 = vpop.f32.mrb[148].mxu0  ;;  %v4049_v35 = vmul.f32 %v13430_v33, %v3988_v27  ;;  %v3991_v12 = vadd.f32 %v3990_v37, %v3830_v14  ;;  %10412 = vmatprep.subr.bf16.mxu0 %v10411_v7 }
 0x341   : > { %v9386_v61 = vpop.f32.mrb[149].mxu0 }
 0x342   : > { %v9387_v0 = vadd.f32 %v9386_v61, %v9385_v26  ;;  %v9388_v29 = vpop.f32.mrb[150].mxu0  ;;  %v4050_v48 = vmul.f32 %v13430_v33, %v3991_v12  ;;  %v10205_v10 = vpop.f32.mrb[156].mxu1  ;;  %v4088_v51 = vadd.f32 %v13444_v18, %v4049_v35 }
 0x343   : > { %v9389_v32 = vpop.f32.mrb[151].mxu0  ;;  %v4003_v49 = vpop.f32.mrb[157].mxu1  ;;  %10414 = vmatpush3.bf16.msra.mxu0 %v15052_v40  ;;  %v4273_v40 = vcombine.low %v15059_v9, %v15058_v59 }
 0x344   : > { %v9390_v42 = vadd.f32 %v9389_v32, %v9388_v29  ;;  %v3835_v56 = vadd.f32 %v9387_v0, %v13347_v6  ;;  %v4089_v24 = vadd.f32 %v13444_v18, %v4050_v48  ;;  %v10206_v38 = vpop.f32.mrb[158].mxu1  ;;  %v10620_v48 = vld [vmem:[#allocation12 + $0xc0] sm:$0xff]   ;;  %v4096_v32 = vld [vmem:[%s14889_s19] sm:$0xff] }
 0x345   : > { %v4006_v45 = vpop.f32.mrb[159].mxu1 }
 0x346   : > { %v3996_v41 = vadd.f32 %v10201_v55, %v3835_v56  ;;  %v3838_v58 = vadd.f32 %v9390_v42, %v13354_v4  ;;  %v10415_v20 = vpack.c.bf16 %v4089_v24, %v4088_v51  ;;  %v15061_v42 = vld [vmem:[#allocation59_spill] sm:$0xff] }
 0x347   : > { %v4099_v51 = vld [vmem:[%s14889_s19 + $0x18] sm:$0xff] }
 0x348   : > { %v9391_v63 = vpop.f32.mrb[152].mxu0  ;;  %v4051_v13 = vmul.f32 %v13430_v33, %v3996_v41  ;;  %v3999_v57 = vadd.f32 %v10202_v36, %v3838_v58  ;;  %10416 = vmatprep.subr.bf16.mxu0 %v10415_v20  ;;  %v10636_v41 = vld [vmem:[#allocation12 + $0xd8] sm:$0xff]   ;;  %v10640_v20 = vld [vmem:[#allocation12 + $0xe0] sm:$0xff]  }
 0x349   : > { %v9392_v47 = vpop.f32.mrb[153].mxu0  ;;  %10418 = vmatpush3.bf16.msra.mxu0 %v15053_v31  ;;  %v10637_v58 = vld [vmem:[#allocation12 + $0x98] sm:$0xff]   ;;  %v10649_v31 = vld [vmem:[#allocation12 + $0xb0] sm:$0xff]  }
 0x34a   : > { %v9393_v6 = vadd.f32 %v9392_v47, %v9391_v63  ;;  %v9394_v53 = vpop.f32.mrb[154].mxu0  ;;  %v4052_v43 = vmul.f32 %v13430_v33, %v3999_v57  ;;  %v4090_v50 = vadd.f32 %v13444_v18, %v4051_v13  ;;  %v10641_v63 = vld [vmem:[#allocation12 + $0xa0] sm:$0xff]   ;;  %v10644_v13 = vld [vmem:[#allocation12 + $0xe8] sm:$0xff]   ;;  %v10648_v47 = vld [vmem:[#allocation12 + $0xf0] sm:$0xff]  }
 0x34b   : > { %v9395_v15 = vpop.f32.mrb[155].mxu0  ;;  %v10645_v57 = vld [vmem:[#allocation12 + $0xa8] sm:$0xff]  }
 0x34c   : > { %v4091_v4 = vadd.f32 %v13444_v18, %v4052_v43  ;;  %v9396_v28 = vadd.f32 %v9395_v15, %v9394_v53  ;;  %v3843_v55 = vadd.f32 %v9393_v6, %v13360_v44  ;;  %v10652_v6 = vld [vmem:[#allocation12 + $0xf8] sm:$0xff]   ;;  %v15062_v53 = vld [vmem:[#allocation60_spill] sm:$0xff] }
 0x34d   : > { %v15063_v43 = vld [vmem:[#allocation56_spill] sm:$0xff] }
 0x34e   : > { %v4004_v30 = vadd.f32 %v4003_v49, %v3843_v55  ;;  %v3846_v23 = vadd.f32 %v9396_v28, %v13366_v11  ;;  %v10419_v19 = vpack.c.bf16 %v4091_v4, %v4090_v50  ;;  %v10622_v49 = vld [vmem:[#allocation12 + $0x80] sm:$0xff]   ;;  %v4243_v15 = vcombine.low %v15063_v43, %v15062_v53  ;;  %v15064_v50 = vld [vmem:[#allocation61_spill] sm:$0xff] }
 0x34f   : > { %v15065_v4 = vld [vmem:[#allocation58_spill] sm:$0xff]  ;;  %v10653_v55 = vld [vmem:[#allocation12 + $0xb8] sm:$0xff]  }
 0x350   : > { %v9397_v8 = vpop.f32.mrb[156].mxu0  ;;  %v4053_v62 = vmul.f32 %v13430_v33, %v4004_v30  ;;  %v4007_v52 = vadd.f32 %v4006_v45, %v3846_v23  ;;  %10420 = vmatprep.subr.bf16.mxu0 %v10419_v19  ;;  %v10633_v45 = vld [vmem:[#allocation12 + $0x90] sm:$0xff]   ;;  %v4244_v28 = vcombine.low %v15065_v4, %v15064_v50  ;;  %v15066_v30 = vld [vmem:[#allocation71_spill] sm:$0xff]  ;;  %v15067_v23 = vld [vmem:[#allocation70_spill] sm:$0xff] }
 0x351   : > { %v9398_v34 = vpop.f32.mrb[157].mxu0  ;;  %10422 = vmatpush3.bf16.msra.mxu0 %v15054_v46  ;;  %v4394_v19 = vcombine.low %v15067_v23, %v15066_v30 }
 0x352   : > { %v9399_v16 = vadd.f32 %v9398_v34, %v9397_v8  ;;  %v9400_v36 = vpop.f32.mrb[158].mxu0  ;;  %v4054_v39 = vmul.f32 %v13430_v33, %v4007_v52  ;;  %v4092_v11 = vadd.f32 %v13444_v18, %v4053_v62  ;;  %v15068_v8 = vld [vmem:[#allocation73_spill] sm:$0xff]  ;;  %v15069_v62 = vld [vmem:[#allocation72_spill] sm:$0xff]  ;;  %v10658_v34 = vld [vmem:[#allocation12 + $0x1c0] sm:$0xff]   ;;  %v4247_v46 = vpack.c.bf16 %v4244_v28, %v4243_v15 }
 0x353   : > { %v9401_v37 = vpop.f32.mrb[159].mxu0  ;;  %v4395_v52 = vcombine.low %v15069_v62, %v15068_v8  ;;  %v8808_v15 = vld [vmem:[%s15074_s18] ss:$0 sm:$0xff]  ;;  %s14820_s18 = scalar_lea.hbm %s15142_s4, %s8930_s0  ;;  %s11157_s0 = scalar_lea.vmem %s11156_s30, 8192 }
 0x354   : > { %v3851_v44 = vadd.f32 %v9399_v16, %v13400_v2  ;;  %v9402_v27 = vadd.f32 %v9401_v37, %v9400_v36  ;;  %v4093_v14 = vadd.f32 %v13444_v18, %v4054_v39  ;;  %v10662_v16 = vld [vmem:[#allocation12 + $0x180] sm:$0xff]   ;;  %v10664_v39 = vld [vmem:[#allocation12 + $0x1c8] sm:$0xff]   ;;  %v5788_v50 = vcombine.high %v8808_v15, %v8808_v15 }
 0x355   : > { %v4398_v36 = vpack.c.bf16 %v4395_v52, %v4394_v19  ;;  %v10667_v37 = vld [vmem:[#allocation12 + $0x188] sm:$0xff]  }
 0x356   : > { %v4012_v7 = vadd.f32 %v10205_v10, %v3851_v44  ;;  %v3854_v26 = vadd.f32 %v9402_v27, %v15055_v17  ;;  %v10423_v35 = vpack.c.bf16 %v4093_v14, %v4092_v11  ;;  %v15057_v10 = vpack.c.bf16 %v13592_v3, %v13582_v60  ;;  %v10627_v60 = vld [vmem:[#allocation12 + $0x88] sm:$0xff]   ;;  %v4098_v3 = vld [vmem:[%s14889_s19 + $0x10] sm:$0xff]  ;;  %v10671_v44 = vld [vmem:[#allocation12 + $0x1d0] sm:$0xff]  }
 0x357   : > { %v10672_v11 = vld [vmem:[#allocation12 + $0x190] sm:$0xff]   ;;  %v10674_v27 = vld [vmem:[#allocation12 + $0x1d8] sm:$0xff]   ;;  %v10678_v17 = vld [vmem:[#allocation12 + $0x1a0] sm:$0xff]  }
 0x358   : > { %v4055_v12 = vmul.f32 %v13430_v33, %v4012_v7  ;;  %v4015_v5 = vadd.f32 %v10206_v38, %v3854_v26  ;;  %10424 = vmatprep.subr.bf16.mxu0 %v10423_v35  ;;  %v10632_v38 = vld [vmem:[#allocation12 + $0xd0] sm:$0xff]   ;;  %v10675_v14 = vld [vmem:[#allocation12 + $0x198] sm:$0xff]   ;;  %v10677_v7 = vld [vmem:[#allocation12 + $0x1e0] sm:$0xff]  }
 0x359   : > { %10426 = vmatpush3.bf16.msra.mxu0 %v15056_v1  ;;  %v10680_v26 = vld [vmem:[#allocation12 + $0x1e8] sm:$0xff]   ;;  %v10686_v1 = vld [vmem:[#allocation12 + $0x1f8] sm:$0xff]  }
 0x35a   : > { %v4056_v61 = vmul.f32 %v13430_v33, %v4015_v5  ;;  %v4094_v2 = vadd.f32 %v13444_v18, %v4055_v12  ;;  %v15060_v33 = vld [vmem:[#allocation63_spill] sm:$0xff]  ;;  %v10683_v12 = vld [vmem:[#allocation12 + $0x1f0] sm:$0xff]  }
 0x35b   : > { %v4274_v56 = vcombine.low %v15061_v42, %v15060_v33  ;;  %v10681_v35 = vld [vmem:[#allocation12 + $0x1a8] sm:$0xff]   ;;  %v10684_v5 = vld [vmem:[#allocation12 + $0x1b0] sm:$0xff]  }
 0x35c   : > { %v4095_v0 = vadd.f32 %v13444_v18, %v4056_v61  ;;  %v10624_v18 = vld [vmem:[#allocation12 + $0xc8] sm:$0xff]   ;;  %v15070_v61 = vld [vmem:[#allocation68_spill] sm:$0xff] }
 0x35d   : > { %v4277_v24 = vpack.c.bf16 %v4274_v56, %v4273_v40 }
 0x35e   : > { %v10427_v29 = vpack.c.bf16 %v4095_v0, %v4094_v2  ;;  %v15071_v2 = vld [vmem:[#allocation66_spill] sm:$0xff] }
 0x35f   : > { %v4364_v0 = vcombine.low %v15071_v2, %v15070_v61  ;;  %v8773_v61 = vld [vmem:[%s15075_s11] ss:$0 sm:$0xff]  ;;  %s8468_s11 = sshll.u32 %s14697_s10, 4  ;;  %s14822_s11 = int_to_ptr.vmem [resolvable:$true] %s8468_s11 }
 0x360   : > { %10428 = vmatprep.subr.bf16.mxu0 %v10427_v29  ;;  %v15072_v29 = vld [vmem:[#allocation69_spill] sm:$0xff]  ;;  %p11158_p1 = scmp.lt.s32.totalorder %s14822_s11, %s11156_s30 }
 0x361   : > { %10430 = vmatpush3.bf16.msra.mxu0 %v15057_v10 }
 0x362   : > { %9487 = vmatprep.subr.bf16.mxu0 %v10620_v48  ;;  %v15073_v48 = vld [vmem:[#allocation67_spill] sm:$0xff] }
 0x363   : > { %v4365_v10 = vcombine.low %v15073_v48, %v15072_v29 }
 0x364   : > { %4165 = vmatmul.mubr.f32.vlgmr.msra.gmra.mrb[160].mxu0 %v4096_v32  ;;  %v10687_v32 = vld [vmem:[#allocation12 + $0x1b8] sm:$0xff]  }
 0x365   : > { %9488 = vmatpush3.bf16.msra.mxu0 %v10622_v49  ;;  %4169 = vmatprep.mubr.f32.mxu0 %v4099_v51  ;;  %v4368_v49 = vpack.c.bf16 %v4365_v10, %v4364_v0  ;;  %v8774_v10 = vld [vmem:[%s15076_s29] ss:$0 sm:$0xff]  ;;  %s15139_s29 = sld [smem:[#allocation85_spill]] }
 0x366   : > { %9489 = vmatprep.subr.bf16.mxu0 %v10624_v18 }
 0x368   : > { %4170 = vmatmul.mubr.f32.gmra.mrb[162].mxu0 %v4098_v3 }
 0x369   : > { %9490 = vmatpush3.bf16.msra.mxu0 %v10627_v60  ;;  %5104 = vmatprep.mubr.bf16.mxu0 %v4277_v24 }
 0x36a   : > { %9491 = vmatprep.subr.bf16.mxu0 %v10632_v38 }
 0x36d   : > { %9492 = vmatpush3.bf16.msra.mxu0 %v10633_v45  ;;  %v13725_v45 = vld [vmem:[%s14890_s20] sm:$0xff] }
 0x36e   : > { %9493 = vmatprep.subr.bf16.mxu0 %v10636_v41  ;;  %v5270_v41 = vld [vmem:[%s14890_s20 + $0x80] sm:$0xff] }
 0x36f   : > { %10255 = vmatprep.mubr.msk.f32.mxu1 %vm5286_vm1, %v5270_v41  ;;  %v13809_v41 = vld [vmem:[%s14890_s20 + $0xa0] sm:$0xff] }
 0x371   : > { %9494 = vmatpush3.bf16.msra.mxu0 %v10637_v58 }
 0x372   : > { %9495 = vmatprep.subr.bf16.mxu0 %v10640_v20 }
 0x375   : > { %9496 = vmatpush3.bf16.msra.mxu0 %v10641_v63 }
 0x376   : > { %9497 = vmatprep.subr.bf16.mxu0 %v10644_v13 }
 0x379   : > { %9498 = vmatpush3.bf16.msra.mxu0 %v10645_v57  ;;  %v8807_v57 = vld [vmem:[%s14883_s13] ss:$0 sm:$0xff] }
 0x37a   : > { %9499 = vmatprep.subr.bf16.mxu0 %v10648_v47  ;;  %v5775_v47 = vcombine.high %v8807_v57, %v8807_v57  ;;  %v5779_v53 = vmul.f32 %v8807_v57, %v13633_v25 }
 0x37c   : > { %v5780_v43 = vmul.f32 %v5775_v47, %v13638_v54 }
 0x37d   : > { %9500 = vmatpush3.bf16.msra.mxu0 %v10649_v31  ;;  %v5777_v31 = vmul.f32 %v8807_v57, %v13631_v21  ;;  %v13838_v57 = vld [vmem:[%s14890_s20 + $0x30] sm:$0xff] }
 0x37e   : > { %9501 = vmatprep.subr.bf16.mxu0 %v10652_v6  ;;  %v5778_v6 = vmul.f32 %v5775_v47, %v13636_v22  ;;  %v5793_v30 = vadd.f32 %v5788_v50, %v5780_v43  ;;  %v13843_v47 = vld [vmem:[%s14890_s20 + $0xb0] sm:$0xff]  ;;  %v13870_v43 = vld [vmem:[%s14890_s20 + $0x40] sm:$0xff] }
 0x37f   : > { %v5790_v4 = vadd.f32 %v8808_v15, %v5777_v31  ;;  %v13854_v31 = vld [vmem:[%s14890_s20 + $0x38] sm:$0xff] }
 0x380   : > { %v5791_v28 = vadd.f32 %v5788_v50, %v5778_v6  ;;  %v13859_v6 = vld [vmem:[%s14890_s20 + $0xb8] sm:$0xff]  ;;  %v13886_v50 = vld [vmem:[%s14890_s20 + $0x48] sm:$0xff] }
 0x381   : > { %9502 = vmatpush3.bf16.msra.mxu0 %v10653_v55  ;;  %v5792_v55 = vadd.f32 %v8808_v15, %v5779_v53  ;;  %v10699_v53 = vld [vmem:[%s15077_s22 + $0x18] sm:$0xff]   ;;  %v13875_v15 = vld [vmem:[%s14890_s20 + $0xc0] sm:$0xff] }
 0x382   : > { %9531 = vmatprep.subr.bf16.mxu0 %v10658_v34  ;;  %v5798_v23 = vcombine.low %v5790_v4, %v5791_v28  ;;  %v13891_v4 = vld [vmem:[%s14890_s20 + $0xc8] sm:$0xff]  ;;  %v10700_v28 = vld [vmem:[%s15077_s22 + $0x20] sm:$0xff]  }
 0x383   : > { %v5799_v19 = vcombine.low %v5792_v55, %v5793_v30  ;;  %v13902_v55 = vld [vmem:[%s14890_s20 + $0x50] sm:$0xff] }
 0x384   : > { %5105 = vmatmul.mubr.bf16.vlgmr.msra.gmra.mrb[164].mxu0 %v4247_v46  ;;  %v13907_v30 = vld [vmem:[%s14890_s20 + $0xd0] sm:$0xff] }
 0x385   : > { %9532 = vmatpush3.bf16.msra.mxu0 %v10662_v16  ;;  %5186 = vmatprep.mubr.bf16.mxu0 %v4398_v36  ;;  %v13743_v8 = vpack.c.bf16 %v5799_v19, %v5798_v23  ;;  %v13918_v23 = vld [vmem:[%s14890_s20 + $0x58] sm:$0xff] }
 0x386   : > { %9533 = vmatprep.subr.bf16.mxu0 %v10664_v39  ;;  %v13923_v19 = vld [vmem:[%s14890_s20 + $0xd8] sm:$0xff] }
 0x389   : > { %9534 = vmatpush3.bf16.msra.mxu0 %v10667_v37 }
 0x38a   : > { %9535 = vmatprep.subr.bf16.mxu0 %v10671_v44 }
 0x38d   : > { %9536 = vmatpush3.bf16.msra.mxu0 %v10672_v11 }
 0x38e   : > { %9537 = vmatprep.subr.bf16.mxu0 %v10674_v27 }
 0x391   : > { %9538 = vmatpush3.bf16.msra.mxu0 %v10675_v14 }
 0x392   : > { %9539 = vmatprep.subr.bf16.mxu0 %v10677_v7 }
 0x395   : > { %9540 = vmatpush3.bf16.msra.mxu0 %v10678_v17 }
 0x396   : > { %9541 = vmatprep.subr.bf16.mxu0 %v10680_v26 }
 0x399   : > { %9542 = vmatpush3.bf16.msra.mxu0 %v10681_v35 }
 0x39a   : > { %9543 = vmatprep.subr.bf16.mxu0 %v10683_v12 }
 0x39d   : > { %9544 = vmatpush3.bf16.msra.mxu0 %v10684_v5 }
 0x39e   : > { %9545 = vmatprep.subr.bf16.mxu0 %v10686_v1 }
 0x3a1   : > { %9546 = vmatpush3.bf16.msra.mxu0 %v10687_v32 }
 0x3a4   : > { %5187 = vmatmul.mubr.bf16.vlgmr.msra.gmra.mrb[168].mxu0 %v4368_v49 }
 0x3a5   : > { %10231 = vmatprep.mubr.msk.f32.mxu0 %vm5286_vm1, %v13725_v45 }
 0x3be   : > { %v9481_v59 = vpop.f32.mrb[160].mxu1 }
 0x3bf   : > { %v9482_v9 = vpop.f32.mrb[161].mxu1 }
 0x3c0   : > { %v9483_v40 = vadd.f32 %v9482_v9, %v9481_v59  ;;  %v9484_v33 = vpop.f32.mrb[162].mxu1 }
 0x3c1   : > { %v9485_v42 = vpop.f32.mrb[163].mxu1 }
 0x3c2   : > { %v9486_v56 = vadd.f32 %v9485_v42, %v9484_v33  ;;  %v13763_v33 = vld [vmem:[%s14890_s20 + $0x88] sm:$0xff]  ;;  %v10696_v42 = vld [vmem:[%s15077_s22] sm:$0xff]  }
 0x3e8   : > { %v9525_v18 = vpop.f32.mrb[164].mxu1 }
 0x3e9   : > { %v9526_v51 = vpop.f32.mrb[165].mxu1 }
 0x3ea   : > { %v9527_v60 = vadd.f32 %v9526_v51, %v9525_v18  ;;  %v9528_v3 = vpop.f32.mrb[166].mxu1  ;;  %v13772_v18 = vld [vmem:[%s14890_s20 + $0x10] sm:$0xff] }
 0x3eb   : > { %v9529_v24 = vpop.f32.mrb[167].mxu1  ;;  %v13777_v51 = vld [vmem:[%s14890_s20 + $0x90] sm:$0xff] }
 0x3ec   : > { %v9530_v38 = vadd.f32 %v9529_v24, %v9528_v3  ;;  %v13793_v3 = vld [vmem:[%s14890_s20 + $0x98] sm:$0xff]  ;;  %v10697_v24 = vld [vmem:[%s15077_s22 + $0x8] sm:$0xff]  }
 0x408   : > { %v5229_v58 = vpop.f32.mrb[168].mxu1 }
 0x409   : > { %v10225_v20 = vpop.f32.mrb[169].mxu1 }
 0x40a   : > { %v5232_v63 = vpop.f32.mrb[170].mxu1  ;;  %v13825_v20 = vld [vmem:[%s14890_s20 + $0xa8] sm:$0xff] }
 0x40b   : > { %v10226_v13 = vpop.f32.mrb[171].mxu1 }
 0x40c   : > { %v13832_v13 = vld [vmem:[#allocation2] sm:$0xff] }
 0x40d   : > { %15079 = vst [vmem:[#allocation54_spill] sm:$0xff] %v13832_v13 }
 0x437   : > { %v9459_v21 = vpop.f32.mrb[160].mxu0 }
 0x438   : > { %v9460_v62 = vpop.f32.mrb[161].mxu0 }
 0x439   : > { %v13745_v22 = vadd.f32 %v9460_v62, %v9459_v21  ;;  %v10701_v21 = vld [vmem:[%s15077_s22 + $0x28] sm:$0xff]   ;;  %v13934_v62 = vld [vmem:[%s14890_s20 + $0x60] sm:$0xff] }
 0x43b   : > { %v9462_v25 = vpop.f32.mrb[162].mxu0 }
 0x43c   : > { %v9463_v52 = vpop.f32.mrb[163].mxu0 }
 0x43d   : > { %v13747_v54 = vadd.f32 %v9463_v52, %v9462_v25  ;;  %v13939_v25 = vld [vmem:[%s14890_s20 + $0xe0] sm:$0xff]  ;;  %v13950_v52 = vld [vmem:[%s14890_s20 + $0x68] sm:$0xff] }
 0x43e   : > { %15080 = vst [vmem:[#allocation55_spill] sm:$0xff] %v13939_v25 }
 0x457   : > { %v9503_v34 = vpop.f32.mrb[164].mxu0 }
 0x458   : > { %v9504_v46 = vpop.f32.mrb[165].mxu0 }
 0x459   : > { %v9505_v16 = vadd.f32 %v9504_v46, %v9503_v34  ;;  %v9506_v36 = vpop.f32.mrb[166].mxu0  ;;  %v13955_v34 = vld [vmem:[%s14890_s20 + $0xe8] sm:$0xff]  ;;  %v10702_v46 = vld [vmem:[%s15077_s22 + $0x30] sm:$0xff]  }
 0x45a   : > { %v9507_v39 = vpop.f32.mrb[167].mxu0  ;;  %15081 = vst [vmem:[#allocation64_spill] sm:$0xff] %v13955_v34 }
 0x45b   : > { %v5107_v37 = vadd.f32 %v9505_v16, %v9483_v40  ;;  %v9508_v44 = vadd.f32 %v9507_v39, %v9506_v36  ;;  %v13758_v40 = vld [vmem:[%s14890_s20 + $0x8] sm:$0xff]  ;;  %v13966_v16 = vld [vmem:[%s14890_s20 + $0x70] sm:$0xff]  ;;  %v13982_v39 = vld [vmem:[%s14890_s20 + $0x78] sm:$0xff] }
 0x45c   : > { %v13971_v36 = vld [vmem:[%s14890_s20 + $0xf0] sm:$0xff] }
 0x45d   : > { %v5110_v11 = vadd.f32 %v9508_v44, %v9486_v56  ;;  %v5148_v27 = vadd.f32 %v9527_v60, %v5107_v37  ;;  %v15078_v56 = vld [vmem:[#allocation65_spill] sm:$0xff]  ;;  %v13788_v60 = vld [vmem:[%s14890_s20 + $0x18] sm:$0xff]  ;;  %15082 = vst [vmem:[#allocation62_spill] sm:$0xff] %v13971_v36 }
 0x45e   : > { %v13987_v37 = vld [vmem:[%s14890_s20 + $0xf8] sm:$0xff] }
 0x45f   : > { %v5151_v14 = vadd.f32 %v9530_v38, %v5110_v11  ;;  %v13804_v38 = vld [vmem:[%s14890_s20 + $0x20] sm:$0xff]  ;;  %15083 = vst [vmem:[#allocation57_spill] sm:$0xff] %v13987_v37  ;;  %v10703_v44 = vld [vmem:[%s15077_s22 + $0x38] sm:$0xff]  }
 0x477   : > { %v9547_v7 = vpop.f32.mrb[168].mxu0 }
 0x478   : > { %v9548_v17 = vpop.f32.mrb[169].mxu0 }
 0x479   : > { %v9549_v26 = vadd.f32 %v9548_v17, %v9547_v7  ;;  %v9550_v35 = vpop.f32.mrb[170].mxu0 }
 0x47a   : > { %v9551_v12 = vpop.f32.mrb[171].mxu0 }
 0x47b   : > { %v9552_v5 = vadd.f32 %v9551_v12, %v9550_v35  ;;  %v5189_v1 = vadd.f32 %v9549_v26, %v5148_v27 }
 0x47d   : > { %v5230_v2 = vadd.f32 %v5229_v58, %v5189_v1  ;;  %v5192_v0 = vadd.f32 %v9552_v5, %v5151_v14  ;;  %v13820_v58 = vld [vmem:[%s14890_s20 + $0x28] sm:$0xff] }
 0x47f   : > { %v5243_v29 = vmul.f32 %v8773_v61, %v5230_v2  ;;  %v5233_v48 = vadd.f32 %v5232_v63, %v5192_v0  ;;  %v10698_v63 = vld [vmem:[%s15077_s22 + $0x10] sm:$0xff]  }
 0x481   : > { %v5244_v32 = vmul.f32 %v8773_v61, %v5233_v48  ;;  %v5252_v49 = vadd.f32 %v8774_v10, %v5243_v29 }
 0x483   : > { %v5253_v59 = vadd.f32 %v8774_v10, %v5244_v32 }
 0x485   : > { %v10431_v9 = vpack.c.bf16 %v5253_v59, %v5252_v49 }
 0x487   : > { %10432 = vmatprep.subr.bf16.mxu0 %v10431_v9  ;;  %10439 = vmatprep.subr.bf16.mxu1 %v10431_v9 }
 0x488   : > { %10434 = vmatpush3.bf16.msra.mxu0 %v10431_v9  ;;  %10440 = vmatpush3.bf16.msra.mxu1 %v10431_v9 }
 0x489   : > { %10279 = vmatprep.subr.bf16.mxu1 %v15078_v56 }
 0x48b   : > { %10232 = vmatmul.mubr.msk.f32.vlgmr.msra.gmra.mrb[172].mxu0 %vm5286_vm1, %v13758_v40  ;;  %10256 = vmatmul.mubr.msk.f32.vlgmr.msra.gmra.mrb[172].mxu1 %vm5286_vm1, %v13763_v33 }
 0x48c   : > { %10280 = vmatpush3.bf16.msra.mxu1 %v10696_v42  ;;  %10234 = vmatprep.mubr.msk.f32.mxu0 %vm5286_vm1, %v13772_v18 }
 0x48d   : > { %10258 = vmatprep.mubr.msk.f32.mxu1 %vm5286_vm1, %v13777_v51  ;;  %10281 = vmatprep.subr.bf16.mxu1 %v15078_v56 }
 0x48f   : > { %10235 = vmatmul.mubr.msk.f32.gmra.mrb[174].mxu0 %vm5286_vm1, %v13788_v60  ;;  %10259 = vmatmul.mubr.msk.f32.gmra.mrb[174].mxu1 %vm5286_vm1, %v13793_v3 }
 0x490   : > { %10282 = vmatpush3.bf16.msra.mxu1 %v10697_v24  ;;  %10237 = vmatprep.mubr.msk.f32.mxu0 %vm5286_vm1, %v13804_v38 }
 0x491   : > { %10261 = vmatprep.mubr.msk.f32.mxu1 %vm5286_vm1, %v13809_v41  ;;  %10283 = vmatprep.subr.bf16.mxu1 %v13832_v13 }
 0x493   : > { %10238 = vmatmul.mubr.msk.f32.gmra.mrb[176].mxu0 %vm5286_vm1, %v13820_v58  ;;  %10262 = vmatmul.mubr.msk.f32.gmra.mrb[176].mxu1 %vm5286_vm1, %v13825_v20 }
 0x494   : > { %10284 = vmatpush3.bf16.msra.mxu1 %v10698_v63  ;;  %10240 = vmatprep.mubr.msk.f32.mxu0 %vm5286_vm1, %v13838_v57 }
 0x495   : > { %10264 = vmatprep.mubr.msk.f32.mxu1 %vm5286_vm1, %v13843_v47  ;;  %10285 = vmatprep.subr.bf16.mxu1 %v13832_v13 }
 0x497   : > { %10241 = vmatmul.mubr.msk.f32.gmra.mrb[178].mxu0 %vm5286_vm1, %v13854_v31  ;;  %10265 = vmatmul.mubr.msk.f32.gmra.mrb[178].mxu1 %vm5286_vm1, %v13859_v6 }
 0x498   : > { %10286 = vmatpush3.bf16.msra.mxu1 %v10699_v53  ;;  %10243 = vmatprep.mubr.msk.f32.mxu0 %vm5286_vm1, %v13870_v43 }
 0x499   : > { %10267 = vmatprep.mubr.msk.f32.mxu1 %vm5286_vm1, %v13875_v15  ;;  %10287 = vmatprep.subr.bf16.mxu1 %v13832_v13 }
 0x49b   : > { %10244 = vmatmul.mubr.msk.f32.gmra.mrb[180].mxu0 %vm5286_vm1, %v13886_v50  ;;  %10268 = vmatmul.mubr.msk.f32.gmra.mrb[180].mxu1 %vm5286_vm1, %v13891_v4 }
 0x49c   : > { %10288 = vmatpush3.bf16.msra.mxu1 %v10700_v28  ;;  %10246 = vmatprep.mubr.msk.f32.mxu0 %vm5286_vm1, %v13902_v55 }
 0x49d   : > { %10270 = vmatprep.mubr.msk.f32.mxu1 %vm5286_vm1, %v13907_v30  ;;  %10289 = vmatprep.subr.bf16.mxu1 %v13832_v13 }
 0x49f   : > { %10247 = vmatmul.mubr.msk.f32.gmra.mrb[182].mxu0 %vm5286_vm1, %v13918_v23  ;;  %10271 = vmatmul.mubr.msk.f32.gmra.mrb[182].mxu1 %vm5286_vm1, %v13923_v19 }
 0x4a0   : > { %10290 = vmatpush3.bf16.msra.mxu1 %v10701_v21  ;;  %10249 = vmatprep.mubr.msk.f32.mxu0 %vm5286_vm1, %v13934_v62 }
 0x4a1   : > { %10273 = vmatprep.mubr.msk.f32.mxu1 %vm5286_vm1, %v13939_v25  ;;  %10291 = vmatprep.subr.bf16.mxu1 %v13832_v13  ;;  %v10707_v25 = vld [vmem:[#allocation13 + $0x8] sm:$0xff]  }
 0x4a3   : > { %10250 = vmatmul.mubr.msk.f32.gmra.mrb[184].mxu0 %vm5286_vm1, %v13950_v52  ;;  %10274 = vmatmul.mubr.msk.f32.gmra.mrb[184].mxu1 %vm5286_vm1, %v13955_v34 }
 0x4a4   : > { %10292 = vmatpush3.bf16.msra.mxu1 %v10702_v46  ;;  %10252 = vmatprep.mubr.msk.f32.mxu0 %vm5286_vm1, %v13966_v16 }
 0x4a5   : > { %10276 = vmatprep.mubr.msk.f32.mxu1 %vm5286_vm1, %v13971_v36  ;;  %10293 = vmatprep.subr.bf16.mxu1 %v13832_v13 }
 0x4a7   : > { %10253 = vmatmul.mubr.msk.f32.gmra.mrb[186].mxu0 %vm5286_vm1, %v13982_v39  ;;  %10277 = vmatmul.mubr.msk.f32.gmra.mrb[186].mxu1 %vm5286_vm1, %v13987_v37 }
 0x4a8   : > { %10294 = vmatpush3.bf16.msra.mxu1 %v10703_v44  ;;  %10295 = vmatprep.mubr.msk.bf16.mxu1 %vm11237_vm0, %v13832_v13  ;;  %v10705_v13 = vld [vmem:[#allocation13] sm:$0xff]  }
 0x4ab   : > { %10296 = vmatmul.mubr.bf16.vlgmr.msra.gmra.mrb[188].mxu1 %v13743_v8 }
 0x4ac   : > { %10303 = vmatprep.mubr.msk.f32.mxu1 %vm5286_vm1, %v13725_v45 }
 0x55e   : > { %v10233_v11 = vpop.f32.mrb[172].mxu0  ;;  %v10257_v27 = vpop.f32.mrb[172].mxu1 }
 0x55f   : > { %v5609_v14 = vsub.f32 0.0, %v10233_v11  ;;  %v5625_v7 = vsub.f32 0.0, %v10257_v27  ;;  %v5449_v17 = vpop.f32.mrb[173].mxu0  ;;  %v5529_v26 = vpop.f32.mrb[173].mxu1 }
 0x560   : > { %v5608_v35 = vsub.f32 0.0, %v5449_v17  ;;  %v5624_v12 = vsub.f32 0.0, %v5529_v26 }
 0x561   : > { %v5642_v5 = vmul.f32 1.442695, %v5609_v14  ;;  %v5674_v1 = vmul.f32 1.442695, %v5625_v7 }
 0x562   : > { %v5640_v61 = vmul.f32 1.442695, %v5608_v35  ;;  %v5672_v2 = vmul.f32 1.442695, %v5624_v12  ;;  %v10236_v0 = vpop.f32.mrb[174].mxu0  ;;  %v10260_v29 = vpop.f32.mrb[174].mxu1 }
 0x563   : > { %10776 = vpow2.f32 %v5642_v5  ;;  %v5611_v48 = vsub.f32 0.0, %v10236_v0  ;;  %v5627_v8 = vsub.f32 0.0, %v10260_v29  ;;  %v5459_v10 = vpop.f32.mrb[175].mxu0  ;;  %v5539_v32 = vpop.f32.mrb[175].mxu1 }
 0x564   : > { %10778 = vpow2.f32 %v5674_v1  ;;  %v5610_v45 = vsub.f32 0.0, %v5459_v10  ;;  %v5626_v49 = vsub.f32 0.0, %v5539_v32 }
 0x565   : > { %10780 = vpow2.f32 %v5640_v61  ;;  %v5646_v59 = vmul.f32 1.442695, %v5611_v48  ;;  %v5678_v9 = vmul.f32 1.442695, %v5627_v8 }
 0x566   : > { %10782 = vpow2.f32 %v5672_v2  ;;  %v5644_v42 = vmul.f32 1.442695, %v5610_v45  ;;  %v5676_v56 = vmul.f32 1.442695, %v5626_v49  ;;  %v10239_v24 = vpop.f32.mrb[176].mxu0  ;;  %v10263_v63 = vpop.f32.mrb[176].mxu1 }
 0x567   : > { %10784 = vpow2.f32 %v5646_v59  ;;  %v5613_v53 = vsub.f32 0.0, %v10239_v24  ;;  %v5629_v28 = vsub.f32 0.0, %v10263_v63  ;;  %v5469_v21 = vpop.f32.mrb[177].mxu0  ;;  %v5549_v46 = vpop.f32.mrb[177].mxu1 }
 0x568   : > { %10786 = vpow2.f32 %v5678_v9  ;;  %v5612_v44 = vsub.f32 0.0, %v5469_v21  ;;  %v5628_v11 = vsub.f32 0.0, %v5549_v46 }
 0x569   : > { %10788 = vpow2.f32 %v5644_v42  ;;  %v5650_v27 = vmul.f32 1.442695, %v5613_v53  ;;  %v5682_v14 = vmul.f32 1.442695, %v5629_v28 }
 0x56a   : > { %10790 = vpow2.f32 %v5676_v56  ;;  %v5648_v7 = vmul.f32 1.442695, %v5612_v44  ;;  %v5680_v17 = vmul.f32 1.442695, %v5628_v11  ;;  %v10242_v26 = vpop.f32.mrb[178].mxu0  ;;  %v10266_v35 = vpop.f32.mrb[178].mxu1 }
 0x56b   : > { %10792 = vpow2.f32 %v5650_v27  ;;  %v5615_v12 = vsub.f32 0.0, %v10242_v26  ;;  %v14004_v5 = vpop.f32.mrb[179].mxu0  ;;  %v14006_v1 = vpop.f32.mrb[179].mxu1  ;;  %v5631_v26 = vsub.f32 0.0, %v10266_v35 }
 0x56c   : > { %10794 = vpow2.f32 %v5682_v14 }
 0x56d   : > { %v10777_v61 = vpop.eup %10776  ;;  %10796 = vpow2.f32 %v5648_v7  ;;  %v5654_v2 = vmul.f32 1.442695, %v5615_v12 }
 0x56e   : > { %v10779_v0 = vpop.eup %10778  ;;  %v5705_v29 = vadd.f32 1.0, %v10777_v61  ;;  %10798 = vpow2.f32 %v5680_v17  ;;  %v14008_v48 = vpop.f32.mrb[180].mxu0 }
 0x56f   : > { %v10781_v8 = vpop.eup %10780  ;;  %v5721_v10 = vadd.f32 1.0, %v10779_v0  ;;  %10800 = vpow2.f32 %v5654_v2  ;;  %v14010_v32 = vpop.f32.mrb[180].mxu1  ;;  %v5614_v2 = vsub.f32 0.0, %v14004_v5  ;;  %v5617_v35 = vsub.f32 0.0, %v14008_v48 }
 0x570   : > { %v14012_v45 = vpop.f32.mrb[181].mxu0  ;;  %v10783_v49 = vpop.eup %10782  ;;  %10802 = vrcp.f32 %v5705_v29  ;;  %v5704_v59 = vadd.f32 1.0, %v10781_v8 }
 0x571   : > { %v14014_v9 = vpop.f32.mrb[181].mxu1  ;;  %v10785_v42 = vpop.eup %10784  ;;  %10804 = vrcp.f32 %v5721_v10  ;;  %v5720_v56 = vadd.f32 1.0, %v10783_v49  ;;  %v5630_v10 = vsub.f32 0.0, %v14006_v1 }
 0x572   : > { %v10787_v24 = vpop.eup %10786  ;;  %10806 = vrcp.f32 %v5704_v59  ;;  %v5707_v63 = vadd.f32 1.0, %v10785_v42  ;;  %v14016_v53 = vpop.f32.mrb[182].mxu0  ;;  %v5632_v48 = vsub.f32 0.0, %v14014_v9 }
 0x573   : > { %v10789_v28 = vpop.eup %10788  ;;  %10808 = vrcp.f32 %v5720_v56  ;;  %v5723_v21 = vadd.f32 1.0, %v10787_v24  ;;  %v14018_v46 = vpop.f32.mrb[182].mxu1 }
 0x574   : > { %v14020_v44 = vpop.f32.mrb[183].mxu0  ;;  %v10791_v11 = vpop.eup %10790  ;;  %10810 = vrcp.f32 %v5707_v63  ;;  %v5706_v27 = vadd.f32 1.0, %v10789_v28  ;;  %v5686_v28 = vmul.f32 1.442695, %v5631_v26  ;;  %v10704_v26 = vld [vmem:[#allocation13 + $0x40] sm:$0xff]   ;;  %v5635_v34 = vsub.f32 0.0, %v14018_v46 }
 0x575   : > { %v14022_v14 = vpop.f32.mrb[183].mxu1  ;;  %v10793_v7 = vpop.eup %10792  ;;  %10812 = vrcp.f32 %v5723_v21  ;;  %v5722_v17 = vadd.f32 1.0, %v10791_v11  ;;  %v5633_v21 = vsub.f32 0.0, %v14010_v32  ;;  %9639 = vmatprep.subr.bf16.mxu0 %v10704_v26 }
 0x576   : > { %v10795_v12 = vpop.eup %10794  ;;  %10814 = vrcp.f32 %v5706_v27  ;;  %v5709_v61 = vadd.f32 1.0, %v10793_v7  ;;  %v14025_v0 = vpop.f32.mrb[184].mxu0  ;;  %v5652_v27 = vmul.f32 1.442695, %v5614_v2  ;;  %v5616_v7 = vsub.f32 0.0, %v14012_v45  ;;  %9640 = vmatpush3.bf16.msra.mxu0 %v10705_v13 }
 0x577   : > { %v10797_v29 = vpop.eup %10796  ;;  %10816 = vrcp.f32 %v5722_v17  ;;  %v5725_v8 = vadd.f32 1.0, %v10795_v12  ;;  %v14028_v49 = vpop.f32.mrb[184].mxu1  ;;  %v5658_v2 = vmul.f32 1.442695, %v5617_v35  ;;  %v5619_v45 = vsub.f32 0.0, %v14016_v53 }
 0x578   : > { %v14030_v59 = vpop.f32.mrb[185].mxu0  ;;  %v10799_v42 = vpop.eup %10798  ;;  %10818 = vrcp.f32 %v5709_v61  ;;  %v5708_v56 = vadd.f32 1.0, %v10797_v29  ;;  %v5684_v61 = vmul.f32 1.442695, %v5630_v10  ;;  %v15086_v10 = vld [vmem:[#allocation41_spill] sm:$0xff]  ;;  %v5618_v53 = vsub.f32 0.0, %v14020_v44 }
 0x579   : > { %v14033_v24 = vpop.f32.mrb[185].mxu1  ;;  %v10801_v63 = vpop.eup %10800  ;;  %10820 = vrcp.f32 %v5725_v8  ;;  %v5724_v5 = vadd.f32 1.0, %v10799_v42  ;;  %v15084_v42 = vld [vmem:[#allocation25_spill] sm:$0xff]  ;;  %v5690_v36 = vmul.f32 1.442695, %v5633_v21  ;;  %v5634_v46 = vsub.f32 0.0, %v14022_v14 }
 0x57a   : > { %v10803_v11 = vpop.eup %10802  ;;  %10822 = vrcp.f32 %v5708_v56  ;;  %v5711_v1 = vadd.f32 1.0, %v10801_v63  ;;  %v14037_v17 = vpop.f32.mrb[186].mxu0  ;;  %v5656_v35 = vmul.f32 1.442695, %v5616_v7  ;;  %v5688_v21 = vmul.f32 1.442695, %v5632_v48 }
 0x57b   : > { %v10805_v12 = vpop.eup %10804  ;;  %10824 = vrcp.f32 %v5724_v5  ;;  %v14040_v29 = vpop.f32.mrb[186].mxu1  ;;  %v14045_v32 = vmul.f32 %v10803_v11, %v15084_v42  ;;  %v10706_v5 = vld [vmem:[#allocation13 + $0x48] sm:$0xff]   ;;  %v5662_v44 = vmul.f32 1.442695, %v5619_v45  ;;  %v5621_v13 = vsub.f32 0.0, %v14025_v0  ;;  %v10710_v45 = vld [vmem:[#allocation13 + $0x10] sm:$0xff]  }
 0x57c   : > { %v14042_v8 = vpop.f32.mrb[187].mxu0  ;;  %v10807_v56 = vpop.eup %10806  ;;  %10826 = vrcp.f32 %v5711_v1  ;;  %v14051_v37 = vmul.f32 %v10805_v12, %v15086_v10  ;;  %v15088_v11 = vld [vmem:[#allocation23_spill] sm:$0xff]  ;;  %9641 = vmatprep.subr.bf16.mxu0 %v10706_v5  ;;  %v5694_v48 = vmul.f32 1.442695, %v5635_v34  ;;  %v5637_v14 = vsub.f32 0.0, %v14028_v49  ;;  %v15095_v0 = vld [vmem:[#allocation38_spill] sm:$0xff] }
 0x57d   : > { %15085 = vst [vmem:[#allocation63_spill] sm:$0xff] %v14045_v32  ;;  %v14048_v63 = vpop.f32.mrb[187].mxu1  ;;  %v10809_v9 = vpop.eup %10808  ;;  %10828 = vpow2.f32 %v5686_v28  ;;  %v14055_v42 = vmul.f32 %v10807_v56, %v15088_v11  ;;  %v15089_v12 = vld [vmem:[#allocation39_spill] sm:$0xff]  ;;  %v10708_v56 = vld [vmem:[#allocation13 + $0x50] sm:$0xff]   ;;  %9642 = vmatpush3.bf16.msra.mxu0 %v10707_v25  ;;  %v15096_v34 = vld [vmem:[#allocation29_spill] sm:$0xff] }
 0x57e   : > { %15087 = vst [vmem:[#allocation59_spill] sm:$0xff] %v14051_v37  ;;  %v10811_v1 = vpop.eup %10810  ;;  %10830 = vpow2.f32 %v5652_v27  ;;  %v14058_v32 = vpop.f32.mrb[188].mxu1  ;;  %v14061_v10 = vmul.f32 %v10809_v9, %v15089_v12  ;;  %v15091_v11 = vld [vmem:[#allocation24_spill] sm:$0xff]  ;;  %9643 = vmatprep.subr.bf16.mxu0 %v10708_v56  ;;  %v5698_v25 = vmul.f32 1.442695, %v5637_v14 }
 0x57f   : > { %v10813_v28 = vpop.eup %10812  ;;  %10832 = vpow2.f32 %v5684_v61  ;;  %v10297_v26 = vpop.f32.mrb[189].mxu1  ;;  %v14065_v27 = vmul.f32 %v10811_v1, %v15091_v11  ;;  %v15093_v9 = vld [vmem:[#allocation40_spill] sm:$0xff] }
 0x580   : > { %15090 = vst [vmem:[#allocation60_spill] sm:$0xff] %v14061_v10  ;;  %v10815_v7 = vpop.eup %10814  ;;  %10834 = vpow2.f32 %v5658_v2  ;;  %v14068_v37 = vpop.f32.mrb[190].mxu1  ;;  %v14071_v12 = vmul.f32 %v10813_v28, %v15093_v9  ;;  %v15094_v26 = vld [vmem:[#allocation22_spill] sm:$0xff]  ;;  %v5660_v2 = vmul.f32 1.442695, %v5618_v53  ;;  %v15098_v53 = vld [vmem:[#allocation27_spill] sm:$0xff] }
 0x581   : > { %15092 = vst [vmem:[#allocation56_spill] sm:$0xff] %v14065_v27  ;;  %v10817_v61 = vpop.eup %10816  ;;  %10836 = vpow2.f32 %v5690_v36  ;;  %v10298_v5 = vpop.f32.mrb[191].mxu1  ;;  %v14075_v10 = vmul.f32 %v10815_v7, %v15094_v26  ;;  %v5692_v28 = vmul.f32 1.442695, %v5634_v46  ;;  %v10712_v36 = vld [vmem:[#allocation13 + $0x58] sm:$0xff]   ;;  %9644 = vmatpush3.bf16.msra.mxu0 %v10710_v45  ;;  %v15099_v46 = vld [vmem:[#allocation43_spill] sm:$0xff] }
 0x582   : > { %v10819_v1 = vpop.eup %10818  ;;  %10838 = vpow2.f32 %v5656_v35  ;;  %v14078_v11 = vmul.f32 %v10817_v61, %v15095_v0  ;;  %v5666_v7 = vmul.f32 1.442695, %v5621_v13  ;;  %v15097_v5 = vld [vmem:[#allocation45_spill] sm:$0xff]  ;;  %9645 = vmatprep.subr.bf16.mxu0 %v10712_v36  ;;  %v15100_v13 = vld [vmem:[#allocation28_spill] sm:$0xff]  ;;  %v10718_v45 = vld [vmem:[#allocation13 + $0x20] sm:$0xff]  }
 0x583   : > { %v10821_v27 = vpop.eup %10820  ;;  %10840 = vpow2.f32 %v5688_v21  ;;  %v14081_v9 = vmul.f32 %v10819_v1, %v15096_v34  ;;  %v10714_v21 = vld [vmem:[#allocation13 + $0x18] sm:$0xff]  }
 0x584   : > { %v10823_v49 = vpop.eup %10822  ;;  %10842 = vpow2.f32 %v5662_v44  ;;  %v14084_v26 = vmul.f32 %v10821_v27, %v15097_v5  ;;  %v10716_v44 = vld [vmem:[#allocation13 + $0x60] sm:$0xff]  }
 0x585   : > { %v10825_v35 = vpop.eup %10824  ;;  %10844 = vpow2.f32 %v5694_v48  ;;  %v14087_v61 = vmul.f32 %v10823_v49, %v15098_v53  ;;  %9646 = vmatpush3.bf16.msra.mxu0 %v10714_v21 }
 0x586   : > { %v10827_v0 = vpop.eup %10826  ;;  %10846 = vpow2.f32 %v5660_v2  ;;  %v14090_v56 = vmul.f32 %v10825_v35, %v15099_v46  ;;  %9647 = vmatprep.subr.bf16.mxu0 %v10716_v44 }
 0x587   : > { %v10829_v1 = vpop.eup %10828  ;;  %10848 = vpow2.f32 %v5692_v28  ;;  %v14093_v27 = vmul.f32 %v10827_v0, %v15100_v13  ;;  %v10720_v28 = vld [vmem:[#allocation13 + $0x68] sm:$0xff]  }
 0x588   : > { %v10831_v34 = vpop.eup %10830  ;;  %v5727_v48 = vadd.f32 1.0, %v10829_v1  ;;  %10850 = vpow2.f32 %v5666_v7 }
 0x589   : > { %v10833_v14 = vpop.eup %10832  ;;  %v5710_v49 = vadd.f32 1.0, %v10831_v34  ;;  %10852 = vpow2.f32 %v5698_v25  ;;  %9648 = vmatpush3.bf16.msra.mxu0 %v10718_v45  ;;  %v10722_v25 = vld [vmem:[#allocation13 + $0x28] sm:$0xff]  }
 0x58a   : > { %v10835_v5 = vpop.eup %10834  ;;  %10854 = vrcp.f32 %v5727_v48  ;;  %v5726_v2 = vadd.f32 1.0, %v10833_v14  ;;  %v5620_v48 = vsub.f32 0.0, %v14030_v59  ;;  %9649 = vmatprep.subr.bf16.mxu0 %v10720_v28  ;;  %v10724_v14 = vld [vmem:[#allocation13 + $0x70] sm:$0xff]  }
 0x58b   : > { %v10837_v35 = vpop.eup %10836  ;;  %10856 = vrcp.f32 %v5710_v49  ;;  %v5713_v53 = vadd.f32 1.0, %v10835_v5  ;;  %v5636_v5 = vsub.f32 0.0, %v14033_v24 }
 0x58c   : > { %v10839_v36 = vpop.eup %10838  ;;  %10858 = vrcp.f32 %v5726_v2  ;;  %v5729_v0 = vadd.f32 1.0, %v10837_v35  ;;  %v5664_v28 = vmul.f32 1.442695, %v5620_v48 }
 0x58d   : > { %v10841_v46 = vpop.eup %10840  ;;  %10860 = vrcp.f32 %v5713_v53  ;;  %v5712_v1 = vadd.f32 1.0, %v10839_v36  ;;  %v5623_v53 = vsub.f32 0.0, %v14037_v17  ;;  %9650 = vmatpush3.bf16.msra.mxu0 %v10722_v25 }
 0x58e   : > { %v10843_v7 = vpop.eup %10842  ;;  %10862 = vrcp.f32 %v5729_v0  ;;  %v5728_v13 = vadd.f32 1.0, %v10841_v46  ;;  %v5639_v0 = vsub.f32 0.0, %v14040_v29  ;;  %9651 = vmatprep.subr.bf16.mxu0 %v10724_v14  ;;  %v15101_v29 = vld [vmem:[#allocation44_spill] sm:$0xff]  ;;  %v15102_v14 = vld [vmem:[#allocation26_spill] sm:$0xff] }
 0x58f   : > { %v10845_v34 = vpop.eup %10844  ;;  %10864 = vrcp.f32 %v5712_v1  ;;  %v5715_v21 = vadd.f32 1.0, %v10843_v7  ;;  %v5622_v1 = vsub.f32 0.0, %v14042_v8  ;;  %v5909_v8 = vsub.f32 0.0, %v14068_v37 }
 0x590   : > { %v10847_v44 = vpop.eup %10846  ;;  %10866 = vrcp.f32 %v5728_v13  ;;  %v5731_v49 = vadd.f32 1.0, %v10845_v34  ;;  %v5696_v13 = vmul.f32 1.442695, %v5636_v5  ;;  %v5638_v34 = vsub.f32 0.0, %v14048_v63  ;;  %v15103_v63 = vld [vmem:[#allocation42_spill] sm:$0xff] }
 0x591   : > { %v10849_v2 = vpop.eup %10848  ;;  %10868 = vrcp.f32 %v5715_v21  ;;  %v5714_v35 = vadd.f32 1.0, %v10847_v44  ;;  %v5670_v21 = vmul.f32 1.442695, %v5623_v53  ;;  %v5908_v44 = vsub.f32 0.0, %v14058_v32 }
 0x592   : > { %v10851_v36 = vpop.eup %10850  ;;  %10870 = vrcp.f32 %v5731_v49  ;;  %v5730_v45 = vadd.f32 1.0, %v10849_v2  ;;  %v5702_v48 = vmul.f32 1.442695, %v5639_v0  ;;  %v5668_v5 = vmul.f32 1.442695, %v5622_v1 }
 0x593   : > { %v10853_v46 = vpop.eup %10852  ;;  %10872 = vrcp.f32 %v5714_v35  ;;  %v5717_v59 = vadd.f32 1.0, %v10851_v36  ;;  %v5700_v32 = vmul.f32 1.442695, %v5638_v34  ;;  %v5910_v0 = vmul.f32 1.442695, %v5908_v44  ;;  %v15110_v44 = vld [vmem:[#allocation48_spill] sm:$0xff] }
 0x594   : > { %v10855_v7 = vpop.eup %10854  ;;  %10874 = vrcp.f32 %v5730_v45  ;;  %v5733_v24 = vadd.f32 1.0, %v10853_v46  ;;  %v15104_v45 = vld [vmem:[#allocation33_spill] sm:$0xff] }
 0x595   : > { %v10857_v17 = vpop.eup %10856  ;;  %10876 = vrcp.f32 %v5717_v59  ;;  %v14103_v25 = vmul.f32 %v10855_v7, %v15101_v29  ;;  %v15105_v7 = vld [vmem:[#allocation49_spill] sm:$0xff] }
 0x596   : > { %v10859_v49 = vpop.eup %10858  ;;  %10878 = vrcp.f32 %v5733_v24  ;;  %v14107_v2 = vmul.f32 %v10857_v17, %v15102_v14  ;;  %v5912_v17 = vmul.f32 1.442695, %v5909_v8  ;;  %v15109_v14 = vld [vmem:[#allocation32_spill] sm:$0xff]  ;;  %v15112_v8 = vld [vmem:[#allocation30_spill] sm:$0xff] }
 0x597   : > { %v10861_v35 = vpop.eup %10860  ;;  %10880 = vpow2.f32 %v5664_v28  ;;  %v14110_v36 = vmul.f32 %v10859_v49, %v15103_v63  ;;  %v15106_v28 = vld [vmem:[#allocation31_spill] sm:$0xff] }
 0x598   : > { %v10863_v53 = vpop.eup %10862  ;;  %10882 = vpow2.f32 %v5696_v13  ;;  %v14113_v46 = vmul.f32 %v10861_v35, %v15104_v45  ;;  %v15107_v49 = vld [vmem:[#allocation47_spill] sm:$0xff] }
 0x599   : > { %v10865_v59 = vpop.eup %10864  ;;  %10884 = vpow2.f32 %v5670_v21  ;;  %v14116_v37 = vmul.f32 %v10863_v53, %v15105_v7 }
 0x59a   : > { %v10867_v24 = vpop.eup %10866  ;;  %10886 = vpow2.f32 %v5702_v48  ;;  %v14119_v1 = vmul.f32 %v10865_v59, %v15106_v28 }
 0x59b   : > { %v10869_v29 = vpop.eup %10868  ;;  %10888 = vpow2.f32 %v5668_v5  ;;  %v14122_v13 = vmul.f32 %v10867_v24, %v15107_v49  ;;  %v15113_v5 = vld [vmem:[#allocation46_spill] sm:$0xff]  ;;  %v15115_v24 = vld [vmem:[#allocation37_spill] sm:$0xff] }
 0x59c   : > { %v10871_v34 = vpop.eup %10870  ;;  %10890 = vpow2.f32 %v5700_v32  ;;  %v14125_v35 = vmul.f32 %v10869_v29, %v15109_v14  ;;  %v15116_v29 = vld [vmem:[#allocation53_spill] sm:$0xff] }
 0x59d   : > { %15108 = vst [vmem:[#allocation61_spill] sm:$0xff] %v14122_v13  ;;  %v10873_v21 = vpop.eup %10872  ;;  %10892 = vpow2.f32 %v5910_v0  ;;  %v14128_v63 = vmul.f32 %v10871_v34, %v15110_v44  ;;  %v15124_v13 = vld [vmem:[#allocation50_spill] sm:$0xff] }
 0x59e   : > { %v10875_v48 = vpop.eup %10874  ;;  %10894 = vpow2.f32 %v5912_v17  ;;  %v14131_v53 = vmul.f32 %v10873_v21, %v15112_v8 }
 0x59f   : > { %15111 = vst [vmem:[#allocation58_spill] sm:$0xff] %v14128_v63  ;;  %v10877_v45 = vpop.eup %10876  ;;  %v14134_v59 = vmul.f32 %v10875_v48, %v15113_v5 }
 0x5a0   : > { %v10879_v7 = vpop.eup %10878  ;;  %v14137_v32 = vmul.f32 %v10877_v45, %v15115_v24 }
 0x5a1   : > { %15114 = vst [vmem:[#allocation71_spill] sm:$0xff] %v14134_v59  ;;  %v10881_v28 = vpop.eup %10880  ;;  %v14140_v49 = vmul.f32 %v10879_v7, %v15116_v29 }
 0x5a2   : > { %v10883_v0 = vpop.eup %10882  ;;  %v5716_v34 = vadd.f32 1.0, %v10881_v28 }
 0x5a3   : > { %15117 = vst [vmem:[#allocation70_spill] sm:$0xff] %v14140_v49  ;;  %v10885_v14 = vpop.eup %10884  ;;  %v5732_v44 = vadd.f32 1.0, %v10883_v0 }
 0x5a4   : > { %v10887_v17 = vpop.eup %10886  ;;  %10896 = vrcp.f32 %v5716_v34  ;;  %v5719_v21 = vadd.f32 1.0, %v10885_v14  ;;  %v15118_v34 = vld [vmem:[#allocation35_spill] sm:$0xff] }
 0x5a5   : > { %v10889_v8 = vpop.eup %10888  ;;  %10898 = vrcp.f32 %v5732_v44  ;;  %v5735_v63 = vadd.f32 1.0, %v10887_v17  ;;  %v15119_v17 = vld [vmem:[#allocation51_spill] sm:$0xff] }
 0x5a6   : > { %v10891_v48 = vpop.eup %10890  ;;  %10900 = vrcp.f32 %v5719_v21  ;;  %v5718_v5 = vadd.f32 1.0, %v10889_v8  ;;  %v15121_v8 = vld [vmem:[#allocation36_spill] sm:$0xff] }
 0x5a7   : > { %v10893_v59 = vpop.eup %10892  ;;  %10902 = vrcp.f32 %v5735_v63  ;;  %v5734_v45 = vadd.f32 1.0, %v10891_v48 }
 0x5a8   : > { %v10895_v24 = vpop.eup %10894  ;;  %10904 = vrcp.f32 %v5718_v5  ;;  %v5914_v7 = vadd.f32 1.0, %v10893_v59  ;;  %v15122_v5 = vld [vmem:[#allocation52_spill] sm:$0xff] }
 0x5a9   : > { %10906 = vrcp.f32 %v5734_v45  ;;  %v5915_v29 = vadd.f32 1.0, %v10895_v24  ;;  %v15123_v24 = vld [vmem:[#allocation34_spill] sm:$0xff] }
 0x5aa   : > { %10908 = vrcp.f32 %v5914_v7 }
 0x5ab   : > { %10910 = vrcp.f32 %v5915_v29 }
 0x5ae   : > { %v10897_v28 = vpop.eup %10896 }
 0x5af   : > { %v10899_v0 = vpop.eup %10898  ;;  %v14143_v14 = vmul.f32 %v10897_v28, %v15118_v34 }
 0x5b0   : > { %v10901_v44 = vpop.eup %10900  ;;  %v14146_v49 = vmul.f32 %v10899_v0, %v15119_v17 }
 0x5b1   : > { %v10903_v21 = vpop.eup %10902  ;;  %v14149_v63 = vmul.f32 %v10901_v44, %v15121_v8  ;;  %v10709_v44 = vld [vmem:[#allocation13 + $0xc0] sm:$0xff]  }
 0x5b2   : > { %15120 = vst [vmem:[#allocation73_spill] sm:$0xff] %v14146_v49  ;;  %v10905_v48 = vpop.eup %10904  ;;  %v14152_v59 = vmul.f32 %v10903_v21, %v15122_v5  ;;  %v10711_v8 = vld [vmem:[#allocation13 + $0x80] sm:$0xff]   ;;  %v10713_v21 = vld [vmem:[#allocation13 + $0xc8] sm:$0xff]  }
 0x5b3   : > { %v10907_v45 = vpop.eup %10906  ;;  %v14155_v7 = vmul.f32 %v10905_v48, %v15123_v24  ;;  %v10717_v48 = vld [vmem:[#allocation13 + $0xd0] sm:$0xff]   ;;  %v10741_v5 = vld [vmem:[#allocation13 + $0x1c0] sm:$0xff]   ;;  %v10744_v24 = vld [vmem:[#allocation13 + $0x158] sm:$0xff]  }
 0x5b4   : > { %v10909_v29 = vpop.eup %10908  ;;  %v14158_v28 = vmul.f32 %v10907_v45, %v15124_v13  ;;  %v10715_v13 = vld [vmem:[#allocation13 + $0x88] sm:$0xff]   ;;  %v10742_v45 = vld [vmem:[#allocation13 + $0x110] sm:$0xff]  }
 0x5b5   : > { %v10911_v34 = vpop.eup %10910  ;;  %v5950_v0 = vmul.f32 %v10909_v29, %v13745_v22  ;;  %v10719_v22 = vld [vmem:[#allocation13 + $0x90] sm:$0xff]   ;;  %v10746_v29 = vld [vmem:[#allocation13 + $0x118] sm:$0xff]  }
 0x5b6   : > { %v5951_v17 = vmul.f32 %v10911_v34, %v13747_v54  ;;  %v10721_v54 = vld [vmem:[#allocation13 + $0xd8] sm:$0xff]   ;;  %v10748_v34 = vld [vmem:[#allocation13 + $0x160] sm:$0xff]  }
 0x5b8   : > { %v10435_v49 = vpack.c.bf16 %v5951_v17, %v5950_v0  ;;  %v10750_v0 = vld [vmem:[#allocation13 + $0x120] sm:$0xff]   ;;  %v10752_v17 = vld [vmem:[#allocation13 + $0x168] sm:$0xff]  }
 0x5ba   : > { %10436 = vmatprep.subr.bf16.mxu1 %v10435_v49 }
 0x5bb   : > { %10438 = vmatpush3.bf16.msra.mxu1 %v10435_v49  ;;  %v10740_v49 = vld [vmem:[#allocation13 + $0x150] sm:$0xff]  }
 0x5bc   : > { %9751 = vmatprep.subr.bf16.mxu1 %v10709_v44  ;;  %v10754_v44 = vld [vmem:[#allocation13 + $0x128] sm:$0xff]  }
 0x5be   : > { %10304 = vmatmul.mubr.msk.f32.vlgmr.msra.gmra.mrb[192].mxu1 %vm5286_vm1, %v13758_v40  ;;  %v10723_v40 = vld [vmem:[#allocation13 + $0x98] sm:$0xff]  }
 0x5bf   : > { %10306 = vmatprep.mubr.msk.f32.mxu1 %vm5286_vm1, %v13772_v18  ;;  %9752 = vmatpush3.bf16.msra.mxu1 %v10711_v8  ;;  %v10725_v18 = vld [vmem:[#allocation13 + $0xe0] sm:$0xff]   ;;  %v10756_v8 = vld [vmem:[#allocation13 + $0x170] sm:$0xff]  }
 0x5c0   : > { %9753 = vmatprep.subr.bf16.mxu1 %v10713_v21 }
 0x5c2   : > { %10307 = vmatmul.mubr.msk.f32.gmra.mrb[194].mxu1 %vm5286_vm1, %v13788_v60  ;;  %v11035_v60 = vld [vmem:[%s14890_s20 + $0x80] sm:$0xff] }
 0x5c3   : > { %10309 = vmatprep.mubr.msk.f32.mxu1 %vm5286_vm1, %v13804_v38  ;;  %9754 = vmatpush3.bf16.msra.mxu1 %v10715_v13  ;;  %v15128_v38 = vld [vmem:[#allocation57_spill] sm:$0xff]  ;;  %v10758_v13 = vld [vmem:[#allocation13 + $0x130] sm:$0xff]  }
 0x5c4   : > { %9755 = vmatprep.subr.bf16.mxu1 %v10717_v48  ;;  %v10760_v48 = vld [vmem:[#allocation13 + $0x178] sm:$0xff]  }
 0x5c6   : > { %10310 = vmatmul.mubr.msk.f32.gmra.mrb[196].mxu1 %vm5286_vm1, %v13820_v58  ;;  %v10728_v58 = vld [vmem:[#allocation13 + $0x78] sm:$0xff]  }
 0x5c7   : > { %10312 = vmatprep.mubr.msk.f32.mxu1 %vm5286_vm1, %v13838_v57  ;;  %9756 = vmatpush3.bf16.msra.mxu1 %v10719_v22  ;;  %v10730_v57 = vld [vmem:[#allocation13 + $0x38] sm:$0xff]   ;;  %v15130_v22 = vld [vmem:[#allocation63_spill] sm:$0xff] }
 0x5c8   : > { %9757 = vmatprep.subr.bf16.mxu1 %v10721_v54 }
 0x5ca   : > { %10313 = vmatmul.mubr.msk.f32.gmra.mrb[198].mxu1 %vm5286_vm1, %v13854_v31 }
 0x5cb   : > { %10315 = vmatprep.mubr.msk.f32.mxu1 %vm5286_vm1, %v13870_v43  ;;  %9758 = vmatpush3.bf16.msra.mxu1 %v10723_v40  ;;  %v6243_v43 = vld [vmem:[#allocation4 + $0xf] sm:$0xff] }
 0x5cc   : > { %9759 = vmatprep.subr.bf16.mxu1 %v10725_v18 }
 0x5ce   : > { %10316 = vmatmul.mubr.msk.f32.gmra.mrb[200].mxu1 %vm5286_vm1, %v13886_v50 }
 0x5cf   : > { %10318 = vmatprep.mubr.msk.f32.mxu1 %vm5286_vm1, %v13902_v55  ;;  %v10732_v55 = vld [vmem:[#allocation13 + $0xf0] sm:$0xff]  }
 0x5d2   : > { %10319 = vmatmul.mubr.msk.f32.gmra.mrb[202].mxu1 %vm5286_vm1, %v13918_v23  ;;  %v10734_v23 = vld [vmem:[#allocation13 + $0xf8] sm:$0xff]  }
 0x5d3   : > { %10321 = vmatprep.mubr.msk.f32.mxu1 %vm5286_vm1, %v13934_v62  ;;  %v10736_v62 = vld [vmem:[#allocation13 + $0x140] sm:$0xff]  }
 0x5d6   : > { %10322 = vmatmul.mubr.msk.f32.gmra.mrb[204].mxu1 %vm5286_vm1, %v13950_v52  ;;  %v10737_v52 = vld [vmem:[#allocation13 + $0x100] sm:$0xff]  }
 0x5d7   : > { %10324 = vmatprep.mubr.msk.f32.mxu1 %vm5286_vm1, %v13966_v16  ;;  %v10738_v16 = vld [vmem:[#allocation13 + $0x148] sm:$0xff]  }
 0x5da   : > { %10325 = vmatmul.mubr.msk.f32.gmra.mrb[206].mxu1 %vm5286_vm1, %v13982_v39  ;;  %v10739_v39 = vld [vmem:[#allocation13 + $0x108] sm:$0xff]  }
 0x5db   : > { %10327 = vmatprep.mubr.msk.f32.mxu1 %vm5286_vm1, %v11035_v60  ;;  %v10762_v60 = vld [vmem:[#allocation13 + $0x138] sm:$0xff]  }
 0x5de   : > { %10328 = vmatmul.mubr.msk.f32.gmra.mrb[208].mxu1 %vm5286_vm1, %v13763_v33  ;;  %v15125_v33 = vld [vmem:[#allocation55_spill] sm:$0xff] }
 0x5df   : > { %10330 = vmatprep.mubr.msk.f32.mxu1 %vm5286_vm1, %v13777_v51  ;;  %v15126_v51 = vld [vmem:[#allocation64_spill] sm:$0xff] }
 0x5e2   : > { %10331 = vmatmul.mubr.msk.f32.gmra.mrb[210].mxu1 %vm5286_vm1, %v13793_v3  ;;  %v15127_v3 = vld [vmem:[#allocation62_spill] sm:$0xff] }
 0x5e3   : > { %10333 = vmatprep.mubr.msk.f32.mxu1 %vm5286_vm1, %v13809_v41  ;;  %v10726_v41 = vld [vmem:[#allocation13 + $0x30] sm:$0xff]  }
 0x5e4   : > { %9652 = vmatpush3.bf16.msra.mxu0 %v10726_v41 }
 0x5e5   : > { %9653 = vmatprep.subr.bf16.mxu0 %v10728_v58 }
 0x5e6   : > { %10334 = vmatmul.mubr.msk.f32.gmra.mrb[212].mxu1 %vm5286_vm1, %v13825_v20  ;;  %v10727_v20 = vld [vmem:[#allocation13 + $0xa0] sm:$0xff]  }
 0x5e7   : > { %10336 = vmatprep.mubr.msk.f32.mxu1 %vm5286_vm1, %v13843_v47  ;;  %9760 = vmatpush3.bf16.msra.mxu1 %v10727_v20  ;;  %v15129_v47 = vld [vmem:[#allocation54_spill] sm:$0xff] }
 0x5e8   : > { %9654 = vmatpush3.bf16.msra.mxu0 %v10730_v57  ;;  %v6338_v31 = vpack.c.bf16 %v15129_v47, %v15129_v47  ;;  %v6370_v57 = vld [vmem:[#allocation4 + $0x9] sm:$0xff]  ;;  %v6371_v47 = vld [vmem:[#allocation4 + $0x11] sm:$0xff] }
 0x5e9   : > { %9863 = vmatprep.subr.bf16.mxu0 %v10736_v62 }
 0x5ea   : > { %10337 = vmatmul.mubr.msk.f32.gmra.mrb[214].mxu1 %vm5286_vm1, %v13859_v6  ;;  %v6242_v6 = vld [vmem:[#allocation4 + $0x7] sm:$0xff]  ;;  %7571 = vmatprep.mubr.bf16.mxu0 %v6338_v31 }
 0x5eb   : > { %10339 = vmatprep.mubr.msk.f32.mxu1 %vm5286_vm1, %v13875_v15  ;;  %v10729_v15 = vld [vmem:[#allocation13 + $0xe8] sm:$0xff]   ;;  %v6274_v50 = vpack.c.bf16 %v6243_v43, %v6242_v6 }
 0x5ec   : > { %9761 = vmatprep.subr.bf16.mxu1 %v10729_v15 }
 0x5ed   : > { %7572 = vmatmul.mubr.bf16.vlgmr.msra.gmra.mrb[188].mxu0 %v6274_v50 }
 0x5ee   : > { %10340 = vmatmul.mubr.msk.f32.gmra.mrb[216].mxu1 %vm5286_vm1, %v13891_v4  ;;  %v10731_v4 = vld [vmem:[#allocation13 + $0xa8] sm:$0xff]   ;;  %9864 = vmatpush3.bf16.msra.mxu0 %v10737_v52 }
 0x5ef   : > { %10342 = vmatprep.mubr.msk.f32.mxu1 %vm5286_vm1, %v13907_v30  ;;  %9762 = vmatpush3.bf16.msra.mxu1 %v10731_v4  ;;  %v10733_v30 = vld [vmem:[#allocation13 + $0xb0] sm:$0xff]   ;;  %v6402_v4 = vpack.c.bf16 %v6371_v47, %v6370_v57  ;;  %v10745_v52 = vld [vmem:[#allocation13 + $0x1c8] sm:$0xff]  }
 0x5f0   : > { %9763 = vmatprep.subr.bf16.mxu1 %v10732_v55  ;;  %9865 = vmatprep.subr.bf16.mxu0 %v10738_v16 }
 0x5f2   : > { %10343 = vmatmul.mubr.msk.f32.gmra.mrb[218].mxu1 %vm5286_vm1, %v13923_v19  ;;  %v10735_v19 = vld [vmem:[#allocation13 + $0xb8] sm:$0xff]   ;;  %9866 = vmatpush3.bf16.msra.mxu0 %v10739_v39 }
 0x5f3   : > { %10345 = vmatprep.mubr.msk.f32.mxu1 %vm5286_vm1, %v15125_v33  ;;  %9764 = vmatpush3.bf16.msra.mxu1 %v10733_v30 }
 0x5f4   : > { %9765 = vmatprep.subr.bf16.mxu1 %v10734_v23  ;;  %9867 = vmatprep.subr.bf16.mxu0 %v10740_v49  ;;  %v10743_v23 = vld [vmem:[#allocation13 + $0x180] sm:$0xff]  }
 0x5f6   : > { %10346 = vmatmul.mubr.msk.f32.gmra.mrb[220].mxu1 %vm5286_vm1, %v15126_v51  ;;  %9868 = vmatpush3.bf16.msra.mxu0 %v10742_v45 }
 0x5f7   : > { %10348 = vmatprep.mubr.msk.f32.mxu1 %vm5286_vm1, %v15127_v3  ;;  %9766 = vmatpush3.bf16.msra.mxu1 %v10735_v19  ;;  %v15131_v3 = vld [vmem:[#allocation56_spill] sm:$0xff] }
 0x5f8   : > { %9975 = vmatprep.subr.bf16.mxu1 %v10741_v5  ;;  %9869 = vmatprep.subr.bf16.mxu0 %v10744_v24  ;;  %v10747_v5 = vld [vmem:[#allocation13 + $0x188] sm:$0xff]   ;;  %v10749_v24 = vld [vmem:[#allocation13 + $0x1d0] sm:$0xff]  }
 0x5fa   : > { %10349 = vmatmul.mubr.msk.f32.gmra.mrb[222].mxu1 %vm5286_vm1, %v15128_v38  ;;  %9870 = vmatpush3.bf16.msra.mxu0 %v10746_v29 }
 0x5fb   : > { %9871 = vmatprep.subr.bf16.mxu0 %v10748_v34 }
 0x5fe   : > { %9872 = vmatpush3.bf16.msra.mxu0 %v10750_v0 }
 0x5ff   : > { %9873 = vmatprep.subr.bf16.mxu0 %v10752_v17 }
 0x602   : > { %9874 = vmatpush3.bf16.msra.mxu0 %v10754_v44 }
 0x603   : > { %9875 = vmatprep.subr.bf16.mxu0 %v10756_v8 }
 0x606   : > { %9876 = vmatpush3.bf16.msra.mxu0 %v10758_v13 }
 0x607   : > { %9877 = vmatprep.subr.bf16.mxu0 %v10760_v48 }
 0x60a   : > { %9878 = vmatpush3.bf16.msra.mxu0 %v10762_v60  ;;  %v10755_v60 = vld [vmem:[#allocation13 + $0x198] sm:$0xff]  }
 0x691   : > { %v10305_v21 = vpop.f32.mrb[192].mxu1 }
 0x692   : > { %v6178_v54 = vadd.f32 %v10305_v21, %v15130_v22  ;;  %v6018_v40 = vpop.f32.mrb[193].mxu1  ;;  %v10753_v22 = vld [vmem:[#allocation13 + $0x1d8] sm:$0xff]  }
 0x693   : > { %v6177_v18 = vadd.f32 %v6018_v40, %v14055_v42 }
 0x694   : > { %6211 = vst [vmem:[#allocation4 + $0x30] sm:$0xff] %v6178_v54 }
 0x695   : > { %6210 = vst [vmem:[#allocation4 + $0x28] sm:$0xff] %v6177_v18  ;;  %v10308_v33 = vpop.f32.mrb[194].mxu1  ;;  %v6339_v51 = vpack.c.bf16 %v6178_v54, %v6177_v18 }
 0x696   : > { %v6180_v38 = vadd.f32 %v10308_v33, %v15131_v3  ;;  %v6028_v41 = vpop.f32.mrb[195].mxu1 }
 0x697   : > { %v6179_v58 = vadd.f32 %v6028_v41, %v14075_v10  ;;  %7579 = vmatprep.mubr.bf16.mxu0 %v6339_v51  ;;  %v10757_v51 = vld [vmem:[#allocation13 + $0x1e0] sm:$0xff]  }
 0x698   : > { %6213 = vst [vmem:[#allocation4 + $0x50] sm:$0xff] %v6180_v38 }
 0x699   : > { %6212 = vst [vmem:[#allocation4 + $0x48] sm:$0xff] %v6179_v58  ;;  %v10311_v20 = vpop.f32.mrb[196].mxu1  ;;  %v6340_v42 = vpack.c.bf16 %v6180_v38, %v6179_v58 }
 0x69a   : > { %v6182_v31 = vadd.f32 %v10311_v20, %v14081_v9  ;;  %v6038_v6 = vpop.f32.mrb[197].mxu1 }
 0x69b   : > { %v6181_v43 = vadd.f32 %v6038_v6, %v14087_v61  ;;  %v6373_v0 = vld [vmem:[#allocation4 + $0x31] sm:$0xff] }
 0x69c   : > { %6215 = vst [vmem:[#allocation4 + $0x70] sm:$0xff] %v6182_v31  ;;  %v6434_v15 = vld [vmem:[#allocation4 + $0x27] sm:$0xff]  ;;  %v6435_v50 = vld [vmem:[#allocation4 + $0x2f] sm:$0xff] }
 0x69d   : > { %6214 = vst [vmem:[#allocation4 + $0x68] sm:$0xff] %v6181_v43  ;;  %v10314_v55 = vpop.f32.mrb[198].mxu1  ;;  %v6466_v10 = vpack.c.bf16 %v6435_v50, %v6434_v15  ;;  %v6341_v30 = vpack.c.bf16 %v6182_v31, %v6181_v43  ;;  %v6372_v34 = vld [vmem:[#allocation4 + $0x29] sm:$0xff] }
 0x69e   : > { %v14235_v19 = vadd.f32 %v10314_v55, %v14093_v27  ;;  %v6048_v62 = vpop.f32.mrb[199].mxu1 }
 0x69f   : > { %v14238_v16 = vadd.f32 %v6048_v62, %v14107_v2  ;;  %7732 = vmatprep.mubr.bf16.mxu1 %v6466_v10  ;;  %7580 = vmatmul.mubr.bf16.gmra.mrb[192].mxu0 %v6466_v10  ;;  %v6375_v41 = vld [vmem:[#allocation4 + $0x51] sm:$0xff] }
 0x6a0   : > { %v6627_v9 = vld [vmem:[#allocation4 + $0x47] sm:$0xff]  ;;  %v6628_v61 = vld [vmem:[#allocation4 + $0x4f] sm:$0xff]  ;;  %6217 = vst [vmem:[#allocation4 + $0x90] sm:$0xff] %v14235_v19  ;;  %7733 = vmatmul.mubr.bf16.vlgmr.msra.gmra.mrb[224].mxu1 %v6402_v4  ;;  %7587 = vmatprep.mubr.bf16.mxu0 %v6340_v42 }
 0x6a1   : > { %v14241_v39 = vpack.c.bf16 %v6628_v61, %v6627_v9  ;;  %6216 = vst [vmem:[#allocation4 + $0x88] sm:$0xff] %v14238_v16  ;;  %v10317_v49 = vpop.f32.mrb[200].mxu1  ;;  %v6342_v27 = vpack.c.bf16 %v14235_v19, %v14238_v16  ;;  %9976 = vmatpush3.bf16.msra.mxu1 %v10743_v23  ;;  %v6374_v38 = vld [vmem:[#allocation4 + $0x49] sm:$0xff]  ;;  %v10759_v42 = vld [vmem:[#allocation13 + $0x1a0] sm:$0xff]  }
 0x6a2   : > { %v6186_v2 = vadd.f32 %v10317_v49, %v14113_v46  ;;  %v6058_v45 = vpop.f32.mrb[201].mxu1  ;;  %9977 = vmatprep.subr.bf16.mxu1 %v10745_v52  ;;  %v10751_v46 = vld [vmem:[#allocation13 + $0x190] sm:$0xff]   ;;  %v14279_v6 = vpack.c.bf16 %v6375_v41, %v6374_v38  ;;  %v10763_v4 = vld [vmem:[#allocation13 + $0x1a8] sm:$0xff]  }
 0x6a3   : > { %v14248_v29 = vadd.f32 %v6058_v45, %v14119_v1  ;;  %7740 = vmatprep.mubr.bf16.mxu1 %v14241_v39  ;;  %v14256_v1 = vpack.c.bf16 %v6373_v0, %v6372_v34  ;;  %v6758_v23 = vld [vmem:[#allocation4 + $0x71] sm:$0xff] }
 0x6a4   : > { %6219 = vst [vmem:[#allocation4 + $0xb0] sm:$0xff] %v6186_v2  ;;  %v6438_v17 = vld [vmem:[#allocation4 + $0x67] sm:$0xff]  ;;  %v6439_v44 = vld [vmem:[#allocation4 + $0x6f] sm:$0xff] }
 0x6a5   : > { %6218 = vst [vmem:[#allocation4 + $0xa8] sm:$0xff] %v14248_v29  ;;  %v10320_v8 = vpop.f32.mrb[202].mxu1  ;;  %v14253_v21 = vpack.c.bf16 %v6186_v2, %v14248_v29  ;;  %9978 = vmatpush3.bf16.msra.mxu1 %v10747_v5  ;;  %v14262_v40 = vpack.c.bf16 %v6439_v44, %v6438_v17  ;;  %v14294_v19 = vld [vmem:[#allocation4 + $0x69] sm:$0xff] }
 0x6a6   : > { %v6188_v13 = vadd.f32 %v10320_v8, %v14125_v35  ;;  %v6068_v48 = vpop.f32.mrb[203].mxu1  ;;  %9979 = vmatprep.subr.bf16.mxu1 %v10749_v24  ;;  %v15133_v62 = vld [vmem:[#allocation60_spill] sm:$0xff]  ;;  %v14304_v5 = vpack.c.bf16 %v6758_v23, %v14294_v19  ;;  %v10766_v24 = vld [vmem:[#allocation13 + $0x1f8] sm:$0xff]  }
 0x6a7   : > { %v14259_v54 = vadd.f32 %v6068_v48, %v14131_v53  ;;  %7588 = vmatmul.mubr.bf16.gmra.mrb[196].mxu0 %v14241_v39  ;;  %v6379_v48 = vld [vmem:[#allocation4 + $0x91] sm:$0xff] }
 0x6a8   : > { %6221 = vst [vmem:[#allocation4 + $0xd0] sm:$0xff] %v6188_v13  ;;  %7741 = vmatmul.mubr.bf16.gmra.mrb[228].mxu1 %v14256_v1  ;;  %7595 = vmatprep.mubr.bf16.mxu0 %v6341_v30  ;;  %v6440_v58 = vld [vmem:[#allocation4 + $0x87] sm:$0xff]  ;;  %v6441_v20 = vld [vmem:[#allocation4 + $0x8f] sm:$0xff] }
 0x6a9   : > { %6220 = vst [vmem:[#allocation4 + $0xc8] sm:$0xff] %v14259_v54  ;;  %v10323_v18 = vpop.f32.mrb[204].mxu1  ;;  %7748 = vmatprep.mubr.bf16.mxu1 %v14262_v40  ;;  %v14268_v35 = vpack.c.bf16 %v6188_v13, %v14259_v54  ;;  %9980 = vmatpush3.bf16.msra.mxu1 %v10751_v46  ;;  %v14285_v15 = vpack.c.bf16 %v6441_v20, %v6440_v58  ;;  %v10764_v30 = vld [vmem:[#allocation13 + $0x1f0] sm:$0xff]  }
 0x6aa   : > { %v6190_v53 = vadd.f32 %v10323_v18, %v14137_v32  ;;  %v6078_v33 = vpop.f32.mrb[205].mxu1  ;;  %9981 = vmatprep.subr.bf16.mxu1 %v10753_v22  ;;  %v6378_v13 = vld [vmem:[#allocation4 + $0x89] sm:$0xff] }
 0x6ab   : > { %v14272_v3 = vadd.f32 %v6078_v33, %v14143_v14  ;;  %v10761_v14 = vld [vmem:[#allocation13 + $0x1e8] sm:$0xff]  }
 0x6ac   : > { %6223 = vst [vmem:[#allocation4 + $0xf0] sm:$0xff] %v6190_v53  ;;  %v6442_v16 = vld [vmem:[#allocation4 + $0xa7] sm:$0xff]  ;;  %v6443_v9 = vld [vmem:[#allocation4 + $0xaf] sm:$0xff] }
 0x6ad   : > { %6222 = vst [vmem:[#allocation4 + $0xe8] sm:$0xff] %v14272_v3  ;;  %v10326_v57 = vpop.f32.mrb[206].mxu1  ;;  %v14276_v47 = vpack.c.bf16 %v6190_v53, %v14272_v3  ;;  %9982 = vmatpush3.bf16.msra.mxu1 %v10755_v60  ;;  %v14311_v0 = vpack.c.bf16 %v6443_v9, %v6442_v16 }
 0x6ae   : > { %v6192_v32 = vadd.f32 %v10326_v57, %v14149_v63  ;;  %v6088_v31 = vpop.f32.mrb[207].mxu1  ;;  %9983 = vmatprep.subr.bf16.mxu1 %v10757_v51  ;;  %v14329_v51 = vpack.c.bf16 %v6379_v48, %v6378_v13 }
 0x6af   : > { %v14282_v43 = vadd.f32 %v6088_v31, %v14155_v7  ;;  %7596 = vmatmul.mubr.bf16.gmra.mrb[200].mxu0 %v14262_v40  ;;  %v15132_v7 = vld [vmem:[#allocation59_spill] sm:$0xff] }
 0x6b0   : > { %6225 = vst [vmem:[#allocation4 + $0x110] sm:$0xff] %v6192_v32  ;;  %7749 = vmatmul.mubr.bf16.gmra.mrb[232].mxu1 %v14279_v6  ;;  %7603 = vmatprep.mubr.bf16.mxu0 %v6342_v27  ;;  %v10765_v27 = vld [vmem:[#allocation13 + $0x1b0] sm:$0xff]   ;;  %v6444_v22 = vld [vmem:[#allocation4 + $0xc7] sm:$0xff] }
 0x6b1   : > { %6224 = vst [vmem:[#allocation4 + $0x108] sm:$0xff] %v14282_v43  ;;  %v10329_v50 = vpop.f32.mrb[208].mxu1  ;;  %7756 = vmatprep.mubr.bf16.mxu1 %v14285_v15  ;;  %v14291_v63 = vpack.c.bf16 %v6192_v32, %v14282_v43  ;;  %9984 = vmatpush3.bf16.msra.mxu1 %v10759_v42  ;;  %v6445_v18 = vld [vmem:[#allocation4 + $0xcf] sm:$0xff] }
 0x6b2   : > { %v6194_v55 = vadd.f32 %v10329_v50, %v15132_v7  ;;  %v6098_v10 = vpop.f32.mrb[209].mxu1  ;;  %9985 = vmatprep.subr.bf16.mxu1 %v10761_v14  ;;  %v14333_v38 = vpack.c.bf16 %v6445_v18, %v6444_v22  ;;  %v6380_v42 = vld [vmem:[#allocation4 + $0xa9] sm:$0xff]  ;;  %v6381_v32 = vld [vmem:[#allocation4 + $0xb1] sm:$0xff]  ;;  %v15135_v7 = vld [vmem:[#allocation58_spill] sm:$0xff] }
 0x6b3   : > { %v14297_v52 = vadd.f32 %v6098_v10, %v15133_v62  ;;  %v14353_v10 = vpack.c.bf16 %v6381_v32, %v6380_v42 }
 0x6b4   : > { %6227 = vst [vmem:[#allocation4 + $0x130] sm:$0xff] %v6194_v55  ;;  %v6446_v31 = vld [vmem:[#allocation4 + $0xe7] sm:$0xff]  ;;  %v6447_v14 = vld [vmem:[#allocation4 + $0xef] sm:$0xff] }
 0x6b5   : > { %6226 = vst [vmem:[#allocation4 + $0x128] sm:$0xff] %v14297_v52  ;;  %v10332_v61 = vpop.f32.mrb[210].mxu1  ;;  %v14301_v49 = vpack.c.bf16 %v6194_v55, %v14297_v52  ;;  %9986 = vmatpush3.bf16.msra.mxu1 %v10763_v4  ;;  %v14359_v62 = vpack.c.bf16 %v6447_v14, %v6446_v31 }
 0x6b6   : > { %v6196_v2 = vadd.f32 %v10332_v61, %v14071_v12  ;;  %v6108_v45 = vpop.f32.mrb[211].mxu1  ;;  %9987 = vmatprep.subr.bf16.mxu1 %v10764_v30  ;;  %v15136_v30 = vld [vmem:[#allocation71_spill] sm:$0xff]  ;;  %v15137_v61 = vld [vmem:[#allocation70_spill] sm:$0xff] }
 0x6b7   : > { %v14308_v34 = vadd.f32 %v6108_v45, %v14078_v11  ;;  %7604 = vmatmul.mubr.bf16.gmra.mrb[204].mxu0 %v14285_v15  ;;  %v10767_v11 = vld [vmem:[#allocation13 + $0x1b8] sm:$0xff]  }
 0x6b8   : > { %6229 = vst [vmem:[#allocation4 + $0x150] sm:$0xff] %v6196_v2  ;;  %7757 = vmatmul.mubr.bf16.gmra.mrb[236].mxu1 %v14304_v5  ;;  %7611 = vmatprep.mubr.bf16.mxu0 %v14253_v21  ;;  %v15138_v45 = vld [vmem:[#allocation73_spill] sm:$0xff]  ;;  %v6386_v42 = vld [vmem:[#allocation4 + $0x109] sm:$0xff] }
 0x6b9   : > { %6228 = vst [vmem:[#allocation4 + $0x148] sm:$0xff] %v14308_v34  ;;  %v10335_v17 = vpop.f32.mrb[212].mxu1  ;;  %7764 = vmatprep.mubr.bf16.mxu1 %v14311_v0  ;;  %v14318_v12 = vpack.c.bf16 %v6196_v2, %v14308_v34  ;;  %9988 = vmatpush3.bf16.msra.mxu1 %v10765_v27  ;;  %v6387_v32 = vld [vmem:[#allocation4 + $0x111] sm:$0xff] }
 0x6ba   : > { %v6198_v44 = vadd.f32 %v10335_v17, %v14084_v26  ;;  %v6118_v8 = vpop.f32.mrb[213].mxu1  ;;  %9989 = vmatprep.subr.bf16.mxu1 %v10766_v24  ;;  %v6382_v17 = vld [vmem:[#allocation4 + $0xc9] sm:$0xff] }
 0x6bb   : > { %v14322_v46 = vadd.f32 %v6118_v8, %v14090_v56  ;;  %v6449_v8 = vld [vmem:[#allocation4 + $0x10f] sm:$0xff] }
 0x6bc   : > { %6231 = vst [vmem:[#allocation4 + $0x170] sm:$0xff] %v6198_v44 }
 0x6bd   : > { %6230 = vst [vmem:[#allocation4 + $0x168] sm:$0xff] %v14322_v46  ;;  %v10338_v60 = vpop.f32.mrb[214].mxu1  ;;  %v14326_v53 = vpack.c.bf16 %v6198_v44, %v14322_v46  ;;  %9990 = vmatpush3.bf16.msra.mxu1 %v10767_v11  ;;  %v6383_v11 = vld [vmem:[#allocation4 + $0xd1] sm:$0xff]  ;;  %v6448_v44 = vld [vmem:[#allocation4 + $0x107] sm:$0xff] }
 0x6be   : > { %v6200_v33 = vadd.f32 %v10338_v60, %v14103_v25  ;;  %v6128_v26 = vpop.f32.mrb[215].mxu1  ;;  %v14379_v60 = vpack.c.bf16 %v6383_v11, %v6382_v17 }
 0x6bf   : > { %v6199_v56 = vadd.f32 %v6128_v26, %v14110_v36  ;;  %7612 = vmatmul.mubr.bf16.gmra.mrb[208].mxu0 %v14311_v0  ;;  %v15134_v36 = vld [vmem:[#allocation61_spill] sm:$0xff]  ;;  %v14383_v26 = vpack.c.bf16 %v6449_v8, %v6448_v44 }
 0x6c0   : > { %6233 = vst [vmem:[#allocation4 + $0x190] sm:$0xff] %v6200_v33  ;;  %7765 = vmatmul.mubr.bf16.gmra.mrb[240].mxu1 %v14329_v51  ;;  %7619 = vmatprep.mubr.bf16.mxu0 %v14268_v35  ;;  %v6452_v31 = vld [vmem:[#allocation4 + $0x147] sm:$0xff]  ;;  %v6453_v14 = vld [vmem:[#allocation4 + $0x14f] sm:$0xff]  ;;  %v9655_v17 = vpop.f32.mrb[188].mxu0 }
 0x6c1   : > { %6232 = vst [vmem:[#allocation4 + $0x188] sm:$0xff] %v6199_v56  ;;  %v10341_v41 = vpop.f32.mrb[216].mxu1  ;;  %7772 = vmatprep.mubr.bf16.mxu1 %v14333_v38  ;;  %v14338_v58 = vpack.c.bf16 %v6200_v33, %v6199_v56  ;;  %v6384_v56 = vld [vmem:[#allocation4 + $0xe9] sm:$0xff]  ;;  %v6391_v44 = vld [vmem:[#allocation4 + $0x151] sm:$0xff]  ;;  %v9656_v8 = vpop.f32.mrb[189].mxu0 }
 0x6c2   : > { %v14341_v25 = vadd.f32 %v10341_v41, %v14116_v37  ;;  %v6138_v20 = vpop.f32.mrb[217].mxu1  ;;  %v6385_v41 = vld [vmem:[#allocation4 + $0xf1] sm:$0xff]  ;;  %v6390_v11 = vld [vmem:[#allocation4 + $0x149] sm:$0xff] }
 0x6c3   : > { %v14344_v57 = vadd.f32 %v6138_v20, %v15134_v36  ;;  %v6451_v20 = vld [vmem:[#allocation4 + $0x12f] sm:$0xff]  ;;  %v14388_v36 = vpack.c.bf16 %v6385_v41, %v6384_v56  ;;  %v14414_v41 = vpack.c.bf16 %v6391_v44, %v6390_v11 }
 0x6c4   : > { %6235 = vst [vmem:[#allocation4 + $0x1b0] sm:$0xff] %v14341_v25 }
 0x6c5   : > { %6234 = vst [vmem:[#allocation4 + $0x1a8] sm:$0xff] %v14344_v57  ;;  %v10344_v50 = vpop.f32.mrb[218].mxu1  ;;  %v6351_v4 = vpack.c.bf16 %v14341_v25, %v14344_v57 }
 0x6c6   : > { %v14351_v55 = vadd.f32 %v10344_v50, %v15135_v7  ;;  %v6148_v37 = vpop.f32.mrb[219].mxu1  ;;  %v14396_v50 = vpack.c.bf16 %v6387_v32, %v6386_v42  ;;  %v14399_v7 = vpack.c.bf16 %v6453_v14, %v6452_v31  ;;  %v6392_v42 = vld [vmem:[#allocation4 + $0x169] sm:$0xff]  ;;  %v6393_v32 = vld [vmem:[#allocation4 + $0x171] sm:$0xff] }
 0x6c7   : > { %v14356_v23 = vadd.f32 %v6148_v37, %v15136_v30  ;;  %7620 = vmatmul.mubr.bf16.gmra.mrb[212].mxu0 %v14333_v38  ;;  %v6388_v37 = vld [vmem:[#allocation4 + $0x129] sm:$0xff]  ;;  %v6389_v30 = vld [vmem:[#allocation4 + $0x131] sm:$0xff] }
 0x6c8   : > { %6237 = vst [vmem:[#allocation4 + $0x1d0] sm:$0xff] %v14351_v55  ;;  %7773 = vmatmul.mubr.bf16.gmra.mrb[244].mxu1 %v14353_v10  ;;  %7627 = vmatprep.mubr.bf16.mxu0 %v14276_v47 }
 0x6c9   : > { %6236 = vst [vmem:[#allocation4 + $0x1c8] sm:$0xff] %v14356_v23  ;;  %v10347_v16 = vpop.f32.mrb[220].mxu1  ;;  %7780 = vmatprep.mubr.bf16.mxu1 %v14359_v62  ;;  %v6352_v9 = vpack.c.bf16 %v14351_v55, %v14356_v23 }
 0x6ca   : > { %v14369_v27 = vadd.f32 %v10347_v16, %v15137_v61  ;;  %v6158_v2 = vpop.f32.mrb[221].mxu1  ;;  %v6454_v16 = vld [vmem:[#allocation4 + $0x167] sm:$0xff]  ;;  %v6455_v61 = vld [vmem:[#allocation4 + $0x16f] sm:$0xff] }
 0x6cb   : > { %v14372_v24 = vadd.f32 %v6158_v2, %v15138_v45  ;;  %v14404_v2 = vpack.c.bf16 %v6389_v30, %v6388_v37  ;;  %v14407_v45 = vpack.c.bf16 %v6455_v61, %v6454_v16  ;;  %v14424_v37 = vpack.c.bf16 %v6393_v32, %v6392_v42  ;;  %v10768_v30 = vld [vmem:[#allocation13 + $0x200] sm:$0xff]   ;;  %v6394_v61 = vld [vmem:[#allocation4 + $0x189] sm:$0xff] }
 0x6cc   : > { %6239 = vst [vmem:[#allocation4 + $0x1f0] sm:$0xff] %v14369_v27  ;;  %v6458_v31 = vld [vmem:[#allocation4 + $0x1a7] sm:$0xff]  ;;  %v6459_v14 = vld [vmem:[#allocation4 + $0x1af] sm:$0xff]  ;;  %10351 = vmatprep.subr.bf16.mxu0 %v10768_v30 }
 0x6cd   : > { %6238 = vst [vmem:[#allocation4 + $0x1e8] sm:$0xff] %v14372_v24  ;;  %v10350_v13 = vpop.f32.mrb[222].mxu1  ;;  %v6353_v48 = vpack.c.bf16 %v14369_v27, %v14372_v24  ;;  %v14427_v16 = vpack.c.bf16 %v6459_v14, %v6458_v31  ;;  %v6396_v25 = vld [vmem:[#allocation4 + $0x1a9] sm:$0xff] }
 0x6ce   : > { %v6208_v22 = vadd.f32 %v10350_v13, %v14152_v59  ;;  %v6168_v18 = vpop.f32.mrb[223].mxu1  ;;  %v6450_v59 = vld [vmem:[#allocation4 + $0x127] sm:$0xff]  ;;  %v6499_v24 = vld [vmem:[#allocation4 + $0x30] sm:$0xff] }
 0x6cf   : > { %v6207_v33 = vadd.f32 %v6168_v18, %v14158_v28  ;;  %7628 = vmatmul.mubr.bf16.gmra.mrb[216].mxu0 %v14359_v62  ;;  %v14391_v28 = vpack.c.bf16 %v6451_v20, %v6450_v59  ;;  %v6456_v13 = vld [vmem:[#allocation4 + $0x187] sm:$0xff]  ;;  %v14412_v18 = vadd.f32 %v9656_v8, %v9655_v17  ;;  %v6395_v17 = vld [vmem:[#allocation4 + $0x191] sm:$0xff] }
 0x6d0   : > { %6241 = vst [vmem:[#allocation4 + $0x210] sm:$0xff] %v6208_v22  ;;  %7781 = vmatmul.mubr.bf16.gmra.mrb[248].mxu1 %v14379_v60  ;;  %7635 = vmatprep.mubr.bf16.mxu0 %v14291_v63  ;;  %v6457_v22 = vld [vmem:[#allocation4 + $0x18f] sm:$0xff]  ;;  %v6460_v11 = vld [vmem:[#allocation4 + $0x1c7] sm:$0xff]  ;;  %v14434_v8 = vpack.c.bf16 %v6395_v17, %v6394_v61 }
 0x6d1   : > { %6240 = vst [vmem:[#allocation4 + $0x208] sm:$0xff] %v6207_v33  ;;  %7788 = vmatprep.mubr.bf16.mxu1 %v14383_v26  ;;  %v9658_v33 = vpop.f32.mrb[190].mxu0  ;;  %v14419_v20 = vpack.c.bf16 %v6457_v22, %v6456_v13  ;;  %v6461_v44 = vld [vmem:[#allocation4 + $0x1cf] sm:$0xff] }
 0x6d2   : > { %v9659_v56 = vpop.f32.mrb[191].mxu0  ;;  %v14437_v13 = vpack.c.bf16 %v6461_v44, %v6460_v11  ;;  %v6398_v55 = vld [vmem:[#allocation4 + $0x1c9] sm:$0xff]  ;;  %v6399_v23 = vld [vmem:[#allocation4 + $0x1d1] sm:$0xff] }
 0x6d3   : > { %v14416_v59 = vadd.f32 %v9659_v56, %v9658_v33  ;;  %v14454_v31 = vpack.c.bf16 %v6399_v23, %v6398_v55  ;;  %v6498_v27 = vld [vmem:[#allocation4 + $0x28] sm:$0xff]  ;;  %v6401_v61 = vld [vmem:[#allocation4 + $0x1f1] sm:$0xff] }
 0x6d4   : > { %v6462_v22 = vld [vmem:[#allocation4 + $0x1e7] sm:$0xff]  ;;  %v6463_v33 = vld [vmem:[#allocation4 + $0x1ef] sm:$0xff]  ;;  %v6530_v44 = vpack.c.bf16 %v6499_v24, %v6498_v27 }
 0x6d5   : > { %v14447_v42 = vpack.c.bf16 %v6463_v33, %v6462_v22  ;;  %v6691_v17 = vld [vmem:[#allocation4 + $0x48] sm:$0xff]  ;;  %v6692_v11 = vld [vmem:[#allocation4 + $0x50] sm:$0xff] }
 0x6d6   : > { %v6723_v22 = vpack.c.bf16 %v6692_v11, %v6691_v17  ;;  %v6567_v33 = vld [vmem:[#allocation4 + $0x71] sm:$0xff]  ;;  %v6693_v55 = vld [vmem:[#allocation4 + $0x68] sm:$0xff] }
 0x6d7   : > { %7636 = vmatmul.mubr.bf16.gmra.mrb[220].mxu0 %v14383_v26  ;;  %v6694_v23 = vld [vmem:[#allocation4 + $0x70] sm:$0xff] }
 0x6d8   : > { %7789 = vmatmul.mubr.bf16.gmra.mrb[252].mxu1 %v14388_v36  ;;  %7643 = vmatprep.mubr.bf16.mxu0 %v14301_v49  ;;  %v6465_v32 = vld [vmem:[#allocation4 + $0x20f] sm:$0xff]  ;;  %v6724_v27 = vpack.c.bf16 %v6694_v23, %v6693_v55 }
 0x6d9   : > { %7796 = vmatprep.mubr.bf16.mxu1 %v14391_v28  ;;  %v6696_v24 = vld [vmem:[#allocation4 + $0x90] sm:$0xff]  ;;  %v6717_v23 = vld [vmem:[#allocation4 + $0x1e8] sm:$0xff] }
 0x6da   : > { %v6507_v17 = vld [vmem:[#allocation4 + $0xb0] sm:$0xff] }
 0x6df   : > { %7644 = vmatmul.mubr.bf16.gmra.mrb[224].mxu0 %v14391_v28 }
 0x6e0   : > { %7797 = vmatmul.mubr.bf16.gmra.mrb[0].mxu1 %v14396_v50  ;;  %7651 = vmatprep.mubr.bf16.mxu0 %v14318_v12 }
 0x6e1   : > { %7804 = vmatprep.mubr.bf16.mxu1 %v14399_v7 }
 0x6e7   : > { %7652 = vmatmul.mubr.bf16.gmra.mrb[228].mxu0 %v14399_v7 }
 0x6e8   : > { %7805 = vmatmul.mubr.bf16.gmra.mrb[4].mxu1 %v14404_v2  ;;  %7659 = vmatprep.mubr.bf16.mxu0 %v14326_v53 }
 0x6e9   : > { %7812 = vmatprep.mubr.bf16.mxu1 %v14407_v45 }
 0x6ef   : > { %7660 = vmatmul.mubr.bf16.gmra.mrb[232].mxu0 %v14407_v45 }
 0x6f0   : > { %7813 = vmatmul.mubr.bf16.gmra.mrb[8].mxu1 %v14414_v41  ;;  %7667 = vmatprep.mubr.bf16.mxu0 %v14338_v58 }
 0x6f1   : > { %7820 = vmatprep.mubr.bf16.mxu1 %v14419_v20 }
 0x6f7   : > { %7668 = vmatmul.mubr.bf16.gmra.mrb[236].mxu0 %v14419_v20 }
 0x6f8   : > { %7821 = vmatmul.mubr.bf16.gmra.mrb[12].mxu1 %v14424_v37  ;;  %7675 = vmatprep.mubr.bf16.mxu0 %v6351_v4  ;;  %v6397_v4 = vld [vmem:[#allocation4 + $0x1b1] sm:$0xff] }
 0x6f9   : > { %7828 = vmatprep.mubr.bf16.mxu1 %v14427_v16  ;;  %v14444_v56 = vpack.c.bf16 %v6397_v4, %v6396_v25  ;;  %v10769_v4 = vld [vmem:[#allocation13 + $0x208] sm:$0xff]  }
 0x6ff   : > { %7676 = vmatmul.mubr.bf16.gmra.mrb[240].mxu0 %v14427_v16 }
 0x700   : > { %7829 = vmatmul.mubr.bf16.gmra.mrb[16].mxu1 %v14434_v8  ;;  %7683 = vmatprep.mubr.bf16.mxu0 %v6352_v9  ;;  %v6464_v9 = vld [vmem:[#allocation4 + $0x207] sm:$0xff] }
 0x701   : > { %7836 = vmatprep.mubr.bf16.mxu1 %v14437_v13  ;;  %v14457_v14 = vpack.c.bf16 %v6465_v32, %v6464_v9  ;;  %v6596_v9 = vpack.c.bf16 %v6567_v33, %v14294_v19  ;;  %v10771_v32 = vld [vmem:[#allocation13 + $0x218] sm:$0xff]  }
 0x702   : > { %v10775_v19 = vld [vmem:[#allocation13 + $0x238] sm:$0xff]  }
 0x707   : > { %7684 = vmatmul.mubr.bf16.gmra.mrb[244].mxu0 %v14437_v13 }
 0x708   : > { %7837 = vmatmul.mubr.bf16.gmra.mrb[20].mxu1 %v14444_v56  ;;  %7691 = vmatprep.mubr.bf16.mxu0 %v6353_v48  ;;  %v6400_v48 = vld [vmem:[#allocation4 + $0x1e9] sm:$0xff] }
 0x709   : > { %7844 = vmatprep.mubr.bf16.mxu1 %v14447_v42  ;;  %v14462_v25 = vpack.c.bf16 %v6401_v61, %v6400_v48  ;;  %v10773_v48 = vld [vmem:[#allocation13 + $0x228] sm:$0xff]  }
 0x70f   : > { %7692 = vmatmul.mubr.bf16.gmra.mrb[248].mxu0 %v14447_v42 }
 0x710   : > { %7845 = vmatmul.mubr.bf16.gmra.mrb[24].mxu1 %v14454_v31  ;;  %7893 = vmatprep.mubr.bf16.mxu0 %v14256_v1  ;;  %v10770_v1 = vld [vmem:[#allocation13 + $0x210] sm:$0xff]  }
 0x711   : > { %7852 = vmatprep.mubr.bf16.mxu1 %v14457_v14 }
 0x717   : > { %7894 = vmatmul.mubr.bf16.vlgmr.msra.gmra.mrb[252].mxu0 %v6530_v44 }
 0x718   : > { %7853 = vmatmul.mubr.bf16.gmra.mrb[28].mxu1 %v14462_v25  ;;  %7901 = vmatprep.mubr.bf16.mxu0 %v14279_v6  ;;  %v10772_v6 = vld [vmem:[#allocation13 + $0x220] sm:$0xff]  }
 0x719   : > { %8054 = vmatprep.mubr.bf16.mxu1 %v6723_v22  ;;  %10352 = vmatpush3.bf16.msra.mxu0 %v10768_v30  ;;  %v6695_v30 = vld [vmem:[#allocation4 + $0x88] sm:$0xff] }
 0x71a   : > { %10353 = vmatprep.subr.bf16.mxu0 %v10769_v4  ;;  %v6725_v61 = vpack.c.bf16 %v6696_v24, %v6695_v30 }
 0x71d   : > { %10354 = vmatpush3.bf16.msra.mxu0 %v10769_v4 }
 0x71e   : > { %10355 = vmatprep.subr.bf16.mxu0 %v10770_v1 }
 0x71f   : > { %7902 = vmatmul.mubr.bf16.gmra.mrb[0].mxu0 %v6723_v22 }
 0x720   : > { %8055 = vmatmul.mubr.bf16.vlgmr.msra.gmra.mrb[32].mxu1 %v14241_v39  ;;  %7909 = vmatprep.mubr.bf16.mxu0 %v6596_v9  ;;  %v10774_v39 = vld [vmem:[#allocation13 + $0x230] sm:$0xff]  }
 0x721   : > { %8062 = vmatprep.mubr.bf16.mxu1 %v6724_v27  ;;  %10356 = vmatpush3.bf16.msra.mxu0 %v10770_v1 }
 0x722   : > { %10357 = vmatprep.subr.bf16.mxu0 %v10771_v32 }
 0x725   : > { %10358 = vmatpush3.bf16.msra.mxu0 %v10771_v32 }
 0x726   : > { %10359 = vmatprep.subr.bf16.mxu0 %v10772_v6 }
 0x727   : > { %7910 = vmatmul.mubr.bf16.gmra.mrb[4].mxu0 %v6724_v27 }
 0x728   : > { %8063 = vmatmul.mubr.bf16.gmra.mrb[36].mxu1 %v14262_v40  ;;  %7917 = vmatprep.mubr.bf16.mxu0 %v14329_v51  ;;  %v6534_v40 = vpack.c.bf16 %v6507_v17, %v14248_v29  ;;  %v6509_v51 = vld [vmem:[#allocation4 + $0xd0] sm:$0xff] }
 0x729   : > { %8070 = vmatprep.mubr.bf16.mxu1 %v6725_v61  ;;  %10360 = vmatpush3.bf16.msra.mxu0 %v10772_v6  ;;  %v6593_v17 = vld [vmem:[#allocation4 + $0x211] sm:$0xff] }
 0x72a   : > { %10361 = vmatprep.subr.bf16.mxu0 %v10773_v48 }
 0x72d   : > { %10362 = vmatpush3.bf16.msra.mxu0 %v10773_v48 }
 0x72e   : > { %10363 = vmatprep.subr.bf16.mxu0 %v10774_v39 }
 0x72f   : > { %7918 = vmatmul.mubr.bf16.gmra.mrb[8].mxu0 %v6725_v61 }
 0x730   : > { %8071 = vmatmul.mubr.bf16.gmra.mrb[40].mxu1 %v14285_v15  ;;  %7925 = vmatprep.mubr.bf16.mxu0 %v14353_v10  ;;  %v6535_v15 = vpack.c.bf16 %v6509_v51, %v14259_v54 }
 0x731   : > { %8078 = vmatprep.mubr.bf16.mxu1 %v14253_v21  ;;  %10364 = vmatpush3.bf16.msra.mxu0 %v10774_v39  ;;  %v6511_v21 = vld [vmem:[#allocation4 + $0xf0] sm:$0xff] }
 0x732   : > { %10365 = vmatprep.subr.bf16.mxu0 %v10775_v19  ;;  %v6536_v29 = vpack.c.bf16 %v6511_v21, %v14272_v3  ;;  %v6719_v21 = vld [vmem:[#allocation4 + $0x208] sm:$0xff] }
 0x735   : > { %10366 = vmatpush3.bf16.msra.mxu0 %v10775_v19  ;;  %v6592_v19 = vld [vmem:[#allocation4 + $0x209] sm:$0xff] }
 0x737   : > { %7926 = vmatmul.mubr.bf16.gmra.mrb[12].mxu0 %v6534_v40 }
 0x738   : > { %8079 = vmatmul.mubr.bf16.gmra.mrb[44].mxu1 %v14311_v0  ;;  %7933 = vmatprep.mubr.bf16.mxu0 %v14379_v60  ;;  %v6520_v0 = vld [vmem:[#allocation4 + $0x188] sm:$0xff] }
 0x739   : > { %8086 = vmatprep.mubr.bf16.mxu1 %v14268_v35  ;;  %v6513_v35 = vld [vmem:[#allocation4 + $0x110] sm:$0xff] }
 0x73a   : > { %v6537_v54 = vpack.c.bf16 %v6513_v35, %v14282_v43 }
 0x73f   : > { %7934 = vmatmul.mubr.bf16.gmra.mrb[16].mxu0 %v6535_v15 }
 0x740   : > { %8087 = vmatmul.mubr.bf16.gmra.mrb[48].mxu1 %v14333_v38  ;;  %7941 = vmatprep.mubr.bf16.mxu0 %v14388_v36 }
 0x741   : > { %8094 = vmatprep.mubr.bf16.mxu1 %v14276_v47  ;;  %v6515_v47 = vld [vmem:[#allocation4 + $0x130] sm:$0xff] }
 0x742   : > { %v6538_v3 = vpack.c.bf16 %v6515_v47, %v14297_v52 }
 0x747   : > { %7942 = vmatmul.mubr.bf16.gmra.mrb[20].mxu0 %v6536_v29  ;;  %v6720_v29 = vld [vmem:[#allocation4 + $0x210] sm:$0xff] }
 0x748   : > { %8095 = vmatmul.mubr.bf16.gmra.mrb[52].mxu1 %v14359_v62  ;;  %7949 = vmatprep.mubr.bf16.mxu0 %v14396_v50  ;;  %v6716_v50 = vld [vmem:[#allocation4 + $0x1d0] sm:$0xff] }
 0x749   : > { %8102 = vmatprep.mubr.bf16.mxu1 %v14291_v63  ;;  %v6517_v63 = vld [vmem:[#allocation4 + $0x150] sm:$0xff] }
 0x74a   : > { %v6539_v43 = vpack.c.bf16 %v6517_v63, %v14308_v34  ;;  %v6714_v34 = vld [vmem:[#allocation4 + $0x1b0] sm:$0xff]  ;;  %v14518_v63 = vpack.c.bf16 %v6593_v17, %v6592_v19 }
 0x74b   : > { %v6734_v10 = vpack.c.bf16 %v6714_v34, %v14344_v57 }
 0x74f   : > { %7950 = vmatmul.mubr.bf16.gmra.mrb[24].mxu0 %v6537_v54 }
 0x750   : > { %8103 = vmatmul.mubr.bf16.gmra.mrb[56].mxu1 %v14383_v26  ;;  %7957 = vmatprep.mubr.bf16.mxu0 %v14404_v2 }
 0x751   : > { %8110 = vmatprep.mubr.bf16.mxu1 %v14301_v49  ;;  %v6519_v49 = vld [vmem:[#allocation4 + $0x170] sm:$0xff] }
 0x752   : > { %v6540_v52 = vpack.c.bf16 %v6519_v49, %v14322_v46  ;;  %v6737_v49 = vpack.c.bf16 %v6720_v29, %v6719_v21 }
 0x757   : > { %7958 = vmatmul.mubr.bf16.gmra.mrb[28].mxu0 %v6538_v3 }
 0x758   : > { %8111 = vmatmul.mubr.bf16.gmra.mrb[60].mxu1 %v14391_v28  ;;  %7965 = vmatprep.mubr.bf16.mxu0 %v14414_v41 }
 0x759   : > { %8118 = vmatprep.mubr.bf16.mxu1 %v14318_v12  ;;  %v6521_v12 = vld [vmem:[#allocation4 + $0x190] sm:$0xff] }
 0x75a   : > { %v6541_v38 = vpack.c.bf16 %v6521_v12, %v6520_v0 }
 0x75f   : > { %7966 = vmatmul.mubr.bf16.gmra.mrb[32].mxu0 %v6539_v43 }
 0x760   : > { %8119 = vmatmul.mubr.bf16.gmra.mrb[64].mxu1 %v14399_v7  ;;  %7973 = vmatprep.mubr.bf16.mxu0 %v14424_v37 }
 0x761   : > { %8126 = vmatprep.mubr.bf16.mxu1 %v14326_v53  ;;  %v6522_v53 = vld [vmem:[#allocation4 + $0x1a8] sm:$0xff] }
 0x767   : > { %7974 = vmatmul.mubr.bf16.gmra.mrb[36].mxu0 %v6540_v52 }
 0x768   : > { %8127 = vmatmul.mubr.bf16.gmra.mrb[68].mxu1 %v14407_v45  ;;  %7981 = vmatprep.mubr.bf16.mxu0 %v14434_v8  ;;  %v6542_v45 = vpack.c.bf16 %v6714_v34, %v6522_v53 }
 0x769   : > { %8134 = vmatprep.mubr.bf16.mxu1 %v14338_v58  ;;  %v6715_v58 = vld [vmem:[#allocation4 + $0x1c8] sm:$0xff] }
 0x76a   : > { %v6735_v8 = vpack.c.bf16 %v6716_v50, %v6715_v58 }
 0x76f   : > { %7982 = vmatmul.mubr.bf16.gmra.mrb[40].mxu0 %v6541_v38  ;;  %v6755_v38 = vld [vmem:[#allocation4 + $0x49] sm:$0xff] }
 0x770   : > { %8135 = vmatmul.mubr.bf16.gmra.mrb[72].mxu1 %v14419_v20  ;;  %7989 = vmatprep.mubr.bf16.mxu0 %v14444_v56 }
 0x771   : > { %8142 = vmatprep.mubr.bf16.mxu1 %v6734_v10  ;;  %v6756_v10 = vld [vmem:[#allocation4 + $0x51] sm:$0xff] }
 0x772   : > { %v9661_v46 = vpop.f32.mrb[192].mxu0 }
 0x773   : > { %v9662_v62 = vpop.f32.mrb[193].mxu0  ;;  %v9767_v60 = vpop.f32.mrb[224].mxu1 }
 0x774   : > { %v9663_v26 = vadd.f32 %v9662_v62, %v9661_v46  ;;  %v9664_v36 = vpop.f32.mrb[194].mxu0  ;;  %v9768_v28 = vpop.f32.mrb[225].mxu1 }
 0x775   : > { %v9665_v7 = vpop.f32.mrb[195].mxu0  ;;  %v9769_v2 = vadd.f32 %v9768_v28, %v9767_v60  ;;  %v9770_v41 = vpop.f32.mrb[226].mxu1  ;;  %v11036_v28 = vld [vmem:[#allocation2] sm:$0xff] }
 0x776   : > { %v9666_v37 = vadd.f32 %v9665_v7, %v9664_v36  ;;  %v9771_v57 = vpop.f32.mrb[227].mxu1  ;;  %v6738_v58 = vpack.c.bf16 %v11036_v28, %v11036_v28  ;;  %v6787_v7 = vpack.c.bf16 %v6756_v10, %v6755_v38  ;;  %v6765_v38 = vld [vmem:[#allocation4 + $0xe9] sm:$0xff]  ;;  %v6766_v10 = vld [vmem:[#allocation4 + $0xf1] sm:$0xff] }
 0x777   : > { %v14505_v20 = vadd.f32 %v9769_v2, %v14412_v18  ;;  %7990 = vmatmul.mubr.bf16.gmra.mrb[44].mxu0 %v6542_v45  ;;  %v9772_v56 = vadd.f32 %v9771_v57, %v9770_v41  ;;  %v6718_v18 = vld [vmem:[#allocation4 + $0x1f0] sm:$0xff] }
 0x778   : > { %8143 = vmatmul.mubr.bf16.gmra.mrb[76].mxu1 %v14427_v16  ;;  %7997 = vmatprep.mubr.bf16.mxu0 %v14454_v31  ;;  %v6736_v24 = vpack.c.bf16 %v6718_v18, %v6717_v23  ;;  %v6658_v57 = vld [vmem:[#allocation4 + $0x22f] sm:$0xff] }
 0x779   : > { %8150 = vmatprep.mubr.bf16.mxu1 %v6735_v8  ;;  %v14510_v11 = vadd.f32 %v9772_v56, %v14416_v59 }
 0x77a   : > { %v9667_v44 = vpop.f32.mrb[196].mxu0 }
 0x77b   : > { %v9773_v4 = vpop.f32.mrb[228].mxu1  ;;  %v9668_v22 = vpop.f32.mrb[197].mxu0 }
 0x77c   : > { %v9669_v1 = vadd.f32 %v9668_v22, %v9667_v44  ;;  %v9774_v33 = vpop.f32.mrb[229].mxu1  ;;  %v9670_v55 = vpop.f32.mrb[198].mxu0  ;;  %v6760_v22 = vld [vmem:[#allocation4 + $0x91] sm:$0xff] }
 0x77d   : > { %v9775_v9 = vadd.f32 %v9774_v33, %v9773_v4  ;;  %v9776_v32 = vpop.f32.mrb[230].mxu1  ;;  %v9671_v27 = vpop.f32.mrb[199].mxu0  ;;  %v6759_v4 = vld [vmem:[#allocation4 + $0x89] sm:$0xff] }
 0x77e   : > { %v9672_v6 = vadd.f32 %v9671_v27, %v9670_v55  ;;  %v9777_v30 = vpop.f32.mrb[231].mxu1 }
 0x77f   : > { %v14512_v16 = vadd.f32 %v9775_v9, %v9663_v26  ;;  %v9778_v31 = vadd.f32 %v9777_v30, %v9776_v32  ;;  %7998 = vmatmul.mubr.bf16.gmra.mrb[48].mxu0 %v6735_v8 }
 0x780   : > { %8151 = vmatmul.mubr.bf16.gmra.mrb[80].mxu1 %v14437_v13  ;;  %8005 = vmatprep.mubr.bf16.mxu0 %v14462_v25 }
 0x781   : > { %v14516_v59 = vadd.f32 %v9778_v31, %v9666_v37  ;;  %8158 = vmatprep.mubr.bf16.mxu1 %v6736_v24  ;;  %v6657_v37 = vld [vmem:[#allocation4 + $0x227] sm:$0xff] }
 0x782   : > { %v9673_v48 = vpop.f32.mrb[200].mxu0  ;;  %v6674_v23 = vpack.c.bf16 %v6658_v57, %v6657_v37 }
 0x783   : > { %v9779_v61 = vpop.f32.mrb[232].mxu1  ;;  %v9674_v39 = vpop.f32.mrb[201].mxu0 }
 0x784   : > { %v9675_v40 = vadd.f32 %v9674_v39, %v9673_v48  ;;  %v9780_v51 = vpop.f32.mrb[233].mxu1  ;;  %v9676_v15 = vpop.f32.mrb[202].mxu0  ;;  %v6762_v39 = vld [vmem:[#allocation4 + $0xb1] sm:$0xff] }
 0x785   : > { %v9781_v35 = vadd.f32 %v9780_v51, %v9779_v61  ;;  %v9782_v54 = vpop.f32.mrb[234].mxu1  ;;  %v9677_v47 = vpop.f32.mrb[203].mxu0  ;;  %v6761_v61 = vld [vmem:[#allocation4 + $0xa9] sm:$0xff]  ;;  %v6764_v51 = vld [vmem:[#allocation4 + $0xd1] sm:$0xff] }
 0x786   : > { %v9678_v3 = vadd.f32 %v9677_v47, %v9676_v15  ;;  %v9783_v13 = vpop.f32.mrb[235].mxu1 }
 0x787   : > { %v14520_v25 = vadd.f32 %v9781_v35, %v9669_v1  ;;  %v9784_v43 = vadd.f32 %v9783_v13, %v9782_v54  ;;  %8006 = vmatmul.mubr.bf16.gmra.mrb[52].mxu0 %v6736_v24 }
 0x788   : > { %8159 = vmatmul.mubr.bf16.gmra.mrb[84].mxu1 %v14447_v42  ;;  %8013 = vmatprep.mubr.bf16.mxu0 %v14518_v63 }
 0x789   : > { %v14524_v52 = vadd.f32 %v9784_v43, %v9672_v6  ;;  %8166 = vmatprep.mubr.bf16.mxu1 %v6737_v49  ;;  %v6789_v6 = vpack.c.bf16 %v6760_v22, %v6759_v4  ;;  %v6769_v22 = vld [vmem:[#allocation4 + $0x129] sm:$0xff] }
 0x78a   : > { %v9679_v0 = vpop.f32.mrb[204].mxu0 }
 0x78b   : > { %v9785_v12 = vpop.f32.mrb[236].mxu1  ;;  %v9680_v34 = vpop.f32.mrb[205].mxu0 }
 0x78c   : > { %v9681_v46 = vadd.f32 %v9680_v34, %v9679_v0  ;;  %v9786_v53 = vpop.f32.mrb[237].mxu1  ;;  %v9682_v62 = vpop.f32.mrb[206].mxu0 }
 0x78d   : > { %v9787_v60 = vadd.f32 %v9786_v53, %v9785_v12  ;;  %v9788_v26 = vpop.f32.mrb[238].mxu1  ;;  %v9683_v36 = vpop.f32.mrb[207].mxu0 }
 0x78e   : > { %v9684_v50 = vadd.f32 %v9683_v36, %v9682_v62  ;;  %v9789_v42 = vpop.f32.mrb[239].mxu1  ;;  %v6767_v62 = vld [vmem:[#allocation4 + $0x109] sm:$0xff] }
 0x78f   : > { %v14526_v2 = vadd.f32 %v9787_v60, %v9675_v40  ;;  %v9790_v45 = vadd.f32 %v9789_v42, %v9788_v26  ;;  %8014 = vmatmul.mubr.bf16.gmra.mrb[56].mxu0 %v6737_v49  ;;  %v6763_v40 = vld [vmem:[#allocation4 + $0xc9] sm:$0xff]  ;;  %v6768_v60 = vld [vmem:[#allocation4 + $0x111] sm:$0xff] }
 0x790   : > { %8167 = vmatmul.mubr.bf16.gmra.mrb[88].mxu1 %v14457_v14  ;;  %10367 = vmatprep.mubr.bf16.mxu0 %v6787_v7  ;;  %v6791_v43 = vpack.c.bf16 %v6764_v51, %v6763_v40  ;;  %v6792_v7 = vpack.c.bf16 %v6766_v10, %v6765_v38  ;;  %v6793_v57 = vpack.c.bf16 %v6768_v60, %v6767_v62 }
 0x791   : > { %v14529_v41 = vadd.f32 %v9790_v45, %v9678_v3  ;;  %8174 = vmatprep.mubr.bf16.mxu1 %v6738_v58  ;;  %v6790_v3 = vpack.c.bf16 %v6762_v39, %v6761_v61 }
 0x792   : > { %v9685_v8 = vpop.f32.mrb[208].mxu0 }
 0x793   : > { %v9791_v56 = vpop.f32.mrb[240].mxu1  ;;  %v9686_v44 = vpop.f32.mrb[209].mxu0 }
 0x794   : > { %v9687_v1 = vadd.f32 %v9686_v44, %v9685_v8  ;;  %v9792_v33 = vpop.f32.mrb[241].mxu1  ;;  %v9688_v55 = vpop.f32.mrb[210].mxu0 }
 0x795   : > { %v9793_v18 = vadd.f32 %v9792_v33, %v9791_v56  ;;  %v9794_v9 = vpop.f32.mrb[242].mxu1  ;;  %v9689_v32 = vpop.f32.mrb[211].mxu0 }
 0x796   : > { %v9690_v27 = vadd.f32 %v9689_v32, %v9688_v55  ;;  %v9795_v14 = vpop.f32.mrb[243].mxu1 }
 0x797   : > { %v14531_v30 = vadd.f32 %v9793_v18, %v9681_v46  ;;  %v9796_v31 = vadd.f32 %v9795_v14, %v9794_v9  ;;  %10368 = vmatmul.mubr.bf16.vlgmr.msra.gmra.mrb[60].mxu0 %v14304_v5  ;;  %v6772_v18 = vld [vmem:[#allocation4 + $0x151] sm:$0xff] }
 0x798   : > { %8175 = vmatmul.mubr.bf16.gmra.mrb[92].mxu1 %v6674_v23  ;;  %10371 = vmatprep.mubr.bf16.mxu0 %v6789_v6  ;;  %v6771_v23 = vld [vmem:[#allocation4 + $0x149] sm:$0xff] }
 0x799   : > { %v14534_v24 = vadd.f32 %v9796_v31, %v9684_v50 }
 0x79a   : > { %v9691_v48 = vpop.f32.mrb[212].mxu0 }
 0x79b   : > { %v9797_v19 = vpop.f32.mrb[244].mxu1  ;;  %v9692_v17 = vpop.f32.mrb[213].mxu0 }
 0x79c   : > { %v9693_v15 = vadd.f32 %v9692_v17, %v9691_v48  ;;  %v9798_v21 = vpop.f32.mrb[245].mxu1  ;;  %v9694_v29 = vpop.f32.mrb[214].mxu0 }
 0x79d   : > { %v9799_v35 = vadd.f32 %v9798_v21, %v9797_v19  ;;  %v9800_v54 = vpop.f32.mrb[246].mxu1  ;;  %v9695_v47 = vpop.f32.mrb[215].mxu0  ;;  %v6795_v19 = vpack.c.bf16 %v6772_v18, %v6771_v23  ;;  %v6773_v21 = vld [vmem:[#allocation4 + $0x169] sm:$0xff] }
 0x79e   : > { %v9696_v13 = vadd.f32 %v9695_v47, %v9694_v29  ;;  %v9801_v5 = vpop.f32.mrb[247].mxu1  ;;  %v6774_v29 = vld [vmem:[#allocation4 + $0x171] sm:$0xff]  ;;  %v6775_v47 = vld [vmem:[#allocation4 + $0x189] sm:$0xff] }
 0x79f   : > { %v14536_v49 = vadd.f32 %v9799_v35, %v9687_v1  ;;  %v9802_v0 = vadd.f32 %v9801_v5, %v9800_v54  ;;  %10372 = vmatmul.mubr.bf16.gmra.mrb[64].mxu0 %v6790_v3  ;;  %v6770_v1 = vld [vmem:[#allocation4 + $0x131] sm:$0xff]  ;;  %v6796_v10 = vpack.c.bf16 %v6774_v29, %v6773_v21 }
 0x7a0   : > { %10375 = vmatprep.mubr.bf16.mxu0 %v6791_v43  ;;  %v6794_v48 = vpack.c.bf16 %v6770_v1, %v6769_v22  ;;  %v6776_v3 = vld [vmem:[#allocation4 + $0x191] sm:$0xff] }
 0x7a1   : > { %v14538_v12 = vadd.f32 %v9802_v0, %v9690_v27  ;;  %v6797_v62 = vpack.c.bf16 %v6776_v3, %v6775_v47 }
 0x7a2   : > { %v9697_v34 = vpop.f32.mrb[216].mxu0 }
 0x7a3   : > { %v9803_v46 = vpop.f32.mrb[248].mxu1  ;;  %v9698_v53 = vpop.f32.mrb[217].mxu0 }
 0x7a4   : > { %v9699_v26 = vadd.f32 %v9698_v53, %v9697_v34  ;;  %v9804_v36 = vpop.f32.mrb[249].mxu1  ;;  %v9700_v28 = vpop.f32.mrb[218].mxu0 }
 0x7a5   : > { %v9805_v58 = vadd.f32 %v9804_v36, %v9803_v46  ;;  %v9806_v50 = vpop.f32.mrb[250].mxu1  ;;  %v9701_v42 = vpop.f32.mrb[219].mxu0 }
 0x7a6   : > { %v9702_v45 = vadd.f32 %v9701_v42, %v9700_v28  ;;  %v9807_v37 = vpop.f32.mrb[251].mxu1 }
 0x7a7   : > { %v14540_v8 = vadd.f32 %v9805_v58, %v9693_v15  ;;  %v9808_v56 = vadd.f32 %v9807_v37, %v9806_v50  ;;  %10376 = vmatmul.mubr.bf16.gmra.mrb[68].mxu0 %v6792_v7  ;;  %v6777_v58 = vld [vmem:[#allocation4 + $0x1a9] sm:$0xff]  ;;  %v6778_v50 = vld [vmem:[#allocation4 + $0x1b1] sm:$0xff] }
 0x7a8   : > { %10379 = vmatprep.mubr.bf16.mxu0 %v6793_v57  ;;  %v6780_v37 = vld [vmem:[#allocation4 + $0x1d1] sm:$0xff] }
 0x7a9   : > { %v14542_v44 = vadd.f32 %v9808_v56, %v9696_v13 }
 0x7aa   : > { %v9703_v4 = vpop.f32.mrb[220].mxu0 }
 0x7ab   : > { %v9809_v33 = vpop.f32.mrb[252].mxu1  ;;  %v9704_v55 = vpop.f32.mrb[221].mxu0 }
 0x7ac   : > { %v9705_v9 = vadd.f32 %v9704_v55, %v9703_v4  ;;  %v9810_v32 = vpop.f32.mrb[253].mxu1  ;;  %v9706_v27 = vpop.f32.mrb[222].mxu0  ;;  %v6798_v55 = vpack.c.bf16 %v6778_v50, %v6777_v58 }
 0x7ad   : > { %v9811_v14 = vadd.f32 %v9810_v32, %v9809_v33  ;;  %v9812_v6 = vpop.f32.mrb[254].mxu1  ;;  %v9707_v31 = vpop.f32.mrb[223].mxu0 }
 0x7ae   : > { %v9708_v61 = vadd.f32 %v9707_v31, %v9706_v27  ;;  %v9813_v39 = vpop.f32.mrb[255].mxu1  ;;  %v6781_v31 = vld [vmem:[#allocation4 + $0x1e9] sm:$0xff] }
 0x7af   : > { %v14544_v17 = vadd.f32 %v9811_v14, %v9699_v26  ;;  %v9814_v40 = vadd.f32 %v9813_v39, %v9812_v6  ;;  %10380 = vmatmul.mubr.bf16.gmra.mrb[72].mxu0 %v6794_v48  ;;  %v6782_v48 = vld [vmem:[#allocation4 + $0x1f1] sm:$0xff] }
 0x7b0   : > { %10383 = vmatprep.mubr.bf16.mxu0 %v6795_v19 }
 0x7b1   : > { %v14546_v51 = vadd.f32 %v9814_v40, %v9702_v45  ;;  %v6779_v45 = vld [vmem:[#allocation4 + $0x1c9] sm:$0xff] }
 0x7b2   : > { %v9709_v15 = vpop.f32.mrb[224].mxu0 }
 0x7b3   : > { %v9815_v35 = vpop.f32.mrb[0].mxu1  ;;  %v9710_v54 = vpop.f32.mrb[225].mxu0 }
 0x7b4   : > { %v9711_v13 = vadd.f32 %v9710_v54, %v9709_v15  ;;  %v9816_v5 = vpop.f32.mrb[1].mxu1  ;;  %v9712_v43 = vpop.f32.mrb[226].mxu0  ;;  %v6800_v54 = vpack.c.bf16 %v6782_v48, %v6781_v31 }
 0x7b5   : > { %v9817_v0 = vadd.f32 %v9816_v5, %v9815_v35  ;;  %v9818_v34 = vpop.f32.mrb[2].mxu1  ;;  %v9713_v38 = vpop.f32.mrb[227].mxu0 }
 0x7b6   : > { %v9714_v46 = vadd.f32 %v9713_v38, %v9712_v43  ;;  %v9819_v53 = vpop.f32.mrb[3].mxu1  ;;  %v6785_v43 = vld [vmem:[#allocation4 + $0x229] sm:$0xff] }
 0x7b7   : > { %v14548_v60 = vadd.f32 %v9817_v0, %v9705_v9  ;;  %v9820_v26 = vadd.f32 %v9819_v53, %v9818_v34  ;;  %10384 = vmatmul.mubr.bf16.gmra.mrb[76].mxu0 %v6796_v10  ;;  %v6799_v9 = vpack.c.bf16 %v6780_v37, %v6779_v45  ;;  %v6786_v0 = vld [vmem:[#allocation4 + $0x231] sm:$0xff] }
 0x7b8   : > { %10387 = vmatprep.mubr.bf16.mxu0 %v6797_v62  ;;  %v6802_v53 = vpack.c.bf16 %v6786_v0, %v6785_v43 }
 0x7b9   : > { %v14550_v36 = vadd.f32 %v9820_v26, %v9708_v61 }
 0x7ba   : > { %v9715_v28 = vpop.f32.mrb[228].mxu0 }
 0x7bb   : > { %v9821_v42 = vpop.f32.mrb[4].mxu1  ;;  %v9716_v7 = vpop.f32.mrb[229].mxu0 }
 0x7bc   : > { %v9717_v57 = vadd.f32 %v9716_v7, %v9715_v28  ;;  %v9822_v56 = vpop.f32.mrb[5].mxu1  ;;  %v9718_v4 = vpop.f32.mrb[230].mxu0 }
 0x7bd   : > { %v9823_v22 = vadd.f32 %v9822_v56, %v9821_v42  ;;  %v9824_v1 = vpop.f32.mrb[6].mxu1  ;;  %v9719_v33 = vpop.f32.mrb[231].mxu0 }
 0x7be   : > { %v9720_v23 = vadd.f32 %v9719_v33, %v9718_v4  ;;  %v9825_v18 = vpop.f32.mrb[7].mxu1 }
 0x7bf   : > { %v14552_v32 = vadd.f32 %v9823_v22, %v9711_v13  ;;  %v9826_v27 = vadd.f32 %v9825_v18, %v9824_v1  ;;  %10388 = vmatmul.mubr.bf16.gmra.mrb[80].mxu0 %v6798_v55 }
 0x7c0   : > { %10391 = vmatprep.mubr.bf16.mxu0 %v6799_v9 }
 0x7c1   : > { %v14554_v14 = vadd.f32 %v9826_v27, %v9714_v46 }
 0x7c2   : > { %v9721_v6 = vpop.f32.mrb[232].mxu0 }
 0x7c3   : > { %v9827_v61 = vpop.f32.mrb[8].mxu1  ;;  %v9722_v39 = vpop.f32.mrb[233].mxu0 }
 0x7c4   : > { %v9723_v19 = vadd.f32 %v9722_v39, %v9721_v6  ;;  %v9828_v40 = vpop.f32.mrb[9].mxu1  ;;  %v9724_v15 = vpop.f32.mrb[234].mxu0 }
 0x7c5   : > { %v9829_v21 = vadd.f32 %v9828_v40, %v9827_v61  ;;  %v9830_v29 = vpop.f32.mrb[10].mxu1  ;;  %v9725_v35 = vpop.f32.mrb[235].mxu0 }
 0x7c6   : > { %v9726_v47 = vadd.f32 %v9725_v35, %v9724_v15  ;;  %v9831_v3 = vpop.f32.mrb[11].mxu1 }
 0x7c7   : > { %v14556_v13 = vadd.f32 %v9829_v21, %v9717_v57  ;;  %v9832_v5 = vadd.f32 %v9831_v3, %v9830_v29  ;;  %10392 = vmatmul.mubr.bf16.gmra.mrb[84].mxu0 %v6800_v54 }
 0x7c8   : > { %10395 = vmatprep.mubr.bf16.mxu0 %v14518_v63 }
 0x7c9   : > { %v14559_v34 = vadd.f32 %v9832_v5, %v9720_v23 }
 0x7ca   : > { %v9727_v38 = vpop.f32.mrb[236].mxu0 }
 0x7cb   : > { %v9833_v10 = vpop.f32.mrb[12].mxu1  ;;  %v9728_v46 = vpop.f32.mrb[237].mxu0 }
 0x7cc   : > { %v9729_v62 = vadd.f32 %v9728_v46, %v9727_v38  ;;  %v9834_v26 = vpop.f32.mrb[13].mxu1  ;;  %v9730_v28 = vpop.f32.mrb[238].mxu0 }
 0x7cd   : > { %v9835_v58 = vadd.f32 %v9834_v26, %v9833_v10  ;;  %v9836_v50 = vpop.f32.mrb[14].mxu1  ;;  %v9731_v42 = vpop.f32.mrb[239].mxu0 }
 0x7ce   : > { %v9732_v7 = vadd.f32 %v9731_v42, %v9730_v28  ;;  %v9837_v45 = vpop.f32.mrb[15].mxu1 }
 0x7cf   : > { %v14561_v37 = vadd.f32 %v9835_v58, %v9723_v19  ;;  %v9838_v57 = vadd.f32 %v9837_v45, %v9836_v50  ;;  %10396 = vmatmul.mubr.bf16.gmra.mrb[88].mxu0 %v6802_v53 }
 0x7d1   : > { %v14563_v63 = vadd.f32 %v9838_v57, %v9726_v47 }
 0x7d2   : > { %v9733_v56 = vpop.f32.mrb[240].mxu0 }
 0x7d3   : > { %v9839_v4 = vpop.f32.mrb[16].mxu1  ;;  %v9734_v22 = vpop.f32.mrb[241].mxu0 }
 0x7d4   : > { %v9735_v1 = vadd.f32 %v9734_v22, %v9733_v56  ;;  %v9840_v33 = vpop.f32.mrb[17].mxu1  ;;  %v9736_v55 = vpop.f32.mrb[242].mxu0 }
 0x7d5   : > { %v9841_v23 = vadd.f32 %v9840_v33, %v9839_v4  ;;  %v9842_v18 = vpop.f32.mrb[18].mxu1  ;;  %v9737_v9 = vpop.f32.mrb[243].mxu0 }
 0x7d6   : > { %v9738_v27 = vadd.f32 %v9737_v9, %v9736_v55  ;;  %v9843_v6 = vpop.f32.mrb[19].mxu1 }
 0x7d7   : > { %v14565_v31 = vadd.f32 %v9841_v23, %v9729_v62  ;;  %v9844_v48 = vadd.f32 %v9843_v6, %v9842_v18 }
 0x7d9   : > { %v14567_v61 = vadd.f32 %v9844_v48, %v9732_v7 }
 0x7da   : > { %v9739_v39 = vpop.f32.mrb[244].mxu0 }
 0x7db   : > { %v9845_v19 = vpop.f32.mrb[20].mxu1  ;;  %v9740_v40 = vpop.f32.mrb[245].mxu0 }
 0x7dc   : > { %v9741_v15 = vadd.f32 %v9740_v40, %v9739_v39  ;;  %v9846_v21 = vpop.f32.mrb[21].mxu1  ;;  %v9742_v29 = vpop.f32.mrb[246].mxu0 }
 0x7dd   : > { %v9847_v35 = vadd.f32 %v9846_v21, %v9845_v19  ;;  %v9848_v54 = vpop.f32.mrb[22].mxu1  ;;  %v9743_v47 = vpop.f32.mrb[247].mxu0 }
 0x7de   : > { %v9744_v3 = vadd.f32 %v9743_v47, %v9742_v29  ;;  %v9849_v5 = vpop.f32.mrb[23].mxu1 }
 0x7df   : > { %v14569_v43 = vadd.f32 %v9847_v35, %v9735_v1  ;;  %v9850_v0 = vadd.f32 %v9849_v5, %v9848_v54 }
 0x7e1   : > { %v14571_v38 = vadd.f32 %v9850_v0, %v9738_v27 }
 0x7e2   : > { %v9745_v10 = vpop.f32.mrb[248].mxu0 }
 0x7e3   : > { %v9851_v46 = vpop.f32.mrb[24].mxu1  ;;  %v9746_v53 = vpop.f32.mrb[249].mxu0 }
 0x7e4   : > { %v9747_v62 = vadd.f32 %v9746_v53, %v9745_v10  ;;  %v9852_v26 = vpop.f32.mrb[25].mxu1  ;;  %v9748_v28 = vpop.f32.mrb[250].mxu0 }
 0x7e5   : > { %v9853_v58 = vadd.f32 %v9852_v26, %v9851_v46  ;;  %v9854_v50 = vpop.f32.mrb[26].mxu1  ;;  %v9749_v42 = vpop.f32.mrb[251].mxu0 }
 0x7e6   : > { %v9750_v7 = vadd.f32 %v9749_v42, %v9748_v28  ;;  %v9855_v45 = vpop.f32.mrb[27].mxu1 }
 0x7e7   : > { %v14573_v57 = vadd.f32 %v9853_v58, %v9741_v15  ;;  %v9856_v56 = vadd.f32 %v9855_v45, %v9854_v50 }
 0x7e9   : > { %v14575_v4 = vadd.f32 %v9856_v56, %v9744_v3 }
 0x7ea   : > { %v9879_v22 = vpop.f32.mrb[252].mxu0 }
 0x7eb   : > { %v9857_v1 = vpop.f32.mrb[28].mxu1  ;;  %v9880_v33 = vpop.f32.mrb[253].mxu0 }
 0x7ec   : > { %v9858_v55 = vpop.f32.mrb[29].mxu1  ;;  %v9881_v23 = vadd.f32 %v9880_v33, %v9879_v22  ;;  %v9882_v18 = vpop.f32.mrb[254].mxu0 }
 0x7ed   : > { %v9859_v9 = vadd.f32 %v9858_v55, %v9857_v1  ;;  %v9860_v27 = vpop.f32.mrb[30].mxu1  ;;  %v9883_v6 = vpop.f32.mrb[255].mxu0 }
 0x7ee   : > { %v7896_v48 = vadd.f32 %v9881_v23, %v14505_v20  ;;  %v9861_v39 = vpop.f32.mrb[31].mxu1  ;;  %v9884_v19 = vadd.f32 %v9883_v6, %v9882_v18 }
 0x7ef   : > { %v14578_v40 = vadd.f32 %v9859_v9, %v9747_v62  ;;  %v9862_v15 = vadd.f32 %v9861_v39, %v9860_v27 }
 0x7f0   : > { %v7899_v21 = vadd.f32 %v9884_v19, %v14510_v11 }
 0x7f1   : > { %v14581_v29 = vadd.f32 %v9862_v15, %v9750_v7 }
 0x7f2   : > { %v9885_v35 = vpop.f32.mrb[0].mxu0 }
 0x7f3   : > { %v9991_v54 = vpop.f32.mrb[32].mxu1  ;;  %v9886_v47 = vpop.f32.mrb[1].mxu0 }
 0x7f4   : > { %v9887_v3 = vadd.f32 %v9886_v47, %v9885_v35  ;;  %v9992_v5 = vpop.f32.mrb[33].mxu1  ;;  %v9888_v0 = vpop.f32.mrb[2].mxu0 }
 0x7f5   : > { %v9993_v10 = vadd.f32 %v9992_v5, %v9991_v54  ;;  %v9994_v46 = vpop.f32.mrb[34].mxu1  ;;  %v9889_v53 = vpop.f32.mrb[3].mxu0 }
 0x7f6   : > { %v7904_v20 = vadd.f32 %v9887_v3, %v14512_v16  ;;  %v9890_v26 = vadd.f32 %v9889_v53, %v9888_v0  ;;  %v9995_v28 = vpop.f32.mrb[35].mxu1 }
 0x7f7   : > { %v9996_v62 = vadd.f32 %v9995_v28, %v9994_v46  ;;  %v14584_v58 = vadd.f32 %v9993_v10, %v7896_v48 }
 0x7f8   : > { %v7907_v11 = vadd.f32 %v9890_v26, %v14516_v59 }
 0x7f9   : > { %v14587_v50 = vadd.f32 %v9996_v62, %v7899_v21 }
 0x7fa   : > { %v9891_v42 = vpop.f32.mrb[4].mxu0 }
 0x7fb   : > { %v9997_v7 = vpop.f32.mrb[36].mxu1  ;;  %v9892_v45 = vpop.f32.mrb[5].mxu0 }
 0x7fc   : > { %v9893_v56 = vadd.f32 %v9892_v45, %v9891_v42  ;;  %v9998_v22 = vpop.f32.mrb[37].mxu1  ;;  %v9894_v1 = vpop.f32.mrb[6].mxu0 }
 0x7fd   : > { %v9999_v33 = vadd.f32 %v9998_v22, %v9997_v7  ;;  %v10000_v55 = vpop.f32.mrb[38].mxu1  ;;  %v9895_v23 = vpop.f32.mrb[7].mxu0 }
 0x7fe   : > { %v7912_v16 = vadd.f32 %v9893_v56, %v14520_v25  ;;  %v9896_v18 = vadd.f32 %v9895_v23, %v9894_v1  ;;  %v10001_v9 = vpop.f32.mrb[39].mxu1 }
 0x7ff   : > { %v10002_v27 = vadd.f32 %v10001_v9, %v10000_v55  ;;  %v14590_v6 = vadd.f32 %v9999_v33, %v7904_v20 }
 0x800   : > { %v7915_v59 = vadd.f32 %v9896_v18, %v14524_v52 }
 0x801   : > { %v14593_v48 = vadd.f32 %v10002_v27, %v7907_v11 }
 0x802   : > { %v9897_v39 = vpop.f32.mrb[8].mxu0 }
 0x803   : > { %v10003_v19 = vpop.f32.mrb[40].mxu1  ;;  %v9898_v15 = vpop.f32.mrb[9].mxu0 }
 0x804   : > { %v9899_v21 = vadd.f32 %v9898_v15, %v9897_v39  ;;  %v10004_v35 = vpop.f32.mrb[41].mxu1  ;;  %v9900_v54 = vpop.f32.mrb[10].mxu0 }
 0x805   : > { %v10005_v47 = vadd.f32 %v10004_v35, %v10003_v19  ;;  %v10006_v3 = vpop.f32.mrb[42].mxu1  ;;  %v9901_v5 = vpop.f32.mrb[11].mxu0 }
 0x806   : > { %v7920_v25 = vadd.f32 %v9899_v21, %v14526_v2  ;;  %v9902_v0 = vadd.f32 %v9901_v5, %v9900_v54  ;;  %v10007_v10 = vpop.f32.mrb[43].mxu1 }
 0x807   : > { %v10008_v46 = vadd.f32 %v10007_v10, %v10006_v3  ;;  %v14596_v53 = vadd.f32 %v10005_v47, %v7912_v16 }
 0x808   : > { %v7923_v52 = vadd.f32 %v9902_v0, %v14529_v41 }
 0x809   : > { %v14599_v20 = vadd.f32 %v10008_v46, %v7915_v59 }
 0x80a   : > { %v9903_v26 = vpop.f32.mrb[12].mxu0 }
 0x80b   : > { %v10009_v28 = vpop.f32.mrb[44].mxu1  ;;  %v9904_v62 = vpop.f32.mrb[13].mxu0 }
 0x80c   : > { %v9905_v11 = vadd.f32 %v9904_v62, %v9903_v26  ;;  %v10010_v42 = vpop.f32.mrb[45].mxu1  ;;  %v9906_v7 = vpop.f32.mrb[14].mxu0 }
 0x80d   : > { %v10011_v45 = vadd.f32 %v10010_v42, %v10009_v28  ;;  %v10012_v56 = vpop.f32.mrb[46].mxu1  ;;  %v9907_v22 = vpop.f32.mrb[15].mxu0 }
 0x80e   : > { %v7928_v2 = vadd.f32 %v9905_v11, %v14531_v30  ;;  %v9908_v1 = vadd.f32 %v9907_v22, %v9906_v7  ;;  %v10013_v33 = vpop.f32.mrb[47].mxu1 }
 0x80f   : > { %v10014_v55 = vadd.f32 %v10013_v33, %v10012_v56  ;;  %v14602_v23 = vadd.f32 %v10011_v45, %v7920_v25 }
 0x810   : > { %v7931_v41 = vadd.f32 %v9908_v1, %v14534_v24 }
 0x811   : > { %v14605_v16 = vadd.f32 %v10014_v55, %v7923_v52 }
 0x812   : > { %v9909_v18 = vpop.f32.mrb[16].mxu0 }
 0x813   : > { %v10015_v9 = vpop.f32.mrb[48].mxu1  ;;  %v9910_v27 = vpop.f32.mrb[17].mxu0 }
 0x814   : > { %v9911_v59 = vadd.f32 %v9910_v27, %v9909_v18  ;;  %v10016_v39 = vpop.f32.mrb[49].mxu1  ;;  %v9912_v19 = vpop.f32.mrb[18].mxu0 }
 0x815   : > { %v10017_v15 = vadd.f32 %v10016_v39, %v10015_v9  ;;  %v10018_v21 = vpop.f32.mrb[50].mxu1  ;;  %v9913_v35 = vpop.f32.mrb[19].mxu0 }
 0x816   : > { %v7936_v30 = vadd.f32 %v9911_v59, %v14536_v49  ;;  %v9914_v54 = vadd.f32 %v9913_v35, %v9912_v19  ;;  %v10019_v47 = vpop.f32.mrb[51].mxu1 }
 0x817   : > { %v10020_v3 = vadd.f32 %v10019_v47, %v10018_v21  ;;  %v14608_v5 = vadd.f32 %v10017_v15, %v7928_v2 }
 0x818   : > { %v7939_v24 = vadd.f32 %v9914_v54, %v14538_v12 }
 0x819   : > { %v14611_v25 = vadd.f32 %v10020_v3, %v7931_v41 }
 0x81a   : > { %v9915_v0 = vpop.f32.mrb[20].mxu0 }
 0x81b   : > { %v10021_v10 = vpop.f32.mrb[52].mxu1  ;;  %v9916_v46 = vpop.f32.mrb[21].mxu0 }
 0x81c   : > { %v9917_v52 = vadd.f32 %v9916_v46, %v9915_v0  ;;  %v10022_v26 = vpop.f32.mrb[53].mxu1  ;;  %v9918_v28 = vpop.f32.mrb[22].mxu0 }
 0x81d   : > { %v10023_v62 = vadd.f32 %v10022_v26, %v10021_v10  ;;  %v10024_v11 = vpop.f32.mrb[54].mxu1  ;;  %v9919_v42 = vpop.f32.mrb[23].mxu0 }
 0x81e   : > { %v7944_v49 = vadd.f32 %v9917_v52, %v14540_v8  ;;  %v9920_v7 = vadd.f32 %v9919_v42, %v9918_v28  ;;  %v10025_v45 = vpop.f32.mrb[55].mxu1 }
 0x81f   : > { %v10026_v56 = vadd.f32 %v10025_v45, %v10024_v11  ;;  %v14614_v22 = vadd.f32 %v10023_v62, %v7936_v30 }
 0x820   : > { %v7947_v12 = vadd.f32 %v9920_v7, %v14542_v44 }
 0x821   : > { %v14617_v2 = vadd.f32 %v10026_v56, %v7939_v24 }
 0x822   : > { %v9921_v1 = vpop.f32.mrb[24].mxu0 }
 0x823   : > { %v10027_v33 = vpop.f32.mrb[56].mxu1  ;;  %v9922_v55 = vpop.f32.mrb[25].mxu0 }
 0x824   : > { %v9923_v41 = vadd.f32 %v9922_v55, %v9921_v1  ;;  %v10028_v18 = vpop.f32.mrb[57].mxu1  ;;  %v9924_v9 = vpop.f32.mrb[26].mxu0 }
 0x825   : > { %v10029_v27 = vadd.f32 %v10028_v18, %v10027_v33  ;;  %v10030_v59 = vpop.f32.mrb[58].mxu1  ;;  %v9925_v39 = vpop.f32.mrb[27].mxu0 }
 0x826   : > { %v7952_v8 = vadd.f32 %v9923_v41, %v14544_v17  ;;  %v9926_v19 = vadd.f32 %v9925_v39, %v9924_v9  ;;  %v10031_v15 = vpop.f32.mrb[59].mxu1 }
 0x827   : > { %v10032_v21 = vadd.f32 %v10031_v15, %v10030_v59  ;;  %v14620_v35 = vadd.f32 %v10029_v27, %v7944_v49 }
 0x828   : > { %v7955_v44 = vadd.f32 %v9926_v19, %v14546_v51 }
 0x829   : > { %v14623_v30 = vadd.f32 %v10032_v21, %v7947_v12 }
 0x82a   : > { %v9927_v54 = vpop.f32.mrb[28].mxu0 }
 0x82b   : > { %v10033_v47 = vpop.f32.mrb[60].mxu1  ;;  %v9928_v3 = vpop.f32.mrb[29].mxu0 }
 0x82c   : > { %v9929_v24 = vadd.f32 %v9928_v3, %v9927_v54  ;;  %v10034_v0 = vpop.f32.mrb[61].mxu1  ;;  %v9930_v10 = vpop.f32.mrb[30].mxu0 }
 0x82d   : > { %v10035_v46 = vadd.f32 %v10034_v0, %v10033_v47  ;;  %v10036_v52 = vpop.f32.mrb[62].mxu1  ;;  %v9931_v26 = vpop.f32.mrb[31].mxu0 }
 0x82e   : > { %v7960_v17 = vadd.f32 %v9929_v24, %v14548_v60  ;;  %v9932_v28 = vadd.f32 %v9931_v26, %v9930_v10  ;;  %v10037_v62 = vpop.f32.mrb[63].mxu1 }
 0x82f   : > { %v10038_v11 = vadd.f32 %v10037_v62, %v10036_v52  ;;  %v14626_v42 = vadd.f32 %v10035_v46, %v7952_v8 }
 0x830   : > { %v7963_v51 = vadd.f32 %v9932_v28, %v14550_v36 }
 0x831   : > { %v14629_v49 = vadd.f32 %v10038_v11, %v7955_v44 }
 0x832   : > { %v9933_v7 = vpop.f32.mrb[32].mxu0 }
 0x833   : > { %v10039_v45 = vpop.f32.mrb[64].mxu1  ;;  %v9934_v56 = vpop.f32.mrb[33].mxu0 }
 0x834   : > { %v9935_v12 = vadd.f32 %v9934_v56, %v9933_v7  ;;  %v10040_v1 = vpop.f32.mrb[65].mxu1  ;;  %v9936_v33 = vpop.f32.mrb[34].mxu0 }
 0x835   : > { %v10041_v55 = vadd.f32 %v10040_v1, %v10039_v45  ;;  %v10042_v41 = vpop.f32.mrb[66].mxu1  ;;  %v9937_v18 = vpop.f32.mrb[35].mxu0 }
 0x836   : > { %v7968_v60 = vadd.f32 %v9935_v12, %v14552_v32  ;;  %v9938_v9 = vadd.f32 %v9937_v18, %v9936_v33  ;;  %v10043_v27 = vpop.f32.mrb[67].mxu1 }
 0x837   : > { %v10044_v59 = vadd.f32 %v10043_v27, %v10042_v41  ;;  %v14632_v39 = vadd.f32 %v10041_v55, %v7960_v17 }
 0x838   : > { %v7971_v36 = vadd.f32 %v9938_v9, %v14554_v14 }
 0x839   : > { %v14635_v8 = vadd.f32 %v10044_v59, %v7963_v51 }
 0x83a   : > { %v9939_v19 = vpop.f32.mrb[36].mxu0 }
 0x83b   : > { %v10045_v15 = vpop.f32.mrb[68].mxu1  ;;  %v9940_v21 = vpop.f32.mrb[37].mxu0 }
 0x83c   : > { %v9941_v44 = vadd.f32 %v9940_v21, %v9939_v19  ;;  %v10046_v54 = vpop.f32.mrb[69].mxu1  ;;  %v9942_v47 = vpop.f32.mrb[38].mxu0 }
 0x83d   : > { %v10047_v3 = vadd.f32 %v10046_v54, %v10045_v15  ;;  %v10048_v24 = vpop.f32.mrb[70].mxu1  ;;  %v9943_v0 = vpop.f32.mrb[39].mxu0 }
 0x83e   : > { %v7976_v32 = vadd.f32 %v9941_v44, %v14556_v13  ;;  %v9944_v10 = vadd.f32 %v9943_v0, %v9942_v47  ;;  %v10049_v46 = vpop.f32.mrb[71].mxu1 }
 0x83f   : > { %v10050_v52 = vadd.f32 %v10049_v46, %v10048_v24  ;;  %v14638_v26 = vadd.f32 %v10047_v3, %v7968_v60 }
 0x840   : > { %v7979_v14 = vadd.f32 %v9944_v10, %v14559_v34 }
 0x841   : > { %v14641_v17 = vadd.f32 %v10050_v52, %v7971_v36 }
 0x842   : > { %v9945_v28 = vpop.f32.mrb[40].mxu0 }
 0x843   : > { %v10051_v62 = vpop.f32.mrb[72].mxu1  ;;  %v9946_v11 = vpop.f32.mrb[41].mxu0 }
 0x844   : > { %v9947_v51 = vadd.f32 %v9946_v11, %v9945_v28  ;;  %v10052_v7 = vpop.f32.mrb[73].mxu1  ;;  %v9948_v45 = vpop.f32.mrb[42].mxu0 }
 0x845   : > { %v10053_v56 = vadd.f32 %v10052_v7, %v10051_v62  ;;  %v10054_v12 = vpop.f32.mrb[74].mxu1  ;;  %v9949_v1 = vpop.f32.mrb[43].mxu0 }
 0x846   : > { %v7984_v13 = vadd.f32 %v9947_v51, %v14561_v37  ;;  %v9950_v33 = vadd.f32 %v9949_v1, %v9948_v45  ;;  %v10055_v55 = vpop.f32.mrb[75].mxu1 }
 0x847   : > { %v10056_v41 = vadd.f32 %v10055_v55, %v10054_v12  ;;  %v14644_v18 = vadd.f32 %v10053_v56, %v7976_v32 }
 0x848   : > { %v7987_v34 = vadd.f32 %v9950_v33, %v14563_v63 }
 0x849   : > { %v14647_v60 = vadd.f32 %v10056_v41, %v7979_v14 }
 0x84a   : > { %v9951_v9 = vpop.f32.mrb[44].mxu0 }
 0x84b   : > { %v10057_v27 = vpop.f32.mrb[76].mxu1  ;;  %v9952_v59 = vpop.f32.mrb[45].mxu0 }
 0x84c   : > { %v9953_v36 = vadd.f32 %v9952_v59, %v9951_v9  ;;  %v10058_v19 = vpop.f32.mrb[77].mxu1  ;;  %v9954_v15 = vpop.f32.mrb[46].mxu0 }
 0x84d   : > { %v10059_v21 = vadd.f32 %v10058_v19, %v10057_v27  ;;  %v10060_v44 = vpop.f32.mrb[78].mxu1  ;;  %v9955_v54 = vpop.f32.mrb[47].mxu0 }
 0x84e   : > { %v7992_v37 = vadd.f32 %v9953_v36, %v14565_v31  ;;  %v9956_v47 = vadd.f32 %v9955_v54, %v9954_v15  ;;  %v10061_v3 = vpop.f32.mrb[79].mxu1 }
 0x84f   : > { %v10062_v24 = vadd.f32 %v10061_v3, %v10060_v44  ;;  %v14650_v0 = vadd.f32 %v10059_v21, %v7984_v13 }
 0x850   : > { %v7995_v63 = vadd.f32 %v9956_v47, %v14567_v61 }
 0x851   : > { %v14653_v32 = vadd.f32 %v10062_v24, %v7987_v34 }
 0x852   : > { %v9957_v10 = vpop.f32.mrb[48].mxu0 }
 0x853   : > { %v10063_v46 = vpop.f32.mrb[80].mxu1  ;;  %v9958_v52 = vpop.f32.mrb[49].mxu0 }
 0x854   : > { %v9959_v14 = vadd.f32 %v9958_v52, %v9957_v10  ;;  %v10064_v28 = vpop.f32.mrb[81].mxu1  ;;  %v9960_v62 = vpop.f32.mrb[50].mxu0 }
 0x855   : > { %v10065_v11 = vadd.f32 %v10064_v28, %v10063_v46  ;;  %v10066_v51 = vpop.f32.mrb[82].mxu1  ;;  %v9961_v7 = vpop.f32.mrb[51].mxu0 }
 0x856   : > { %v8000_v31 = vadd.f32 %v9959_v14, %v14569_v43  ;;  %v9962_v45 = vadd.f32 %v9961_v7, %v9960_v62  ;;  %v10067_v56 = vpop.f32.mrb[83].mxu1 }
 0x857   : > { %v10068_v12 = vadd.f32 %v10067_v56, %v10066_v51  ;;  %v14656_v1 = vadd.f32 %v10065_v11, %v7992_v37  ;;  %v14676_v56 = vld [vmem:[%s15139_s29] ss:$0 sm:$0xff] }
 0x858   : > { %v8003_v61 = vadd.f32 %v9962_v45, %v14571_v38 }
 0x859   : > { %v14659_v13 = vadd.f32 %v10068_v12, %v7995_v63 }
 0x85a   : > { %v9963_v33 = vpop.f32.mrb[52].mxu0 }
 0x85b   : > { %v10069_v55 = vpop.f32.mrb[84].mxu1  ;;  %v9964_v41 = vpop.f32.mrb[53].mxu0 }
 0x85c   : > { %v9965_v34 = vadd.f32 %v9964_v41, %v9963_v33  ;;  %v10070_v9 = vpop.f32.mrb[85].mxu1  ;;  %v9966_v27 = vpop.f32.mrb[54].mxu0 }
 0x85d   : > { %v10071_v59 = vadd.f32 %v10070_v9, %v10069_v55  ;;  %v10072_v36 = vpop.f32.mrb[86].mxu1  ;;  %v9967_v19 = vpop.f32.mrb[55].mxu0 }
 0x85e   : > { %v8008_v43 = vadd.f32 %v9965_v34, %v14573_v57  ;;  %v9968_v15 = vadd.f32 %v9967_v19, %v9966_v27  ;;  %v10073_v21 = vpop.f32.mrb[87].mxu1 }
 0x85f   : > { %v10074_v44 = vadd.f32 %v10073_v21, %v10072_v36  ;;  %v14662_v54 = vadd.f32 %v10071_v59, %v8000_v31 }
 0x860   : > { %v8011_v38 = vadd.f32 %v9968_v15, %v14575_v4 }
 0x861   : > { %v14665_v37 = vadd.f32 %v10074_v44, %v8003_v61 }
 0x862   : > { %v9969_v47 = vpop.f32.mrb[56].mxu0 }
 0x863   : > { %v10075_v3 = vpop.f32.mrb[88].mxu1  ;;  %v9970_v24 = vpop.f32.mrb[57].mxu0 }
 0x864   : > { %v9971_v63 = vadd.f32 %v9970_v24, %v9969_v47  ;;  %v10076_v10 = vpop.f32.mrb[89].mxu1  ;;  %v9972_v46 = vpop.f32.mrb[58].mxu0 }
 0x865   : > { %v10077_v52 = vadd.f32 %v10076_v10, %v10075_v3  ;;  %v10078_v14 = vpop.f32.mrb[90].mxu1  ;;  %v9973_v28 = vpop.f32.mrb[59].mxu0 }
 0x866   : > { %v8016_v57 = vadd.f32 %v9971_v63, %v14578_v40  ;;  %v9974_v62 = vadd.f32 %v9973_v28, %v9972_v46  ;;  %v10079_v11 = vpop.f32.mrb[91].mxu1  ;;  %v14682_v40 = vld [vmem:[%s15140_s1] ss:$0 sm:$0xff]  ;;  %s11151_s1 = scalar_lea.vmem %s14822_s11, 4096 }
 0x867   : > { %v10080_v51 = vadd.f32 %v10079_v11, %v10078_v14  ;;  %v14668_v7 = vadd.f32 %v10077_v52, %v8008_v43  ;;  %p11152_p3 = scmp.ne.s32.totalorder %s14822_s11, %s11151_s1  ;;  %p11159_p2 = scmp.lt.s32.totalorder %s11157_s0, %s11151_s1 }
 0x868   : > { %v8019_v4 = vadd.f32 %v9974_v62, %v14581_v29 }
 0x869   : > { %v14671_v31 = vadd.f32 %v10080_v51, %v8011_v38  ;;  %p11153_p7 = pnand %p11152_p3, %p11505_p5  ;;  %p11160_p4 = por %p11159_p2, %p11158_p1 }
 0x86a   : > { %v10369_v45 = vpop.f32.mrb[60].mxu0 }
 0x86b   : > { %v10081_v12 = vpop.f32.mrb[92].mxu1  ;;  %v8226_v61 = vadd.f32 %v10369_v45, %v14590_v6  ;;  %v8217_v33 = vpop.f32.mrb[61].mxu0  ;;  %p11154_p12 = pneg %p11153_p7 }
 0x86c   : > { %v10082_v55 = vpop.f32.mrb[93].mxu1  ;;  %v8218_v29 = vadd.f32 %v8217_v33, %v14584_v58  ;;  %v10370_v41 = vpop.f32.mrb[62].mxu0 }
 0x86d   : > { %v8353_v34 = vmul.f32 %v14676_v56, %v8226_v61  ;;  %v10083_v9 = vadd.f32 %v10082_v55, %v10081_v12  ;;  %v10084_v27 = vpop.f32.mrb[94].mxu1  ;;  %v8229_v59 = vadd.f32 %v10370_v41, %v14593_v48  ;;  %v8220_v36 = vpop.f32.mrb[63].mxu0  ;;  %p11161_p9 = pnand %p11160_p4, %p11154_p12 }
 0x86e   : > { %v8351_v6 = vmul.f32 %v14676_v56, %v8218_v29  ;;  %v10085_v19 = vpop.f32.mrb[95].mxu1  ;;  %v8221_v43 = vadd.f32 %v8220_v36, %v14587_v50 }
 0x86f   : > { %v8392_v15 = vadd.f32 %v14682_v40, %v8353_v34  ;;  %v8354_v21 = vmul.f32 %v14676_v56, %v8229_v59  ;;  %v10086_v44 = vadd.f32 %v10085_v19, %v10084_v27  ;;  %v14691_v58 = vadd.f32 %v10083_v9, %v8016_v57 }
 0x870   : > { %v8390_v38 = vadd.f32 %v14682_v40, %v8351_v6  ;;  %v8352_v47 = vmul.f32 %v14676_v56, %v8221_v43 }
 0x871   : > { %8424 = vst [vmem:[%s14697_s10 + $0x10] sm:$0xff] %v8392_v15  ;;  %v8393_v50 = vadd.f32 %v14682_v40, %v8354_v21  ;;  %v14701_v48 = vadd.f32 %v10086_v44, %v8019_v4 }
 0x872   : > { %8422 = vst [vmem:[%s14697_s10] sm:$0xff] %v8390_v38  ;;  %v8391_v3 = vadd.f32 %v14682_v40, %v8352_v47  ;;  %v10373_v24 = vpop.f32.mrb[64].mxu0 }
 0x873   : > { %8425 = vst [vmem:[%s14697_s10 + $0x18] sm:$0xff] %v8393_v50  ;;  %v8242_v63 = vadd.f32 %v10373_v24, %v14602_v23  ;;  %v8233_v10 = vpop.f32.mrb[65].mxu0 }
 0x874   : > { %8423 = vst [vmem:[%s14697_s10 + $0x8] sm:$0xff] %v8391_v3  ;;  %v8234_v46 = vadd.f32 %v8233_v10, %v14596_v53  ;;  %v10374_v52 = vpop.f32.mrb[66].mxu0 }
 0x875   : > { %v8357_v14 = vmul.f32 %v14676_v56, %v8242_v63  ;;  %v8245_v28 = vadd.f32 %v10374_v52, %v14605_v16  ;;  %v8236_v57 = vpop.f32.mrb[67].mxu0 }
 0x876   : > { %v8355_v62 = vmul.f32 %v14676_v56, %v8234_v46  ;;  %v8237_v11 = vadd.f32 %v8236_v57, %v14599_v20 }
 0x877   : > { %v8396_v51 = vadd.f32 %v14682_v40, %v8357_v14  ;;  %v8358_v23 = vmul.f32 %v14676_v56, %v8245_v28 }
 0x878   : > { %v8394_v4 = vadd.f32 %v14682_v40, %v8355_v62  ;;  %v8356_v53 = vmul.f32 %v14676_v56, %v8237_v11 }
 0x879   : > { %8428 = vst [vmem:[%s14697_s10 + $0x30] sm:$0xff] %v8396_v51  ;;  %v8397_v45 = vadd.f32 %v14682_v40, %v8358_v23 }
 0x87a   : > { %8426 = vst [vmem:[%s14697_s10 + $0x20] sm:$0xff] %v8394_v4  ;;  %v8395_v16 = vadd.f32 %v14682_v40, %v8356_v53  ;;  %v10377_v12 = vpop.f32.mrb[68].mxu0 }
 0x87b   : > { %8429 = vst [vmem:[%s14697_s10 + $0x38] sm:$0xff] %v8397_v45  ;;  %v8258_v61 = vadd.f32 %v10377_v12, %v14614_v22  ;;  %v8249_v20 = vpop.f32.mrb[69].mxu0 }
 0x87c   : > { %8427 = vst [vmem:[%s14697_s10 + $0x28] sm:$0xff] %v8395_v16  ;;  %v8250_v33 = vadd.f32 %v8249_v20, %v14608_v5  ;;  %v10378_v55 = vpop.f32.mrb[70].mxu0 }
 0x87d   : > { %v8361_v29 = vmul.f32 %v14676_v56, %v8258_v61  ;;  %v8261_v41 = vadd.f32 %v10378_v55, %v14617_v2  ;;  %v8252_v34 = vpop.f32.mrb[71].mxu0 }
 0x87e   : > { %v8359_v9 = vmul.f32 %v14676_v56, %v8250_v33  ;;  %v8253_v27 = vadd.f32 %v8252_v34, %v14611_v25 }
 0x87f   : > { %v8400_v59 = vadd.f32 %v14682_v40, %v8361_v29  ;;  %v8362_v22 = vmul.f32 %v14676_v56, %v8261_v41 }
 0x880   : > { %v8398_v36 = vadd.f32 %v14682_v40, %v8359_v9  ;;  %v8360_v5 = vmul.f32 %v14676_v56, %v8253_v27 }
 0x881   : > { %8432 = vst [vmem:[%s14697_s10 + $0x50] sm:$0xff] %v8400_v59  ;;  %v8401_v6 = vadd.f32 %v14682_v40, %v8362_v22 }
 0x882   : > { %8430 = vst [vmem:[%s14697_s10 + $0x40] sm:$0xff] %v8398_v36  ;;  %v8399_v2 = vadd.f32 %v14682_v40, %v8360_v5  ;;  %v10381_v19 = vpop.f32.mrb[72].mxu0 }
 0x883   : > { %8433 = vst [vmem:[%s14697_s10 + $0x58] sm:$0xff] %v8401_v6  ;;  %v8274_v43 = vadd.f32 %v10381_v19, %v14626_v42  ;;  %v8265_v25 = vpop.f32.mrb[73].mxu0 }
 0x884   : > { %8431 = vst [vmem:[%s14697_s10 + $0x48] sm:$0xff] %v8399_v2  ;;  %v8266_v15 = vadd.f32 %v8265_v25, %v14620_v35  ;;  %v10382_v21 = vpop.f32.mrb[74].mxu0 }
 0x885   : > { %v8365_v44 = vmul.f32 %v14676_v56, %v8274_v43  ;;  %v8277_v38 = vadd.f32 %v10382_v21, %v14629_v49  ;;  %v8268_v47 = vpop.f32.mrb[75].mxu0 }
 0x886   : > { %v8363_v50 = vmul.f32 %v14676_v56, %v8266_v15  ;;  %v8269_v3 = vadd.f32 %v8268_v47, %v14623_v30 }
 0x887   : > { %v8404_v24 = vadd.f32 %v14682_v40, %v8365_v44  ;;  %v8366_v42 = vmul.f32 %v14676_v56, %v8277_v38 }
 0x888   : > { %v8402_v63 = vadd.f32 %v14682_v40, %v8363_v50  ;;  %v8364_v35 = vmul.f32 %v14676_v56, %v8269_v3 }
 0x889   : > { %8436 = vst [vmem:[%s14697_s10 + $0x70] sm:$0xff] %v8404_v24  ;;  %v8405_v10 = vadd.f32 %v14682_v40, %v8366_v42 }
 0x88a   : > { %8434 = vst [vmem:[%s14697_s10 + $0x60] sm:$0xff] %v8402_v63  ;;  %v8403_v49 = vadd.f32 %v14682_v40, %v8364_v35  ;;  %v10385_v46 = vpop.f32.mrb[76].mxu0 }
 0x88b   : > { %8437 = vst [vmem:[%s14697_s10 + $0x78] sm:$0xff] %v8405_v10  ;;  %v8290_v52 = vadd.f32 %v10385_v46, %v14638_v26  ;;  %v8281_v30 = vpop.f32.mrb[77].mxu0 }
 0x88c   : > { %8435 = vst [vmem:[%s14697_s10 + $0x68] sm:$0xff] %v8403_v49  ;;  %v8282_v14 = vadd.f32 %v8281_v30, %v14632_v39  ;;  %v10386_v28 = vpop.f32.mrb[78].mxu0 }
 0x88d   : > { %v8369_v57 = vmul.f32 %v14676_v56, %v8290_v52  ;;  %v8293_v62 = vadd.f32 %v10386_v28, %v14641_v17  ;;  %v8284_v11 = vpop.f32.mrb[79].mxu0 }
 0x88e   : > { %v8367_v51 = vmul.f32 %v14676_v56, %v8282_v14  ;;  %v8285_v23 = vadd.f32 %v8284_v11, %v14635_v8 }
 0x88f   : > { %v8408_v4 = vadd.f32 %v14682_v40, %v8369_v57  ;;  %v8370_v26 = vmul.f32 %v14676_v56, %v8293_v62 }
 0x890   : > { %v8406_v53 = vadd.f32 %v14682_v40, %v8367_v51  ;;  %v8368_v39 = vmul.f32 %v14676_v56, %v8285_v23 }
 0x891   : > { %8440 = vst [vmem:[%s14697_s10 + $0x90] sm:$0xff] %v8408_v4  ;;  %v8409_v45 = vadd.f32 %v14682_v40, %v8370_v26 }
 0x892   : > { %8438 = vst [vmem:[%s14697_s10 + $0x80] sm:$0xff] %v8406_v53  ;;  %v8407_v17 = vadd.f32 %v14682_v40, %v8368_v39  ;;  %v10389_v16 = vpop.f32.mrb[80].mxu0 }
 0x893   : > { %8441 = vst [vmem:[%s14697_s10 + $0x98] sm:$0xff] %v8409_v45  ;;  %v8306_v12 = vadd.f32 %v10389_v16, %v14650_v0  ;;  %v8297_v8 = vpop.f32.mrb[81].mxu0 }
 0x894   : > { %8439 = vst [vmem:[%s14697_s10 + $0x88] sm:$0xff] %v8407_v17  ;;  %v8298_v61 = vadd.f32 %v8297_v8, %v14644_v18  ;;  %v10390_v20 = vpop.f32.mrb[82].mxu0 }
 0x895   : > { %v8373_v33 = vmul.f32 %v14676_v56, %v8306_v12  ;;  %v8309_v55 = vadd.f32 %v10390_v20, %v14653_v32  ;;  %v8300_v29 = vpop.f32.mrb[83].mxu0 }
 0x896   : > { %v8371_v41 = vmul.f32 %v14676_v56, %v8298_v61  ;;  %v8301_v34 = vadd.f32 %v8300_v29, %v14647_v60 }
 0x897   : > { %v8412_v9 = vadd.f32 %v14682_v40, %v8373_v33  ;;  %v8374_v0 = vmul.f32 %v14676_v56, %v8309_v55 }
 0x898   : > { %v8410_v27 = vadd.f32 %v14682_v40, %v8371_v41  ;;  %v8372_v18 = vmul.f32 %v14676_v56, %v8301_v34 }
 0x899   : > { %8444 = vst [vmem:[%s14697_s10 + $0xb0] sm:$0xff] %v8412_v9  ;;  %v8413_v59 = vadd.f32 %v14682_v40, %v8374_v0 }
 0x89a   : > { %8442 = vst [vmem:[%s14697_s10 + $0xa0] sm:$0xff] %v8410_v27  ;;  %v8411_v32 = vadd.f32 %v14682_v40, %v8372_v18  ;;  %v10393_v22 = vpop.f32.mrb[84].mxu0 }
 0x89b   : > { %8445 = vst [vmem:[%s14697_s10 + $0xb8] sm:$0xff] %v8413_v59  ;;  %v8322_v36 = vadd.f32 %v10393_v22, %v14662_v54  ;;  %v8313_v60 = vpop.f32.mrb[85].mxu0 }
 0x89c   : > { %8443 = vst [vmem:[%s14697_s10 + $0xa8] sm:$0xff] %v8411_v32  ;;  %v8314_v5 = vadd.f32 %v8313_v60, %v14656_v1  ;;  %v10394_v6 = vpop.f32.mrb[86].mxu0 }
 0x89d   : > { %v8377_v2 = vmul.f32 %v14676_v56, %v8322_v36  ;;  %v8325_v19 = vadd.f32 %v10394_v6, %v14665_v37  ;;  %v8316_v43 = vpop.f32.mrb[87].mxu0 }
 0x89e   : > { %v8375_v25 = vmul.f32 %v14676_v56, %v8314_v5  ;;  %v8317_v15 = vadd.f32 %v8316_v43, %v14659_v13 }
 0x89f   : > { %v8416_v21 = vadd.f32 %v14682_v40, %v8377_v2  ;;  %v8378_v54 = vmul.f32 %v14676_v56, %v8325_v19 }
 0x8a0   : > { %v8414_v44 = vadd.f32 %v14682_v40, %v8375_v25  ;;  %v8376_v1 = vmul.f32 %v14676_v56, %v8317_v15 }
 0x8a1   : > { %8448 = vst [vmem:[%s14697_s10 + $0xd0] sm:$0xff] %v8416_v21  ;;  %v8417_v38 = vadd.f32 %v14682_v40, %v8378_v54 }
 0x8a2   : > { %8446 = vst [vmem:[%s14697_s10 + $0xc0] sm:$0xff] %v8414_v44  ;;  %v8415_v37 = vadd.f32 %v14682_v40, %v8376_v1  ;;  %v10397_v47 = vpop.f32.mrb[88].mxu0 }
 0x8a3   : > { %8449 = vst [vmem:[%s14697_s10 + $0xd8] sm:$0xff] %v8417_v38  ;;  %v8338_v13 = vadd.f32 %v10397_v47, %v14691_v58  ;;  %v8329_v50 = vpop.f32.mrb[89].mxu0 }
 0x8a4   : > { %8447 = vst [vmem:[%s14697_s10 + $0xc8] sm:$0xff] %v8415_v37  ;;  %v8330_v3 = vadd.f32 %v8329_v50, %v14668_v7  ;;  %v10398_v24 = vpop.f32.mrb[90].mxu0 }
 0x8a5   : > { %v8381_v42 = vmul.f32 %v14676_v56, %v8338_v13  ;;  %v8341_v63 = vadd.f32 %v10398_v24, %v14701_v48  ;;  %v8332_v35 = vpop.f32.mrb[91].mxu0 }
 0x8a6   : > { %v8379_v10 = vmul.f32 %v14676_v56, %v8330_v3  ;;  %v8333_v49 = vadd.f32 %v8332_v35, %v14671_v31 }
 0x8a7   : > { %v8420_v58 = vadd.f32 %v14682_v40, %v8381_v42  ;;  %v8382_v7 = vmul.f32 %v14676_v56, %v8341_v63 }
 0x8a8   : > { %v8418_v46 = vadd.f32 %v14682_v40, %v8379_v10  ;;  %v8380_v52 = vmul.f32 %v14676_v56, %v8333_v49 }
 0x8a9   : > { %8452 = vst [vmem:[%s14697_s10 + $0xf0] sm:$0xff] %v8420_v58  ;;  %v8421_v48 = vadd.f32 %v14682_v40, %v8382_v7 }
 0x8aa   : > { %8450 = vst [vmem:[%s14697_s10 + $0xe0] sm:$0xff] %v8418_v46  ;;  %v8419_v31 = vadd.f32 %v14682_v40, %v8380_v52 }
 0x8ab   : > { %8453 = vst [vmem:[%s14697_s10 + $0xf8] sm:$0xff] %v8421_v48 }
 0x8ac   : > { %8451 = vst [vmem:[%s14697_s10 + $0xe8] sm:$0xff] %v8419_v31 }
 0x8ad   : > { %11164 = shalt.err (!%p11161_p9)
}
 0x8ae   : > { %s11165_s10 = scalar_lea.hbm %s14820_s18, 4096  ;;  %s11169_s2 = scalar_lea.hbm %s15142_s4, 8192 }
 0x8af   : > { %p11166_p0 = scmp.ne.s32.totalorder %s14820_s18, %s11165_s10  ;;  %p11170_p13 = scmp.lt.u32.totalorder %s14820_s18, %s15142_s4 }
 0x8b0   : > { %p11171_p6 = scmp.lt.u32.totalorder %s11169_s2, %s11165_s10  ;;  %p11173_p3 = scmp.lt.u32.totalorder %s11165_s10, %s14820_s18 }
 0x8b1   : > { %p11167_p11 = pnand %p11166_p0, %p11505_p5 }
 0x8b2   : > { %p11172_p10 = por %p11171_p6, %p11170_p13 }
 0x8b3   : > { %p11168_p8 = pneg %p11167_p11 }
 0x8b4   : > { %p11174_p7 = por %p11173_p3, %p11172_p10 }
 0x8b6   : > { %p11175_p12 = pnand %p11174_p7, %p11168_p8 }
 0x8b8   : > { %11178 = shalt.err (!%p11175_p12)
}
 0x8b9   : > { %s11239_s1 = smov 128   ;;  %s11240_s0 = smov 8  }
 0x8ba   : > { %s15143_s6 = scalar_lea.sflag [#allocation9], %s11553_s21 }
 0x8bb   : > { %10455 = dma.vmem_to_hbm [thread:$0]  (%p11505_p5), %s14822_s11, 4096, %s14820_s18, %s15143_s6, %s11239_s1, %s11239_s1, %s11240_s0  }
 0x8bc PF: > { %s15144_s3 = sld [smem:[#allocation20_spill]]  ;;  %s15145_s29 = sld [smem:[#allocation21_spill]] }
 0x8bd   : > { %p15147_p2 = scmp.ge.s32.totalorder %s11225_s27, 2 }
 0x8c2   : > { %s8483_s5 = sand.u32 1, %s15144_s3   ;;  %p15146_p1 = scmp.ne.s32.totalorder %s15145_s29, 0 }
 0x8c3   : > { %s8484_s10 = scalar_lea.sflag [#allocation9], %s8483_s5 }
 0x8c4   : > { %p10472_p4 = pnand %p15147_p2, %p15146_p1 }
 0x8c6   : > { %11208 = dma.done.wait (!%p10472_p4), %s8484_s10, 4096  }
 0x8c7   : > { %11210 = vsyncadd (!%p10472_p4), %s8484_s10, 4294963200  ;;  %p36_p9 = scmp.ge.s32.totalorder %s11491_s17, 4   ;;  %s15148_s2 = smov %s11217_s25 }
 0x8c8   : > { %s15149_s25 = smov %s11221_s26  ;;  %s15150_s26 = smov %s11501_s14 }
 0x8c9   : > { %s15151_s27 = smov %s11491_s17  ;;  %38 = sbr.rel (!%p36_p9) target bundleno = 22 (0x16), region = 170 }
 0x8d0   :  { %8489 = vsyncpa [#allocation8], 1 }
 0x8d1   :  { %8491 = vsyncpa [#allocation8 + $0x1], 1 }
 0x8d2   :  { %8492 = vsyncpa [#allocation11], 1 }
 0x8d3   :  { %8493 = vsyncpa [#allocation14], 1 }
 0x8d4   :  { %8494 = vsyncpa [#allocation9], 1 }
 0x8d5   :  { %8496 = vsyncpa [#allocation9 + $0x1], 1 }

</bundles_post_ra>
